<compile_context>
chip_gen: v6e
topology: v6e:2x2x1
jax: 0.10.0
libtpu: 0.0.40
codegen_flags: <defaults>
</compile_context>

<pallas_src>
import functools

import jax
import jax.numpy as jnp
from jax.experimental import pallas as pl
from jax.experimental.pallas import tpu as pltpu


IMG_SIZE = 64                 # forward() hardcodes x.view(-1, 64*64)
Z_DIM = 16
IN_DIM = IMG_SIZE * IMG_SIZE  # 4096
HID = 1000                    # true PyTorch hidden size
HID_PAD = 1024                # zero-padded for clean (8,128) tiling

_VMEM_LIMIT = 32 * 1024 * 1024   # actual use ~9 MB; safe on v5e/v6e/v7x


# ----------------------------------------------------------------------------
# Pallas kernels
# ----------------------------------------------------------------------------
def _fc1_kernel(x_ref, w_ref, b_ref, h1_ref):
    """One n-tile of h1 = relu(x @ W1_t + b1).  Full K in a single block."""
    acc = jnp.dot(x_ref[...].astype(w_ref.dtype), w_ref[...],
                  preferred_element_type=jnp.float32)
    h1_ref[...] = jnp.maximum(acc + b_ref[...], 0.0)


def _mid_fc4_kernel(h1_ref, w2_ref, b2_ref, eps_ref, w3_ref, b3_ref,
                    w4_ref, b4_ref, recon_ref, mu_ref, logvar_ref, z_ref):
    """Fused fc21|fc22 -> reparameterize -> fc3+relu -> fc4 n-tile + sigmoid.

    The middle math is tiny and recomputed on every grid step: it hides under
    the fc4 weight-tile DMA and makes the kernel independent of how the
    'parallel' grid axis is sharded across TensorCores (each step writes the
    same mu/logvar/z values).
    """
    h1 = h1_ref[...]
    # fc21 | fc22 as one (HID_PAD, 2*Z_DIM) matmul, then split.
    ml = jnp.dot(h1, w2_ref[...], preferred_element_type=jnp.float32) + b2_ref[...]
    mu = ml[:, :Z_DIM]
    logvar = ml[:, Z_DIM:]
    # z = eps * exp(0.5 * logvar) + mu   (torch: eps.mul(std).add_(mu))
    z = eps_ref[...] * jnp.exp(0.5 * logvar) + mu
    h3 = jnp.maximum(
        jnp.dot(z, w3_ref[...], preferred_element_type=jnp.float32) + b3_ref[...],
        0.0)
    mu_ref[...] = mu
    logvar_ref[...] = logvar
    z_ref[...] = z
    # fc4 n-tile (lane-dense output store).
    y = jnp.dot(h3.astype(w4_ref.dtype), w4_ref[...],
                preferred_element_type=jnp.float32) + b4_ref[...]
    recon_ref[...] = jax.nn.sigmoid(y)


# ----------------------------------------------------------------------------
# Wrappers
# ----------------------------------------------------------------------------
def _pick_tiles():
    """Weight n-tile sizes: (fc1 tn, fc4 tn).

    Single-TC chips (v5e/v6e): 2 x 4 MB tiles per layer (minimal step count).
    Multi-TC chips (v7x, v4/v5p) or unknown: 4 x 2 MB tiles so each core gets
    >=2 steps on the 'parallel' axis and double-buffers its weight stream.
    """
    try:
        kind = jax.devices()[0].device_kind.lower()
    except Exception:
        kind = ""
    if any(t in kind for t in ("v5 lite", "v5e", "v6 lite", "v6e")):
        return 512, 2048
    return 256, 1024


def pallas_fc1(x, w1t, b1, *, tn):
    """x: (M, 4096) f32, w1t: (4096, 1024) bf16, b1: (1024,) f32 -> (M, 1024) f32."""
    M, K = x.shape
    N = w1t.shape[1]
    assert N % tn == 0
    gn = N // tn

    cost = pl.CostEstimate(
        flops=2 * M * K * N,
        transcendentals=0,
        bytes_accessed=int(x.size * x.dtype.itemsize
                           + w1t.size * w1t.dtype.itemsize
                           + N * 4 + M * N * 4),
    )
    return pl.pallas_call(
        _fc1_kernel,
        out_shape=jax.ShapeDtypeStruct((M, N), jnp.float32),
        grid_spec=pltpu.PrefetchScalarGridSpec(
            num_scalar_prefetch=0,
            grid=(gn,),
            in_specs=[
                pl.BlockSpec((M, K), lambda j: (0, 0)),
                pl.BlockSpec((K, tn), lambda j: (0, j)),
                pl.BlockSpec((1, tn), lambda j: (0, j)),
            ],
            out_specs=pl.BlockSpec((M, tn), lambda j: (0, j)),
        ),
        compiler_params=pltpu.CompilerParams(
            dimension_semantics=("parallel",),
            vmem_limit_bytes=_VMEM_LIMIT,
        ),
        cost_estimate=cost,
    )(x, w1t, b1.reshape(1, N))


def pallas_mid_fc4(h1, w2cat, b2cat, eps, w3t, b3, w4t, b4, *, tn):
    """Fused middle + fc4.  Returns (recon, mu, logvar, z)."""
    M, H = h1.shape
    N = w4t.shape[1]
    assert N % tn == 0
    gn = N // tn

    cost = pl.CostEstimate(
        flops=2 * M * H * N + gn * 2 * M * (H * 2 * Z_DIM + Z_DIM * H),
        transcendentals=M * N + gn * M * Z_DIM,
        bytes_accessed=int(h1.size * 4 + w2cat.size * 4 + w3t.size * 4
                           + w4t.size * w4t.dtype.itemsize
                           + (2 * Z_DIM + H + N) * 4
                           + M * (N + 3 * Z_DIM) * 4),
    )
    return pl.pallas_call(
        _mid_fc4_kernel,
        out_shape=(
            jax.ShapeDtypeStruct((M, N), jnp.float32),       # recon
            jax.ShapeDtypeStruct((M, Z_DIM), jnp.float32),   # mu
            jax.ShapeDtypeStruct((M, Z_DIM), jnp.float32),   # logvar
            jax.ShapeDtypeStruct((M, Z_DIM), jnp.float32),   # z
        ),
        grid_spec=pltpu.PrefetchScalarGridSpec(
            num_scalar_prefetch=0,
            grid=(gn,),
            in_specs=[
                pl.BlockSpec((M, H), lambda j: (0, 0)),            # h1
                pl.BlockSpec((H, 2 * Z_DIM), lambda j: (0, 0)),    # w21|w22
                pl.BlockSpec((1, 2 * Z_DIM), lambda j: (0, 0)),    # b21|b22
                pl.BlockSpec((M, Z_DIM), lambda j: (0, 0)),        # eps
                pl.BlockSpec((Z_DIM, H), lambda j: (0, 0)),        # w3t
                pl.BlockSpec((1, H), lambda j: (0, 0)),            # b3
                pl.BlockSpec((H, tn), lambda j: (0, j)),           # w4t tile
                pl.BlockSpec((1, tn), lambda j: (0, j)),           # b4 tile
            ],
            out_specs=(
                pl.BlockSpec((M, tn), lambda j: (0, j)),           # recon tile
                pl.BlockSpec((M, Z_DIM), lambda j: (0, 0)),        # mu
                pl.BlockSpec((M, Z_DIM), lambda j: (0, 0)),        # logvar
                pl.BlockSpec((M, Z_DIM), lambda j: (0, 0)),        # z
            ),
        ),
        compiler_params=pltpu.CompilerParams(
            dimension_semantics=("parallel",),
            vmem_limit_bytes=_VMEM_LIMIT,
        ),
        cost_estimate=cost,
    )(h1, w2cat, b2cat.reshape(1, 2 * Z_DIM), eps, w3t, b3.reshape(1, H),
      w4t, b4.reshape(1, N))


# ----------------------------------------------------------------------------
# Params (PyTorch nn.Linear-like init on true shapes, then zero-pad HID->1024)
# ----------------------------------------------------------------------------
def init_params(key):
    def linear_init(k, fan_in, fan_out):
        kw, kb = jax.random.split(k)
        bound = 1.0 / jnp.sqrt(jnp.float32(fan_in))
        w = jax.random.uniform(kw, (fan_out, fan_in), jnp.float32, -bound, bound)
        b = jax.random.uniform(kb, (fan_out,), jnp.float32, -bound, bound)
        return w, b

    k1, k21, k22, k3, k4 = jax.random.split(key, 5)
    w1, b1 = linear_init(k1, IN_DIM, HID)      # (1000, 4096)
    w21, b21 = linear_init(k21, HID, Z_DIM)    # (16, 1000)
    w22, b22 = linear_init(k22, HID, Z_DIM)
    w3, b3 = linear_init(k3, Z_DIM, HID)       # (1000, 16)
    w4, b4 = linear_init(k4, HID, IN_DIM)      # (4096, 1000)

    pad = HID_PAD - HID
    # fc1: pad output dim (columns of w1.T)
    w1t = jnp.pad(w1.T, ((0, 0), (0, pad)))                 # (4096, 1024)
    b1p = jnp.pad(b1, (0, pad))                             # (1024,)
    # fc21/fc22: pad input dim (rows of w.T) with zeros, then concatenate.
    w2cat = jnp.concatenate(
        [jnp.pad(w21.T, ((0, pad), (0, 0))),
         jnp.pad(w22.T, ((0, pad), (0, 0)))], axis=1)       # (1024, 32)
    b2cat = jnp.concatenate([b21, b22])                     # (32,)
    # fc3: pad output dim
    w3t = jnp.pad(w3.T, ((0, 0), (0, pad)))                 # (16, 1024)
    b3p = jnp.pad(b3, (0, pad))                             # (1024,)
    # fc4: pad input dim with zeros
    w4t = jnp.pad(w4.T, ((0, pad), (0, 0)))                 # (1024, 4096)

    return {
        # heavy weights in bf16 (halves HBM traffic; f32 accumulation in-kernel)
        "w1t": w1t.astype(jnp.bfloat16), "b1": b1p,
        "w2cat": w2cat, "b2cat": b2cat,
        "w3t": w3t, "b3": b3p,
        "w4t": w4t.astype(jnp.bfloat16), "b4": b4,
    }


# ----------------------------------------------------------------------------
# Forward
# ----------------------------------------------------------------------------
@functools.partial(jax.jit, static_argnames=("tn1", "tn4"))
def vae_forward(params, x, eps, *, tn1, tn4):
    """Returns (recon, mu, logvar, z) exactly like the PyTorch forward."""
    B = x.shape[0]
    xf = x.reshape(B, IN_DIM)                              # x.view(-1, 64*64)

    # fc1 + relu: (B, 4096) @ (4096, 1024), full-K weight n-tiles.
    h1 = pallas_fc1(xf, params["w1t"], params["b1"], tn=tn1)

    # fused fc21|fc22 -> reparameterize -> fc3+relu -> fc4 + sigmoid.
    recon, mu, logvar, z = pallas_mid_fc4(
        h1, params["w2cat"], params["b2cat"], eps,
        params["w3t"], params["b3"], params["w4t"], params["b4"], tn=tn4)
    return recon, mu, logvar, z


# ----------------------------------------------------------------------------
# Main
# ----------------------------------------------------------------------------
if __name__ == "__main__":
    key = jax.random.PRNGKey(0)
    k_params, k_x, k_eps = jax.random.split(key, 3)

    B = 2
    params = init_params(k_params)
    # NCHW input like PyTorch; forward flattens it to (B, 64*64).
    x = jax.random.uniform(k_x, (B, 1, IMG_SIZE, IMG_SIZE), jnp.float32)
    # eps plays the role of torch.randn_like(std) in reparameterize().
    eps = jax.random.normal(k_eps, (B, Z_DIM), jnp.float32)

    tn1, tn4 = _pick_tiles()
    recon, mu, logvar, z = jax.block_until_ready(
        vae_forward(params, x, eps, tn1=tn1, tn4=tn4))

    assert recon.shape == (B, IN_DIM)
    assert mu.shape == (B, Z_DIM) and logvar.shape == (B, Z_DIM) and z.shape == (B, Z_DIM)
    assert bool(jnp.all(jnp.isfinite(recon)))
    assert bool(jnp.all((recon >= 0.0) & (recon <= 1.0)))   # sigmoid output range

    print("KERNEL_OK")
</pallas_src>

<mosaic_0001>
module attributes {stable_mosaic.version = 11 : i64} {
  func.func @_mid_fc4_kernel(%arg0: i32, %arg1: memref<2x1024xf32, #tpu.memory_space<vmem>>, %arg2: memref<1024x32xf32, #tpu.memory_space<vmem>>, %arg3: memref<1x32xf32, #tpu.memory_space<vmem>>, %arg4: memref<2x16xf32, #tpu.memory_space<vmem>>, %arg5: memref<16x1024xf32, #tpu.memory_space<vmem>>, %arg6: memref<1x1024xf32, #tpu.memory_space<vmem>>, %arg7: memref<1024x1024xbf16, #tpu.memory_space<vmem>>, %arg8: memref<1x1024xf32, #tpu.memory_space<vmem>>, %arg9: memref<2x1024xf32, #tpu.memory_space<vmem>>, %arg10: memref<2x16xf32, #tpu.memory_space<vmem>>, %arg11: memref<2x16xf32, #tpu.memory_space<vmem>>, %arg12: memref<2x16xf32, #tpu.memory_space<vmem>>) attributes {dimension_semantics = [#tpu.dimension_semantics<parallel>], iteration_bounds = array<i64: 4>, scalar_prefetch = 0 : i64, scratch_operands = 0 : i64, tpu.core_type = #tpu.core_type<tc>, window_params = [{pipeline_mode = #tpu.pipeline_mode<synchronous>, transform_indices = @transform_0, window_bounds = array<i64: 2, 1024>}, {pipeline_mode = #tpu.pipeline_mode<synchronous>, transform_indices = @transform_1, window_bounds = array<i64: 1024, 32>}, {pipeline_mode = #tpu.pipeline_mode<synchronous>, transform_indices = @transform_2, window_bounds = array<i64: 1, 32>}, {pipeline_mode = #tpu.pipeline_mode<synchronous>, transform_indices = @transform_3, window_bounds = array<i64: 2, 16>}, {pipeline_mode = #tpu.pipeline_mode<synchronous>, transform_indices = @transform_4, window_bounds = array<i64: 16, 1024>}, {pipeline_mode = #tpu.pipeline_mode<synchronous>, transform_indices = @transform_5, window_bounds = array<i64: 1, 1024>}, {transform_indices = @transform_6, window_bounds = array<i64: 1024, 1024>}, {transform_indices = @transform_7, window_bounds = array<i64: 1, 1024>}, {transform_indices = @transform_8, window_bounds = array<i64: 2, 1024>}, {pipeline_mode = #tpu.pipeline_mode<synchronous>, transform_indices = @transform_9, window_bounds = array<i64: 2, 16>}, {pipeline_mode = #tpu.pipeline_mode<synchronous>, transform_indices = @transform_10, window_bounds = array<i64: 2, 16>}, {pipeline_mode = #tpu.pipeline_mode<synchronous>, transform_indices = @transform_11, window_bounds = array<i64: 2, 16>}]} {
    %c0 = arith.constant 0 : index
    %c0_0 = arith.constant 0 : index
    %0 = vector.load %arg1[%c0, %c0_0] : memref<2x1024xf32, #tpu.memory_space<vmem>>, vector<2x1024xf32>
    %c0_1 = arith.constant 0 : index
    %c0_2 = arith.constant 0 : index
    %1 = vector.load %arg2[%c0_1, %c0_2] : memref<1024x32xf32, #tpu.memory_space<vmem>>, vector<1024x32xf32>
    %cst = arith.constant dense<0.000000e+00> : vector<2x32xf32>
    %2 = tpu.matmul %0, %1, %cst {dimension_numbers = #tpu.dot_dimension_numbers<[1], [0], [0], [1], [0, 0, 1, 1], [], []>} : vector<2x1024xf32>, vector<1024x32xf32>, vector<2x32xf32> -> vector<2x32xf32>
    %c0_3 = arith.constant 0 : index
    %c0_4 = arith.constant 0 : index
    %3 = vector.load %arg3[%c0_3, %c0_4] : memref<1x32xf32, #tpu.memory_space<vmem>>, vector<1x32xf32>
    %4 = vector.broadcast %3 : vector<1x32xf32> to vector<2x32xf32>
    %5 = arith.addf %2, %4 : vector<2x32xf32>
    %6 = vector.extract_strided_slice %5 {offsets = [0, 0], sizes = [2, 16], strides = [1, 1]} : vector<2x32xf32> to vector<2x16xf32>
    %7 = vector.extract_strided_slice %5 {offsets = [0, 16], sizes = [2, 16], strides = [1, 1]} : vector<2x32xf32> to vector<2x16xf32>
    %c0_5 = arith.constant 0 : index
    %c0_6 = arith.constant 0 : index
    %8 = vector.load %arg4[%c0_5, %c0_6] : memref<2x16xf32, #tpu.memory_space<vmem>>, vector<2x16xf32>
    %cst_7 = arith.constant 5.000000e-01 : f32
    %9 = vector.broadcast %cst_7 : f32 to vector<2x16xf32>
    %10 = arith.mulf %9, %7 : vector<2x16xf32>
    %11 = math.exp %10 : vector<2x16xf32>
    %12 = arith.mulf %8, %11 : vector<2x16xf32>
    %13 = arith.addf %12, %6 : vector<2x16xf32>
    %c0_8 = arith.constant 0 : index
    %c0_9 = arith.constant 0 : index
    %14 = vector.load %arg5[%c0_8, %c0_9] : memref<16x1024xf32, #tpu.memory_space<vmem>>, vector<16x1024xf32>
    %cst_10 = arith.constant dense<0.000000e+00> : vector<2x1024xf32>
    %15 = tpu.matmul %13, %14, %cst_10 {dimension_numbers = #tpu.dot_dimension_numbers<[1], [0], [0], [1], [0, 0, 1, 1], [], []>} : vector<2x16xf32>, vector<16x1024xf32>, vector<2x1024xf32> -> vector<2x1024xf32>
    %c0_11 = arith.constant 0 : index
    %c0_12 = arith.constant 0 : index
    %16 = vector.load %arg6[%c0_11, %c0_12] : memref<1x1024xf32, #tpu.memory_space<vmem>>, vector<1x1024xf32>
    %17 = vector.broadcast %16 : vector<1x1024xf32> to vector<2x1024xf32>
    %18 = arith.addf %15, %17 : vector<2x1024xf32>
    %cst_13 = arith.constant 0.000000e+00 : f32
    %19 = vector.broadcast %cst_13 : f32 to vector<2x1024xf32>
    %20 = arith.maximumf %18, %19 : vector<2x1024xf32>
    %c0_14 = arith.constant 0 : index
    %c0_15 = arith.constant 0 : index
    %21 = vector.load %arg10[%c0_14, %c0_15] : memref<2x16xf32, #tpu.memory_space<vmem>>, vector<2x16xf32>
    tpu.vector_store %arg10[%c0_14, %c0_15], %6 {strides = array<i32>} : memref<2x16xf32, #tpu.memory_space<vmem>>, vector<2x16xf32>,
    %c0_16 = arith.constant 0 : index
    %c0_17 = arith.constant 0 : index
    %22 = vector.load %arg11[%c0_16, %c0_17] : memref<2x16xf32, #tpu.memory_space<vmem>>, vector<2x16xf32>
    tpu.vector_store %arg11[%c0_16, %c0_17], %7 {strides = array<i32>} : memref<2x16xf32, #tpu.memory_space<vmem>>, vector<2x16xf32>,
    %c0_18 = arith.constant 0 : index
    %c0_19 = arith.constant 0 : index
    %23 = vector.load %arg12[%c0_18, %c0_19] : memref<2x16xf32, #tpu.memory_space<vmem>>, vector<2x16xf32>
    tpu.vector_store %arg12[%c0_18, %c0_19], %13 {strides = array<i32>} : memref<2x16xf32, #tpu.memory_space<vmem>>, vector<2x16xf32>,
    %24 = arith.truncf %20 : vector<2x1024xf32> to vector<2x1024xbf16>
    %c0_20 = arith.constant 0 : index
    %c0_21 = arith.constant 0 : index
    %25 = vector.load %arg7[%c0_20, %c0_21] : memref<1024x1024xbf16, #tpu.memory_space<vmem>>, vector<1024x1024xbf16>
    %cst_22 = arith.constant dense<0.000000e+00> : vector<2x1024xf32>
    %26 = tpu.matmul %24, %25, %cst_22 {dimension_numbers = #tpu.dot_dimension_numbers<[1], [0], [0], [1], [0, 0, 1, 1], [], []>} : vector<2x1024xbf16>, vector<1024x1024xbf16>, vector<2x1024xf32> -> vector<2x1024xf32>
    %c0_23 = arith.constant 0 : index
    %c0_24 = arith.constant 0 : index
    %27 = vector.load %arg8[%c0_23, %c0_24] : memref<1x1024xf32, #tpu.memory_space<vmem>>, vector<1x1024xf32>
    %28 = vector.broadcast %27 : vector<1x1024xf32> to vector<2x1024xf32>
    %29 = arith.addf %26, %28 : vector<2x1024xf32>
    %30 = arith.negf %29 : vector<2x1024xf32>
    %31 = math.exp %30 : vector<2x1024xf32>
    %cst_25 = arith.constant 1.000000e+00 : f32
    %32 = vector.broadcast %cst_25 : f32 to vector<2x1024xf32>
    %33 = arith.addf %32, %31 : vector<2x1024xf32>
    %34 = arith.divf %32, %33 : vector<2x1024xf32>
    %c0_26 = arith.constant 0 : index
    %c0_27 = arith.constant 0 : index
    %35 = vector.load %arg9[%c0_26, %c0_27] : memref<2x1024xf32, #tpu.memory_space<vmem>>, vector<2x1024xf32>
    tpu.vector_store %arg9[%c0_26, %c0_27], %34 {strides = array<i32>} : memref<2x1024xf32, #tpu.memory_space<vmem>>, vector<2x1024xf32>,
    return
  }
  func.func @transform_0(%arg0: i32) -> (i32, i32) {
    %c0_i32 = arith.constant 0 : i32
    %c0_i32_0 = arith.constant 0 : i32
    %c0_i32_1 = arith.constant 0 : i32
    return %c0_i32, %c0_i32_0 : i32, i32
  }
  func.func @transform_1(%arg0: i32) -> (i32, i32) {
    %c0_i32 = arith.constant 0 : i32
    %c0_i32_0 = arith.constant 0 : i32
    %c0_i32_1 = arith.constant 0 : i32
    return %c0_i32, %c0_i32_0 : i32, i32
  }
  func.func @transform_2(%arg0: i32) -> (i32, i32) {
    %c0_i32 = arith.constant 0 : i32
    %c0_i32_0 = arith.constant 0 : i32
    %c0_i32_1 = arith.constant 0 : i32
    return %c0_i32, %c0_i32_0 : i32, i32
  }
  func.func @transform_3(%arg0: i32) -> (i32, i32) {
    %c0_i32 = arith.constant 0 : i32
    %c0_i32_0 = arith.constant 0 : i32
    %c0_i32_1 = arith.constant 0 : i32
    return %c0_i32, %c0_i32_0 : i32, i32
  }
  func.func @transform_4(%arg0: i32) -> (i32, i32) {
    %c0_i32 = arith.constant 0 : i32
    %c0_i32_0 = arith.constant 0 : i32
    %c0_i32_1 = arith.constant 0 : i32
    return %c0_i32, %c0_i32_0 : i32, i32
  }
  func.func @transform_5(%arg0: i32) -> (i32, i32) {
    %c0_i32 = arith.constant 0 : i32
    %c0_i32_0 = arith.constant 0 : i32
    %c0_i32_1 = arith.constant 0 : i32
    return %c0_i32, %c0_i32_0 : i32, i32
  }
  func.func @transform_6(%arg0: i32) -> (i32, i32) {
    %c0_i32 = arith.constant 0 : i32
    %c0_i32_0 = arith.constant 0 : i32
    return %c0_i32, %arg0 : i32, i32
  }
  func.func @transform_7(%arg0: i32) -> (i32, i32) {
    %c0_i32 = arith.constant 0 : i32
    %c0_i32_0 = arith.constant 0 : i32
    return %c0_i32, %arg0 : i32, i32
  }
  func.func @transform_8(%arg0: i32) -> (i32, i32) {
    %c0_i32 = arith.constant 0 : i32
    %c0_i32_0 = arith.constant 0 : i32
    return %c0_i32, %arg0 : i32, i32
  }
  func.func @transform_9(%arg0: i32) -> (i32, i32) {
    %c0_i32 = arith.constant 0 : i32
    %c0_i32_0 = arith.constant 0 : i32
    %c0_i32_1 = arith.constant 0 : i32
    return %c0_i32, %c0_i32_0 : i32, i32
  }
  func.func @transform_10(%arg0: i32) -> (i32, i32) {
    %c0_i32 = arith.constant 0 : i32
    %c0_i32_0 = arith.constant 0 : i32
    %c0_i32_1 = arith.constant 0 : i32
    return %c0_i32, %c0_i32_0 : i32, i32
  }
  func.func @transform_11(%arg0: i32) -> (i32, i32) {
    %c0_i32 = arith.constant 0 : i32
    %c0_i32_0 = arith.constant 0 : i32
    %c0_i32_1 = arith.constant 0 : i32
    return %c0_i32, %c0_i32_0 : i32, i32
  }
}

module attributes {stable_mosaic.version = 11 : i64} {
  func.func @_fc1_kernel(%arg0: i32, %arg1: memref<2x4096xf32, #tpu.memory_space<vmem>>, %arg2: memref<4096x256xbf16, #tpu.memory_space<vmem>>, %arg3: memref<1x256xf32, #tpu.memory_space<vmem>>, %arg4: memref<2x256xf32, #tpu.memory_space<vmem>>) attributes {dimension_semantics = [#tpu.dimension_semantics<parallel>], iteration_bounds = array<i64: 4>, scalar_prefetch = 0 : i64, scratch_operands = 0 : i64, tpu.core_type = #tpu.core_type<tc>, window_params = [{pipeline_mode = #tpu.pipeline_mode<synchronous>, transform_indices = @transform_0, window_bounds = array<i64: 2, 4096>}, {transform_indices = @transform_1, window_bounds = array<i64: 4096, 256>}, {transform_indices = @transform_2, window_bounds = array<i64: 1, 256>}, {transform_indices = @transform_3, window_bounds = array<i64: 2, 256>}]} {
    %c0 = arith.constant 0 : index
    %c0_0 = arith.constant 0 : index
    %0 = vector.load %arg1[%c0, %c0_0] : memref<2x4096xf32, #tpu.memory_space<vmem>>, vector<2x4096xf32>
    %1 = arith.truncf %0 : vector<2x4096xf32> to vector<2x4096xbf16>
    %c0_1 = arith.constant 0 : index
    %c0_2 = arith.constant 0 : index
    %2 = vector.load %arg2[%c0_1, %c0_2] : memref<4096x256xbf16, #tpu.memory_space<vmem>>, vector<4096x256xbf16>
    %cst = arith.constant dense<0.000000e+00> : vector<2x256xf32>
    %3 = tpu.matmul %1, %2, %cst {dimension_numbers = #tpu.dot_dimension_numbers<[1], [0], [0], [1], [0, 0, 1, 1], [], []>} : vector<2x4096xbf16>, vector<4096x256xbf16>, vector<2x256xf32> -> vector<2x256xf32>
    %c0_3 = arith.constant 0 : index
    %c0_4 = arith.constant 0 : index
    %4 = vector.load %arg3[%c0_3, %c0_4] : memref<1x256xf32, #tpu.memory_space<vmem>>, vector<1x256xf32>
    %5 = vector.broadcast %4 : vector<1x256xf32> to vector<2x256xf32>
    %6 = arith.addf %3, %5 : vector<2x256xf32>
    %cst_5 = arith.constant 0.000000e+00 : f32
    %7 = vector.broadcast %cst_5 : f32 to vector<2x256xf32>
    %8 = arith.maximumf %6, %7 : vector<2x256xf32>
    %c0_6 = arith.constant 0 : index
    %c0_7 = arith.constant 0 : index
    %9 = vector.load %arg4[%c0_6, %c0_7] : memref<2x256xf32, #tpu.memory_space<vmem>>, vector<2x256xf32>
    tpu.vector_store %arg4[%c0_6, %c0_7], %8 {strides = array<i32>} : memref<2x256xf32, #tpu.memory_space<vmem>>, vector<2x256xf32>,
    return
  }
  func.func @transform_0(%arg0: i32) -> (i32, i32) {
    %c0_i32 = arith.constant 0 : i32
    %c0_i32_0 = arith.constant 0 : i32
    %c0_i32_1 = arith.constant 0 : i32
    return %c0_i32, %c0_i32_0 : i32, i32
  }
  func.func @transform_1(%arg0: i32) -> (i32, i32) {
    %c0_i32 = arith.constant 0 : i32
    %c0_i32_0 = arith.constant 0 : i32
    return %c0_i32, %arg0 : i32, i32
  }
  func.func @transform_2(%arg0: i32) -> (i32, i32) {
    %c0_i32 = arith.constant 0 : i32
    %c0_i32_0 = arith.constant 0 : i32
    return %c0_i32, %arg0 : i32, i32
  }
  func.func @transform_3(%arg0: i32) -> (i32, i32) {
    %c0_i32 = arith.constant 0 : i32
    %c0_i32_0 = arith.constant 0 : i32
    return %c0_i32, %arg0 : i32, i32
  }
}

</mosaic_0001>

<bundles_post_ra>
// kernel: vae_forward.3
= control target key start
LH: loop header
LB: loop body
LE: loop exit
PB: predicated region body
PF: predicated region fallthrough
CT: control target
= control target key end

     0   :  { %s9593_s0 = inlined_call_operand.vmem [shape: f32[2,1024], index: 0, kind: input, shape index: {}]   ;;  %s9594_s1 = inlined_call_operand.vmem [shape: f32[1024,32], index: 1, kind: input, shape index: {}]   ;;  %s9595_s2 = inlined_call_operand.vmem [shape: f32[1,32], index: 2, kind: input, shape index: {}]   ;;  %s9596_s3 = inlined_call_operand.vmem [shape: f32[2,16], index: 3, kind: input, shape index: {}]   ;;  %s9597_s4 = inlined_call_operand.vmem [shape: f32[16,1024], index: 4, kind: input, shape index: {}]   ;;  %s9598_s5 = inlined_call_operand.vmem [shape: f32[1,1024], index: 5, kind: input, shape index: {}]   ;;  %s9599_s6 = inlined_call_operand.vmem [shape: bf16[1024,4096], index: 6, kind: input, shape index: {}]   ;;  %s9600_s7 = inlined_call_operand.vmem [shape: f32[1,4096], index: 7, kind: input, shape index: {}]   ;;  %s9601_s8 = inlined_call_operand.hbm [shape: f32[2,4096], index: 8, kind: output, shape index: {0}]   ;;  %s9602_s9 = inlined_call_operand.hbm [shape: f32[2,16], index: 9, kind: output, shape index: {1}]   ;;  %s9603_s10 = inlined_call_operand.hbm [shape: f32[2,16], index: 10, kind: output, shape index: {2}]   ;;  %s9604_s11 = inlined_call_operand.hbm [shape: f32[2,16], index: 11, kind: output, shape index: {3}]  }
   0x1   :  { %9605 = sst [smem:[#allocation13_spill]] %s9593_s0 }
   0x2   :  { %9606 = sst [smem:[#allocation14_spill]] %s9594_s1 }
   0x3   :  { %9607 = sst [smem:[#allocation15_spill]] %s9595_s2 }
   0x4   :  { %17 = vsyncpa [#allocation4], 0 }
   0x5   :  { %19 = vsyncpa [#allocation4 + $0x1], 0 }
   0x6   :  { %20 = vsyncpa [#allocation6], 0 }
   0x7   :  { %21 = vsyncpa [#allocation9], 0  ;;  %s7298_s17 = smov 0   ;;  %s7300_s18 = smov 0  }
   0x8   :  { %s7302_s19 = smov 0   ;;  %s7304_s20 = smov 0  }
   0x9 LB: > { %s7319_s21 = sadd.s32 4294967295, %s7229_s20   ;;  %s6301_s22 = sadd.s32 4294967294, %s7229_s20   ;;  %s7229_s20 = sphi %s7304_s20, %s9617_s20   ;;  %s7225_s19 = sphi %s7302_s19, %s9616_s19   ;;  %s7221_s18 = sphi %s7300_s18, %s9615_s18   ;;  %s7217_s17 = sphi %s7298_s17, %s9614_s17  }
   0xa   : > { %s7323_s23 = sadd.s32 1, %s7229_s20   ;;  %s160_s24 = sadd.s32 1, %s7225_s19 }
   0xb   : > { %s157_s25 = ssub.s32 %s7229_s20, %s7323_s23  ;;  %p167_p0 = scmp.ne.s32.totalorder %s7225_s19, %s7221_s18 }
   0xc   : > { %p158_p1 = scmp.eq.s32.totalorder %s157_s25, 0  ;;  %p168_p2 = scmp.eq.s32.totalorder %s7229_s20, 0 }
   0xd   : > { %p223_p3 = scmp.eq.s32.totalorder %s7319_s21, 3  ;;  %p228_p4 = scmp.ne.s32.totalorder %s7221_s18, %s7217_s17 }
   0xe   : > { %s7335_s26 = scalar_select %p158_p1, %s7225_s19, %s160_s24  }
   0xf   : > { %p169_p5 = por %p168_p2, %p167_p0  ;;  %p7339_p6 = por %p223_p3, %p167_p0 }
  0x10   : > { %p229_p7 = scmp.eq.s32.totalorder %s6301_s22, 3  ;;  %p6303_p9 = scmp.ge.s32.totalorder %s7229_s20, 4 }
  0x12   : > { %p7343_p8 = por %p229_p7, %p228_p4  ;;  %326 = sbr.rel (%p6303_p9) target bundleno = 283 (0x11b), region = 40 }
  0x14   : > { %s9609_s28 = scalar_select %p7343_p8, 1, 0 }
  0x17   : > { %329 = sbr.rel (!%p169_p5) target bundleno = 283 (0x11b), region = 44  ;;  %s331_s29 = sand.u32 (%p169_p5), 1, %s7225_s19  }
  0x18   : > { %s6847_s30 = sshll.u32 (%p169_p5), %s7229_s20, 5  ;;  %s6304_s12 = sshll.u32 (%p169_p5), %s331_s29, 12 }
  0x19   : > { %s7353_s15 = scalar_lea.vmem (%p169_p5), %s9599_s6, %s6847_s30  ;;  %s7358_s16 = scalar_lea.vmem (%p169_p5), [#allocation2], %s6304_s12 }
  0x1a   : > { %v349_v0 = vld [vmem:[%s7353_s15] sm:$0xff] (%p169_p5)  ;;  %v351_v1 = vld [vmem:[%s7353_s15 + $0x8] sm:$0xff] (%p169_p5)  ;;  %v353_v2 = vld [vmem:[%s7353_s15 + $0x10] sm:$0xff] (%p169_p5) }
  0x1b   : > { %350 = vst [vmem:[%s7358_s16] sm:$0xff] (%p169_p5), %v349_v0  ;;  %352 = vst [vmem:[%s7358_s16 + $0x8] sm:$0xff] (%p169_p5), %v351_v1  ;;  %v355_v3 = vld [vmem:[%s7353_s15 + $0x18] sm:$0xff] (%p169_p5)  ;;  %v357_v4 = vld [vmem:[%s7353_s15 + $0x80] sm:$0xff] (%p169_p5) }
  0x1c   : > { %354 = vst [vmem:[%s7358_s16 + $0x10] sm:$0xff] %v353_v2  ;;  %v359_v5 = vld [vmem:[%s7353_s15 + $0x88] sm:$0xff]  ;;  %356 = vst [vmem:[%s7358_s16 + $0x18] sm:$0xff] %v355_v3  ;;  %v361_v6 = vld [vmem:[%s7353_s15 + $0x90] sm:$0xff] }
  0x1d   : > { %358 = vst [vmem:[%s7358_s16 + $0x20] sm:$0xff] %v357_v4  ;;  %360 = vst [vmem:[%s7358_s16 + $0x28] sm:$0xff] %v359_v5  ;;  %v363_v7 = vld [vmem:[%s7353_s15 + $0x98] sm:$0xff]  ;;  %v365_v8 = vld [vmem:[%s7353_s15 + $0x100] sm:$0xff] }
  0x1e   : > { %362 = vst [vmem:[%s7358_s16 + $0x30] sm:$0xff] %v361_v6  ;;  %364 = vst [vmem:[%s7358_s16 + $0x38] sm:$0xff] %v363_v7  ;;  %v367_v9 = vld [vmem:[%s7353_s15 + $0x108] sm:$0xff]  ;;  %v369_v10 = vld [vmem:[%s7353_s15 + $0x110] sm:$0xff] }
  0x1f   : > { %366 = vst [vmem:[%s7358_s16 + $0x40] sm:$0xff] %v365_v8  ;;  %v371_v11 = vld [vmem:[%s7353_s15 + $0x118] sm:$0xff]  ;;  %368 = vst [vmem:[%s7358_s16 + $0x48] sm:$0xff] %v367_v9  ;;  %v373_v12 = vld [vmem:[%s7353_s15 + $0x180] sm:$0xff] }
  0x20   : > { %370 = vst [vmem:[%s7358_s16 + $0x50] sm:$0xff] %v369_v10  ;;  %372 = vst [vmem:[%s7358_s16 + $0x58] sm:$0xff] %v371_v11  ;;  %v375_v13 = vld [vmem:[%s7353_s15 + $0x188] sm:$0xff]  ;;  %v377_v14 = vld [vmem:[%s7353_s15 + $0x190] sm:$0xff] }
  0x21   : > { %374 = vst [vmem:[%s7358_s16 + $0x60] sm:$0xff] %v373_v12  ;;  %376 = vst [vmem:[%s7358_s16 + $0x68] sm:$0xff] %v375_v13  ;;  %v379_v15 = vld [vmem:[%s7353_s15 + $0x198] sm:$0xff]  ;;  %v381_v16 = vld [vmem:[%s7353_s15 + $0x200] sm:$0xff] }
  0x22   : > { %378 = vst [vmem:[%s7358_s16 + $0x70] sm:$0xff] %v377_v14  ;;  %v383_v17 = vld [vmem:[%s7353_s15 + $0x208] sm:$0xff]  ;;  %380 = vst [vmem:[%s7358_s16 + $0x78] sm:$0xff] %v379_v15  ;;  %v385_v18 = vld [vmem:[%s7353_s15 + $0x210] sm:$0xff] }
  0x23   : > { %382 = vst [vmem:[%s7358_s16 + $0x80] sm:$0xff] %v381_v16  ;;  %384 = vst [vmem:[%s7358_s16 + $0x88] sm:$0xff] %v383_v17  ;;  %v387_v19 = vld [vmem:[%s7353_s15 + $0x218] sm:$0xff]  ;;  %v389_v20 = vld [vmem:[%s7353_s15 + $0x280] sm:$0xff] }
  0x24   : > { %386 = vst [vmem:[%s7358_s16 + $0x90] sm:$0xff] %v385_v18  ;;  %388 = vst [vmem:[%s7358_s16 + $0x98] sm:$0xff] %v387_v19  ;;  %v391_v21 = vld [vmem:[%s7353_s15 + $0x288] sm:$0xff]  ;;  %v393_v22 = vld [vmem:[%s7353_s15 + $0x290] sm:$0xff] }
  0x25   : > { %390 = vst [vmem:[%s7358_s16 + $0xa0] sm:$0xff] %v389_v20  ;;  %v395_v23 = vld [vmem:[%s7353_s15 + $0x298] sm:$0xff]  ;;  %392 = vst [vmem:[%s7358_s16 + $0xa8] sm:$0xff] %v391_v21  ;;  %v397_v24 = vld [vmem:[%s7353_s15 + $0x300] sm:$0xff] }
  0x26   : > { %394 = vst [vmem:[%s7358_s16 + $0xb0] sm:$0xff] %v393_v22  ;;  %396 = vst [vmem:[%s7358_s16 + $0xb8] sm:$0xff] %v395_v23  ;;  %v399_v25 = vld [vmem:[%s7353_s15 + $0x308] sm:$0xff]  ;;  %v401_v26 = vld [vmem:[%s7353_s15 + $0x310] sm:$0xff] }
  0x27   : > { %398 = vst [vmem:[%s7358_s16 + $0xc0] sm:$0xff] %v397_v24  ;;  %400 = vst [vmem:[%s7358_s16 + $0xc8] sm:$0xff] %v399_v25  ;;  %v403_v27 = vld [vmem:[%s7353_s15 + $0x318] sm:$0xff]  ;;  %v405_v28 = vld [vmem:[%s7353_s15 + $0x380] sm:$0xff] }
  0x28   : > { %402 = vst [vmem:[%s7358_s16 + $0xd0] sm:$0xff] %v401_v26  ;;  %v407_v29 = vld [vmem:[%s7353_s15 + $0x388] sm:$0xff]  ;;  %404 = vst [vmem:[%s7358_s16 + $0xd8] sm:$0xff] %v403_v27  ;;  %v409_v30 = vld [vmem:[%s7353_s15 + $0x390] sm:$0xff] }
  0x29   : > { %406 = vst [vmem:[%s7358_s16 + $0xe0] sm:$0xff] %v405_v28  ;;  %408 = vst [vmem:[%s7358_s16 + $0xe8] sm:$0xff] %v407_v29  ;;  %v411_v31 = vld [vmem:[%s7353_s15 + $0x398] sm:$0xff]  ;;  %v413_v32 = vld [vmem:[%s7353_s15 + $0x400] sm:$0xff] }
  0x2a   : > { %410 = vst [vmem:[%s7358_s16 + $0xf0] sm:$0xff] %v409_v30  ;;  %412 = vst [vmem:[%s7358_s16 + $0xf8] sm:$0xff] %v411_v31  ;;  %v415_v33 = vld [vmem:[%s7353_s15 + $0x408] sm:$0xff]  ;;  %v417_v34 = vld [vmem:[%s7353_s15 + $0x410] sm:$0xff] }
  0x2b   : > { %414 = vst [vmem:[%s7358_s16 + $0x100] sm:$0xff] %v413_v32  ;;  %v419_v35 = vld [vmem:[%s7353_s15 + $0x418] sm:$0xff]  ;;  %416 = vst [vmem:[%s7358_s16 + $0x108] sm:$0xff] %v415_v33  ;;  %v421_v36 = vld [vmem:[%s7353_s15 + $0x480] sm:$0xff] }
  0x2c   : > { %418 = vst [vmem:[%s7358_s16 + $0x110] sm:$0xff] %v417_v34  ;;  %420 = vst [vmem:[%s7358_s16 + $0x118] sm:$0xff] %v419_v35  ;;  %v423_v37 = vld [vmem:[%s7353_s15 + $0x488] sm:$0xff]  ;;  %v425_v38 = vld [vmem:[%s7353_s15 + $0x490] sm:$0xff] }
  0x2d   : > { %422 = vst [vmem:[%s7358_s16 + $0x120] sm:$0xff] %v421_v36  ;;  %424 = vst [vmem:[%s7358_s16 + $0x128] sm:$0xff] %v423_v37  ;;  %v427_v39 = vld [vmem:[%s7353_s15 + $0x498] sm:$0xff]  ;;  %v429_v40 = vld [vmem:[%s7353_s15 + $0x500] sm:$0xff] }
  0x2e   : > { %426 = vst [vmem:[%s7358_s16 + $0x130] sm:$0xff] %v425_v38  ;;  %v431_v41 = vld [vmem:[%s7353_s15 + $0x508] sm:$0xff]  ;;  %428 = vst [vmem:[%s7358_s16 + $0x138] sm:$0xff] %v427_v39  ;;  %v433_v42 = vld [vmem:[%s7353_s15 + $0x510] sm:$0xff] }
  0x2f   : > { %430 = vst [vmem:[%s7358_s16 + $0x140] sm:$0xff] %v429_v40  ;;  %432 = vst [vmem:[%s7358_s16 + $0x148] sm:$0xff] %v431_v41  ;;  %v435_v43 = vld [vmem:[%s7353_s15 + $0x518] sm:$0xff]  ;;  %v437_v44 = vld [vmem:[%s7353_s15 + $0x580] sm:$0xff] }
  0x30   : > { %434 = vst [vmem:[%s7358_s16 + $0x150] sm:$0xff] %v433_v42  ;;  %436 = vst [vmem:[%s7358_s16 + $0x158] sm:$0xff] %v435_v43  ;;  %v439_v45 = vld [vmem:[%s7353_s15 + $0x588] sm:$0xff]  ;;  %v441_v46 = vld [vmem:[%s7353_s15 + $0x590] sm:$0xff] }
  0x31   : > { %438 = vst [vmem:[%s7358_s16 + $0x160] sm:$0xff] %v437_v44  ;;  %v443_v47 = vld [vmem:[%s7353_s15 + $0x598] sm:$0xff]  ;;  %440 = vst [vmem:[%s7358_s16 + $0x168] sm:$0xff] %v439_v45  ;;  %v445_v48 = vld [vmem:[%s7353_s15 + $0x600] sm:$0xff] }
  0x32   : > { %442 = vst [vmem:[%s7358_s16 + $0x170] sm:$0xff] %v441_v46  ;;  %444 = vst [vmem:[%s7358_s16 + $0x178] sm:$0xff] %v443_v47  ;;  %v447_v49 = vld [vmem:[%s7353_s15 + $0x608] sm:$0xff]  ;;  %v449_v50 = vld [vmem:[%s7353_s15 + $0x610] sm:$0xff] }
  0x33   : > { %446 = vst [vmem:[%s7358_s16 + $0x180] sm:$0xff] %v445_v48  ;;  %448 = vst [vmem:[%s7358_s16 + $0x188] sm:$0xff] %v447_v49  ;;  %v451_v51 = vld [vmem:[%s7353_s15 + $0x618] sm:$0xff]  ;;  %v453_v52 = vld [vmem:[%s7353_s15 + $0x680] sm:$0xff] }
  0x34   : > { %450 = vst [vmem:[%s7358_s16 + $0x190] sm:$0xff] %v449_v50  ;;  %v455_v53 = vld [vmem:[%s7353_s15 + $0x688] sm:$0xff]  ;;  %452 = vst [vmem:[%s7358_s16 + $0x198] sm:$0xff] %v451_v51  ;;  %v457_v54 = vld [vmem:[%s7353_s15 + $0x690] sm:$0xff] }
  0x35   : > { %454 = vst [vmem:[%s7358_s16 + $0x1a0] sm:$0xff] %v453_v52  ;;  %456 = vst [vmem:[%s7358_s16 + $0x1a8] sm:$0xff] %v455_v53  ;;  %v459_v55 = vld [vmem:[%s7353_s15 + $0x698] sm:$0xff]  ;;  %v461_v56 = vld [vmem:[%s7353_s15 + $0x700] sm:$0xff] }
  0x36   : > { %458 = vst [vmem:[%s7358_s16 + $0x1b0] sm:$0xff] %v457_v54  ;;  %460 = vst [vmem:[%s7358_s16 + $0x1b8] sm:$0xff] %v459_v55  ;;  %v463_v57 = vld [vmem:[%s7353_s15 + $0x708] sm:$0xff]  ;;  %v465_v58 = vld [vmem:[%s7353_s15 + $0x710] sm:$0xff] }
  0x37   : > { %462 = vst [vmem:[%s7358_s16 + $0x1c0] sm:$0xff] %v461_v56  ;;  %v467_v59 = vld [vmem:[%s7353_s15 + $0x718] sm:$0xff]  ;;  %464 = vst [vmem:[%s7358_s16 + $0x1c8] sm:$0xff] %v463_v57  ;;  %v469_v60 = vld [vmem:[%s7353_s15 + $0x780] sm:$0xff] }
  0x38   : > { %466 = vst [vmem:[%s7358_s16 + $0x1d0] sm:$0xff] %v465_v58  ;;  %468 = vst [vmem:[%s7358_s16 + $0x1d8] sm:$0xff] %v467_v59  ;;  %v471_v61 = vld [vmem:[%s7353_s15 + $0x788] sm:$0xff]  ;;  %v473_v62 = vld [vmem:[%s7353_s15 + $0x790] sm:$0xff] }
  0x39   : > { %470 = vst [vmem:[%s7358_s16 + $0x1e0] sm:$0xff] %v469_v60  ;;  %472 = vst [vmem:[%s7358_s16 + $0x1e8] sm:$0xff] %v471_v61  ;;  %v475_v63 = vld [vmem:[%s7353_s15 + $0x798] sm:$0xff]  ;;  %v477_v0 = vld [vmem:[%s7353_s15 + $0x800] sm:$0xff] }
  0x3a   : > { %474 = vst [vmem:[%s7358_s16 + $0x1f0] sm:$0xff] %v473_v62  ;;  %v479_v1 = vld [vmem:[%s7353_s15 + $0x808] sm:$0xff]  ;;  %476 = vst [vmem:[%s7358_s16 + $0x1f8] sm:$0xff] %v475_v63  ;;  %v481_v2 = vld [vmem:[%s7353_s15 + $0x810] sm:$0xff] }
  0x3b   : > { %478 = vst [vmem:[%s7358_s16 + $0x200] sm:$0xff] %v477_v0  ;;  %480 = vst [vmem:[%s7358_s16 + $0x208] sm:$0xff] %v479_v1  ;;  %v483_v3 = vld [vmem:[%s7353_s15 + $0x818] sm:$0xff]  ;;  %v485_v4 = vld [vmem:[%s7353_s15 + $0x880] sm:$0xff] }
  0x3c   : > { %482 = vst [vmem:[%s7358_s16 + $0x210] sm:$0xff] %v481_v2  ;;  %484 = vst [vmem:[%s7358_s16 + $0x218] sm:$0xff] %v483_v3  ;;  %v487_v5 = vld [vmem:[%s7353_s15 + $0x888] sm:$0xff]  ;;  %v489_v6 = vld [vmem:[%s7353_s15 + $0x890] sm:$0xff] }
  0x3d   : > { %486 = vst [vmem:[%s7358_s16 + $0x220] sm:$0xff] %v485_v4  ;;  %v491_v7 = vld [vmem:[%s7353_s15 + $0x898] sm:$0xff]  ;;  %488 = vst [vmem:[%s7358_s16 + $0x228] sm:$0xff] %v487_v5  ;;  %v493_v8 = vld [vmem:[%s7353_s15 + $0x900] sm:$0xff] }
  0x3e   : > { %490 = vst [vmem:[%s7358_s16 + $0x230] sm:$0xff] %v489_v6  ;;  %492 = vst [vmem:[%s7358_s16 + $0x238] sm:$0xff] %v491_v7  ;;  %v495_v9 = vld [vmem:[%s7353_s15 + $0x908] sm:$0xff]  ;;  %v497_v10 = vld [vmem:[%s7353_s15 + $0x910] sm:$0xff] }
  0x3f   : > { %494 = vst [vmem:[%s7358_s16 + $0x240] sm:$0xff] %v493_v8  ;;  %496 = vst [vmem:[%s7358_s16 + $0x248] sm:$0xff] %v495_v9  ;;  %v499_v11 = vld [vmem:[%s7353_s15 + $0x918] sm:$0xff]  ;;  %v501_v12 = vld [vmem:[%s7353_s15 + $0x980] sm:$0xff] }
  0x40   : > { %498 = vst [vmem:[%s7358_s16 + $0x250] sm:$0xff] %v497_v10  ;;  %v503_v13 = vld [vmem:[%s7353_s15 + $0x988] sm:$0xff]  ;;  %500 = vst [vmem:[%s7358_s16 + $0x258] sm:$0xff] %v499_v11  ;;  %v505_v14 = vld [vmem:[%s7353_s15 + $0x990] sm:$0xff] }
  0x41   : > { %502 = vst [vmem:[%s7358_s16 + $0x260] sm:$0xff] %v501_v12  ;;  %504 = vst [vmem:[%s7358_s16 + $0x268] sm:$0xff] %v503_v13  ;;  %v507_v15 = vld [vmem:[%s7353_s15 + $0x998] sm:$0xff]  ;;  %v509_v16 = vld [vmem:[%s7353_s15 + $0xa00] sm:$0xff] }
  0x42   : > { %506 = vst [vmem:[%s7358_s16 + $0x270] sm:$0xff] %v505_v14  ;;  %508 = vst [vmem:[%s7358_s16 + $0x278] sm:$0xff] %v507_v15  ;;  %v511_v17 = vld [vmem:[%s7353_s15 + $0xa08] sm:$0xff]  ;;  %v513_v18 = vld [vmem:[%s7353_s15 + $0xa10] sm:$0xff] }
  0x43   : > { %510 = vst [vmem:[%s7358_s16 + $0x280] sm:$0xff] %v509_v16  ;;  %v515_v19 = vld [vmem:[%s7353_s15 + $0xa18] sm:$0xff]  ;;  %512 = vst [vmem:[%s7358_s16 + $0x288] sm:$0xff] %v511_v17  ;;  %v517_v20 = vld [vmem:[%s7353_s15 + $0xa80] sm:$0xff] }
  0x44   : > { %514 = vst [vmem:[%s7358_s16 + $0x290] sm:$0xff] %v513_v18  ;;  %516 = vst [vmem:[%s7358_s16 + $0x298] sm:$0xff] %v515_v19  ;;  %v519_v21 = vld [vmem:[%s7353_s15 + $0xa88] sm:$0xff]  ;;  %v521_v22 = vld [vmem:[%s7353_s15 + $0xa90] sm:$0xff] }
  0x45   : > { %518 = vst [vmem:[%s7358_s16 + $0x2a0] sm:$0xff] %v517_v20  ;;  %520 = vst [vmem:[%s7358_s16 + $0x2a8] sm:$0xff] %v519_v21  ;;  %v523_v23 = vld [vmem:[%s7353_s15 + $0xa98] sm:$0xff]  ;;  %v525_v24 = vld [vmem:[%s7353_s15 + $0xb00] sm:$0xff] }
  0x46   : > { %522 = vst [vmem:[%s7358_s16 + $0x2b0] sm:$0xff] %v521_v22  ;;  %v527_v25 = vld [vmem:[%s7353_s15 + $0xb08] sm:$0xff]  ;;  %524 = vst [vmem:[%s7358_s16 + $0x2b8] sm:$0xff] %v523_v23  ;;  %v529_v26 = vld [vmem:[%s7353_s15 + $0xb10] sm:$0xff] }
  0x47   : > { %526 = vst [vmem:[%s7358_s16 + $0x2c0] sm:$0xff] %v525_v24  ;;  %528 = vst [vmem:[%s7358_s16 + $0x2c8] sm:$0xff] %v527_v25  ;;  %v531_v27 = vld [vmem:[%s7353_s15 + $0xb18] sm:$0xff]  ;;  %v533_v28 = vld [vmem:[%s7353_s15 + $0xb80] sm:$0xff] }
  0x48   : > { %530 = vst [vmem:[%s7358_s16 + $0x2d0] sm:$0xff] %v529_v26  ;;  %532 = vst [vmem:[%s7358_s16 + $0x2d8] sm:$0xff] %v531_v27  ;;  %v535_v29 = vld [vmem:[%s7353_s15 + $0xb88] sm:$0xff]  ;;  %v537_v30 = vld [vmem:[%s7353_s15 + $0xb90] sm:$0xff] }
  0x49   : > { %534 = vst [vmem:[%s7358_s16 + $0x2e0] sm:$0xff] %v533_v28  ;;  %v539_v31 = vld [vmem:[%s7353_s15 + $0xb98] sm:$0xff]  ;;  %536 = vst [vmem:[%s7358_s16 + $0x2e8] sm:$0xff] %v535_v29  ;;  %v541_v32 = vld [vmem:[%s7353_s15 + $0xc00] sm:$0xff] }
  0x4a   : > { %538 = vst [vmem:[%s7358_s16 + $0x2f0] sm:$0xff] %v537_v30  ;;  %540 = vst [vmem:[%s7358_s16 + $0x2f8] sm:$0xff] %v539_v31  ;;  %v543_v33 = vld [vmem:[%s7353_s15 + $0xc08] sm:$0xff]  ;;  %v545_v34 = vld [vmem:[%s7353_s15 + $0xc10] sm:$0xff] }
  0x4b   : > { %542 = vst [vmem:[%s7358_s16 + $0x300] sm:$0xff] %v541_v32  ;;  %544 = vst [vmem:[%s7358_s16 + $0x308] sm:$0xff] %v543_v33  ;;  %v547_v35 = vld [vmem:[%s7353_s15 + $0xc18] sm:$0xff]  ;;  %v549_v36 = vld [vmem:[%s7353_s15 + $0xc80] sm:$0xff] }
  0x4c   : > { %546 = vst [vmem:[%s7358_s16 + $0x310] sm:$0xff] %v545_v34  ;;  %v551_v37 = vld [vmem:[%s7353_s15 + $0xc88] sm:$0xff]  ;;  %548 = vst [vmem:[%s7358_s16 + $0x318] sm:$0xff] %v547_v35  ;;  %v553_v38 = vld [vmem:[%s7353_s15 + $0xc90] sm:$0xff] }
  0x4d   : > { %550 = vst [vmem:[%s7358_s16 + $0x320] sm:$0xff] %v549_v36  ;;  %552 = vst [vmem:[%s7358_s16 + $0x328] sm:$0xff] %v551_v37  ;;  %v555_v39 = vld [vmem:[%s7353_s15 + $0xc98] sm:$0xff]  ;;  %v557_v40 = vld [vmem:[%s7353_s15 + $0xd00] sm:$0xff] }
  0x4e   : > { %554 = vst [vmem:[%s7358_s16 + $0x330] sm:$0xff] %v553_v38  ;;  %556 = vst [vmem:[%s7358_s16 + $0x338] sm:$0xff] %v555_v39  ;;  %v559_v41 = vld [vmem:[%s7353_s15 + $0xd08] sm:$0xff]  ;;  %v561_v42 = vld [vmem:[%s7353_s15 + $0xd10] sm:$0xff] }
  0x4f   : > { %558 = vst [vmem:[%s7358_s16 + $0x340] sm:$0xff] %v557_v40  ;;  %v563_v43 = vld [vmem:[%s7353_s15 + $0xd18] sm:$0xff]  ;;  %560 = vst [vmem:[%s7358_s16 + $0x348] sm:$0xff] %v559_v41  ;;  %v565_v44 = vld [vmem:[%s7353_s15 + $0xd80] sm:$0xff] }
  0x50   : > { %562 = vst [vmem:[%s7358_s16 + $0x350] sm:$0xff] %v561_v42  ;;  %564 = vst [vmem:[%s7358_s16 + $0x358] sm:$0xff] %v563_v43  ;;  %v567_v45 = vld [vmem:[%s7353_s15 + $0xd88] sm:$0xff]  ;;  %v569_v46 = vld [vmem:[%s7353_s15 + $0xd90] sm:$0xff] }
  0x51   : > { %566 = vst [vmem:[%s7358_s16 + $0x360] sm:$0xff] %v565_v44  ;;  %568 = vst [vmem:[%s7358_s16 + $0x368] sm:$0xff] %v567_v45  ;;  %v571_v47 = vld [vmem:[%s7353_s15 + $0xd98] sm:$0xff]  ;;  %v573_v48 = vld [vmem:[%s7353_s15 + $0xe00] sm:$0xff] }
  0x52   : > { %570 = vst [vmem:[%s7358_s16 + $0x370] sm:$0xff] %v569_v46  ;;  %v575_v49 = vld [vmem:[%s7353_s15 + $0xe08] sm:$0xff]  ;;  %572 = vst [vmem:[%s7358_s16 + $0x378] sm:$0xff] %v571_v47  ;;  %v577_v50 = vld [vmem:[%s7353_s15 + $0xe10] sm:$0xff] }
  0x53   : > { %574 = vst [vmem:[%s7358_s16 + $0x380] sm:$0xff] %v573_v48  ;;  %576 = vst [vmem:[%s7358_s16 + $0x388] sm:$0xff] %v575_v49  ;;  %v579_v51 = vld [vmem:[%s7353_s15 + $0xe18] sm:$0xff]  ;;  %v581_v52 = vld [vmem:[%s7353_s15 + $0xe80] sm:$0xff] }
  0x54   : > { %578 = vst [vmem:[%s7358_s16 + $0x390] sm:$0xff] %v577_v50  ;;  %580 = vst [vmem:[%s7358_s16 + $0x398] sm:$0xff] %v579_v51  ;;  %v583_v53 = vld [vmem:[%s7353_s15 + $0xe88] sm:$0xff]  ;;  %v585_v54 = vld [vmem:[%s7353_s15 + $0xe90] sm:$0xff] }
  0x55   : > { %582 = vst [vmem:[%s7358_s16 + $0x3a0] sm:$0xff] %v581_v52  ;;  %v587_v55 = vld [vmem:[%s7353_s15 + $0xe98] sm:$0xff]  ;;  %584 = vst [vmem:[%s7358_s16 + $0x3a8] sm:$0xff] %v583_v53  ;;  %v589_v56 = vld [vmem:[%s7353_s15 + $0xf00] sm:$0xff] }
  0x56   : > { %586 = vst [vmem:[%s7358_s16 + $0x3b0] sm:$0xff] %v585_v54  ;;  %588 = vst [vmem:[%s7358_s16 + $0x3b8] sm:$0xff] %v587_v55  ;;  %v591_v57 = vld [vmem:[%s7353_s15 + $0xf08] sm:$0xff]  ;;  %v593_v58 = vld [vmem:[%s7353_s15 + $0xf10] sm:$0xff] }
  0x57   : > { %590 = vst [vmem:[%s7358_s16 + $0x3c0] sm:$0xff] %v589_v56  ;;  %592 = vst [vmem:[%s7358_s16 + $0x3c8] sm:$0xff] %v591_v57  ;;  %v595_v59 = vld [vmem:[%s7353_s15 + $0xf18] sm:$0xff]  ;;  %v597_v60 = vld [vmem:[%s7353_s15 + $0xf80] sm:$0xff] }
  0x58   : > { %594 = vst [vmem:[%s7358_s16 + $0x3d0] sm:$0xff] %v593_v58  ;;  %v599_v61 = vld [vmem:[%s7353_s15 + $0xf88] sm:$0xff]  ;;  %596 = vst [vmem:[%s7358_s16 + $0x3d8] sm:$0xff] %v595_v59  ;;  %v601_v62 = vld [vmem:[%s7353_s15 + $0xf90] sm:$0xff] }
  0x59   : > { %598 = vst [vmem:[%s7358_s16 + $0x3e0] sm:$0xff] %v597_v60  ;;  %600 = vst [vmem:[%s7358_s16 + $0x3e8] sm:$0xff] %v599_v61  ;;  %v603_v63 = vld [vmem:[%s7353_s15 + $0xf98] sm:$0xff]  ;;  %v605_v0 = vld [vmem:[%s7353_s15 + $0x1000] sm:$0xff] }
  0x5a   : > { %602 = vst [vmem:[%s7358_s16 + $0x3f0] sm:$0xff] %v601_v62  ;;  %604 = vst [vmem:[%s7358_s16 + $0x3f8] sm:$0xff] %v603_v63  ;;  %v607_v1 = vld [vmem:[%s7353_s15 + $0x1008] sm:$0xff]  ;;  %v609_v2 = vld [vmem:[%s7353_s15 + $0x1010] sm:$0xff] }
  0x5b   : > { %606 = vst [vmem:[%s7358_s16 + $0x400] sm:$0xff] %v605_v0  ;;  %v611_v3 = vld [vmem:[%s7353_s15 + $0x1018] sm:$0xff]  ;;  %608 = vst [vmem:[%s7358_s16 + $0x408] sm:$0xff] %v607_v1  ;;  %v613_v4 = vld [vmem:[%s7353_s15 + $0x1080] sm:$0xff] }
  0x5c   : > { %610 = vst [vmem:[%s7358_s16 + $0x410] sm:$0xff] %v609_v2  ;;  %612 = vst [vmem:[%s7358_s16 + $0x418] sm:$0xff] %v611_v3  ;;  %v615_v5 = vld [vmem:[%s7353_s15 + $0x1088] sm:$0xff]  ;;  %v617_v6 = vld [vmem:[%s7353_s15 + $0x1090] sm:$0xff] }
  0x5d   : > { %614 = vst [vmem:[%s7358_s16 + $0x420] sm:$0xff] %v613_v4  ;;  %616 = vst [vmem:[%s7358_s16 + $0x428] sm:$0xff] %v615_v5  ;;  %v619_v7 = vld [vmem:[%s7353_s15 + $0x1098] sm:$0xff]  ;;  %v621_v8 = vld [vmem:[%s7353_s15 + $0x1100] sm:$0xff] }
  0x5e   : > { %618 = vst [vmem:[%s7358_s16 + $0x430] sm:$0xff] %v617_v6  ;;  %v623_v9 = vld [vmem:[%s7353_s15 + $0x1108] sm:$0xff]  ;;  %620 = vst [vmem:[%s7358_s16 + $0x438] sm:$0xff] %v619_v7  ;;  %v625_v10 = vld [vmem:[%s7353_s15 + $0x1110] sm:$0xff] }
  0x5f   : > { %622 = vst [vmem:[%s7358_s16 + $0x440] sm:$0xff] %v621_v8  ;;  %624 = vst [vmem:[%s7358_s16 + $0x448] sm:$0xff] %v623_v9  ;;  %v627_v11 = vld [vmem:[%s7353_s15 + $0x1118] sm:$0xff]  ;;  %v629_v12 = vld [vmem:[%s7353_s15 + $0x1180] sm:$0xff] }
  0x60   : > { %626 = vst [vmem:[%s7358_s16 + $0x450] sm:$0xff] %v625_v10  ;;  %628 = vst [vmem:[%s7358_s16 + $0x458] sm:$0xff] %v627_v11  ;;  %v631_v13 = vld [vmem:[%s7353_s15 + $0x1188] sm:$0xff]  ;;  %v633_v14 = vld [vmem:[%s7353_s15 + $0x1190] sm:$0xff] }
  0x61   : > { %630 = vst [vmem:[%s7358_s16 + $0x460] sm:$0xff] %v629_v12  ;;  %v635_v15 = vld [vmem:[%s7353_s15 + $0x1198] sm:$0xff]  ;;  %632 = vst [vmem:[%s7358_s16 + $0x468] sm:$0xff] %v631_v13  ;;  %v637_v16 = vld [vmem:[%s7353_s15 + $0x1200] sm:$0xff] }
  0x62   : > { %634 = vst [vmem:[%s7358_s16 + $0x470] sm:$0xff] %v633_v14  ;;  %636 = vst [vmem:[%s7358_s16 + $0x478] sm:$0xff] %v635_v15  ;;  %v639_v17 = vld [vmem:[%s7353_s15 + $0x1208] sm:$0xff]  ;;  %v641_v18 = vld [vmem:[%s7353_s15 + $0x1210] sm:$0xff] }
  0x63   : > { %638 = vst [vmem:[%s7358_s16 + $0x480] sm:$0xff] %v637_v16  ;;  %640 = vst [vmem:[%s7358_s16 + $0x488] sm:$0xff] %v639_v17  ;;  %v643_v19 = vld [vmem:[%s7353_s15 + $0x1218] sm:$0xff]  ;;  %v645_v20 = vld [vmem:[%s7353_s15 + $0x1280] sm:$0xff] }
  0x64   : > { %642 = vst [vmem:[%s7358_s16 + $0x490] sm:$0xff] %v641_v18  ;;  %v647_v21 = vld [vmem:[%s7353_s15 + $0x1288] sm:$0xff]  ;;  %644 = vst [vmem:[%s7358_s16 + $0x498] sm:$0xff] %v643_v19  ;;  %v649_v22 = vld [vmem:[%s7353_s15 + $0x1290] sm:$0xff] }
  0x65   : > { %646 = vst [vmem:[%s7358_s16 + $0x4a0] sm:$0xff] %v645_v20  ;;  %648 = vst [vmem:[%s7358_s16 + $0x4a8] sm:$0xff] %v647_v21  ;;  %v651_v23 = vld [vmem:[%s7353_s15 + $0x1298] sm:$0xff]  ;;  %v653_v24 = vld [vmem:[%s7353_s15 + $0x1300] sm:$0xff] }
  0x66   : > { %650 = vst [vmem:[%s7358_s16 + $0x4b0] sm:$0xff] %v649_v22  ;;  %652 = vst [vmem:[%s7358_s16 + $0x4b8] sm:$0xff] %v651_v23  ;;  %v655_v25 = vld [vmem:[%s7353_s15 + $0x1308] sm:$0xff]  ;;  %v657_v26 = vld [vmem:[%s7353_s15 + $0x1310] sm:$0xff] }
  0x67   : > { %654 = vst [vmem:[%s7358_s16 + $0x4c0] sm:$0xff] %v653_v24  ;;  %v659_v27 = vld [vmem:[%s7353_s15 + $0x1318] sm:$0xff]  ;;  %656 = vst [vmem:[%s7358_s16 + $0x4c8] sm:$0xff] %v655_v25  ;;  %v661_v28 = vld [vmem:[%s7353_s15 + $0x1380] sm:$0xff] }
  0x68   : > { %658 = vst [vmem:[%s7358_s16 + $0x4d0] sm:$0xff] %v657_v26  ;;  %660 = vst [vmem:[%s7358_s16 + $0x4d8] sm:$0xff] %v659_v27  ;;  %v663_v29 = vld [vmem:[%s7353_s15 + $0x1388] sm:$0xff]  ;;  %v665_v30 = vld [vmem:[%s7353_s15 + $0x1390] sm:$0xff] }
  0x69   : > { %662 = vst [vmem:[%s7358_s16 + $0x4e0] sm:$0xff] %v661_v28  ;;  %664 = vst [vmem:[%s7358_s16 + $0x4e8] sm:$0xff] %v663_v29  ;;  %v667_v31 = vld [vmem:[%s7353_s15 + $0x1398] sm:$0xff]  ;;  %v669_v32 = vld [vmem:[%s7353_s15 + $0x1400] sm:$0xff] }
  0x6a   : > { %666 = vst [vmem:[%s7358_s16 + $0x4f0] sm:$0xff] %v665_v30  ;;  %v671_v33 = vld [vmem:[%s7353_s15 + $0x1408] sm:$0xff]  ;;  %668 = vst [vmem:[%s7358_s16 + $0x4f8] sm:$0xff] %v667_v31  ;;  %v673_v34 = vld [vmem:[%s7353_s15 + $0x1410] sm:$0xff] }
  0x6b   : > { %670 = vst [vmem:[%s7358_s16 + $0x500] sm:$0xff] %v669_v32  ;;  %672 = vst [vmem:[%s7358_s16 + $0x508] sm:$0xff] %v671_v33  ;;  %v675_v35 = vld [vmem:[%s7353_s15 + $0x1418] sm:$0xff]  ;;  %v677_v36 = vld [vmem:[%s7353_s15 + $0x1480] sm:$0xff] }
  0x6c   : > { %674 = vst [vmem:[%s7358_s16 + $0x510] sm:$0xff] %v673_v34  ;;  %676 = vst [vmem:[%s7358_s16 + $0x518] sm:$0xff] %v675_v35  ;;  %v679_v37 = vld [vmem:[%s7353_s15 + $0x1488] sm:$0xff]  ;;  %v681_v38 = vld [vmem:[%s7353_s15 + $0x1490] sm:$0xff] }
  0x6d   : > { %678 = vst [vmem:[%s7358_s16 + $0x520] sm:$0xff] %v677_v36  ;;  %v683_v39 = vld [vmem:[%s7353_s15 + $0x1498] sm:$0xff]  ;;  %680 = vst [vmem:[%s7358_s16 + $0x528] sm:$0xff] %v679_v37  ;;  %v685_v40 = vld [vmem:[%s7353_s15 + $0x1500] sm:$0xff] }
  0x6e   : > { %682 = vst [vmem:[%s7358_s16 + $0x530] sm:$0xff] %v681_v38  ;;  %684 = vst [vmem:[%s7358_s16 + $0x538] sm:$0xff] %v683_v39  ;;  %v687_v41 = vld [vmem:[%s7353_s15 + $0x1508] sm:$0xff]  ;;  %v689_v42 = vld [vmem:[%s7353_s15 + $0x1510] sm:$0xff] }
  0x6f   : > { %686 = vst [vmem:[%s7358_s16 + $0x540] sm:$0xff] %v685_v40  ;;  %688 = vst [vmem:[%s7358_s16 + $0x548] sm:$0xff] %v687_v41  ;;  %v691_v43 = vld [vmem:[%s7353_s15 + $0x1518] sm:$0xff]  ;;  %v693_v44 = vld [vmem:[%s7353_s15 + $0x1580] sm:$0xff] }
  0x70   : > { %690 = vst [vmem:[%s7358_s16 + $0x550] sm:$0xff] %v689_v42  ;;  %v695_v45 = vld [vmem:[%s7353_s15 + $0x1588] sm:$0xff]  ;;  %692 = vst [vmem:[%s7358_s16 + $0x558] sm:$0xff] %v691_v43  ;;  %v697_v46 = vld [vmem:[%s7353_s15 + $0x1590] sm:$0xff] }
  0x71   : > { %694 = vst [vmem:[%s7358_s16 + $0x560] sm:$0xff] %v693_v44  ;;  %696 = vst [vmem:[%s7358_s16 + $0x568] sm:$0xff] %v695_v45  ;;  %v699_v47 = vld [vmem:[%s7353_s15 + $0x1598] sm:$0xff]  ;;  %v701_v48 = vld [vmem:[%s7353_s15 + $0x1600] sm:$0xff] }
  0x72   : > { %698 = vst [vmem:[%s7358_s16 + $0x570] sm:$0xff] %v697_v46  ;;  %700 = vst [vmem:[%s7358_s16 + $0x578] sm:$0xff] %v699_v47  ;;  %v703_v49 = vld [vmem:[%s7353_s15 + $0x1608] sm:$0xff]  ;;  %v705_v50 = vld [vmem:[%s7353_s15 + $0x1610] sm:$0xff] }
  0x73   : > { %702 = vst [vmem:[%s7358_s16 + $0x580] sm:$0xff] %v701_v48  ;;  %v707_v51 = vld [vmem:[%s7353_s15 + $0x1618] sm:$0xff]  ;;  %704 = vst [vmem:[%s7358_s16 + $0x588] sm:$0xff] %v703_v49  ;;  %v709_v52 = vld [vmem:[%s7353_s15 + $0x1680] sm:$0xff] }
  0x74   : > { %706 = vst [vmem:[%s7358_s16 + $0x590] sm:$0xff] %v705_v50  ;;  %708 = vst [vmem:[%s7358_s16 + $0x598] sm:$0xff] %v707_v51  ;;  %v711_v53 = vld [vmem:[%s7353_s15 + $0x1688] sm:$0xff]  ;;  %v713_v54 = vld [vmem:[%s7353_s15 + $0x1690] sm:$0xff] }
  0x75   : > { %710 = vst [vmem:[%s7358_s16 + $0x5a0] sm:$0xff] %v709_v52  ;;  %712 = vst [vmem:[%s7358_s16 + $0x5a8] sm:$0xff] %v711_v53  ;;  %v715_v55 = vld [vmem:[%s7353_s15 + $0x1698] sm:$0xff]  ;;  %v717_v56 = vld [vmem:[%s7353_s15 + $0x1700] sm:$0xff] }
  0x76   : > { %714 = vst [vmem:[%s7358_s16 + $0x5b0] sm:$0xff] %v713_v54  ;;  %v719_v57 = vld [vmem:[%s7353_s15 + $0x1708] sm:$0xff]  ;;  %716 = vst [vmem:[%s7358_s16 + $0x5b8] sm:$0xff] %v715_v55  ;;  %v721_v58 = vld [vmem:[%s7353_s15 + $0x1710] sm:$0xff] }
  0x77   : > { %718 = vst [vmem:[%s7358_s16 + $0x5c0] sm:$0xff] %v717_v56  ;;  %720 = vst [vmem:[%s7358_s16 + $0x5c8] sm:$0xff] %v719_v57  ;;  %v723_v59 = vld [vmem:[%s7353_s15 + $0x1718] sm:$0xff]  ;;  %v725_v60 = vld [vmem:[%s7353_s15 + $0x1780] sm:$0xff] }
  0x78   : > { %722 = vst [vmem:[%s7358_s16 + $0x5d0] sm:$0xff] %v721_v58  ;;  %724 = vst [vmem:[%s7358_s16 + $0x5d8] sm:$0xff] %v723_v59  ;;  %v727_v61 = vld [vmem:[%s7353_s15 + $0x1788] sm:$0xff]  ;;  %v729_v62 = vld [vmem:[%s7353_s15 + $0x1790] sm:$0xff] }
  0x79   : > { %726 = vst [vmem:[%s7358_s16 + $0x5e0] sm:$0xff] %v725_v60  ;;  %v731_v63 = vld [vmem:[%s7353_s15 + $0x1798] sm:$0xff]  ;;  %728 = vst [vmem:[%s7358_s16 + $0x5e8] sm:$0xff] %v727_v61  ;;  %v733_v0 = vld [vmem:[%s7353_s15 + $0x1800] sm:$0xff] }
  0x7a   : > { %730 = vst [vmem:[%s7358_s16 + $0x5f0] sm:$0xff] %v729_v62  ;;  %732 = vst [vmem:[%s7358_s16 + $0x5f8] sm:$0xff] %v731_v63  ;;  %v735_v1 = vld [vmem:[%s7353_s15 + $0x1808] sm:$0xff]  ;;  %v737_v2 = vld [vmem:[%s7353_s15 + $0x1810] sm:$0xff] }
  0x7b   : > { %734 = vst [vmem:[%s7358_s16 + $0x600] sm:$0xff] %v733_v0  ;;  %736 = vst [vmem:[%s7358_s16 + $0x608] sm:$0xff] %v735_v1  ;;  %v739_v3 = vld [vmem:[%s7353_s15 + $0x1818] sm:$0xff]  ;;  %v741_v4 = vld [vmem:[%s7353_s15 + $0x1880] sm:$0xff] }
  0x7c   : > { %738 = vst [vmem:[%s7358_s16 + $0x610] sm:$0xff] %v737_v2  ;;  %v743_v5 = vld [vmem:[%s7353_s15 + $0x1888] sm:$0xff]  ;;  %740 = vst [vmem:[%s7358_s16 + $0x618] sm:$0xff] %v739_v3  ;;  %v745_v6 = vld [vmem:[%s7353_s15 + $0x1890] sm:$0xff] }
  0x7d   : > { %742 = vst [vmem:[%s7358_s16 + $0x620] sm:$0xff] %v741_v4  ;;  %744 = vst [vmem:[%s7358_s16 + $0x628] sm:$0xff] %v743_v5  ;;  %v747_v7 = vld [vmem:[%s7353_s15 + $0x1898] sm:$0xff]  ;;  %v749_v8 = vld [vmem:[%s7353_s15 + $0x1900] sm:$0xff] }
  0x7e   : > { %746 = vst [vmem:[%s7358_s16 + $0x630] sm:$0xff] %v745_v6  ;;  %748 = vst [vmem:[%s7358_s16 + $0x638] sm:$0xff] %v747_v7  ;;  %v751_v9 = vld [vmem:[%s7353_s15 + $0x1908] sm:$0xff]  ;;  %v753_v10 = vld [vmem:[%s7353_s15 + $0x1910] sm:$0xff] }
  0x7f   : > { %750 = vst [vmem:[%s7358_s16 + $0x640] sm:$0xff] %v749_v8  ;;  %v755_v11 = vld [vmem:[%s7353_s15 + $0x1918] sm:$0xff]  ;;  %752 = vst [vmem:[%s7358_s16 + $0x648] sm:$0xff] %v751_v9  ;;  %v757_v12 = vld [vmem:[%s7353_s15 + $0x1980] sm:$0xff] }
  0x80   : > { %754 = vst [vmem:[%s7358_s16 + $0x650] sm:$0xff] %v753_v10  ;;  %756 = vst [vmem:[%s7358_s16 + $0x658] sm:$0xff] %v755_v11  ;;  %v759_v13 = vld [vmem:[%s7353_s15 + $0x1988] sm:$0xff]  ;;  %v761_v14 = vld [vmem:[%s7353_s15 + $0x1990] sm:$0xff] }
  0x81   : > { %758 = vst [vmem:[%s7358_s16 + $0x660] sm:$0xff] %v757_v12  ;;  %760 = vst [vmem:[%s7358_s16 + $0x668] sm:$0xff] %v759_v13  ;;  %v763_v15 = vld [vmem:[%s7353_s15 + $0x1998] sm:$0xff]  ;;  %v765_v16 = vld [vmem:[%s7353_s15 + $0x1a00] sm:$0xff] }
  0x82   : > { %762 = vst [vmem:[%s7358_s16 + $0x670] sm:$0xff] %v761_v14  ;;  %v767_v17 = vld [vmem:[%s7353_s15 + $0x1a08] sm:$0xff]  ;;  %764 = vst [vmem:[%s7358_s16 + $0x678] sm:$0xff] %v763_v15  ;;  %v769_v18 = vld [vmem:[%s7353_s15 + $0x1a10] sm:$0xff] }
  0x83   : > { %766 = vst [vmem:[%s7358_s16 + $0x680] sm:$0xff] %v765_v16  ;;  %768 = vst [vmem:[%s7358_s16 + $0x688] sm:$0xff] %v767_v17  ;;  %v771_v19 = vld [vmem:[%s7353_s15 + $0x1a18] sm:$0xff]  ;;  %v773_v20 = vld [vmem:[%s7353_s15 + $0x1a80] sm:$0xff] }
  0x84   : > { %770 = vst [vmem:[%s7358_s16 + $0x690] sm:$0xff] %v769_v18  ;;  %772 = vst [vmem:[%s7358_s16 + $0x698] sm:$0xff] %v771_v19  ;;  %v775_v21 = vld [vmem:[%s7353_s15 + $0x1a88] sm:$0xff]  ;;  %v777_v22 = vld [vmem:[%s7353_s15 + $0x1a90] sm:$0xff] }
  0x85   : > { %774 = vst [vmem:[%s7358_s16 + $0x6a0] sm:$0xff] %v773_v20  ;;  %v779_v23 = vld [vmem:[%s7353_s15 + $0x1a98] sm:$0xff]  ;;  %776 = vst [vmem:[%s7358_s16 + $0x6a8] sm:$0xff] %v775_v21  ;;  %v781_v24 = vld [vmem:[%s7353_s15 + $0x1b00] sm:$0xff] }
  0x86   : > { %778 = vst [vmem:[%s7358_s16 + $0x6b0] sm:$0xff] %v777_v22  ;;  %780 = vst [vmem:[%s7358_s16 + $0x6b8] sm:$0xff] %v779_v23  ;;  %v783_v25 = vld [vmem:[%s7353_s15 + $0x1b08] sm:$0xff]  ;;  %v785_v26 = vld [vmem:[%s7353_s15 + $0x1b10] sm:$0xff] }
  0x87   : > { %782 = vst [vmem:[%s7358_s16 + $0x6c0] sm:$0xff] %v781_v24  ;;  %784 = vst [vmem:[%s7358_s16 + $0x6c8] sm:$0xff] %v783_v25  ;;  %v787_v27 = vld [vmem:[%s7353_s15 + $0x1b18] sm:$0xff]  ;;  %v789_v28 = vld [vmem:[%s7353_s15 + $0x1b80] sm:$0xff] }
  0x88   : > { %786 = vst [vmem:[%s7358_s16 + $0x6d0] sm:$0xff] %v785_v26  ;;  %v791_v29 = vld [vmem:[%s7353_s15 + $0x1b88] sm:$0xff]  ;;  %788 = vst [vmem:[%s7358_s16 + $0x6d8] sm:$0xff] %v787_v27  ;;  %v793_v30 = vld [vmem:[%s7353_s15 + $0x1b90] sm:$0xff] }
  0x89   : > { %790 = vst [vmem:[%s7358_s16 + $0x6e0] sm:$0xff] %v789_v28  ;;  %792 = vst [vmem:[%s7358_s16 + $0x6e8] sm:$0xff] %v791_v29  ;;  %v795_v31 = vld [vmem:[%s7353_s15 + $0x1b98] sm:$0xff]  ;;  %v797_v32 = vld [vmem:[%s7353_s15 + $0x1c00] sm:$0xff] }
  0x8a   : > { %794 = vst [vmem:[%s7358_s16 + $0x6f0] sm:$0xff] %v793_v30  ;;  %796 = vst [vmem:[%s7358_s16 + $0x6f8] sm:$0xff] %v795_v31  ;;  %v799_v33 = vld [vmem:[%s7353_s15 + $0x1c08] sm:$0xff]  ;;  %v801_v34 = vld [vmem:[%s7353_s15 + $0x1c10] sm:$0xff] }
  0x8b   : > { %798 = vst [vmem:[%s7358_s16 + $0x700] sm:$0xff] %v797_v32  ;;  %v803_v35 = vld [vmem:[%s7353_s15 + $0x1c18] sm:$0xff]  ;;  %800 = vst [vmem:[%s7358_s16 + $0x708] sm:$0xff] %v799_v33  ;;  %v805_v36 = vld [vmem:[%s7353_s15 + $0x1c80] sm:$0xff] }
  0x8c   : > { %802 = vst [vmem:[%s7358_s16 + $0x710] sm:$0xff] %v801_v34  ;;  %804 = vst [vmem:[%s7358_s16 + $0x718] sm:$0xff] %v803_v35  ;;  %v807_v37 = vld [vmem:[%s7353_s15 + $0x1c88] sm:$0xff]  ;;  %v809_v38 = vld [vmem:[%s7353_s15 + $0x1c90] sm:$0xff] }
  0x8d   : > { %806 = vst [vmem:[%s7358_s16 + $0x720] sm:$0xff] %v805_v36  ;;  %808 = vst [vmem:[%s7358_s16 + $0x728] sm:$0xff] %v807_v37  ;;  %v811_v39 = vld [vmem:[%s7353_s15 + $0x1c98] sm:$0xff]  ;;  %v813_v40 = vld [vmem:[%s7353_s15 + $0x1d00] sm:$0xff] }
  0x8e   : > { %810 = vst [vmem:[%s7358_s16 + $0x730] sm:$0xff] %v809_v38  ;;  %v815_v41 = vld [vmem:[%s7353_s15 + $0x1d08] sm:$0xff]  ;;  %812 = vst [vmem:[%s7358_s16 + $0x738] sm:$0xff] %v811_v39  ;;  %v817_v42 = vld [vmem:[%s7353_s15 + $0x1d10] sm:$0xff] }
  0x8f   : > { %814 = vst [vmem:[%s7358_s16 + $0x740] sm:$0xff] %v813_v40  ;;  %816 = vst [vmem:[%s7358_s16 + $0x748] sm:$0xff] %v815_v41  ;;  %v819_v43 = vld [vmem:[%s7353_s15 + $0x1d18] sm:$0xff]  ;;  %v821_v44 = vld [vmem:[%s7353_s15 + $0x1d80] sm:$0xff] }
  0x90   : > { %818 = vst [vmem:[%s7358_s16 + $0x750] sm:$0xff] %v817_v42  ;;  %820 = vst [vmem:[%s7358_s16 + $0x758] sm:$0xff] %v819_v43  ;;  %v823_v45 = vld [vmem:[%s7353_s15 + $0x1d88] sm:$0xff]  ;;  %v825_v46 = vld [vmem:[%s7353_s15 + $0x1d90] sm:$0xff] }
  0x91   : > { %822 = vst [vmem:[%s7358_s16 + $0x760] sm:$0xff] %v821_v44  ;;  %v827_v47 = vld [vmem:[%s7353_s15 + $0x1d98] sm:$0xff]  ;;  %824 = vst [vmem:[%s7358_s16 + $0x768] sm:$0xff] %v823_v45  ;;  %v829_v48 = vld [vmem:[%s7353_s15 + $0x1e00] sm:$0xff] }
  0x92   : > { %826 = vst [vmem:[%s7358_s16 + $0x770] sm:$0xff] %v825_v46  ;;  %828 = vst [vmem:[%s7358_s16 + $0x778] sm:$0xff] %v827_v47  ;;  %v831_v49 = vld [vmem:[%s7353_s15 + $0x1e08] sm:$0xff]  ;;  %v833_v50 = vld [vmem:[%s7353_s15 + $0x1e10] sm:$0xff] }
  0x93   : > { %830 = vst [vmem:[%s7358_s16 + $0x780] sm:$0xff] %v829_v48  ;;  %832 = vst [vmem:[%s7358_s16 + $0x788] sm:$0xff] %v831_v49  ;;  %v835_v51 = vld [vmem:[%s7353_s15 + $0x1e18] sm:$0xff]  ;;  %v837_v52 = vld [vmem:[%s7353_s15 + $0x1e80] sm:$0xff] }
  0x94   : > { %834 = vst [vmem:[%s7358_s16 + $0x790] sm:$0xff] %v833_v50  ;;  %v839_v53 = vld [vmem:[%s7353_s15 + $0x1e88] sm:$0xff]  ;;  %836 = vst [vmem:[%s7358_s16 + $0x798] sm:$0xff] %v835_v51  ;;  %v841_v54 = vld [vmem:[%s7353_s15 + $0x1e90] sm:$0xff] }
  0x95   : > { %838 = vst [vmem:[%s7358_s16 + $0x7a0] sm:$0xff] %v837_v52  ;;  %840 = vst [vmem:[%s7358_s16 + $0x7a8] sm:$0xff] %v839_v53  ;;  %v843_v55 = vld [vmem:[%s7353_s15 + $0x1e98] sm:$0xff]  ;;  %v845_v56 = vld [vmem:[%s7353_s15 + $0x1f00] sm:$0xff] }
  0x96   : > { %842 = vst [vmem:[%s7358_s16 + $0x7b0] sm:$0xff] %v841_v54  ;;  %844 = vst [vmem:[%s7358_s16 + $0x7b8] sm:$0xff] %v843_v55  ;;  %v847_v57 = vld [vmem:[%s7353_s15 + $0x1f08] sm:$0xff]  ;;  %v849_v58 = vld [vmem:[%s7353_s15 + $0x1f10] sm:$0xff] }
  0x97   : > { %846 = vst [vmem:[%s7358_s16 + $0x7c0] sm:$0xff] %v845_v56  ;;  %v851_v59 = vld [vmem:[%s7353_s15 + $0x1f18] sm:$0xff]  ;;  %848 = vst [vmem:[%s7358_s16 + $0x7c8] sm:$0xff] %v847_v57  ;;  %v853_v60 = vld [vmem:[%s7353_s15 + $0x1f80] sm:$0xff] }
  0x98   : > { %850 = vst [vmem:[%s7358_s16 + $0x7d0] sm:$0xff] %v849_v58  ;;  %852 = vst [vmem:[%s7358_s16 + $0x7d8] sm:$0xff] %v851_v59  ;;  %v855_v61 = vld [vmem:[%s7353_s15 + $0x1f88] sm:$0xff]  ;;  %v857_v62 = vld [vmem:[%s7353_s15 + $0x1f90] sm:$0xff] }
  0x99   : > { %854 = vst [vmem:[%s7358_s16 + $0x7e0] sm:$0xff] %v853_v60  ;;  %856 = vst [vmem:[%s7358_s16 + $0x7e8] sm:$0xff] %v855_v61  ;;  %v859_v63 = vld [vmem:[%s7353_s15 + $0x1f98] sm:$0xff]  ;;  %v861_v0 = vld [vmem:[%s7353_s15 + $0x2000] sm:$0xff] }
  0x9a   : > { %858 = vst [vmem:[%s7358_s16 + $0x7f0] sm:$0xff] %v857_v62  ;;  %v863_v1 = vld [vmem:[%s7353_s15 + $0x2008] sm:$0xff]  ;;  %860 = vst [vmem:[%s7358_s16 + $0x7f8] sm:$0xff] %v859_v63  ;;  %v865_v2 = vld [vmem:[%s7353_s15 + $0x2010] sm:$0xff] }
  0x9b   : > { %862 = vst [vmem:[%s7358_s16 + $0x800] sm:$0xff] %v861_v0  ;;  %864 = vst [vmem:[%s7358_s16 + $0x808] sm:$0xff] %v863_v1  ;;  %v867_v3 = vld [vmem:[%s7353_s15 + $0x2018] sm:$0xff]  ;;  %v869_v4 = vld [vmem:[%s7353_s15 + $0x2080] sm:$0xff] }
  0x9c   : > { %866 = vst [vmem:[%s7358_s16 + $0x810] sm:$0xff] %v865_v2  ;;  %868 = vst [vmem:[%s7358_s16 + $0x818] sm:$0xff] %v867_v3  ;;  %v871_v5 = vld [vmem:[%s7353_s15 + $0x2088] sm:$0xff]  ;;  %v873_v6 = vld [vmem:[%s7353_s15 + $0x2090] sm:$0xff] }
  0x9d   : > { %870 = vst [vmem:[%s7358_s16 + $0x820] sm:$0xff] %v869_v4  ;;  %v875_v7 = vld [vmem:[%s7353_s15 + $0x2098] sm:$0xff]  ;;  %872 = vst [vmem:[%s7358_s16 + $0x828] sm:$0xff] %v871_v5  ;;  %v877_v8 = vld [vmem:[%s7353_s15 + $0x2100] sm:$0xff] }
  0x9e   : > { %874 = vst [vmem:[%s7358_s16 + $0x830] sm:$0xff] %v873_v6  ;;  %876 = vst [vmem:[%s7358_s16 + $0x838] sm:$0xff] %v875_v7  ;;  %v879_v9 = vld [vmem:[%s7353_s15 + $0x2108] sm:$0xff]  ;;  %v881_v10 = vld [vmem:[%s7353_s15 + $0x2110] sm:$0xff] }
  0x9f   : > { %878 = vst [vmem:[%s7358_s16 + $0x840] sm:$0xff] %v877_v8  ;;  %880 = vst [vmem:[%s7358_s16 + $0x848] sm:$0xff] %v879_v9  ;;  %v883_v11 = vld [vmem:[%s7353_s15 + $0x2118] sm:$0xff]  ;;  %v885_v12 = vld [vmem:[%s7353_s15 + $0x2180] sm:$0xff] }
  0xa0   : > { %882 = vst [vmem:[%s7358_s16 + $0x850] sm:$0xff] %v881_v10  ;;  %v887_v13 = vld [vmem:[%s7353_s15 + $0x2188] sm:$0xff]  ;;  %884 = vst [vmem:[%s7358_s16 + $0x858] sm:$0xff] %v883_v11  ;;  %v889_v14 = vld [vmem:[%s7353_s15 + $0x2190] sm:$0xff] }
  0xa1   : > { %886 = vst [vmem:[%s7358_s16 + $0x860] sm:$0xff] %v885_v12  ;;  %888 = vst [vmem:[%s7358_s16 + $0x868] sm:$0xff] %v887_v13  ;;  %v891_v15 = vld [vmem:[%s7353_s15 + $0x2198] sm:$0xff]  ;;  %v893_v16 = vld [vmem:[%s7353_s15 + $0x2200] sm:$0xff] }
  0xa2   : > { %890 = vst [vmem:[%s7358_s16 + $0x870] sm:$0xff] %v889_v14  ;;  %892 = vst [vmem:[%s7358_s16 + $0x878] sm:$0xff] %v891_v15  ;;  %v895_v17 = vld [vmem:[%s7353_s15 + $0x2208] sm:$0xff]  ;;  %v897_v18 = vld [vmem:[%s7353_s15 + $0x2210] sm:$0xff] }
  0xa3   : > { %894 = vst [vmem:[%s7358_s16 + $0x880] sm:$0xff] %v893_v16  ;;  %v899_v19 = vld [vmem:[%s7353_s15 + $0x2218] sm:$0xff]  ;;  %896 = vst [vmem:[%s7358_s16 + $0x888] sm:$0xff] %v895_v17  ;;  %v901_v20 = vld [vmem:[%s7353_s15 + $0x2280] sm:$0xff] }
  0xa4   : > { %898 = vst [vmem:[%s7358_s16 + $0x890] sm:$0xff] %v897_v18  ;;  %900 = vst [vmem:[%s7358_s16 + $0x898] sm:$0xff] %v899_v19  ;;  %v903_v21 = vld [vmem:[%s7353_s15 + $0x2288] sm:$0xff]  ;;  %v905_v22 = vld [vmem:[%s7353_s15 + $0x2290] sm:$0xff] }
  0xa5   : > { %902 = vst [vmem:[%s7358_s16 + $0x8a0] sm:$0xff] %v901_v20  ;;  %904 = vst [vmem:[%s7358_s16 + $0x8a8] sm:$0xff] %v903_v21  ;;  %v907_v23 = vld [vmem:[%s7353_s15 + $0x2298] sm:$0xff]  ;;  %v909_v24 = vld [vmem:[%s7353_s15 + $0x2300] sm:$0xff] }
  0xa6   : > { %906 = vst [vmem:[%s7358_s16 + $0x8b0] sm:$0xff] %v905_v22  ;;  %v911_v25 = vld [vmem:[%s7353_s15 + $0x2308] sm:$0xff]  ;;  %908 = vst [vmem:[%s7358_s16 + $0x8b8] sm:$0xff] %v907_v23  ;;  %v913_v26 = vld [vmem:[%s7353_s15 + $0x2310] sm:$0xff] }
  0xa7   : > { %910 = vst [vmem:[%s7358_s16 + $0x8c0] sm:$0xff] %v909_v24  ;;  %912 = vst [vmem:[%s7358_s16 + $0x8c8] sm:$0xff] %v911_v25  ;;  %v915_v27 = vld [vmem:[%s7353_s15 + $0x2318] sm:$0xff]  ;;  %v917_v28 = vld [vmem:[%s7353_s15 + $0x2380] sm:$0xff] }
  0xa8   : > { %914 = vst [vmem:[%s7358_s16 + $0x8d0] sm:$0xff] %v913_v26  ;;  %916 = vst [vmem:[%s7358_s16 + $0x8d8] sm:$0xff] %v915_v27  ;;  %v919_v29 = vld [vmem:[%s7353_s15 + $0x2388] sm:$0xff]  ;;  %v921_v30 = vld [vmem:[%s7353_s15 + $0x2390] sm:$0xff] }
  0xa9   : > { %918 = vst [vmem:[%s7358_s16 + $0x8e0] sm:$0xff] %v917_v28  ;;  %v923_v31 = vld [vmem:[%s7353_s15 + $0x2398] sm:$0xff]  ;;  %920 = vst [vmem:[%s7358_s16 + $0x8e8] sm:$0xff] %v919_v29  ;;  %v925_v32 = vld [vmem:[%s7353_s15 + $0x2400] sm:$0xff] }
  0xaa   : > { %922 = vst [vmem:[%s7358_s16 + $0x8f0] sm:$0xff] %v921_v30  ;;  %924 = vst [vmem:[%s7358_s16 + $0x8f8] sm:$0xff] %v923_v31  ;;  %v927_v33 = vld [vmem:[%s7353_s15 + $0x2408] sm:$0xff]  ;;  %v929_v34 = vld [vmem:[%s7353_s15 + $0x2410] sm:$0xff] }
  0xab   : > { %926 = vst [vmem:[%s7358_s16 + $0x900] sm:$0xff] %v925_v32  ;;  %928 = vst [vmem:[%s7358_s16 + $0x908] sm:$0xff] %v927_v33  ;;  %v931_v35 = vld [vmem:[%s7353_s15 + $0x2418] sm:$0xff]  ;;  %v933_v36 = vld [vmem:[%s7353_s15 + $0x2480] sm:$0xff] }
  0xac   : > { %930 = vst [vmem:[%s7358_s16 + $0x910] sm:$0xff] %v929_v34  ;;  %v935_v37 = vld [vmem:[%s7353_s15 + $0x2488] sm:$0xff]  ;;  %932 = vst [vmem:[%s7358_s16 + $0x918] sm:$0xff] %v931_v35  ;;  %v937_v38 = vld [vmem:[%s7353_s15 + $0x2490] sm:$0xff] }
  0xad   : > { %934 = vst [vmem:[%s7358_s16 + $0x920] sm:$0xff] %v933_v36  ;;  %936 = vst [vmem:[%s7358_s16 + $0x928] sm:$0xff] %v935_v37  ;;  %v939_v39 = vld [vmem:[%s7353_s15 + $0x2498] sm:$0xff]  ;;  %v941_v40 = vld [vmem:[%s7353_s15 + $0x2500] sm:$0xff] }
  0xae   : > { %938 = vst [vmem:[%s7358_s16 + $0x930] sm:$0xff] %v937_v38  ;;  %940 = vst [vmem:[%s7358_s16 + $0x938] sm:$0xff] %v939_v39  ;;  %v943_v41 = vld [vmem:[%s7353_s15 + $0x2508] sm:$0xff]  ;;  %v945_v42 = vld [vmem:[%s7353_s15 + $0x2510] sm:$0xff] }
  0xaf   : > { %942 = vst [vmem:[%s7358_s16 + $0x940] sm:$0xff] %v941_v40  ;;  %v947_v43 = vld [vmem:[%s7353_s15 + $0x2518] sm:$0xff]  ;;  %944 = vst [vmem:[%s7358_s16 + $0x948] sm:$0xff] %v943_v41  ;;  %v949_v44 = vld [vmem:[%s7353_s15 + $0x2580] sm:$0xff] }
  0xb0   : > { %946 = vst [vmem:[%s7358_s16 + $0x950] sm:$0xff] %v945_v42  ;;  %948 = vst [vmem:[%s7358_s16 + $0x958] sm:$0xff] %v947_v43  ;;  %v951_v45 = vld [vmem:[%s7353_s15 + $0x2588] sm:$0xff]  ;;  %v953_v46 = vld [vmem:[%s7353_s15 + $0x2590] sm:$0xff] }
  0xb1   : > { %950 = vst [vmem:[%s7358_s16 + $0x960] sm:$0xff] %v949_v44  ;;  %952 = vst [vmem:[%s7358_s16 + $0x968] sm:$0xff] %v951_v45  ;;  %v955_v47 = vld [vmem:[%s7353_s15 + $0x2598] sm:$0xff]  ;;  %v957_v48 = vld [vmem:[%s7353_s15 + $0x2600] sm:$0xff] }
  0xb2   : > { %954 = vst [vmem:[%s7358_s16 + $0x970] sm:$0xff] %v953_v46  ;;  %v959_v49 = vld [vmem:[%s7353_s15 + $0x2608] sm:$0xff]  ;;  %956 = vst [vmem:[%s7358_s16 + $0x978] sm:$0xff] %v955_v47  ;;  %v961_v50 = vld [vmem:[%s7353_s15 + $0x2610] sm:$0xff] }
  0xb3   : > { %958 = vst [vmem:[%s7358_s16 + $0x980] sm:$0xff] %v957_v48  ;;  %960 = vst [vmem:[%s7358_s16 + $0x988] sm:$0xff] %v959_v49  ;;  %v963_v51 = vld [vmem:[%s7353_s15 + $0x2618] sm:$0xff]  ;;  %v965_v52 = vld [vmem:[%s7353_s15 + $0x2680] sm:$0xff] }
  0xb4   : > { %962 = vst [vmem:[%s7358_s16 + $0x990] sm:$0xff] %v961_v50  ;;  %964 = vst [vmem:[%s7358_s16 + $0x998] sm:$0xff] %v963_v51  ;;  %v967_v53 = vld [vmem:[%s7353_s15 + $0x2688] sm:$0xff]  ;;  %v969_v54 = vld [vmem:[%s7353_s15 + $0x2690] sm:$0xff] }
  0xb5   : > { %966 = vst [vmem:[%s7358_s16 + $0x9a0] sm:$0xff] %v965_v52  ;;  %v971_v55 = vld [vmem:[%s7353_s15 + $0x2698] sm:$0xff]  ;;  %968 = vst [vmem:[%s7358_s16 + $0x9a8] sm:$0xff] %v967_v53  ;;  %v973_v56 = vld [vmem:[%s7353_s15 + $0x2700] sm:$0xff] }
  0xb6   : > { %970 = vst [vmem:[%s7358_s16 + $0x9b0] sm:$0xff] %v969_v54  ;;  %972 = vst [vmem:[%s7358_s16 + $0x9b8] sm:$0xff] %v971_v55  ;;  %v975_v57 = vld [vmem:[%s7353_s15 + $0x2708] sm:$0xff]  ;;  %v977_v58 = vld [vmem:[%s7353_s15 + $0x2710] sm:$0xff] }
  0xb7   : > { %974 = vst [vmem:[%s7358_s16 + $0x9c0] sm:$0xff] %v973_v56  ;;  %976 = vst [vmem:[%s7358_s16 + $0x9c8] sm:$0xff] %v975_v57  ;;  %v979_v59 = vld [vmem:[%s7353_s15 + $0x2718] sm:$0xff]  ;;  %v981_v60 = vld [vmem:[%s7353_s15 + $0x2780] sm:$0xff] }
  0xb8   : > { %978 = vst [vmem:[%s7358_s16 + $0x9d0] sm:$0xff] %v977_v58  ;;  %v983_v61 = vld [vmem:[%s7353_s15 + $0x2788] sm:$0xff]  ;;  %980 = vst [vmem:[%s7358_s16 + $0x9d8] sm:$0xff] %v979_v59  ;;  %v985_v62 = vld [vmem:[%s7353_s15 + $0x2790] sm:$0xff] }
  0xb9   : > { %982 = vst [vmem:[%s7358_s16 + $0x9e0] sm:$0xff] %v981_v60  ;;  %984 = vst [vmem:[%s7358_s16 + $0x9e8] sm:$0xff] %v983_v61  ;;  %v987_v63 = vld [vmem:[%s7353_s15 + $0x2798] sm:$0xff]  ;;  %v989_v0 = vld [vmem:[%s7353_s15 + $0x2800] sm:$0xff] }
  0xba   : > { %986 = vst [vmem:[%s7358_s16 + $0x9f0] sm:$0xff] %v985_v62  ;;  %988 = vst [vmem:[%s7358_s16 + $0x9f8] sm:$0xff] %v987_v63  ;;  %v991_v1 = vld [vmem:[%s7353_s15 + $0x2808] sm:$0xff]  ;;  %v993_v2 = vld [vmem:[%s7353_s15 + $0x2810] sm:$0xff] }
  0xbb   : > { %990 = vst [vmem:[%s7358_s16 + $0xa00] sm:$0xff] %v989_v0  ;;  %v995_v3 = vld [vmem:[%s7353_s15 + $0x2818] sm:$0xff]  ;;  %992 = vst [vmem:[%s7358_s16 + $0xa08] sm:$0xff] %v991_v1  ;;  %v997_v4 = vld [vmem:[%s7353_s15 + $0x2880] sm:$0xff] }
  0xbc   : > { %994 = vst [vmem:[%s7358_s16 + $0xa10] sm:$0xff] %v993_v2  ;;  %996 = vst [vmem:[%s7358_s16 + $0xa18] sm:$0xff] %v995_v3  ;;  %v999_v5 = vld [vmem:[%s7353_s15 + $0x2888] sm:$0xff]  ;;  %v1001_v6 = vld [vmem:[%s7353_s15 + $0x2890] sm:$0xff] }
  0xbd   : > { %998 = vst [vmem:[%s7358_s16 + $0xa20] sm:$0xff] %v997_v4  ;;  %1000 = vst [vmem:[%s7358_s16 + $0xa28] sm:$0xff] %v999_v5  ;;  %v1003_v7 = vld [vmem:[%s7353_s15 + $0x2898] sm:$0xff]  ;;  %v1005_v8 = vld [vmem:[%s7353_s15 + $0x2900] sm:$0xff] }
  0xbe   : > { %1002 = vst [vmem:[%s7358_s16 + $0xa30] sm:$0xff] %v1001_v6  ;;  %v1007_v9 = vld [vmem:[%s7353_s15 + $0x2908] sm:$0xff]  ;;  %1004 = vst [vmem:[%s7358_s16 + $0xa38] sm:$0xff] %v1003_v7  ;;  %v1009_v10 = vld [vmem:[%s7353_s15 + $0x2910] sm:$0xff] }
  0xbf   : > { %1006 = vst [vmem:[%s7358_s16 + $0xa40] sm:$0xff] %v1005_v8  ;;  %1008 = vst [vmem:[%s7358_s16 + $0xa48] sm:$0xff] %v1007_v9  ;;  %v1011_v11 = vld [vmem:[%s7353_s15 + $0x2918] sm:$0xff]  ;;  %v1013_v12 = vld [vmem:[%s7353_s15 + $0x2980] sm:$0xff] }
  0xc0   : > { %1010 = vst [vmem:[%s7358_s16 + $0xa50] sm:$0xff] %v1009_v10  ;;  %1012 = vst [vmem:[%s7358_s16 + $0xa58] sm:$0xff] %v1011_v11  ;;  %v1015_v13 = vld [vmem:[%s7353_s15 + $0x2988] sm:$0xff]  ;;  %v1017_v14 = vld [vmem:[%s7353_s15 + $0x2990] sm:$0xff] }
  0xc1   : > { %1014 = vst [vmem:[%s7358_s16 + $0xa60] sm:$0xff] %v1013_v12  ;;  %v1019_v15 = vld [vmem:[%s7353_s15 + $0x2998] sm:$0xff]  ;;  %1016 = vst [vmem:[%s7358_s16 + $0xa68] sm:$0xff] %v1015_v13  ;;  %v1021_v16 = vld [vmem:[%s7353_s15 + $0x2a00] sm:$0xff] }
  0xc2   : > { %1018 = vst [vmem:[%s7358_s16 + $0xa70] sm:$0xff] %v1017_v14  ;;  %1020 = vst [vmem:[%s7358_s16 + $0xa78] sm:$0xff] %v1019_v15  ;;  %v1023_v17 = vld [vmem:[%s7353_s15 + $0x2a08] sm:$0xff]  ;;  %v1025_v18 = vld [vmem:[%s7353_s15 + $0x2a10] sm:$0xff] }
  0xc3   : > { %1022 = vst [vmem:[%s7358_s16 + $0xa80] sm:$0xff] %v1021_v16  ;;  %1024 = vst [vmem:[%s7358_s16 + $0xa88] sm:$0xff] %v1023_v17  ;;  %v1027_v19 = vld [vmem:[%s7353_s15 + $0x2a18] sm:$0xff]  ;;  %v1029_v20 = vld [vmem:[%s7353_s15 + $0x2a80] sm:$0xff] }
  0xc4   : > { %1026 = vst [vmem:[%s7358_s16 + $0xa90] sm:$0xff] %v1025_v18  ;;  %v1031_v21 = vld [vmem:[%s7353_s15 + $0x2a88] sm:$0xff]  ;;  %1028 = vst [vmem:[%s7358_s16 + $0xa98] sm:$0xff] %v1027_v19  ;;  %v1033_v22 = vld [vmem:[%s7353_s15 + $0x2a90] sm:$0xff] }
  0xc5   : > { %1030 = vst [vmem:[%s7358_s16 + $0xaa0] sm:$0xff] %v1029_v20  ;;  %1032 = vst [vmem:[%s7358_s16 + $0xaa8] sm:$0xff] %v1031_v21  ;;  %v1035_v23 = vld [vmem:[%s7353_s15 + $0x2a98] sm:$0xff]  ;;  %v1037_v24 = vld [vmem:[%s7353_s15 + $0x2b00] sm:$0xff] }
  0xc6   : > { %1034 = vst [vmem:[%s7358_s16 + $0xab0] sm:$0xff] %v1033_v22  ;;  %1036 = vst [vmem:[%s7358_s16 + $0xab8] sm:$0xff] %v1035_v23  ;;  %v1039_v25 = vld [vmem:[%s7353_s15 + $0x2b08] sm:$0xff]  ;;  %v1041_v26 = vld [vmem:[%s7353_s15 + $0x2b10] sm:$0xff] }
  0xc7   : > { %1038 = vst [vmem:[%s7358_s16 + $0xac0] sm:$0xff] %v1037_v24  ;;  %v1043_v27 = vld [vmem:[%s7353_s15 + $0x2b18] sm:$0xff]  ;;  %1040 = vst [vmem:[%s7358_s16 + $0xac8] sm:$0xff] %v1039_v25  ;;  %v1045_v28 = vld [vmem:[%s7353_s15 + $0x2b80] sm:$0xff] }
  0xc8   : > { %1042 = vst [vmem:[%s7358_s16 + $0xad0] sm:$0xff] %v1041_v26  ;;  %1044 = vst [vmem:[%s7358_s16 + $0xad8] sm:$0xff] %v1043_v27  ;;  %v1047_v29 = vld [vmem:[%s7353_s15 + $0x2b88] sm:$0xff]  ;;  %v1049_v30 = vld [vmem:[%s7353_s15 + $0x2b90] sm:$0xff] }
  0xc9   : > { %1046 = vst [vmem:[%s7358_s16 + $0xae0] sm:$0xff] %v1045_v28  ;;  %1048 = vst [vmem:[%s7358_s16 + $0xae8] sm:$0xff] %v1047_v29  ;;  %v1051_v31 = vld [vmem:[%s7353_s15 + $0x2b98] sm:$0xff]  ;;  %v1053_v32 = vld [vmem:[%s7353_s15 + $0x2c00] sm:$0xff] }
  0xca   : > { %1050 = vst [vmem:[%s7358_s16 + $0xaf0] sm:$0xff] %v1049_v30  ;;  %v1055_v33 = vld [vmem:[%s7353_s15 + $0x2c08] sm:$0xff]  ;;  %1052 = vst [vmem:[%s7358_s16 + $0xaf8] sm:$0xff] %v1051_v31  ;;  %v1057_v34 = vld [vmem:[%s7353_s15 + $0x2c10] sm:$0xff] }
  0xcb   : > { %1054 = vst [vmem:[%s7358_s16 + $0xb00] sm:$0xff] %v1053_v32  ;;  %1056 = vst [vmem:[%s7358_s16 + $0xb08] sm:$0xff] %v1055_v33  ;;  %v1059_v35 = vld [vmem:[%s7353_s15 + $0x2c18] sm:$0xff]  ;;  %v1061_v36 = vld [vmem:[%s7353_s15 + $0x2c80] sm:$0xff] }
  0xcc   : > { %1058 = vst [vmem:[%s7358_s16 + $0xb10] sm:$0xff] %v1057_v34  ;;  %1060 = vst [vmem:[%s7358_s16 + $0xb18] sm:$0xff] %v1059_v35  ;;  %v1063_v37 = vld [vmem:[%s7353_s15 + $0x2c88] sm:$0xff]  ;;  %v1065_v38 = vld [vmem:[%s7353_s15 + $0x2c90] sm:$0xff] }
  0xcd   : > { %1062 = vst [vmem:[%s7358_s16 + $0xb20] sm:$0xff] %v1061_v36  ;;  %v1067_v39 = vld [vmem:[%s7353_s15 + $0x2c98] sm:$0xff]  ;;  %1064 = vst [vmem:[%s7358_s16 + $0xb28] sm:$0xff] %v1063_v37  ;;  %v1069_v40 = vld [vmem:[%s7353_s15 + $0x2d00] sm:$0xff] }
  0xce   : > { %1066 = vst [vmem:[%s7358_s16 + $0xb30] sm:$0xff] %v1065_v38  ;;  %1068 = vst [vmem:[%s7358_s16 + $0xb38] sm:$0xff] %v1067_v39  ;;  %v1071_v41 = vld [vmem:[%s7353_s15 + $0x2d08] sm:$0xff]  ;;  %v1073_v42 = vld [vmem:[%s7353_s15 + $0x2d10] sm:$0xff] }
  0xcf   : > { %1070 = vst [vmem:[%s7358_s16 + $0xb40] sm:$0xff] %v1069_v40  ;;  %1072 = vst [vmem:[%s7358_s16 + $0xb48] sm:$0xff] %v1071_v41  ;;  %v1075_v43 = vld [vmem:[%s7353_s15 + $0x2d18] sm:$0xff]  ;;  %v1077_v44 = vld [vmem:[%s7353_s15 + $0x2d80] sm:$0xff] }
  0xd0   : > { %1074 = vst [vmem:[%s7358_s16 + $0xb50] sm:$0xff] %v1073_v42  ;;  %v1079_v45 = vld [vmem:[%s7353_s15 + $0x2d88] sm:$0xff]  ;;  %1076 = vst [vmem:[%s7358_s16 + $0xb58] sm:$0xff] %v1075_v43  ;;  %v1081_v46 = vld [vmem:[%s7353_s15 + $0x2d90] sm:$0xff] }
  0xd1   : > { %1078 = vst [vmem:[%s7358_s16 + $0xb60] sm:$0xff] %v1077_v44  ;;  %1080 = vst [vmem:[%s7358_s16 + $0xb68] sm:$0xff] %v1079_v45  ;;  %v1083_v47 = vld [vmem:[%s7353_s15 + $0x2d98] sm:$0xff]  ;;  %v1085_v48 = vld [vmem:[%s7353_s15 + $0x2e00] sm:$0xff] }
  0xd2   : > { %1082 = vst [vmem:[%s7358_s16 + $0xb70] sm:$0xff] %v1081_v46  ;;  %1084 = vst [vmem:[%s7358_s16 + $0xb78] sm:$0xff] %v1083_v47  ;;  %v1087_v49 = vld [vmem:[%s7353_s15 + $0x2e08] sm:$0xff]  ;;  %v1089_v50 = vld [vmem:[%s7353_s15 + $0x2e10] sm:$0xff] }
  0xd3   : > { %1086 = vst [vmem:[%s7358_s16 + $0xb80] sm:$0xff] %v1085_v48  ;;  %v1091_v51 = vld [vmem:[%s7353_s15 + $0x2e18] sm:$0xff]  ;;  %1088 = vst [vmem:[%s7358_s16 + $0xb88] sm:$0xff] %v1087_v49  ;;  %v1093_v52 = vld [vmem:[%s7353_s15 + $0x2e80] sm:$0xff] }
  0xd4   : > { %1090 = vst [vmem:[%s7358_s16 + $0xb90] sm:$0xff] %v1089_v50  ;;  %1092 = vst [vmem:[%s7358_s16 + $0xb98] sm:$0xff] %v1091_v51  ;;  %v1095_v53 = vld [vmem:[%s7353_s15 + $0x2e88] sm:$0xff]  ;;  %v1097_v54 = vld [vmem:[%s7353_s15 + $0x2e90] sm:$0xff] }
  0xd5   : > { %1094 = vst [vmem:[%s7358_s16 + $0xba0] sm:$0xff] %v1093_v52  ;;  %1096 = vst [vmem:[%s7358_s16 + $0xba8] sm:$0xff] %v1095_v53  ;;  %v1099_v55 = vld [vmem:[%s7353_s15 + $0x2e98] sm:$0xff]  ;;  %v1101_v56 = vld [vmem:[%s7353_s15 + $0x2f00] sm:$0xff] }
  0xd6   : > { %1098 = vst [vmem:[%s7358_s16 + $0xbb0] sm:$0xff] %v1097_v54  ;;  %v1103_v57 = vld [vmem:[%s7353_s15 + $0x2f08] sm:$0xff]  ;;  %1100 = vst [vmem:[%s7358_s16 + $0xbb8] sm:$0xff] %v1099_v55  ;;  %v1105_v58 = vld [vmem:[%s7353_s15 + $0x2f10] sm:$0xff] }
  0xd7   : > { %1102 = vst [vmem:[%s7358_s16 + $0xbc0] sm:$0xff] %v1101_v56  ;;  %1104 = vst [vmem:[%s7358_s16 + $0xbc8] sm:$0xff] %v1103_v57  ;;  %v1107_v59 = vld [vmem:[%s7353_s15 + $0x2f18] sm:$0xff]  ;;  %v1109_v60 = vld [vmem:[%s7353_s15 + $0x2f80] sm:$0xff] }
  0xd8   : > { %1106 = vst [vmem:[%s7358_s16 + $0xbd0] sm:$0xff] %v1105_v58  ;;  %1108 = vst [vmem:[%s7358_s16 + $0xbd8] sm:$0xff] %v1107_v59  ;;  %v1111_v61 = vld [vmem:[%s7353_s15 + $0x2f88] sm:$0xff]  ;;  %v1113_v62 = vld [vmem:[%s7353_s15 + $0x2f90] sm:$0xff] }
  0xd9   : > { %1110 = vst [vmem:[%s7358_s16 + $0xbe0] sm:$0xff] %v1109_v60  ;;  %v1115_v63 = vld [vmem:[%s7353_s15 + $0x2f98] sm:$0xff]  ;;  %1112 = vst [vmem:[%s7358_s16 + $0xbe8] sm:$0xff] %v1111_v61  ;;  %v1117_v0 = vld [vmem:[%s7353_s15 + $0x3000] sm:$0xff] }
  0xda   : > { %1114 = vst [vmem:[%s7358_s16 + $0xbf0] sm:$0xff] %v1113_v62  ;;  %1116 = vst [vmem:[%s7358_s16 + $0xbf8] sm:$0xff] %v1115_v63  ;;  %v1119_v1 = vld [vmem:[%s7353_s15 + $0x3008] sm:$0xff]  ;;  %v1121_v2 = vld [vmem:[%s7353_s15 + $0x3010] sm:$0xff] }
  0xdb   : > { %1118 = vst [vmem:[%s7358_s16 + $0xc00] sm:$0xff] %v1117_v0  ;;  %1120 = vst [vmem:[%s7358_s16 + $0xc08] sm:$0xff] %v1119_v1  ;;  %v1123_v3 = vld [vmem:[%s7353_s15 + $0x3018] sm:$0xff]  ;;  %v1125_v4 = vld [vmem:[%s7353_s15 + $0x3080] sm:$0xff] }
  0xdc   : > { %1122 = vst [vmem:[%s7358_s16 + $0xc10] sm:$0xff] %v1121_v2  ;;  %v1127_v5 = vld [vmem:[%s7353_s15 + $0x3088] sm:$0xff]  ;;  %1124 = vst [vmem:[%s7358_s16 + $0xc18] sm:$0xff] %v1123_v3  ;;  %v1129_v6 = vld [vmem:[%s7353_s15 + $0x3090] sm:$0xff] }
  0xdd   : > { %1126 = vst [vmem:[%s7358_s16 + $0xc20] sm:$0xff] %v1125_v4  ;;  %1128 = vst [vmem:[%s7358_s16 + $0xc28] sm:$0xff] %v1127_v5  ;;  %v1131_v7 = vld [vmem:[%s7353_s15 + $0x3098] sm:$0xff]  ;;  %v1133_v8 = vld [vmem:[%s7353_s15 + $0x3100] sm:$0xff] }
  0xde   : > { %1130 = vst [vmem:[%s7358_s16 + $0xc30] sm:$0xff] %v1129_v6  ;;  %1132 = vst [vmem:[%s7358_s16 + $0xc38] sm:$0xff] %v1131_v7  ;;  %v1135_v9 = vld [vmem:[%s7353_s15 + $0x3108] sm:$0xff]  ;;  %v1137_v10 = vld [vmem:[%s7353_s15 + $0x3110] sm:$0xff] }
  0xdf   : > { %1134 = vst [vmem:[%s7358_s16 + $0xc40] sm:$0xff] %v1133_v8  ;;  %v1139_v11 = vld [vmem:[%s7353_s15 + $0x3118] sm:$0xff]  ;;  %1136 = vst [vmem:[%s7358_s16 + $0xc48] sm:$0xff] %v1135_v9  ;;  %v1141_v12 = vld [vmem:[%s7353_s15 + $0x3180] sm:$0xff] }
  0xe0   : > { %1138 = vst [vmem:[%s7358_s16 + $0xc50] sm:$0xff] %v1137_v10  ;;  %1140 = vst [vmem:[%s7358_s16 + $0xc58] sm:$0xff] %v1139_v11  ;;  %v1143_v13 = vld [vmem:[%s7353_s15 + $0x3188] sm:$0xff]  ;;  %v1145_v14 = vld [vmem:[%s7353_s15 + $0x3190] sm:$0xff] }
  0xe1   : > { %1142 = vst [vmem:[%s7358_s16 + $0xc60] sm:$0xff] %v1141_v12  ;;  %1144 = vst [vmem:[%s7358_s16 + $0xc68] sm:$0xff] %v1143_v13  ;;  %v1147_v15 = vld [vmem:[%s7353_s15 + $0x3198] sm:$0xff]  ;;  %v1149_v16 = vld [vmem:[%s7353_s15 + $0x3200] sm:$0xff] }
  0xe2   : > { %1146 = vst [vmem:[%s7358_s16 + $0xc70] sm:$0xff] %v1145_v14  ;;  %v1151_v17 = vld [vmem:[%s7353_s15 + $0x3208] sm:$0xff]  ;;  %1148 = vst [vmem:[%s7358_s16 + $0xc78] sm:$0xff] %v1147_v15  ;;  %v1153_v18 = vld [vmem:[%s7353_s15 + $0x3210] sm:$0xff] }
  0xe3   : > { %1150 = vst [vmem:[%s7358_s16 + $0xc80] sm:$0xff] %v1149_v16  ;;  %1152 = vst [vmem:[%s7358_s16 + $0xc88] sm:$0xff] %v1151_v17  ;;  %v1155_v19 = vld [vmem:[%s7353_s15 + $0x3218] sm:$0xff]  ;;  %v1157_v20 = vld [vmem:[%s7353_s15 + $0x3280] sm:$0xff] }
  0xe4   : > { %1154 = vst [vmem:[%s7358_s16 + $0xc90] sm:$0xff] %v1153_v18  ;;  %1156 = vst [vmem:[%s7358_s16 + $0xc98] sm:$0xff] %v1155_v19  ;;  %v1159_v21 = vld [vmem:[%s7353_s15 + $0x3288] sm:$0xff]  ;;  %v1161_v22 = vld [vmem:[%s7353_s15 + $0x3290] sm:$0xff] }
  0xe5   : > { %1158 = vst [vmem:[%s7358_s16 + $0xca0] sm:$0xff] %v1157_v20  ;;  %v1163_v23 = vld [vmem:[%s7353_s15 + $0x3298] sm:$0xff]  ;;  %1160 = vst [vmem:[%s7358_s16 + $0xca8] sm:$0xff] %v1159_v21  ;;  %v1165_v24 = vld [vmem:[%s7353_s15 + $0x3300] sm:$0xff] }
  0xe6   : > { %1162 = vst [vmem:[%s7358_s16 + $0xcb0] sm:$0xff] %v1161_v22  ;;  %1164 = vst [vmem:[%s7358_s16 + $0xcb8] sm:$0xff] %v1163_v23  ;;  %v1167_v25 = vld [vmem:[%s7353_s15 + $0x3308] sm:$0xff]  ;;  %v1169_v26 = vld [vmem:[%s7353_s15 + $0x3310] sm:$0xff] }
  0xe7   : > { %1166 = vst [vmem:[%s7358_s16 + $0xcc0] sm:$0xff] %v1165_v24  ;;  %1168 = vst [vmem:[%s7358_s16 + $0xcc8] sm:$0xff] %v1167_v25  ;;  %v1171_v27 = vld [vmem:[%s7353_s15 + $0x3318] sm:$0xff]  ;;  %v1173_v28 = vld [vmem:[%s7353_s15 + $0x3380] sm:$0xff] }
  0xe8   : > { %1170 = vst [vmem:[%s7358_s16 + $0xcd0] sm:$0xff] %v1169_v26  ;;  %v1175_v29 = vld [vmem:[%s7353_s15 + $0x3388] sm:$0xff]  ;;  %1172 = vst [vmem:[%s7358_s16 + $0xcd8] sm:$0xff] %v1171_v27  ;;  %v1177_v30 = vld [vmem:[%s7353_s15 + $0x3390] sm:$0xff] }
  0xe9   : > { %1174 = vst [vmem:[%s7358_s16 + $0xce0] sm:$0xff] %v1173_v28  ;;  %1176 = vst [vmem:[%s7358_s16 + $0xce8] sm:$0xff] %v1175_v29  ;;  %v1179_v31 = vld [vmem:[%s7353_s15 + $0x3398] sm:$0xff]  ;;  %v1181_v32 = vld [vmem:[%s7353_s15 + $0x3400] sm:$0xff] }
  0xea   : > { %1178 = vst [vmem:[%s7358_s16 + $0xcf0] sm:$0xff] %v1177_v30  ;;  %1180 = vst [vmem:[%s7358_s16 + $0xcf8] sm:$0xff] %v1179_v31  ;;  %v1183_v33 = vld [vmem:[%s7353_s15 + $0x3408] sm:$0xff]  ;;  %v1185_v34 = vld [vmem:[%s7353_s15 + $0x3410] sm:$0xff] }
  0xeb   : > { %1182 = vst [vmem:[%s7358_s16 + $0xd00] sm:$0xff] %v1181_v32  ;;  %v1187_v35 = vld [vmem:[%s7353_s15 + $0x3418] sm:$0xff]  ;;  %1184 = vst [vmem:[%s7358_s16 + $0xd08] sm:$0xff] %v1183_v33  ;;  %v1189_v36 = vld [vmem:[%s7353_s15 + $0x3480] sm:$0xff] }
  0xec   : > { %1186 = vst [vmem:[%s7358_s16 + $0xd10] sm:$0xff] %v1185_v34  ;;  %1188 = vst [vmem:[%s7358_s16 + $0xd18] sm:$0xff] %v1187_v35  ;;  %v1191_v37 = vld [vmem:[%s7353_s15 + $0x3488] sm:$0xff]  ;;  %v1193_v38 = vld [vmem:[%s7353_s15 + $0x3490] sm:$0xff] }
  0xed   : > { %1190 = vst [vmem:[%s7358_s16 + $0xd20] sm:$0xff] %v1189_v36  ;;  %1192 = vst [vmem:[%s7358_s16 + $0xd28] sm:$0xff] %v1191_v37  ;;  %v1195_v39 = vld [vmem:[%s7353_s15 + $0x3498] sm:$0xff]  ;;  %v1197_v40 = vld [vmem:[%s7353_s15 + $0x3500] sm:$0xff] }
  0xee   : > { %1194 = vst [vmem:[%s7358_s16 + $0xd30] sm:$0xff] %v1193_v38  ;;  %v1199_v41 = vld [vmem:[%s7353_s15 + $0x3508] sm:$0xff]  ;;  %1196 = vst [vmem:[%s7358_s16 + $0xd38] sm:$0xff] %v1195_v39  ;;  %v1201_v42 = vld [vmem:[%s7353_s15 + $0x3510] sm:$0xff] }
  0xef   : > { %1198 = vst [vmem:[%s7358_s16 + $0xd40] sm:$0xff] %v1197_v40  ;;  %1200 = vst [vmem:[%s7358_s16 + $0xd48] sm:$0xff] %v1199_v41  ;;  %v1203_v43 = vld [vmem:[%s7353_s15 + $0x3518] sm:$0xff]  ;;  %v1205_v44 = vld [vmem:[%s7353_s15 + $0x3580] sm:$0xff] }
  0xf0   : > { %1202 = vst [vmem:[%s7358_s16 + $0xd50] sm:$0xff] %v1201_v42  ;;  %1204 = vst [vmem:[%s7358_s16 + $0xd58] sm:$0xff] %v1203_v43  ;;  %v1207_v45 = vld [vmem:[%s7353_s15 + $0x3588] sm:$0xff]  ;;  %v1209_v46 = vld [vmem:[%s7353_s15 + $0x3590] sm:$0xff] }
  0xf1   : > { %1206 = vst [vmem:[%s7358_s16 + $0xd60] sm:$0xff] %v1205_v44  ;;  %v1211_v47 = vld [vmem:[%s7353_s15 + $0x3598] sm:$0xff]  ;;  %1208 = vst [vmem:[%s7358_s16 + $0xd68] sm:$0xff] %v1207_v45  ;;  %v1213_v48 = vld [vmem:[%s7353_s15 + $0x3600] sm:$0xff] }
  0xf2   : > { %1210 = vst [vmem:[%s7358_s16 + $0xd70] sm:$0xff] %v1209_v46  ;;  %1212 = vst [vmem:[%s7358_s16 + $0xd78] sm:$0xff] %v1211_v47  ;;  %v1215_v49 = vld [vmem:[%s7353_s15 + $0x3608] sm:$0xff]  ;;  %v1217_v50 = vld [vmem:[%s7353_s15 + $0x3610] sm:$0xff] }
  0xf3   : > { %1214 = vst [vmem:[%s7358_s16 + $0xd80] sm:$0xff] %v1213_v48  ;;  %1216 = vst [vmem:[%s7358_s16 + $0xd88] sm:$0xff] %v1215_v49  ;;  %v1219_v51 = vld [vmem:[%s7353_s15 + $0x3618] sm:$0xff]  ;;  %v1221_v52 = vld [vmem:[%s7353_s15 + $0x3680] sm:$0xff] }
  0xf4   : > { %1218 = vst [vmem:[%s7358_s16 + $0xd90] sm:$0xff] %v1217_v50  ;;  %v1223_v53 = vld [vmem:[%s7353_s15 + $0x3688] sm:$0xff]  ;;  %1220 = vst [vmem:[%s7358_s16 + $0xd98] sm:$0xff] %v1219_v51  ;;  %v1225_v54 = vld [vmem:[%s7353_s15 + $0x3690] sm:$0xff] }
  0xf5   : > { %1222 = vst [vmem:[%s7358_s16 + $0xda0] sm:$0xff] %v1221_v52  ;;  %1224 = vst [vmem:[%s7358_s16 + $0xda8] sm:$0xff] %v1223_v53  ;;  %v1227_v55 = vld [vmem:[%s7353_s15 + $0x3698] sm:$0xff]  ;;  %v1229_v56 = vld [vmem:[%s7353_s15 + $0x3700] sm:$0xff] }
  0xf6   : > { %1226 = vst [vmem:[%s7358_s16 + $0xdb0] sm:$0xff] %v1225_v54  ;;  %1228 = vst [vmem:[%s7358_s16 + $0xdb8] sm:$0xff] %v1227_v55  ;;  %v1231_v57 = vld [vmem:[%s7353_s15 + $0x3708] sm:$0xff]  ;;  %v1233_v58 = vld [vmem:[%s7353_s15 + $0x3710] sm:$0xff] }
  0xf7   : > { %1230 = vst [vmem:[%s7358_s16 + $0xdc0] sm:$0xff] %v1229_v56  ;;  %v1235_v59 = vld [vmem:[%s7353_s15 + $0x3718] sm:$0xff]  ;;  %1232 = vst [vmem:[%s7358_s16 + $0xdc8] sm:$0xff] %v1231_v57  ;;  %v1237_v60 = vld [vmem:[%s7353_s15 + $0x3780] sm:$0xff] }
  0xf8   : > { %1234 = vst [vmem:[%s7358_s16 + $0xdd0] sm:$0xff] %v1233_v58  ;;  %1236 = vst [vmem:[%s7358_s16 + $0xdd8] sm:$0xff] %v1235_v59  ;;  %v1239_v61 = vld [vmem:[%s7353_s15 + $0x3788] sm:$0xff]  ;;  %v1241_v62 = vld [vmem:[%s7353_s15 + $0x3790] sm:$0xff] }
  0xf9   : > { %1238 = vst [vmem:[%s7358_s16 + $0xde0] sm:$0xff] %v1237_v60  ;;  %1240 = vst [vmem:[%s7358_s16 + $0xde8] sm:$0xff] %v1239_v61  ;;  %v1243_v63 = vld [vmem:[%s7353_s15 + $0x3798] sm:$0xff]  ;;  %v1245_v0 = vld [vmem:[%s7353_s15 + $0x3800] sm:$0xff] }
  0xfa   : > { %1242 = vst [vmem:[%s7358_s16 + $0xdf0] sm:$0xff] %v1241_v62  ;;  %v1247_v1 = vld [vmem:[%s7353_s15 + $0x3808] sm:$0xff]  ;;  %1244 = vst [vmem:[%s7358_s16 + $0xdf8] sm:$0xff] %v1243_v63  ;;  %v1249_v2 = vld [vmem:[%s7353_s15 + $0x3810] sm:$0xff] }
  0xfb   : > { %1246 = vst [vmem:[%s7358_s16 + $0xe00] sm:$0xff] %v1245_v0  ;;  %1248 = vst [vmem:[%s7358_s16 + $0xe08] sm:$0xff] %v1247_v1  ;;  %v1251_v3 = vld [vmem:[%s7353_s15 + $0x3818] sm:$0xff]  ;;  %v1253_v4 = vld [vmem:[%s7353_s15 + $0x3880] sm:$0xff] }
  0xfc   : > { %1250 = vst [vmem:[%s7358_s16 + $0xe10] sm:$0xff] %v1249_v2  ;;  %1252 = vst [vmem:[%s7358_s16 + $0xe18] sm:$0xff] %v1251_v3  ;;  %v1255_v5 = vld [vmem:[%s7353_s15 + $0x3888] sm:$0xff]  ;;  %v1257_v6 = vld [vmem:[%s7353_s15 + $0x3890] sm:$0xff] }
  0xfd   : > { %1254 = vst [vmem:[%s7358_s16 + $0xe20] sm:$0xff] %v1253_v4  ;;  %v1259_v7 = vld [vmem:[%s7353_s15 + $0x3898] sm:$0xff]  ;;  %1256 = vst [vmem:[%s7358_s16 + $0xe28] sm:$0xff] %v1255_v5  ;;  %v1261_v8 = vld [vmem:[%s7353_s15 + $0x3900] sm:$0xff] }
  0xfe   : > { %1258 = vst [vmem:[%s7358_s16 + $0xe30] sm:$0xff] %v1257_v6  ;;  %1260 = vst [vmem:[%s7358_s16 + $0xe38] sm:$0xff] %v1259_v7  ;;  %v1263_v9 = vld [vmem:[%s7353_s15 + $0x3908] sm:$0xff]  ;;  %v1265_v10 = vld [vmem:[%s7353_s15 + $0x3910] sm:$0xff] }
  0xff   : > { %1262 = vst [vmem:[%s7358_s16 + $0xe40] sm:$0xff] %v1261_v8  ;;  %1264 = vst [vmem:[%s7358_s16 + $0xe48] sm:$0xff] %v1263_v9  ;;  %v1267_v11 = vld [vmem:[%s7353_s15 + $0x3918] sm:$0xff]  ;;  %v1269_v12 = vld [vmem:[%s7353_s15 + $0x3980] sm:$0xff] }
 0x100   : > { %1266 = vst [vmem:[%s7358_s16 + $0xe50] sm:$0xff] %v1265_v10  ;;  %v1271_v13 = vld [vmem:[%s7353_s15 + $0x3988] sm:$0xff]  ;;  %1268 = vst [vmem:[%s7358_s16 + $0xe58] sm:$0xff] %v1267_v11  ;;  %v1273_v14 = vld [vmem:[%s7353_s15 + $0x3990] sm:$0xff] }
 0x101   : > { %1270 = vst [vmem:[%s7358_s16 + $0xe60] sm:$0xff] %v1269_v12  ;;  %1272 = vst [vmem:[%s7358_s16 + $0xe68] sm:$0xff] %v1271_v13  ;;  %v1275_v15 = vld [vmem:[%s7353_s15 + $0x3998] sm:$0xff]  ;;  %v1277_v16 = vld [vmem:[%s7353_s15 + $0x3a00] sm:$0xff] }
 0x102   : > { %1274 = vst [vmem:[%s7358_s16 + $0xe70] sm:$0xff] %v1273_v14  ;;  %1276 = vst [vmem:[%s7358_s16 + $0xe78] sm:$0xff] %v1275_v15  ;;  %v1279_v17 = vld [vmem:[%s7353_s15 + $0x3a08] sm:$0xff]  ;;  %v1281_v18 = vld [vmem:[%s7353_s15 + $0x3a10] sm:$0xff] }
 0x103   : > { %1278 = vst [vmem:[%s7358_s16 + $0xe80] sm:$0xff] %v1277_v16  ;;  %v1283_v19 = vld [vmem:[%s7353_s15 + $0x3a18] sm:$0xff]  ;;  %1280 = vst [vmem:[%s7358_s16 + $0xe88] sm:$0xff] %v1279_v17  ;;  %v1285_v20 = vld [vmem:[%s7353_s15 + $0x3a80] sm:$0xff] }
 0x104   : > { %1282 = vst [vmem:[%s7358_s16 + $0xe90] sm:$0xff] %v1281_v18  ;;  %1284 = vst [vmem:[%s7358_s16 + $0xe98] sm:$0xff] %v1283_v19  ;;  %v1287_v21 = vld [vmem:[%s7353_s15 + $0x3a88] sm:$0xff]  ;;  %v1289_v22 = vld [vmem:[%s7353_s15 + $0x3a90] sm:$0xff] }
 0x105   : > { %1286 = vst [vmem:[%s7358_s16 + $0xea0] sm:$0xff] %v1285_v20  ;;  %1288 = vst [vmem:[%s7358_s16 + $0xea8] sm:$0xff] %v1287_v21  ;;  %v1291_v23 = vld [vmem:[%s7353_s15 + $0x3a98] sm:$0xff]  ;;  %v1293_v24 = vld [vmem:[%s7353_s15 + $0x3b00] sm:$0xff] }
 0x106   : > { %1290 = vst [vmem:[%s7358_s16 + $0xeb0] sm:$0xff] %v1289_v22  ;;  %v1295_v25 = vld [vmem:[%s7353_s15 + $0x3b08] sm:$0xff]  ;;  %1292 = vst [vmem:[%s7358_s16 + $0xeb8] sm:$0xff] %v1291_v23  ;;  %v1297_v26 = vld [vmem:[%s7353_s15 + $0x3b10] sm:$0xff] }
 0x107   : > { %1294 = vst [vmem:[%s7358_s16 + $0xec0] sm:$0xff] %v1293_v24  ;;  %1296 = vst [vmem:[%s7358_s16 + $0xec8] sm:$0xff] %v1295_v25  ;;  %v1299_v27 = vld [vmem:[%s7353_s15 + $0x3b18] sm:$0xff]  ;;  %v1301_v28 = vld [vmem:[%s7353_s15 + $0x3b80] sm:$0xff] }
 0x108   : > { %1298 = vst [vmem:[%s7358_s16 + $0xed0] sm:$0xff] %v1297_v26  ;;  %1300 = vst [vmem:[%s7358_s16 + $0xed8] sm:$0xff] %v1299_v27  ;;  %v1303_v29 = vld [vmem:[%s7353_s15 + $0x3b88] sm:$0xff]  ;;  %v1305_v30 = vld [vmem:[%s7353_s15 + $0x3b90] sm:$0xff] }
 0x109   : > { %1302 = vst [vmem:[%s7358_s16 + $0xee0] sm:$0xff] %v1301_v28  ;;  %v1307_v31 = vld [vmem:[%s7353_s15 + $0x3b98] sm:$0xff]  ;;  %1304 = vst [vmem:[%s7358_s16 + $0xee8] sm:$0xff] %v1303_v29  ;;  %v1309_v32 = vld [vmem:[%s7353_s15 + $0x3c00] sm:$0xff] }
 0x10a   : > { %1306 = vst [vmem:[%s7358_s16 + $0xef0] sm:$0xff] %v1305_v30  ;;  %1308 = vst [vmem:[%s7358_s16 + $0xef8] sm:$0xff] %v1307_v31  ;;  %v1311_v33 = vld [vmem:[%s7353_s15 + $0x3c08] sm:$0xff]  ;;  %v1313_v34 = vld [vmem:[%s7353_s15 + $0x3c10] sm:$0xff] }
 0x10b   : > { %1310 = vst [vmem:[%s7358_s16 + $0xf00] sm:$0xff] %v1309_v32  ;;  %1312 = vst [vmem:[%s7358_s16 + $0xf08] sm:$0xff] %v1311_v33  ;;  %v1315_v35 = vld [vmem:[%s7353_s15 + $0x3c18] sm:$0xff]  ;;  %v1317_v36 = vld [vmem:[%s7353_s15 + $0x3c80] sm:$0xff] }
 0x10c   : > { %1314 = vst [vmem:[%s7358_s16 + $0xf10] sm:$0xff] %v1313_v34  ;;  %v1319_v37 = vld [vmem:[%s7353_s15 + $0x3c88] sm:$0xff]  ;;  %1316 = vst [vmem:[%s7358_s16 + $0xf18] sm:$0xff] %v1315_v35  ;;  %v1321_v38 = vld [vmem:[%s7353_s15 + $0x3c90] sm:$0xff] }
 0x10d   : > { %1318 = vst [vmem:[%s7358_s16 + $0xf20] sm:$0xff] %v1317_v36  ;;  %1320 = vst [vmem:[%s7358_s16 + $0xf28] sm:$0xff] %v1319_v37  ;;  %v1323_v39 = vld [vmem:[%s7353_s15 + $0x3c98] sm:$0xff]  ;;  %v1325_v40 = vld [vmem:[%s7353_s15 + $0x3d00] sm:$0xff] }
 0x10e   : > { %1322 = vst [vmem:[%s7358_s16 + $0xf30] sm:$0xff] %v1321_v38  ;;  %1324 = vst [vmem:[%s7358_s16 + $0xf38] sm:$0xff] %v1323_v39  ;;  %v1327_v41 = vld [vmem:[%s7353_s15 + $0x3d08] sm:$0xff]  ;;  %v1329_v42 = vld [vmem:[%s7353_s15 + $0x3d10] sm:$0xff] }
 0x10f   : > { %1326 = vst [vmem:[%s7358_s16 + $0xf40] sm:$0xff] %v1325_v40  ;;  %v1331_v43 = vld [vmem:[%s7353_s15 + $0x3d18] sm:$0xff]  ;;  %1328 = vst [vmem:[%s7358_s16 + $0xf48] sm:$0xff] %v1327_v41  ;;  %v1333_v44 = vld [vmem:[%s7353_s15 + $0x3d80] sm:$0xff] }
 0x110   : > { %1330 = vst [vmem:[%s7358_s16 + $0xf50] sm:$0xff] %v1329_v42  ;;  %1332 = vst [vmem:[%s7358_s16 + $0xf58] sm:$0xff] %v1331_v43  ;;  %v1335_v45 = vld [vmem:[%s7353_s15 + $0x3d88] sm:$0xff]  ;;  %v1337_v46 = vld [vmem:[%s7353_s15 + $0x3d90] sm:$0xff] }
 0x111   : > { %1334 = vst [vmem:[%s7358_s16 + $0xf60] sm:$0xff] %v1333_v44  ;;  %1336 = vst [vmem:[%s7358_s16 + $0xf68] sm:$0xff] %v1335_v45  ;;  %v1339_v47 = vld [vmem:[%s7353_s15 + $0x3d98] sm:$0xff]  ;;  %v1341_v48 = vld [vmem:[%s7353_s15 + $0x3e00] sm:$0xff] }
 0x112   : > { %1338 = vst [vmem:[%s7358_s16 + $0xf70] sm:$0xff] %v1337_v46  ;;  %v1343_v49 = vld [vmem:[%s7353_s15 + $0x3e08] sm:$0xff]  ;;  %1340 = vst [vmem:[%s7358_s16 + $0xf78] sm:$0xff] %v1339_v47  ;;  %v1345_v50 = vld [vmem:[%s7353_s15 + $0x3e10] sm:$0xff] }
 0x113   : > { %1342 = vst [vmem:[%s7358_s16 + $0xf80] sm:$0xff] %v1341_v48  ;;  %1344 = vst [vmem:[%s7358_s16 + $0xf88] sm:$0xff] %v1343_v49  ;;  %v1347_v51 = vld [vmem:[%s7353_s15 + $0x3e18] sm:$0xff]  ;;  %v1349_v52 = vld [vmem:[%s7353_s15 + $0x3e80] sm:$0xff] }
 0x114   : > { %1346 = vst [vmem:[%s7358_s16 + $0xf90] sm:$0xff] %v1345_v50  ;;  %1348 = vst [vmem:[%s7358_s16 + $0xf98] sm:$0xff] %v1347_v51  ;;  %v1351_v53 = vld [vmem:[%s7353_s15 + $0x3e88] sm:$0xff]  ;;  %v1353_v54 = vld [vmem:[%s7353_s15 + $0x3e90] sm:$0xff] }
 0x115   : > { %1350 = vst [vmem:[%s7358_s16 + $0xfa0] sm:$0xff] %v1349_v52  ;;  %v1355_v55 = vld [vmem:[%s7353_s15 + $0x3e98] sm:$0xff]  ;;  %1352 = vst [vmem:[%s7358_s16 + $0xfa8] sm:$0xff] %v1351_v53  ;;  %v1357_v56 = vld [vmem:[%s7353_s15 + $0x3f00] sm:$0xff] }
 0x116   : > { %1354 = vst [vmem:[%s7358_s16 + $0xfb0] sm:$0xff] %v1353_v54  ;;  %1356 = vst [vmem:[%s7358_s16 + $0xfb8] sm:$0xff] %v1355_v55  ;;  %v1359_v57 = vld [vmem:[%s7353_s15 + $0x3f08] sm:$0xff]  ;;  %v1361_v58 = vld [vmem:[%s7353_s15 + $0x3f10] sm:$0xff] }
 0x117   : > { %1358 = vst [vmem:[%s7358_s16 + $0xfc0] sm:$0xff] %v1357_v56  ;;  %1360 = vst [vmem:[%s7358_s16 + $0xfc8] sm:$0xff] %v1359_v57  ;;  %v1363_v59 = vld [vmem:[%s7353_s15 + $0x3f18] sm:$0xff]  ;;  %v1365_v60 = vld [vmem:[%s7353_s15 + $0x3f80] sm:$0xff] }
 0x118   : > { %1362 = vst [vmem:[%s7358_s16 + $0xfd0] sm:$0xff] %v1361_v58  ;;  %v1367_v61 = vld [vmem:[%s7353_s15 + $0x3f88] sm:$0xff]  ;;  %1364 = vst [vmem:[%s7358_s16 + $0xfd8] sm:$0xff] %v1363_v59  ;;  %v1369_v62 = vld [vmem:[%s7353_s15 + $0x3f90] sm:$0xff] }
 0x119   : > { %1366 = vst [vmem:[%s7358_s16 + $0xfe0] sm:$0xff] %v1365_v60  ;;  %1368 = vst [vmem:[%s7358_s16 + $0xfe8] sm:$0xff] %v1367_v61  ;;  %v1371_v63 = vld [vmem:[%s7353_s15 + $0x3f98] sm:$0xff] }
 0x11a   : > { %1370 = vst [vmem:[%s7358_s16 + $0xff0] sm:$0xff] %v1369_v62  ;;  %1372 = vst [vmem:[%s7358_s16 + $0xff8] sm:$0xff] %v1371_v63 }
 0x11b PF: > { %p6307_p10 = scmp.ge.s32.totalorder %s7229_s20, 1  ;;  %p1385_p11 = scmp.lt.s32.totalorder %s7229_s20, 5 }
 0x11d   : > { %p1386_p12 = pnand %p6307_p10, %p1385_p11 }
 0x11e   : > { %s9610_s1 = sld [smem:[#allocation14_spill]] (!%p1386_p12)  ;;  %s7233_s25 = smov (!%p1386_p12), 112  }
 0x11f   : > { %1389 = sbr.rel (%p1386_p12) target bundleno = 1603 (0x643), region = 71  ;;  %s9611_s0 = sld [smem:[#allocation13_spill]] (!%p1386_p12) }
 0x120   : > { %s9612_s2 = sld [smem:[#allocation15_spill]] (!%p1386_p12)  ;;  %s8817_s29 = sand.u32 (!%p1386_p12), 1, %s7221_s18  }
 0x121   : > { %s6308_s30 = sshll.u32 (!%p1386_p12), %s8817_s29, 12  ;;  %s6310_s16 = sshll.u32 (!%p1386_p12), %s7319_s21, 3 }
 0x122   : > { %s8835_s12 = scalar_lea.vmem (!%p1386_p12), [#allocation2], %s6308_s30  ;;  %p1437_p13 = scmp.lt.s32.totalorder (!%p1386_p12), %s6310_s16, 31 }
 0x124   : > { %v1475_v0 = vld [vmem:[%s9610_s1 + $0xf8] sm:$0xff]  ;;  %v1474_v4 = vld [vmem:[%s9610_s1 + $0xf0] sm:$0xff]  ;;  %v1473_v8 = vld [vmem:[%s9610_s1 + $0xe8] sm:$0xff]  ;;  %v7231_v30 = vmov 1983009808   ;;  %v1585_v32 = vlaneseq  ;;  %vm2267_vm0 = vcmask 123904  }
 0x125   : > { %v1507_v1 = vld [vmem:[%s9610_s1 + $0x1f8] sm:$0xff]  ;;  %6849 = vmatprep.subr.mxu0 %v1475_v0  ;;  %v1506_v5 = vld [vmem:[%s9610_s1 + $0x1f0] sm:$0xff]  ;;  %v1505_v9 = vld [vmem:[%s9610_s1 + $0x1e8] sm:$0xff]  ;;  %v1583_v31 = vunpack.c.l.s4 %v7231_v30  ;;  %vm1971_vm1 = vcmask 130048   ;;  %s9619_s16 = smov (!%p1437_p13, %s6310_s16), 31 }
 0x126   : > { %v1459_v2 = vld [vmem:[%s9610_s1 + $0x78] sm:$0xff]  ;;  %6884 = vmatprep.subr.mxu1 %v1507_v1  ;;  %v1458_v6 = vld [vmem:[%s9610_s1 + $0x70] sm:$0xff]  ;;  %v1457_v10 = vld [vmem:[%s9610_s1 + $0x68] sm:$0xff]  ;;  %v8497_v42 = vshrl.u32 %v1585_v32, 7 }
 0x127   : > { %v1491_v3 = vld [vmem:[%s9610_s1 + $0x178] sm:$0xff]  ;;  %6850 = vmatpush3.msra.mxu0 %v1459_v2  ;;  %v1490_v7 = vld [vmem:[%s9610_s1 + $0x170] sm:$0xff]  ;;  %v1489_v11 = vld [vmem:[%s9610_s1 + $0x168] sm:$0xff]  ;;  %v1584_v41 = vunpack.c.0.s8 %v1583_v31 }
 0x128   : > { %6885 = vmatpush3.msra.mxu1 %v1491_v3  ;;  %6851 = vmatprep.subr.mxu0 %v1474_v4  ;;  %v1472_v12 = vld [vmem:[%s9610_s1 + $0xe0] sm:$0xff]  ;;  %v1471_v16 = vld [vmem:[%s9610_s1 + $0xd8] sm:$0xff]  ;;  %v1470_v20 = vld [vmem:[%s9610_s1 + $0xd0] sm:$0xff] }
 0x129   : > { %6886 = vmatprep.subr.mxu1 %v1506_v5  ;;  %6852 = vmatpush3.msra.mxu0 %v1458_v6  ;;  %v1504_v13 = vld [vmem:[%s9610_s1 + $0x1e0] sm:$0xff]  ;;  %v1503_v17 = vld [vmem:[%s9610_s1 + $0x1d8] sm:$0xff]  ;;  %v1502_v21 = vld [vmem:[%s9610_s1 + $0x1d0] sm:$0xff]  ;;  %v8524_v51 = vsub.s32 %v1584_v41, %v8497_v42 }
 0x12a   : > { %6887 = vmatpush3.msra.mxu1 %v1490_v7  ;;  %6853 = vmatprep.subr.mxu0 %v1473_v8  ;;  %v1456_v14 = vld [vmem:[%s9610_s1 + $0x60] sm:$0xff]  ;;  %v1455_v18 = vld [vmem:[%s9610_s1 + $0x58] sm:$0xff]  ;;  %v1454_v22 = vld [vmem:[%s9610_s1 + $0x50] sm:$0xff] }
 0x12b   : > { %6888 = vmatprep.subr.mxu1 %v1505_v9  ;;  %v1488_v15 = vld [vmem:[%s9610_s1 + $0x160] sm:$0xff]  ;;  %6854 = vmatpush3.msra.mxu0 %v1457_v10  ;;  %v1487_v19 = vld [vmem:[%s9610_s1 + $0x158] sm:$0xff]  ;;  %v1486_v23 = vld [vmem:[%s9610_s1 + $0x150] sm:$0xff] }
 0x12c   : > { %6889 = vmatpush3.msra.mxu1 %v1489_v11  ;;  %6855 = vmatprep.subr.mxu0 %v1472_v12  ;;  %v1469_v24 = vld [vmem:[%s9610_s1 + $0xc8] sm:$0xff]  ;;  %v1468_v28 = vld [vmem:[%s9610_s1 + $0xc0] sm:$0xff]  ;;  %v1467_v35 = vld [vmem:[%s9610_s1 + $0xb8] sm:$0xff] }
 0x12d   : > { %6890 = vmatprep.subr.mxu1 %v1504_v13  ;;  %6856 = vmatpush3.msra.mxu0 %v1456_v14  ;;  %v1501_v25 = vld [vmem:[%s9610_s1 + $0x1c8] sm:$0xff]  ;;  %v1500_v29 = vld [vmem:[%s9610_s1 + $0x1c0] sm:$0xff]  ;;  %v1499_v36 = vld [vmem:[%s9610_s1 + $0x1b8] sm:$0xff] }
 0x12e   : > { %6891 = vmatpush3.msra.mxu1 %v1488_v15  ;;  %6857 = vmatprep.subr.mxu0 %v1471_v16  ;;  %v1453_v26 = vld [vmem:[%s9610_s1 + $0x48] sm:$0xff]  ;;  %v1452_v33 = vld [vmem:[%s9610_s1 + $0x40] sm:$0xff]  ;;  %v1451_v37 = vld [vmem:[%s9610_s1 + $0x38] sm:$0xff] }
 0x12f   : > { %6892 = vmatprep.subr.mxu1 %v1503_v17  ;;  %6858 = vmatpush3.msra.mxu0 %v1455_v18  ;;  %v1485_v27 = vld [vmem:[%s9610_s1 + $0x148] sm:$0xff]  ;;  %v1484_v34 = vld [vmem:[%s9610_s1 + $0x140] sm:$0xff]  ;;  %v1483_v38 = vld [vmem:[%s9610_s1 + $0x138] sm:$0xff] }
 0x130   : > { %6893 = vmatpush3.msra.mxu1 %v1487_v19  ;;  %6859 = vmatprep.subr.mxu0 %v1470_v20  ;;  %v1466_v39 = vld [vmem:[%s9610_s1 + $0xb0] sm:$0xff]  ;;  %v1465_v45 = vld [vmem:[%s9610_s1 + $0xa8] sm:$0xff]  ;;  %v1464_v49 = vld [vmem:[%s9610_s1 + $0xa0] sm:$0xff] }
 0x131   : > { %6894 = vmatprep.subr.mxu1 %v1502_v21  ;;  %6860 = vmatpush3.msra.mxu0 %v1454_v22  ;;  %v1498_v40 = vld [vmem:[%s9610_s1 + $0x1b0] sm:$0xff]  ;;  %v1497_v46 = vld [vmem:[%s9610_s1 + $0x1a8] sm:$0xff]  ;;  %v1496_v50 = vld [vmem:[%s9610_s1 + $0x1a0] sm:$0xff] }
 0x132   : > { %6895 = vmatpush3.msra.mxu1 %v1486_v23  ;;  %6861 = vmatprep.subr.mxu0 %v1469_v24  ;;  %v1450_v43 = vld [vmem:[%s9610_s1 + $0x30] sm:$0xff]  ;;  %v1449_v47 = vld [vmem:[%s9610_s1 + $0x28] sm:$0xff]  ;;  %v1448_v52 = vld [vmem:[%s9610_s1 + $0x20] sm:$0xff] }
 0x133   : > { %6896 = vmatprep.subr.mxu1 %v1501_v25  ;;  %6862 = vmatpush3.msra.mxu0 %v1453_v26  ;;  %v1482_v44 = vld [vmem:[%s9610_s1 + $0x130] sm:$0xff]  ;;  %v1481_v48 = vld [vmem:[%s9610_s1 + $0x128] sm:$0xff]  ;;  %v1480_v53 = vld [vmem:[%s9610_s1 + $0x120] sm:$0xff] }
 0x134   : > { %6897 = vmatpush3.msra.mxu1 %v1485_v27  ;;  %6863 = vmatprep.subr.mxu0 %v1468_v28  ;;  %v1442_v54 = vld [vmem:[%s9611_s0] sm:$0xff]  ;;  %v1463_v55 = vld [vmem:[%s9610_s1 + $0x98] sm:$0xff]  ;;  %v1462_v60 = vld [vmem:[%s9610_s1 + $0x90] sm:$0xff] }
 0x135   : > { %6898 = vmatprep.subr.mxu1 %v1500_v29  ;;  %6864 = vmatpush3.msra.mxu0 %v1452_v33  ;;  %v1495_v56 = vld [vmem:[%s9610_s1 + $0x198] sm:$0xff]  ;;  %v1581_v57 = vcombine.high %v1442_v54, %v1442_v54  ;;  %v1494_v61 = vld [vmem:[%s9610_s1 + $0x190] sm:$0xff]  ;;  %v1588_v62 = vrot.slane %v1442_v54, %v8524_v51  ;;  %v1461_v1 = vld [vmem:[%s9610_s1 + $0x88] sm:$0xff] }
 0x136   : > { %6899 = vmatpush3.msra.mxu1 %v1484_v34  ;;  %6865 = vmatprep.subr.mxu0 %v1467_v35  ;;  %v1447_v58 = vld [vmem:[%s9610_s1 + $0x18] sm:$0xff]  ;;  %v1446_v63 = vld [vmem:[%s9610_s1 + $0x10] sm:$0xff]  ;;  %v1493_v2 = vld [vmem:[%s9610_s1 + $0x188] sm:$0xff] }
 0x137   : > { %6900 = vmatprep.subr.mxu1 %v1499_v36  ;;  %6866 = vmatpush3.msra.mxu0 %v1451_v37  ;;  %v1479_v59 = vld [vmem:[%s9610_s1 + $0x118] sm:$0xff]  ;;  %v1478_v0 = vld [vmem:[%s9610_s1 + $0x110] sm:$0xff]  ;;  %v1595_v3 = vrot.slane %v1581_v57, %v8524_v51  ;;  %v1445_v4 = vld [vmem:[%s9610_s1 + $0x8] sm:$0xff]  ;;  %v1596_v8 = vcombine.high %v1588_v62, %v1588_v62 }
 0x138   : > { %6901 = vmatpush3.msra.mxu1 %v1483_v38  ;;  %6867 = vmatprep.subr.mxu0 %v1466_v39  ;;  %v1477_v5 = vld [vmem:[%s9610_s1 + $0x108] sm:$0xff]  ;;  %v1460_v6 = vld [vmem:[%s9610_s1 + $0x80] sm:$0xff]  ;;  %v1539_v12 = vld [vmem:[%s9610_s1 + $0x2f8] sm:$0xff] }
 0x139   : > { %6902 = vmatprep.subr.mxu1 %v1498_v40  ;;  %6868 = vmatpush3.msra.mxu0 %v1450_v43  ;;  %v1492_v7 = vld [vmem:[%s9610_s1 + $0x180] sm:$0xff]  ;;  %v1597_v11 = vcombine.high %v1595_v3, %v1595_v3  ;;  %v1571_v13 = vld [vmem:[%s9610_s1 + $0x3f8] sm:$0xff]  ;;  %v1538_v16 = vld [vmem:[%s9610_s1 + $0x2f0] sm:$0xff] }
 0x13a   : > { %6903 = vmatpush3.msra.mxu1 %v1482_v44  ;;  %6869 = vmatprep.subr.mxu0 %v1465_v45  ;;  %v1444_v9 = vld [vmem:[%s9610_s1] sm:$0xff]  ;;  %v1523_v14 = vld [vmem:[%s9610_s1 + $0x278] sm:$0xff]  ;;  %v1570_v17 = vld [vmem:[%s9610_s1 + $0x3f0] sm:$0xff] }
 0x13b   : > { %6904 = vmatprep.subr.mxu1 %v1497_v46  ;;  %6870 = vmatpush3.msra.mxu0 %v1449_v47  ;;  %v1476_v10 = vld [vmem:[%s9610_s1 + $0x100] sm:$0xff]  ;;  %v1555_v15 = vld [vmem:[%s9610_s1 + $0x378] sm:$0xff]  ;;  %v1522_v18 = vld [vmem:[%s9610_s1 + $0x270] sm:$0xff] }
 0x13c   : > { %6905 = vmatpush3.msra.mxu1 %v1481_v48  ;;  %6871 = vmatprep.subr.mxu0 %v1464_v49  ;;  %v1554_v19 = vld [vmem:[%s9610_s1 + $0x370] sm:$0xff]  ;;  %v1537_v20 = vld [vmem:[%s9610_s1 + $0x2e8] sm:$0xff]  ;;  %v1536_v24 = vld [vmem:[%s9610_s1 + $0x2e0] sm:$0xff] }
 0x13d   : > { %6906 = vmatprep.subr.mxu1 %v1496_v50  ;;  %6872 = vmatpush3.msra.mxu0 %v1448_v52  ;;  %v1569_v21 = vld [vmem:[%s9610_s1 + $0x3e8] sm:$0xff]  ;;  %v1568_v25 = vld [vmem:[%s9610_s1 + $0x3e0] sm:$0xff]  ;;  %v1535_v28 = vld [vmem:[%s9610_s1 + $0x2d8] sm:$0xff] }
 0x13e   : > { %6907 = vmatpush3.msra.mxu1 %v1480_v53  ;;  %6873 = vmatprep.subr.mxu0 %v1463_v55  ;;  %v1521_v22 = vld [vmem:[%s9610_s1 + $0x268] sm:$0xff]  ;;  %v1520_v26 = vld [vmem:[%s9610_s1 + $0x260] sm:$0xff]  ;;  %v1567_v29 = vld [vmem:[%s9610_s1 + $0x3d8] sm:$0xff] }
 0x13f   : > { %6908 = vmatprep.subr.mxu1 %v1495_v56  ;;  %6874 = vmatpush3.msra.mxu0 %v1447_v58  ;;  %v1553_v23 = vld [vmem:[%s9610_s1 + $0x368] sm:$0xff]  ;;  %v1552_v27 = vld [vmem:[%s9610_s1 + $0x360] sm:$0xff]  ;;  %v1519_v30 = vld [vmem:[%s9610_s1 + $0x258] sm:$0xff] }
 0x140   : > { %6909 = vmatpush3.msra.mxu1 %v1479_v59  ;;  %6875 = vmatprep.subr.mxu0 %v1462_v60  ;;  %v1551_v31 = vld [vmem:[%s9610_s1 + $0x358] sm:$0xff]  ;;  %v1534_v32 = vld [vmem:[%s9610_s1 + $0x2d0] sm:$0xff]  ;;  %v1533_v36 = vld [vmem:[%s9610_s1 + $0x2c8] sm:$0xff] }
 0x141   : > { %6910 = vmatprep.subr.mxu1 %v1494_v61  ;;  %6876 = vmatpush3.msra.mxu0 %v1446_v63  ;;  %v1566_v33 = vld [vmem:[%s9610_s1 + $0x3d0] sm:$0xff]  ;;  %v1565_v37 = vld [vmem:[%s9610_s1 + $0x3c8] sm:$0xff]  ;;  %v1532_v40 = vld [vmem:[%s9610_s1 + $0x2c0] sm:$0xff] }
 0x142   : > { %6911 = vmatpush3.msra.mxu1 %v1478_v0  ;;  %6877 = vmatprep.subr.mxu0 %v1461_v1  ;;  %v1518_v34 = vld [vmem:[%s9610_s1 + $0x250] sm:$0xff]  ;;  %v1517_v38 = vld [vmem:[%s9610_s1 + $0x248] sm:$0xff]  ;;  %v1564_v41 = vld [vmem:[%s9610_s1 + $0x3c0] sm:$0xff] }
 0x143   : > { %6912 = vmatprep.subr.mxu1 %v1493_v2  ;;  %6878 = vmatpush3.msra.mxu0 %v1445_v4  ;;  %v1550_v35 = vld [vmem:[%s9610_s1 + $0x350] sm:$0xff]  ;;  %v1549_v39 = vld [vmem:[%s9610_s1 + $0x348] sm:$0xff]  ;;  %v1516_v43 = vld [vmem:[%s9610_s1 + $0x240] sm:$0xff] }
 0x144   : > { %6913 = vmatpush3.msra.mxu1 %v1477_v5  ;;  %6879 = vmatprep.subr.mxu0 %v1460_v6  ;;  %v1548_v44 = vld [vmem:[%s9610_s1 + $0x340] sm:$0xff]  ;;  %v1531_v45 = vld [vmem:[%s9610_s1 + $0x2b8] sm:$0xff]  ;;  %v1530_v49 = vld [vmem:[%s9610_s1 + $0x2b0] sm:$0xff] }
 0x145   : > { %6914 = vmatprep.subr.mxu1 %v1492_v7  ;;  %6880 = vmatpush3.msra.mxu0 %v1444_v9  ;;  %v1563_v46 = vld [vmem:[%s9610_s1 + $0x3b8] sm:$0xff]  ;;  %v1562_v50 = vld [vmem:[%s9610_s1 + $0x3b0] sm:$0xff]  ;;  %v1529_v54 = vld [vmem:[%s9610_s1 + $0x2a8] sm:$0xff] }
 0x146   : > { %1687 = vmatprep.mubr.f32.mxu0 %v1596_v8  ;;  %6915 = vmatpush3.msra.mxu1 %v1476_v10  ;;  %v1515_v47 = vld [vmem:[%s9610_s1 + $0x238] sm:$0xff]  ;;  %v1514_v52 = vld [vmem:[%s9610_s1 + $0x230] sm:$0xff]  ;;  %v1561_v55 = vld [vmem:[%s9610_s1 + $0x3a8] sm:$0xff] }
 0x147   : > { %1688 = vmatmul.mubr.f32.vlgmr.msra.gmra.mxu0 %v1588_v62  ;;  %1757 = vmatprep.mubr.f32.mxu1 %v1597_v11  ;;  %v1547_v48 = vld [vmem:[%s9610_s1 + $0x338] sm:$0xff]  ;;  %v1546_v53 = vld [vmem:[%s9610_s1 + $0x330] sm:$0xff]  ;;  %v1443_v56 = vld [vmem:[%s9611_s0 + $0x8] sm:$0xff]  ;;  %s6309_s0 = sshll.u32 %s8817_s29, 4 }
 0x148   : > { %6919 = vmatprep.subr.mxu0 %v1539_v12  ;;  %6954 = vmatprep.subr.mxu1 %v1571_v13  ;;  %v1513_v57 = vld [vmem:[%s9610_s1 + $0x228] sm:$0xff]  ;;  %v1528_v59 = vld [vmem:[%s9610_s1 + $0x2a0] sm:$0xff]  ;;  %v1598_v63 = vcombine.high %v1443_v56, %v1443_v56  ;;  %v1527_v0 = vld [vmem:[%s9610_s1 + $0x298] sm:$0xff]  ;;  %v1605_v6 = vrot.slane %v1443_v56, %v8524_v51 }
 0x149   : > { %1758 = vmatmul.mubr.f32.vlgmr.msra.gmra.mxu1 %v1595_v3  ;;  %6920 = vmatpush3.msra.mxu0 %v1523_v14  ;;  %v1545_v58 = vld [vmem:[%s9610_s1 + $0x328] sm:$0xff]  ;;  %v1560_v60 = vld [vmem:[%s9610_s1 + $0x3a0] sm:$0xff]  ;;  %v1559_v1 = vld [vmem:[%s9610_s1 + $0x398] sm:$0xff] }
 0x14a   : > { %6955 = vmatpush3.msra.mxu1 %v1555_v15  ;;  %6921 = vmatprep.subr.mxu0 %v1538_v16  ;;  %v1512_v61 = vld [vmem:[%s9610_s1 + $0x220] sm:$0xff]  ;;  %v1511_v2 = vld [vmem:[%s9610_s1 + $0x218] sm:$0xff]  ;;  %v1526_v4 = vld [vmem:[%s9610_s1 + $0x290] sm:$0xff]  ;;  %v1612_v9 = vrot.slane %v1598_v63, %v8524_v51  ;;  %v1613_v16 = vcombine.high %v1605_v6, %v1605_v6 }
 0x14b   : > { %6956 = vmatprep.subr.mxu1 %v1570_v17  ;;  %6922 = vmatpush3.msra.mxu0 %v1522_v18  ;;  %v1544_v62 = vld [vmem:[%s9610_s1 + $0x320] sm:$0xff]  ;;  %v1543_v3 = vld [vmem:[%s9610_s1 + $0x318] sm:$0xff]  ;;  %v1558_v5 = vld [vmem:[%s9610_s1 + $0x390] sm:$0xff] }
 0x14c   : > { %6957 = vmatpush3.msra.mxu1 %v1554_v19  ;;  %6923 = vmatprep.subr.mxu0 %v1537_v20  ;;  %v1510_v7 = vld [vmem:[%s9610_s1 + $0x210] sm:$0xff]  ;;  %v1525_v10 = vld [vmem:[%s9610_s1 + $0x288] sm:$0xff]  ;;  %v1524_v14 = vld [vmem:[%s9610_s1 + $0x280] sm:$0xff]  ;;  %v1614_v18 = vcombine.high %v1612_v9, %v1612_v9 }
 0x14d   : > { %6958 = vmatprep.subr.mxu1 %v1569_v21  ;;  %6924 = vmatpush3.msra.mxu0 %v1521_v22  ;;  %v1542_v8 = vld [vmem:[%s9610_s1 + $0x310] sm:$0xff]  ;;  %v1557_v11 = vld [vmem:[%s9610_s1 + $0x388] sm:$0xff]  ;;  %v1556_v15 = vld [vmem:[%s9610_s1 + $0x380] sm:$0xff] }
 0x14e   : > { %6959 = vmatpush3.msra.mxu1 %v1553_v23  ;;  %6925 = vmatprep.subr.mxu0 %v1536_v24  ;;  %v1509_v12 = vld [vmem:[%s9610_s1 + $0x208] sm:$0xff]  ;;  %v1508_v17 = vld [vmem:[%s9610_s1 + $0x200] sm:$0xff] }
 0x14f   : > { %6960 = vmatprep.subr.mxu1 %v1568_v25  ;;  %6926 = vmatpush3.msra.mxu0 %v1520_v26  ;;  %v1541_v13 = vld [vmem:[%s9610_s1 + $0x308] sm:$0xff]  ;;  %v1540_v19 = vld [vmem:[%s9610_s1 + $0x300] sm:$0xff]  ;;  %s9492_s1 = scalar_lea.vmem [#allocation3], %s6309_s0 }
 0x150   : > { %6961 = vmatpush3.msra.mxu1 %v1552_v27  ;;  %6927 = vmatprep.subr.mxu0 %v1535_v28  ;;  %v1922_v20 = vld [vmem:[%s9597_s4 + $0x48] sm:$0xff]  ;;  %v6311_v25 = vld [vmem:[%s9612_s2] ss:$0 sm:$0xff] }
 0x151   : > { %6962 = vmatprep.subr.mxu1 %v1567_v29  ;;  %6928 = vmatpush3.msra.mxu0 %v1519_v30  ;;  %v1925_v56 = vld [vmem:[%s9597_s4 + $0x60] sm:$0xff] }
 0x152   : > { %6963 = vmatpush3.msra.mxu1 %v1551_v31  ;;  %6929 = vmatprep.subr.mxu0 %v1534_v32  ;;  %v2343_v63 = vld [vmem:[%s8835_s12 + $0x1e0] sm:$0xff] }
 0x153   : > { %6964 = vmatprep.subr.mxu1 %v1566_v33  ;;  %6930 = vmatpush3.msra.mxu0 %v1518_v34 }
 0x154   : > { %6965 = vmatpush3.msra.mxu1 %v1550_v35  ;;  %6931 = vmatprep.subr.mxu0 %v1533_v36 }
 0x155   : > { %6966 = vmatprep.subr.mxu1 %v1565_v37  ;;  %6932 = vmatpush3.msra.mxu0 %v1517_v38 }
 0x156   : > { %6967 = vmatpush3.msra.mxu1 %v1549_v39  ;;  %6933 = vmatprep.subr.mxu0 %v1532_v40  ;;  %v1924_v40 = vld [vmem:[%s9597_s4 + $0x58] sm:$0xff] }
 0x157   : > { %6968 = vmatprep.subr.mxu1 %v1564_v41  ;;  %6934 = vmatpush3.msra.mxu0 %v1516_v43  ;;  %v1921_v41 = vld [vmem:[%s9597_s4 + $0x40] sm:$0xff]  ;;  %v1923_v43 = vld [vmem:[%s9597_s4 + $0x50] sm:$0xff] }
 0x158   : > { %6969 = vmatpush3.msra.mxu1 %v1548_v44  ;;  %6935 = vmatprep.subr.mxu0 %v1531_v45  ;;  %v1914_v44 = vld [vmem:[%s9597_s4 + $0x8] sm:$0xff]  ;;  %v1916_v45 = vld [vmem:[%s9597_s4 + $0x18] sm:$0xff] }
 0x159   : > { %6970 = vmatprep.subr.mxu1 %v1563_v46  ;;  %6936 = vmatpush3.msra.mxu0 %v1515_v47  ;;  %v1913_v46 = vld [vmem:[%s9597_s4] sm:$0xff]  ;;  %v1915_v47 = vld [vmem:[%s9597_s4 + $0x10] sm:$0xff] }
 0x15a   : > { %6971 = vmatpush3.msra.mxu1 %v1547_v48  ;;  %6937 = vmatprep.subr.mxu0 %v1530_v49  ;;  %v7232_v48 = vmov 0.0   ;;  %v1926_v49 = vld [vmem:[%s9597_s4 + $0x68] sm:$0xff] }
 0x15b   : > { %6972 = vmatprep.subr.mxu1 %v1562_v50  ;;  %6938 = vmatpush3.msra.mxu0 %v1514_v52  ;;  %v1928_v50 = vld [vmem:[%s9597_s4 + $0x78] sm:$0xff] }
 0x15c   : > { %6973 = vmatpush3.msra.mxu1 %v1546_v53  ;;  %6939 = vmatprep.subr.mxu0 %v1529_v54  ;;  %v1903_v53 = vld [vmem:[%s9596_s3] sm:$0x3] }
 0x15d   : > { %6974 = vmatprep.subr.mxu1 %v1561_v55  ;;  %6940 = vmatpush3.msra.mxu0 %v1513_v57  ;;  %v1927_v57 = vld [vmem:[%s9597_s4 + $0x70] sm:$0xff] }
 0x15e   : > { %6975 = vmatpush3.msra.mxu1 %v1545_v58  ;;  %6941 = vmatprep.subr.mxu0 %v1528_v59  ;;  %v1918_v59 = vld [vmem:[%s9597_s4 + $0x28] sm:$0xff] }
 0x15f   : > { %6976 = vmatprep.subr.mxu1 %v1560_v60  ;;  %6942 = vmatpush3.msra.mxu0 %v1512_v61  ;;  %v1920_v60 = vld [vmem:[%s9597_s4 + $0x38] sm:$0xff]  ;;  %v2339_v61 = vld [vmem:[%s8835_s12 + $0x1c0] sm:$0xff] }
 0x160   : > { %6977 = vmatpush3.msra.mxu1 %v1544_v62  ;;  %6943 = vmatprep.subr.mxu0 %v1527_v0  ;;  %v2467_v0 = vld [vmem:[%s8835_s12 + $0x5c0] sm:$0xff] }
 0x161   : > { %6978 = vmatprep.subr.mxu1 %v1559_v1  ;;  %6944 = vmatpush3.msra.mxu0 %v1511_v2  ;;  %v2471_v1 = vld [vmem:[%s8835_s12 + $0x5e0] sm:$0xff] }
 0x162   : > { %6979 = vmatpush3.msra.mxu1 %v1543_v3  ;;  %6945 = vmatprep.subr.mxu0 %v1526_v4  ;;  %v1917_v2 = vld [vmem:[%s9597_s4 + $0x20] sm:$0xff]  ;;  %v1919_v3 = vld [vmem:[%s9597_s4 + $0x30] sm:$0xff] }
 0x163   : > { %6980 = vmatprep.subr.mxu1 %v1558_v5  ;;  %6946 = vmatpush3.msra.mxu0 %v1510_v7  ;;  %v2331_v4 = vld [vmem:[%s8835_s12 + $0x180] sm:$0xff] }
 0x164   : > { %6981 = vmatpush3.msra.mxu1 %v1542_v8  ;;  %6947 = vmatprep.subr.mxu0 %v1525_v10  ;;  %v2335_v5 = vld [vmem:[%s8835_s12 + $0x1a0] sm:$0xff]  ;;  %v6373_v8 = vcombine.high %v2339_v61, %v2343_v63  ;;  %v6372_v10 = vcombine.low %v2339_v61, %v2343_v63 }
 0x165   : > { %6982 = vmatprep.subr.mxu1 %v1557_v11  ;;  %6948 = vmatpush3.msra.mxu0 %v1509_v12  ;;  %v2463_v7 = vld [vmem:[%s8835_s12 + $0x5a0] sm:$0xff]  ;;  %v6500_v11 = vcombine.low %v2467_v0, %v2471_v1  ;;  %v6365_v12 = vcombine.high %v2331_v4, %v2335_v5 }
 0x166   : > { %6983 = vmatpush3.msra.mxu1 %v1541_v13  ;;  %6949 = vmatprep.subr.mxu0 %v1524_v14  ;;  %v2323_v14 = vld [vmem:[%s8835_s12 + $0x140] sm:$0xff] }
 0x167   : > { %6984 = vmatprep.subr.mxu1 %v1556_v15  ;;  %6950 = vmatpush3.msra.mxu0 %v1508_v17  ;;  %v2327_v15 = vld [vmem:[%s8835_s12 + $0x160] sm:$0xff] }
 0x168   : > { %1827 = vmatprep.mubr.f32.mxu0 %v1613_v16  ;;  %6985 = vmatpush3.msra.mxu1 %v1540_v19  ;;  %v2451_v16 = vld [vmem:[%s8835_s12 + $0x540] sm:$0xff] }
 0x169   : > { %1897 = vmatprep.mubr.f32.mxu1 %v1614_v18  ;;  %1828 = vmatmul.mubr.f32.vlgmr.msra.gmra.mxu0 %v1605_v6  ;;  %v2459_v6 = vld [vmem:[%s8835_s12 + $0x580] sm:$0xff]  ;;  %v6364_v18 = vcombine.low %v2331_v4, %v2335_v5 }
 0x16a   : > { %1898 = vmatmul.mubr.f32.vlgmr.msra.gmra.mxu1 %v1612_v9  ;;  %2003 = vmatprep.subr.mxu0 %v1922_v20  ;;  %v6501_v9 = vcombine.high %v2467_v0, %v2471_v1  ;;  %v6493_v13 = vcombine.high %v2459_v6, %v2463_v7  ;;  %v2455_v17 = vld [vmem:[%s8835_s12 + $0x560] sm:$0xff]  ;;  %v6492_v19 = vcombine.low %v2459_v6, %v2463_v7 }
 0x16b   : > { %2074 = vmatprep.subr.mxu1 %v1924_v40  ;;  %2004 = vmatpush1.msra.mxu0 %v1921_v41  ;;  %v6357_v20 = vcombine.high %v2323_v14, %v2327_v15  ;;  %v2427_v40 = vld [vmem:[%s8835_s12 + $0x480] sm:$0xff] }
 0x16c   : > { %2075 = vmatpush1.msra.mxu1 %v1923_v43  ;;  %2005 = vmatprep.subr.mxu0 %v1914_v44  ;;  %v2431_v41 = vld [vmem:[%s8835_s12 + $0x4a0] sm:$0xff] }
 0x16d   : > { %2076 = vmatprep.subr.mxu1 %v1916_v45  ;;  %2006 = vmatpush1.msra.mxu0 %v1913_v46  ;;  %v6461_v46 = vcombine.high %v2427_v40, %v2431_v41  ;;  %v2403_v0 = vld [vmem:[%s8835_s12 + $0x3c0] sm:$0xff] }
 0x16e   : > { %2039 = vmatprep.mubr.f32.mxu0 %v7232_v48  ;;  %2077 = vmatpush1.msra.mxu1 %v1915_v47  ;;  %v2291_v47 = vld [vmem:[%s8835_s12 + $0x40] sm:$0xff] }
 0x16f   : > { %2110 = vmatprep.mubr.f32.mxu1 %v7232_v48  ;;  %2145 = vmatprep.subr.mxu0 %v1926_v49  ;;  %v2419_v49 = vld [vmem:[%s8835_s12 + $0x440] sm:$0xff] }
 0x170   : > { %2216 = vmatprep.subr.mxu1 %v1928_v50  ;;  %v2423_v50 = vld [vmem:[%s8835_s12 + $0x460] sm:$0xff] }
 0x171   : > { %v6452_v61 = vcombine.low %v2419_v49, %v2423_v50  ;;  %v2407_v1 = vld [vmem:[%s8835_s12 + $0x3e0] sm:$0xff] }
 0x172   : > { %v6437_v6 = vcombine.high %v2403_v0, %v2407_v1 }
 0x207   : > { %v6881_v21 = vpop.f32.mrf.mxu0 }
 0x209   : > { %v6916_v22 = vpop.f32.mrf.mxu1  ;;  %v6882_v23 = vpop.f32.mrf.mxu0 }
 0x20a   : > { %v6883_v24 = vadd.f32 %v6882_v23, %v6881_v21  ;;  %v6485_v21 = vcombine.high %v2451_v16, %v2455_v17  ;;  %v2319_v23 = vld [vmem:[%s8835_s12 + $0x120] sm:$0xff] }
 0x20b   : > { %v6917_v26 = vpop.f32.mrf.mxu1 }
 0x20c   : > { %v1690_v27 = vadd.f32 %v6883_v24, %v6311_v25  ;;  %v6918_v28 = vadd.f32 %v6917_v26, %v6916_v22  ;;  %v2315_v22 = vld [vmem:[%s8835_s12 + $0x100] sm:$0xff]  ;;  %v6356_v26 = vcombine.low %v2323_v14, %v2327_v15 }
 0x20d   : > { %v2443_v24 = vld [vmem:[%s8835_s12 + $0x500] sm:$0xff] }
 0x20e   : > { %v1760_v33 = vadd.f32 %v6918_v28, %v1690_v27  ;;  %v2447_v25 = vld [vmem:[%s8835_s12 + $0x520] sm:$0xff]  ;;  %v6484_v27 = vcombine.low %v2451_v16, %v2455_v17  ;;  %v6349_v28 = vcombine.high %v2315_v22, %v2319_v23 }
 0x20f   : > { %v2387_v16 = vld [vmem:[%s8835_s12 + $0x340] sm:$0xff] }
 0x210   : > { %v2391_v17 = vld [vmem:[%s8835_s12 + $0x360] sm:$0xff] }
 0x229   : > { %v6951_v29 = vpop.f32.mrf.mxu0 }
 0x22a   : > { %v6986_v30 = vpop.f32.mrf.mxu1 }
 0x22b   : > { %v6952_v31 = vpop.f32.mrf.mxu0 }
 0x22c   : > { %v6987_v32 = vpop.f32.mrf.mxu1  ;;  %v6953_v34 = vadd.f32 %v6952_v31, %v6951_v29  ;;  %v6477_v29 = vcombine.high %v2443_v24, %v2447_v25  ;;  %v2311_v31 = vld [vmem:[%s8835_s12 + $0xe0] sm:$0xff] }
 0x22d   : > { %v6988_v36 = vadd.f32 %v6987_v32, %v6986_v30  ;;  %v2307_v30 = vld [vmem:[%s8835_s12 + $0xc0] sm:$0xff] }
 0x22e   : > { %v1830_v35 = vadd.f32 %v6953_v34, %v1760_v33  ;;  %v2435_v32 = vld [vmem:[%s8835_s12 + $0x4c0] sm:$0xff]  ;;  %v6348_v34 = vcombine.low %v2315_v22, %v2319_v23  ;;  %v6340_v43 = vcombine.low %v2307_v30, %v2311_v31  ;;  %v6421_v22 = vcombine.high %v2387_v16, %v2391_v17 }
 0x22f   : > { %v2439_v33 = vld [vmem:[%s8835_s12 + $0x4e0] sm:$0xff] }
 0x230   : > { %v1900_v37 = vadd.f32 %v6988_v36, %v1830_v35  ;;  %v6476_v35 = vcombine.low %v2443_v24, %v2447_v25  ;;  %v6341_v36 = vcombine.high %v2307_v30, %v2311_v31  ;;  %v6468_v44 = vcombine.low %v2435_v32, %v2439_v33  ;;  %v2379_v24 = vld [vmem:[%s8835_s12 + $0x300] sm:$0xff] }
 0x231   : > { %v2383_v25 = vld [vmem:[%s8835_s12 + $0x320] sm:$0xff] }
 0x232   : > { %v1904_v38 = vmul.f32 0.5, %v1900_v37  ;;  %2268 = vst.msk [vmem:[#allocation5] sm:$0x3] %vm2267_vm0, %v1900_v37  ;;  %v6413_v30 = vcombine.high %v2379_v24, %v2383_v25 }
 0x234   : > { %v1905_v39 = vmul.f32 1.442695, %v1904_v38  ;;  %v2299_v38 = vld [vmem:[%s8835_s12 + $0x80] sm:$0xff] }
 0x236   : > { %7054 = vpow2.f32 %v1905_v39  ;;  %v2303_v39 = vld [vmem:[%s8835_s12 + $0xa0] sm:$0xff] }
 0x237   : > { %v6333_v45 = vcombine.high %v2299_v38, %v2303_v39 }
 0x243   : > { %v7055_v52 = vpop.eup %7054 }
 0x244   : > { %1908 = vrot.lane.b32.xlu0 %v7055_v52, %s7233_s25  ;;  %v6332_v52 = vcombine.low %v2299_v38, %v2303_v39 }
 0x248   : > { %2270 = vrot.lane.b32.xlu0 %v1900_v37, %s7233_s25  ;;  %s9184_s25 = scalar_lea.vmem %s9600_s7, %s9619_s16 }
 0x2b6   : > { %v1909_v54 = vpop.permute.xlu0 %1908 }
 0x2b7   : > { %v1911_v55 = vmul.f32 %v1909_v54, %v1903_v53  ;;  %v6460_v53 = vcombine.low %v2427_v40, %v2431_v41  ;;  %v2363_v40 = vld [vmem:[%s8835_s12 + $0x280] sm:$0xff] }
 0x2b8   : > { %v2367_v41 = vld [vmem:[%s8835_s12 + $0x2a0] sm:$0xff] }
 0x2b9   : > { %v1912_v58 = vadd.f32 %v1911_v55, %v1900_v37  ;;  %v6469_v37 = vcombine.high %v2435_v32, %v2439_v33  ;;  %v6453_v55 = vcombine.high %v2419_v49, %v2423_v50  ;;  %v2371_v32 = vld [vmem:[%s8835_s12 + $0x2c0] sm:$0xff]  ;;  %v6396_v49 = vcombine.low %v2363_v40, %v2367_v41 }
 0x2ba   : > { %v2271_v62 = vpop.permute.xlu0 %2270  ;;  %v2375_v33 = vld [vmem:[%s8835_s12 + $0x2e0] sm:$0xff] }
 0x2bb   : > { %2273 = vst.msk [vmem:[#allocation7] sm:$0x3] %vm2267_vm0, %v2271_v62  ;;  %2274 = vst.msk [vmem:[#allocation8] sm:$0x3] %vm2267_vm0, %v1912_v58  ;;  %6312 = vmatmul.mubr.msk.f32.vlgmr.msra.gmra.mxu0 %vm1971_vm1, %v1912_v58  ;;  %6313 = vmatmul.mubr.msk.f32.vlgmr.msra.gmra.mxu1 %vm1971_vm1, %v1912_v58  ;;  %v6405_v38 = vcombine.high %v2371_v32, %v2375_v33 }
 0x2bc   : > { %2146 = vmatpush1.msra.mxu0 %v1925_v56  ;;  %2217 = vmatpush1.msra.mxu1 %v1927_v57  ;;  %v2283_v56 = vld [vmem:[%s8835_s12] sm:$0xff] }
 0x2bd   : > { %2147 = vmatprep.subr.mxu0 %v1918_v59  ;;  %2218 = vmatprep.subr.mxu1 %v1920_v60  ;;  %v2287_v57 = vld [vmem:[%s8835_s12 + $0x20] sm:$0xff] }
 0x2be   : > { %2148 = vmatpush1.msra.mxu0 %v1917_v2  ;;  %2181 = vmatprep.mubr.f32.mxu0 %v7232_v48  ;;  %v2415_v59 = vld [vmem:[%s8835_s12 + $0x420] sm:$0xff]  ;;  %v6317_v62 = vcombine.high %v2283_v56, %v2287_v57  ;;  %v6316_v4 = vcombine.low %v2283_v56, %v2287_v57 }
 0x2bf   : > { %2219 = vmatpush1.msra.mxu1 %v1919_v3  ;;  %2252 = vmatprep.mubr.f32.mxu1 %v7232_v48  ;;  %v2295_v48 = vld [vmem:[%s8835_s12 + $0x60] sm:$0xff] }
 0x2c0   : > { %6314 = vmatmul.mubr.msk.f32.vlgmr.msra.gmra.mxu0 %vm1971_vm1, %v1912_v58  ;;  %6315 = vmatmul.mubr.msk.f32.vlgmr.msra.gmra.mxu1 %vm1971_vm1, %v1912_v58  ;;  %v6325_v54 = vcombine.high %v2291_v47, %v2295_v48  ;;  %v2411_v58 = vld [vmem:[%s8835_s12 + $0x400] sm:$0xff]  ;;  %v6324_v60 = vcombine.low %v2291_v47, %v2295_v48  ;;  %v6397_v47 = vcombine.high %v2363_v40, %v2367_v41 }
 0x2c1   : > { %5397 = vmatprep.subr.bf16.mxu0 %v6373_v8  ;;  %5438 = vmatprep.subr.bf16.mxu1 %v6501_v9  ;;  %v6445_v63 = vcombine.high %v2411_v58, %v2415_v59  ;;  %v2531_v2 = vld [vmem:[%s8835_s12 + $0x7c0] sm:$0xff]  ;;  %v6444_v5 = vcombine.low %v2411_v58, %v2415_v59 }
 0x2c2   : > { %5398 = vmatpush1.bf16.msra.mxu0 %v6372_v10  ;;  %5439 = vmatpush1.bf16.msra.mxu1 %v6500_v11  ;;  %v2535_v3 = vld [vmem:[%s8835_s12 + $0x7e0] sm:$0xff] }
 0x2c3   : > { %5399 = vmatprep.subr.bf16.mxu0 %v6365_v12  ;;  %5440 = vmatprep.subr.bf16.mxu1 %v6493_v13  ;;  %v6565_v7 = vcombine.high %v2531_v2, %v2535_v3  ;;  %v2395_v8 = vld [vmem:[%s8835_s12 + $0x380] sm:$0xff]  ;;  %v6436_v12 = vcombine.low %v2403_v0, %v2407_v1  ;;  %v6564_v13 = vcombine.low %v2531_v2, %v2535_v3 }
 0x2c4   : > { %v2399_v9 = vld [vmem:[%s8835_s12 + $0x3a0] sm:$0xff] }
 0x2c5   : > { %v2523_v10 = vld [vmem:[%s8835_s12 + $0x780] sm:$0xff]  ;;  %v6429_v14 = vcombine.high %v2395_v8, %v2399_v9 }
 0x2c6   : > { %5400 = vmatpush1.bf16.msra.mxu0 %v6364_v18  ;;  %5441 = vmatpush1.bf16.msra.mxu1 %v6492_v19  ;;  %v2527_v11 = vld [vmem:[%s8835_s12 + $0x7a0] sm:$0xff] }
 0x2c7   : > { %5401 = vmatprep.subr.bf16.mxu0 %v6357_v20  ;;  %5442 = vmatprep.subr.bf16.mxu1 %v6485_v21  ;;  %v6557_v15 = vcombine.high %v2523_v10, %v2527_v11  ;;  %v2515_v18 = vld [vmem:[%s8835_s12 + $0x740] sm:$0xff]  ;;  %v6428_v20 = vcombine.low %v2395_v8, %v2399_v9  ;;  %v6556_v21 = vcombine.low %v2523_v10, %v2527_v11 }
 0x2c8   : > { %v2519_v19 = vld [vmem:[%s8835_s12 + $0x760] sm:$0xff] }
 0x2c9   : > { %v6549_v23 = vcombine.high %v2515_v18, %v2519_v19  ;;  %v2487_v56 = vld [vmem:[%s8835_s12 + $0x660] sm:$0xff] }
 0x2ca   : > { %5402 = vmatpush1.bf16.msra.mxu0 %v6356_v26  ;;  %5443 = vmatpush1.bf16.msra.mxu1 %v6484_v27  ;;  %v2507_v26 = vld [vmem:[%s8835_s12 + $0x700] sm:$0xff] }
 0x2cb   : > { %5403 = vmatprep.subr.bf16.mxu0 %v6349_v28  ;;  %5444 = vmatprep.subr.bf16.mxu1 %v6477_v29  ;;  %v2511_v27 = vld [vmem:[%s8835_s12 + $0x720] sm:$0xff]  ;;  %v6420_v28 = vcombine.low %v2387_v16, %v2391_v17  ;;  %v6548_v29 = vcombine.low %v2515_v18, %v2519_v19  ;;  %v1945_v16 = vsub.s32 3, %v8497_v42 }
 0x2cc   : > { %v6541_v31 = vcombine.high %v2507_v26, %v2511_v27  ;;  %v2479_v0 = vld [vmem:[%s8835_s12 + $0x620] sm:$0xff] }
 0x2cd   : > { %v2727_v8 = vld [vmem:[%s8835_s12 + $0xde0] sm:$0xff] }
 0x2ce   : > { %5404 = vmatpush1.bf16.msra.mxu0 %v6348_v34  ;;  %5445 = vmatpush1.bf16.msra.mxu1 %v6476_v35  ;;  %v2499_v34 = vld [vmem:[%s8835_s12 + $0x6c0] sm:$0xff] }
 0x2cf   : > { %5405 = vmatprep.subr.bf16.mxu0 %v6341_v36  ;;  %5446 = vmatprep.subr.bf16.mxu1 %v6469_v37  ;;  %v2503_v35 = vld [vmem:[%s8835_s12 + $0x6e0] sm:$0xff]  ;;  %v6412_v36 = vcombine.low %v2379_v24, %v2383_v25  ;;  %v6540_v37 = vcombine.low %v2507_v26, %v2511_v27  ;;  %v1961_v24 = vsub.s32 7, %v8497_v42 }
 0x2d0   : > { %v6533_v39 = vcombine.high %v2499_v34, %v2503_v35 }
 0x2d2   : > { %5406 = vmatpush1.bf16.msra.mxu0 %v6340_v43  ;;  %5447 = vmatpush1.bf16.msra.mxu1 %v6468_v44  ;;  %v2491_v43 = vld [vmem:[%s8835_s12 + $0x680] sm:$0xff] }
 0x2d3   : > { %5407 = vmatprep.subr.bf16.mxu0 %v6333_v45  ;;  %5448 = vmatprep.subr.bf16.mxu1 %v6461_v46  ;;  %v2495_v44 = vld [vmem:[%s8835_s12 + $0x6a0] sm:$0xff]  ;;  %v6404_v45 = vcombine.low %v2371_v32, %v2375_v33  ;;  %v6532_v46 = vcombine.low %v2499_v34, %v2503_v35 }
 0x2d4   : > { %v6525_v48 = vcombine.high %v2491_v43, %v2495_v44  ;;  %v6524_v50 = vcombine.low %v2491_v43, %v2495_v44 }
 0x2d6   : > { %5408 = vmatpush1.bf16.msra.mxu0 %v6332_v52  ;;  %5449 = vmatpush1.bf16.msra.mxu1 %v6460_v53  ;;  %v2355_v52 = vld [vmem:[%s8835_s12 + $0x240] sm:$0xff] }
 0x2d7   : > { %5409 = vmatprep.subr.bf16.mxu0 %v6325_v54  ;;  %5450 = vmatprep.subr.bf16.mxu1 %v6453_v55  ;;  %v2359_v53 = vld [vmem:[%s8835_s12 + $0x260] sm:$0xff] }
 0x2d8   : > { %v2483_v54 = vld [vmem:[%s8835_s12 + $0x640] sm:$0xff]  ;;  %v6389_v55 = vcombine.high %v2355_v52, %v2359_v53  ;;  %v6388_v57 = vcombine.low %v2355_v52, %v2359_v53 }
 0x2d9   : > { %v6516_v58 = vcombine.low %v2483_v54, %v2487_v56  ;;  %v6517_v59 = vcombine.high %v2483_v54, %v2487_v56  ;;  %v2583_v56 = vld [vmem:[%s8835_s12 + $0x960] sm:$0xff] }
 0x2da   : > { %5410 = vmatpush1.bf16.msra.mxu0 %v6324_v60  ;;  %5451 = vmatpush1.bf16.msra.mxu1 %v6452_v61  ;;  %v2347_v60 = vld [vmem:[%s8835_s12 + $0x200] sm:$0xff] }
 0x2db   : > { %5411 = vmatprep.subr.bf16.mxu0 %v6317_v62  ;;  %5452 = vmatprep.subr.bf16.mxu1 %v6445_v63  ;;  %v2351_v61 = vld [vmem:[%s8835_s12 + $0x220] sm:$0xff] }
 0x2dc   : > { %v2475_v62 = vld [vmem:[%s8835_s12 + $0x600] sm:$0xff]  ;;  %v6381_v63 = vcombine.high %v2347_v60, %v2351_v61  ;;  %v6380_v1 = vcombine.low %v2347_v60, %v2351_v61 }
 0x2dd   : > { %v6508_v2 = vcombine.low %v2475_v62, %v2479_v0  ;;  %v6509_v3 = vcombine.high %v2475_v62, %v2479_v0 }
 0x2de   : > { %5412 = vmatpush1.bf16.msra.mxu0 %v6316_v4  ;;  %5453 = vmatpush1.bf16.msra.mxu1 %v6444_v5  ;;  %v2595_v4 = vld [vmem:[%s8835_s12 + $0x9c0] sm:$0xff] }
 0x2df   : > { %5413 = vmatprep.subr.bf16.mxu0 %v6437_v6  ;;  %5454 = vmatprep.subr.bf16.mxu1 %v6565_v7  ;;  %v2599_v5 = vld [vmem:[%s8835_s12 + $0x9e0] sm:$0xff] }
 0x2e0   : > { %v2723_v6 = vld [vmem:[%s8835_s12 + $0xdc0] sm:$0xff]  ;;  %v6629_v7 = vcombine.high %v2595_v4, %v2599_v5  ;;  %v6628_v9 = vcombine.low %v2595_v4, %v2599_v5 }
 0x2e1   : > { %v6756_v10 = vcombine.low %v2723_v6, %v2727_v8  ;;  %v6757_v11 = vcombine.high %v2723_v6, %v2727_v8  ;;  %v2575_v4 = vld [vmem:[%s8835_s12 + $0x920] sm:$0xff] }
 0x2e2   : > { %5414 = vmatpush2.bf16.msra.mxu0 %v6436_v12  ;;  %5455 = vmatpush2.bf16.msra.mxu1 %v6564_v13  ;;  %v1933_v12 = vsub.s32 0, %v8497_v42  ;;  %v1941_v13 = vsub.s32 2, %v8497_v42  ;;  %v2699_v5 = vld [vmem:[%s8835_s12 + $0xd00] sm:$0xff] }
 0x2e3   : > { %5415 = vmatprep.subr.bf16.mxu0 %v6429_v14  ;;  %5456 = vmatprep.subr.bf16.mxu1 %v6557_v15  ;;  %v8922_v14 = vld [vmem:[%s9598_s5] sm:$0xff]  ;;  %v1937_v15 = vsub.s32 1, %v8497_v42 }
 0x2e4   : > { %v1934_v17 = vrot.slane %v8922_v14, %v1933_v12  ;;  %v1942_v18 = vrot.slane %v8922_v14, %v1941_v13  ;;  %v1962_v35 = vrot.slane %v8922_v14, %v1961_v24  ;;  %v2703_v6 = vld [vmem:[%s8835_s12 + $0xd20] sm:$0xff] }
 0x2e5   : > { %v1938_v19 = vrot.slane %v8922_v14, %v1937_v15 }
 0x2e6   : > { %5416 = vmatpush2.bf16.msra.mxu0 %v6428_v20  ;;  %5457 = vmatpush2.bf16.msra.mxu1 %v6556_v21  ;;  %v1946_v20 = vrot.slane %v8922_v14, %v1945_v16 }
 0x2e7   : > { %5417 = vmatprep.subr.bf16.mxu0 %v6421_v22  ;;  %5458 = vmatprep.subr.bf16.mxu1 %v6549_v23  ;;  %v1953_v23 = vsub.s32 5, %v8497_v42 }
 0x2e9   : > { %v1954_v34 = vrot.slane %v8922_v14, %v1953_v23 }
 0x2ea   : > { %5418 = vmatpush2.bf16.msra.mxu0 %v6420_v28  ;;  %5459 = vmatpush2.bf16.msra.mxu1 %v6548_v29 }
 0x2eb   : > { %5419 = vmatprep.subr.bf16.mxu0 %v6413_v30  ;;  %5460 = vmatprep.subr.bf16.mxu1 %v6541_v31  ;;  %v2587_v31 = vld [vmem:[%s8835_s12 + $0x980] sm:$0xff] }
 0x2ee   : > { %5420 = vmatpush2.bf16.msra.mxu0 %v6412_v36  ;;  %5461 = vmatpush2.bf16.msra.mxu1 %v6540_v37  ;;  %v2591_v36 = vld [vmem:[%s8835_s12 + $0x9a0] sm:$0xff] }
 0x2ef   : > { %5421 = vmatprep.subr.bf16.mxu0 %v6405_v38  ;;  %5462 = vmatprep.subr.bf16.mxu1 %v6533_v39  ;;  %v2715_v37 = vld [vmem:[%s8835_s12 + $0xd80] sm:$0xff]  ;;  %v6620_v61 = vcombine.low %v2587_v31, %v2591_v36 }
 0x2f0   : > { %v2719_v38 = vld [vmem:[%s8835_s12 + $0xda0] sm:$0xff] }
 0x2f1   : > { %v6748_v62 = vcombine.low %v2715_v37, %v2719_v38 }
 0x2f2   : > { %5422 = vmatpush2.bf16.msra.mxu0 %v6404_v45  ;;  %5463 = vmatpush2.bf16.msra.mxu1 %v6532_v46 }
 0x2f3   : > { %5423 = vmatprep.subr.bf16.mxu0 %v6397_v47  ;;  %5464 = vmatprep.subr.bf16.mxu1 %v6525_v48  ;;  %v6621_v48 = vcombine.high %v2587_v31, %v2591_v36  ;;  %v2675_v36 = vld [vmem:[%s8835_s12 + $0xc40] sm:$0xff] }
 0x2f6   : > { %5424 = vmatpush2.bf16.msra.mxu0 %v6396_v49  ;;  %5465 = vmatpush2.bf16.msra.mxu1 %v6524_v50  ;;  %v6749_v49 = vcombine.high %v2715_v37, %v2719_v38  ;;  %v2679_v37 = vld [vmem:[%s8835_s12 + $0xc60] sm:$0xff] }
 0x2f7   : > { %5425 = vmatprep.subr.bf16.mxu0 %v6389_v55  ;;  %5466 = vmatprep.subr.bf16.mxu1 %v6517_v59  ;;  %v2579_v55 = vld [vmem:[%s8835_s12 + $0x940] sm:$0xff] }
 0x2fa   : > { %5426 = vmatpush2.bf16.msra.mxu0 %v6388_v57  ;;  %5467 = vmatpush2.bf16.msra.mxu1 %v6516_v58  ;;  %v2707_v57 = vld [vmem:[%s8835_s12 + $0xd40] sm:$0xff] }
 0x2fb   : > { %5427 = vmatprep.subr.bf16.mxu0 %v6381_v63  ;;  %5468 = vmatprep.subr.bf16.mxu1 %v6509_v3  ;;  %v2711_v58 = vld [vmem:[%s8835_s12 + $0xd60] sm:$0xff]  ;;  %v6613_v63 = vcombine.high %v2579_v55, %v2583_v56 }
 0x2fc   : > { %v2571_v3 = vld [vmem:[%s8835_s12 + $0x900] sm:$0xff]  ;;  %v6740_v8 = vcombine.low %v2707_v57, %v2711_v58 }
 0x2fe   : > { %5428 = vmatpush2.bf16.msra.mxu0 %v6380_v1  ;;  %5469 = vmatpush2.bf16.msra.mxu1 %v6508_v2  ;;  %v6741_v2 = vcombine.high %v2707_v57, %v2711_v58  ;;  %v2659_v58 = vld [vmem:[%s8835_s12 + $0xbc0] sm:$0xff] }
 0x2ff   : > { %5479 = vmatprep.subr.bf16.mxu0 %v6629_v7  ;;  %5520 = vmatprep.subr.bf16.mxu1 %v6757_v11  ;;  %v6612_v7 = vcombine.low %v2579_v55, %v2583_v56  ;;  %v2563_v11 = vld [vmem:[%s8835_s12 + $0x8c0] sm:$0xff]  ;;  %v6708_v55 = vcombine.low %v2675_v36, %v2679_v37 }
 0x37b   : > { %v2041_v21 = vpop.f32.mrf.mxu0  ;;  %v2112_v22 = vpop.f32.mrf.mxu1 }
 0x37c   : > { %v2042_v25 = vadd.f32 %v2041_v21, %v1934_v17  ;;  %v2113_v26 = vadd.f32 %v2112_v22, %v1942_v18  ;;  %v2567_v17 = vld [vmem:[%s8835_s12 + $0x8e0] sm:$0xff]  ;;  %v6732_v21 = vcombine.low %v2699_v5, %v2703_v6 }
 0x37d   : > { %v2043_v27 = vpop.f32.mrf.mxu0  ;;  %v2114_v28 = vpop.f32.mrf.mxu1  ;;  %v2691_v18 = vld [vmem:[%s8835_s12 + $0xcc0] sm:$0xff]  ;;  %v6597_v22 = vcombine.high %v2563_v11, %v2567_v17 }
 0x37e   : > { %v2044_v29 = vadd.f32 %v2043_v27, %v1938_v19  ;;  %v2115_v30 = vadd.f32 %v2114_v28, %v1946_v20  ;;  %v2259_v32 = vmax.f32 %v2042_v25, 0.0  ;;  %v2261_v33 = vmax.f32 %v2113_v26, 0.0  ;;  %v2695_v19 = vld [vmem:[%s8835_s12 + $0xce0] sm:$0xff] }
 0x37f   : > { %v6604_v20 = vcombine.low %v2571_v3, %v2575_v4  ;;  %v6725_v25 = vcombine.high %v2691_v18, %v2695_v19  ;;  %v2555_v26 = vld [vmem:[%s8835_s12 + $0x880] sm:$0xff]  ;;  %v6724_v31 = vcombine.low %v2691_v18, %v2695_v19 }
 0x380   : > { %v2260_v39 = vmax.f32 %v2044_v29, 0.0  ;;  %v2262_v40 = vmax.f32 %v2115_v30, 0.0  ;;  %v8950_v41 = vpop.f32.mrf.mxu0  ;;  %v8952_v43 = vpop.f32.mrf.mxu1  ;;  %v8958_v50 = vpack.c.bf16 %v2259_v32, %v2259_v32  ;;  %v8960_v52 = vpack.c.bf16 %v2261_v33, %v2261_v33  ;;  %v2559_v27 = vld [vmem:[%s8835_s12 + $0x8a0] sm:$0xff] }
 0x381   : > { %v2683_v28 = vld [vmem:[%s8835_s12 + $0xc80] sm:$0xff]  ;;  %v6596_v30 = vcombine.low %v2563_v11, %v2567_v17  ;;  %v6589_v32 = vcombine.high %v2555_v26, %v2559_v27  ;;  %v6588_v38 = vcombine.low %v2555_v26, %v2559_v27 }
 0x382   : > { %v8954_v44 = vpack.c.bf16 %v2260_v39, %v2260_v39  ;;  %v8956_v45 = vpack.c.bf16 %v2262_v40, %v2262_v40  ;;  %v2185_v46 = vpop.f32.mrf.mxu0  ;;  %v2256_v47 = vpop.f32.mrf.mxu1  ;;  %v2687_v29 = vld [vmem:[%s8835_s12 + $0xca0] sm:$0xff] }
 0x383   : > { %v2186_v53 = vadd.f32 %v2185_v46, %v1954_v34  ;;  %v2257_v54 = vadd.f32 %v2256_v47, %v1962_v35  ;;  %v6717_v33 = vcombine.high %v2683_v28, %v2687_v29  ;;  %v2547_v34 = vld [vmem:[%s8835_s12 + $0x840] sm:$0xff]  ;;  %v6716_v39 = vcombine.low %v2683_v28, %v2687_v29 }
 0x384   : > { %5429 = vmatprep.mubr.bf16.mxu0 %v8954_v44  ;;  %5470 = vmatprep.mubr.bf16.mxu1 %v8956_v45  ;;  %v2551_v35 = vld [vmem:[%s8835_s12 + $0x860] sm:$0xff]  ;;  %v6709_v46 = vcombine.high %v2675_v36, %v2679_v37 }
 0x385   : > { %v2264_v59 = vmax.f32 %v2186_v53, 0.0  ;;  %v2266_v60 = vmax.f32 %v2257_v54, 0.0  ;;  %5430 = vmatmul.mubr.bf16.vlgmr.msra.gmra.mxu0 %v8958_v50  ;;  %5471 = vmatmul.mubr.bf16.vlgmr.msra.gmra.mxu1 %v8960_v52  ;;  %v6581_v40 = vcombine.high %v2547_v34, %v2551_v35  ;;  %v2539_v47 = vld [vmem:[%s8835_s12 + $0x800] sm:$0xff]  ;;  %v6580_v54 = vcombine.low %v2547_v34, %v2551_v35 }
 0x386   : > { %5480 = vmatpush1.bf16.msra.mxu0 %v6628_v9  ;;  %5521 = vmatpush1.bf16.msra.mxu1 %v6756_v10  ;;  %v6605_v9 = vcombine.high %v2571_v3, %v2575_v4  ;;  %v6733_v10 = vcombine.high %v2699_v5, %v2703_v6  ;;  %v2671_v53 = vld [vmem:[%s8835_s12 + $0xc20] sm:$0xff] }
 0x387   : > { %v8970_v0 = vpack.c.bf16 %v2264_v59, %v2264_v59  ;;  %v8972_v1 = vpack.c.bf16 %v2266_v60, %v2266_v60  ;;  %5481 = vmatprep.subr.bf16.mxu0 %v6621_v48  ;;  %5522 = vmatprep.subr.bf16.mxu1 %v6749_v49  ;;  %v2543_v48 = vld [vmem:[%s8835_s12 + $0x820] sm:$0xff] }
 0x388   : > { %v2667_v49 = vld [vmem:[%s8835_s12 + $0xc00] sm:$0xff]  ;;  %v6573_v56 = vcombine.high %v2539_v47, %v2543_v48 }
 0x389   : > { %5511 = vmatprep.mubr.bf16.mxu0 %v8970_v0  ;;  %5552 = vmatprep.mubr.bf16.mxu1 %v8972_v1  ;;  %v6701_v57 = vcombine.high %v2667_v49, %v2671_v53  ;;  %v2663_v59 = vld [vmem:[%s8835_s12 + $0xbe0] sm:$0xff] }
 0x38a   : > { %5482 = vmatpush1.bf16.msra.mxu0 %v6620_v61  ;;  %5523 = vmatpush1.bf16.msra.mxu1 %v6748_v62  ;;  %v2787_v60 = vld [vmem:[%s8835_s12 + $0xfc0] sm:$0xff]  ;;  %v6572_v62 = vcombine.low %v2539_v47, %v2543_v48 }
 0x38b   : > { %5483 = vmatprep.subr.bf16.mxu0 %v6613_v63  ;;  %5524 = vmatprep.subr.bf16.mxu1 %v6741_v2  ;;  %v2791_v61 = vld [vmem:[%s8835_s12 + $0xfe0] sm:$0xff]  ;;  %v6700_v63 = vcombine.low %v2667_v49, %v2671_v53  ;;  %v6693_v2 = vcombine.high %v2659_v58, %v2663_v59 }
 0x38c   : > { %v6821_v3 = vcombine.high %v2787_v60, %v2791_v61  ;;  %v2651_v4 = vld [vmem:[%s8835_s12 + $0xb80] sm:$0xff] }
 0x38d   : > { %v2655_v5 = vld [vmem:[%s8835_s12 + $0xba0] sm:$0xff] }
 0x38e   : > { %5484 = vmatpush1.bf16.msra.mxu0 %v6612_v7  ;;  %5525 = vmatpush1.bf16.msra.mxu1 %v6740_v8  ;;  %v2779_v6 = vld [vmem:[%s8835_s12 + $0xf80] sm:$0xff]  ;;  %v6692_v8 = vcombine.low %v2659_v58, %v2663_v59  ;;  %v1957_v58 = vsub.s32 6, %v8497_v42 }
 0x38f   : > { %5485 = vmatprep.subr.bf16.mxu0 %v6605_v9  ;;  %5526 = vmatprep.subr.bf16.mxu1 %v6733_v10  ;;  %v2783_v7 = vld [vmem:[%s8835_s12 + $0xfa0] sm:$0xff]  ;;  %v6820_v9 = vcombine.low %v2787_v60, %v2791_v61  ;;  %v6685_v10 = vcombine.high %v2651_v4, %v2655_v5 }
 0x390   : > { %v6813_v11 = vcombine.high %v2779_v6, %v2783_v7  ;;  %v2643_v17 = vld [vmem:[%s8835_s12 + $0xb40] sm:$0xff] }
 0x391   : > { %v2647_v18 = vld [vmem:[%s8835_s12 + $0xb60] sm:$0xff] }
 0x392   : > { %5486 = vmatpush1.bf16.msra.mxu0 %v6604_v20  ;;  %5527 = vmatpush1.bf16.msra.mxu1 %v6732_v21  ;;  %v2771_v19 = vld [vmem:[%s8835_s12 + $0xf40] sm:$0xff]  ;;  %v6684_v21 = vcombine.low %v2651_v4, %v2655_v5 }
 0x393   : > { %5487 = vmatprep.subr.bf16.mxu0 %v6597_v22  ;;  %5528 = vmatprep.subr.bf16.mxu1 %v6725_v25  ;;  %v2775_v20 = vld [vmem:[%s8835_s12 + $0xf60] sm:$0xff]  ;;  %v6812_v22 = vcombine.low %v2779_v6, %v2783_v7  ;;  %v6677_v25 = vcombine.high %v2643_v17, %v2647_v18  ;;  %v1958_v6 = vrot.slane %v8922_v14, %v1957_v58 }
 0x394   : > { %v6805_v26 = vcombine.high %v2771_v19, %v2775_v20  ;;  %v2635_v27 = vld [vmem:[%s8835_s12 + $0xb00] sm:$0xff] }
 0x395   : > { %v2639_v28 = vld [vmem:[%s8835_s12 + $0xb20] sm:$0xff] }
 0x396   : > { %5488 = vmatpush1.bf16.msra.mxu0 %v6596_v30  ;;  %5529 = vmatpush1.bf16.msra.mxu1 %v6724_v31  ;;  %v2763_v29 = vld [vmem:[%s8835_s12 + $0xf00] sm:$0xff]  ;;  %v6676_v31 = vcombine.low %v2643_v17, %v2647_v18 }
 0x397   : > { %5489 = vmatprep.subr.bf16.mxu0 %v6589_v32  ;;  %5530 = vmatprep.subr.bf16.mxu1 %v6717_v33  ;;  %v2767_v30 = vld [vmem:[%s8835_s12 + $0xf20] sm:$0xff]  ;;  %v6804_v32 = vcombine.low %v2771_v19, %v2775_v20  ;;  %v6669_v33 = vcombine.high %v2635_v27, %v2639_v28 }
 0x398   : > { %v6797_v34 = vcombine.high %v2763_v29, %v2767_v30  ;;  %v2627_v35 = vld [vmem:[%s8835_s12 + $0xac0] sm:$0xff] }
 0x399   : > { %v2631_v36 = vld [vmem:[%s8835_s12 + $0xae0] sm:$0xff] }
 0x39a   : > { %5490 = vmatpush1.bf16.msra.mxu0 %v6588_v38  ;;  %5531 = vmatpush1.bf16.msra.mxu1 %v6716_v39  ;;  %v2755_v37 = vld [vmem:[%s8835_s12 + $0xec0] sm:$0xff]  ;;  %v6668_v39 = vcombine.low %v2635_v27, %v2639_v28  ;;  %v2468_v27 = vld [vmem:[%s8835_s12 + $0x5c8] sm:$0xff] }
 0x39b   : > { %5491 = vmatprep.subr.bf16.mxu0 %v6581_v40  ;;  %5532 = vmatprep.subr.bf16.mxu1 %v6709_v46  ;;  %v2759_v38 = vld [vmem:[%s8835_s12 + $0xee0] sm:$0xff]  ;;  %v6796_v40 = vcombine.low %v2763_v29, %v2767_v30  ;;  %v6661_v46 = vcombine.high %v2627_v35, %v2631_v36  ;;  %v2472_v28 = vld [vmem:[%s8835_s12 + $0x5e8] sm:$0xff] }
 0x39c   : > { %v6789_v47 = vcombine.high %v2755_v37, %v2759_v38  ;;  %v2619_v48 = vld [vmem:[%s8835_s12 + $0xa80] sm:$0xff] }
 0x39d   : > { %v2623_v49 = vld [vmem:[%s8835_s12 + $0xaa0] sm:$0xff] }
 0x39e   : > { %5492 = vmatpush1.bf16.msra.mxu0 %v6580_v54  ;;  %5533 = vmatpush1.bf16.msra.mxu1 %v6708_v55  ;;  %v2747_v53 = vld [vmem:[%s8835_s12 + $0xe80] sm:$0xff]  ;;  %v1949_v55 = vsub.s32 4, %v8497_v42  ;;  %v6653_v59 = vcombine.high %v2619_v48, %v2623_v49  ;;  %v6652_v4 = vcombine.low %v2619_v48, %v2623_v49  ;;  %v2324_v48 = vld [vmem:[%s8835_s12 + $0x148] sm:$0xff] }
 0x39f   : > { %5493 = vmatprep.subr.bf16.mxu0 %v6573_v56  ;;  %5534 = vmatprep.subr.bf16.mxu1 %v6701_v57  ;;  %v2751_v54 = vld [vmem:[%s8835_s12 + $0xea0] sm:$0xff]  ;;  %v6660_v56 = vcombine.low %v2627_v35, %v2631_v36  ;;  %v6788_v57 = vcombine.low %v2755_v37, %v2759_v38  ;;  %v2460_v35 = vld [vmem:[%s8835_s12 + $0x588] sm:$0xff] }
 0x3a0   : > { %v6781_v60 = vcombine.high %v2747_v53, %v2751_v54  ;;  %v2611_v61 = vld [vmem:[%s8835_s12 + $0xa40] sm:$0xff]  ;;  %v6780_v5 = vcombine.low %v2747_v53, %v2751_v54  ;;  %v2464_v36 = vld [vmem:[%s8835_s12 + $0x5a8] sm:$0xff] }
 0x3a1   : > { %v2735_v17 = vld [vmem:[%s8835_s12 + $0xe20] sm:$0xff]  ;;  %v2328_v49 = vld [vmem:[%s8835_s12 + $0x168] sm:$0xff] }
 0x3a2   : > { %5494 = vmatpush1.bf16.msra.mxu0 %v6572_v62  ;;  %5535 = vmatpush1.bf16.msra.mxu1 %v6700_v63  ;;  %v2615_v62 = vld [vmem:[%s8835_s12 + $0xa60] sm:$0xff]  ;;  %v2452_v53 = vld [vmem:[%s8835_s12 + $0x548] sm:$0xff] }
 0x3a3   : > { %5495 = vmatprep.subr.bf16.mxu0 %v6693_v2  ;;  %5536 = vmatprep.subr.bf16.mxu1 %v6821_v3  ;;  %v2739_v63 = vld [vmem:[%s8835_s12 + $0xe40] sm:$0xff]  ;;  %v1950_v3 = vrot.slane %v8922_v14, %v1949_v55  ;;  %v6645_v7 = vcombine.high %v2611_v61, %v2615_v62  ;;  %v6644_v18 = vcombine.low %v2611_v61, %v2615_v62  ;;  %v2456_v54 = vld [vmem:[%s8835_s12 + $0x568] sm:$0xff] }
 0x3a4   : > { %v2743_v2 = vld [vmem:[%s8835_s12 + $0xe60] sm:$0xff]  ;;  %v2255_v14 = vadd.f32 %v8952_v43, %v1958_v6  ;;  %v6503_v43 = vcombine.high %v2468_v27, %v2472_v28  ;;  %v2316_v61 = vld [vmem:[%s8835_s12 + $0x108] sm:$0xff] }
 0x3a5   : > { %v6772_v19 = vcombine.low %v2739_v63, %v2743_v2  ;;  %v2320_v62 = vld [vmem:[%s8835_s12 + $0x128] sm:$0xff] }
 0x3a6   : > { %5496 = vmatpush2.bf16.msra.mxu0 %v6692_v8  ;;  %5537 = vmatpush2.bf16.msra.mxu1 %v6820_v9  ;;  %v6773_v8 = vcombine.high %v2739_v63, %v2743_v2  ;;  %v2603_v9 = vld [vmem:[%s8835_s12 + $0xa00] sm:$0xff]  ;;  %v2444_v63 = vld [vmem:[%s8835_s12 + $0x508] sm:$0xff] }
 0x3a7   : > { %5497 = vmatprep.subr.bf16.mxu0 %v6685_v10  ;;  %5538 = vmatprep.subr.bf16.mxu1 %v6813_v11  ;;  %v2607_v10 = vld [vmem:[%s8835_s12 + $0xa20] sm:$0xff]  ;;  %v2448_v2 = vld [vmem:[%s8835_s12 + $0x528] sm:$0xff] }
 0x3a8   : > { %v2731_v11 = vld [vmem:[%s8835_s12 + $0xe00] sm:$0xff]  ;;  %v6637_v20 = vcombine.high %v2603_v9, %v2607_v10  ;;  %v6636_v29 = vcombine.low %v2603_v9, %v2607_v10  ;;  %v6479_v6 = vcombine.high %v2444_v63, %v2448_v2  ;;  %v2436_v9 = vld [vmem:[%s8835_s12 + $0x4c8] sm:$0xff] }
 0x3a9   : > { %v6764_v30 = vcombine.low %v2731_v11, %v2735_v17  ;;  %v2440_v10 = vld [vmem:[%s8835_s12 + $0x4e8] sm:$0xff] }
 0x3aa   : > { %5498 = vmatpush2.bf16.msra.mxu0 %v6684_v21  ;;  %5539 = vmatpush2.bf16.msra.mxu1 %v6812_v22  ;;  %v2184_v21 = vadd.f32 %v8950_v41, %v1950_v3  ;;  %v6765_v22 = vcombine.high %v2731_v11, %v2735_v17  ;;  %v6358_v3 = vcombine.low %v2324_v48, %v2328_v49 }
 0x3ab   : > { %5499 = vmatprep.subr.bf16.mxu0 %v6677_v25  ;;  %5540 = vmatprep.subr.bf16.mxu1 %v6805_v26  ;;  %v2340_v25 = vld [vmem:[%s8835_s12 + $0x1c8] sm:$0xff]  ;;  %v6350_v11 = vcombine.low %v2316_v61, %v2320_v62  ;;  %v6478_v17 = vcombine.low %v2444_v63, %v2448_v2 }
 0x3ac   : > { %v2344_v26 = vld [vmem:[%s8835_s12 + $0x1e8] sm:$0xff] }
 0x3ad   : > { %v6375_v41 = vcombine.high %v2340_v25, %v2344_v26  ;;  %v6374_v37 = vcombine.low %v2340_v25, %v2344_v26  ;;  %v6470_v26 = vcombine.low %v2436_v9, %v2440_v10  ;;  %v2396_v63 = vld [vmem:[%s8835_s12 + $0x388] sm:$0xff] }
 0x3ae   : > { %5500 = vmatpush2.bf16.msra.mxu0 %v6676_v31  ;;  %5541 = vmatpush2.bf16.msra.mxu1 %v6804_v32  ;;  %v2263_v31 = vmax.f32 %v2184_v21, 0.0  ;;  %v2265_v32 = vmax.f32 %v2255_v14, 0.0  ;;  %v2304_v21 = vld [vmem:[%s8835_s12 + $0xa8] sm:$0xff] }
 0x3af   : > { %5501 = vmatprep.subr.bf16.mxu0 %v6669_v33  ;;  %5542 = vmatprep.subr.bf16.mxu1 %v6797_v34  ;;  %v2332_v33 = vld [vmem:[%s8835_s12 + $0x188] sm:$0xff] }
 0x3b0   : > { %v2336_v34 = vld [vmem:[%s8835_s12 + $0x1a8] sm:$0xff]  ;;  %v9046_v38 = vpack.c.bf16 %v2263_v31, %v2263_v31 }
 0x3b1   : > { %v2428_v14 = vld [vmem:[%s8835_s12 + $0x488] sm:$0xff] }
 0x3b2   : > { %5502 = vmatpush2.bf16.msra.mxu0 %v6668_v39  ;;  %5543 = vmatpush2.bf16.msra.mxu1 %v6796_v40  ;;  %v9048_v39 = vpack.c.bf16 %v2265_v32, %v2265_v32  ;;  %v6502_v40 = vcombine.low %v2468_v27, %v2472_v28  ;;  %v2420_v31 = vld [vmem:[%s8835_s12 + $0x448] sm:$0xff] }
 0x3b3   : > { %5503 = vmatprep.subr.bf16.mxu0 %v6661_v46  ;;  %5544 = vmatprep.subr.bf16.mxu1 %v6789_v47  ;;  %v6367_v46 = vcombine.high %v2332_v33, %v2336_v34  ;;  %v6495_v47 = vcombine.high %v2460_v35, %v2464_v36  ;;  %v2424_v32 = vld [vmem:[%s8835_s12 + $0x468] sm:$0xff] }
 0x3b4   : > { %v2400_v2 = vld [vmem:[%s8835_s12 + $0x3a8] sm:$0xff] }
 0x3b6   : > { %5504 = vmatpush2.bf16.msra.mxu0 %v6660_v56  ;;  %5545 = vmatpush2.bf16.msra.mxu1 %v6788_v57  ;;  %v6366_v56 = vcombine.low %v2332_v33, %v2336_v34  ;;  %v6494_v57 = vcombine.low %v2460_v35, %v2464_v36  ;;  %v6455_v34 = vcombine.high %v2420_v31, %v2424_v32  ;;  %v2284_v35 = vld [vmem:[%s8835_s12 + $0x8] sm:$0xff] }
 0x3b7   : > { %5505 = vmatprep.subr.bf16.mxu0 %v6653_v59  ;;  %5546 = vmatprep.subr.bf16.mxu1 %v6781_v60  ;;  %v6359_v59 = vcombine.high %v2324_v48, %v2328_v49  ;;  %v6487_v60 = vcombine.high %v2452_v53, %v2456_v54  ;;  %v2288_v36 = vld [vmem:[%s8835_s12 + $0x28] sm:$0xff] }
 0x3b8   : > { %v6319_v48 = vcombine.high %v2284_v35, %v2288_v36 }
 0x3ba   : > { %5506 = vmatpush2.bf16.msra.mxu0 %v6652_v4  ;;  %5547 = vmatpush2.bf16.msra.mxu1 %v6780_v5  ;;  %v6486_v4 = vcombine.low %v2452_v53, %v2456_v54  ;;  %v6351_v5 = vcombine.high %v2316_v61, %v2320_v62  ;;  %v2404_v53 = vld [vmem:[%s8835_s12 + $0x3c8] sm:$0xff] }
 0x3bb   : > { %5507 = vmatprep.subr.bf16.mxu0 %v6645_v7  ;;  %5548 = vmatprep.subr.bf16.mxu1 %v6773_v8  ;;  %v2308_v7 = vld [vmem:[%s8835_s12 + $0xc8] sm:$0xff] }
 0x3bc   : > { %v2312_v8 = vld [vmem:[%s8835_s12 + $0xe8] sm:$0xff] }
 0x3bd   : > { %v6342_v25 = vcombine.low %v2308_v7, %v2312_v8  ;;  %v2408_v54 = vld [vmem:[%s8835_s12 + $0x3e8] sm:$0xff] }
 0x3be   : > { %5508 = vmatpush2.bf16.msra.mxu0 %v6644_v18  ;;  %5549 = vmatpush2.bf16.msra.mxu1 %v6772_v19  ;;  %v6343_v18 = vcombine.high %v2308_v7, %v2312_v8  ;;  %v6471_v19 = vcombine.high %v2436_v9, %v2440_v10  ;;  %v6439_v61 = vcombine.high %v2404_v53, %v2408_v54  ;;  %v2388_v9 = vld [vmem:[%s8835_s12 + $0x348] sm:$0xff] }
 0x3bf   : > { %5509 = vmatprep.subr.bf16.mxu0 %v6637_v20  ;;  %5550 = vmatprep.subr.bf16.mxu1 %v6765_v22  ;;  %v2300_v20 = vld [vmem:[%s8835_s12 + $0x88] sm:$0xff]  ;;  %v6431_v7 = vcombine.high %v2396_v63, %v2400_v2 }
 0x3c0   : > { %v2432_v22 = vld [vmem:[%s8835_s12 + $0x4a8] sm:$0xff]  ;;  %v6335_v27 = vcombine.high %v2300_v20, %v2304_v21 }
 0x3c1   : > { %v6463_v28 = vcombine.high %v2428_v14, %v2432_v22  ;;  %v2392_v10 = vld [vmem:[%s8835_s12 + $0x368] sm:$0xff] }
 0x3c2   : > { %5510 = vmatpush2.bf16.msra.mxu0 %v6636_v29  ;;  %5551 = vmatpush2.bf16.msra.mxu1 %v6764_v30  ;;  %v2292_v29 = vld [vmem:[%s8835_s12 + $0x48] sm:$0xff] }
 0x3c3   : > { %5561 = vmatprep.subr.bf16.mxu0 %v6375_v41  ;;  %5602 = vmatprep.subr.bf16.mxu1 %v6503_v43  ;;  %v2296_v30 = vld [vmem:[%s8835_s12 + $0x68] sm:$0xff]  ;;  %v6334_v41 = vcombine.low %v2300_v20, %v2304_v21  ;;  %v6462_v43 = vcombine.low %v2428_v14, %v2432_v22  ;;  %v6423_v20 = vcombine.high %v2388_v9, %v2392_v10 }
 0x3c4   : > { %v6327_v33 = vcombine.high %v2292_v29, %v2296_v30  ;;  %v2380_v14 = vld [vmem:[%s8835_s12 + $0x308] sm:$0xff] }
 0x3c5   : > { %5512 = vmatmul.mubr.bf16.vlgmr.msra.gmra.mxu0 %v9046_v38  ;;  %5553 = vmatmul.mubr.bf16.vlgmr.msra.gmra.mxu1 %v9048_v39  ;;  %v2384_v22 = vld [vmem:[%s8835_s12 + $0x328] sm:$0xff] }
 0x3c6   : > { %5562 = vmatpush1.bf16.msra.mxu0 %v6374_v37  ;;  %5593 = vmatprep.mubr.bf16.mxu0 %v8954_v44  ;;  %v2412_v37 = vld [vmem:[%s8835_s12 + $0x408] sm:$0xff] }
 0x3c7   : > { %5603 = vmatpush1.bf16.msra.mxu1 %v6502_v40  ;;  %5634 = vmatprep.mubr.bf16.mxu1 %v8956_v45  ;;  %v2416_v40 = vld [vmem:[%s8835_s12 + $0x428] sm:$0xff] }
 0x3c8   : > { %5563 = vmatprep.subr.bf16.mxu0 %v6367_v46  ;;  %5604 = vmatprep.subr.bf16.mxu1 %v6495_v47  ;;  %v6326_v46 = vcombine.low %v2292_v29, %v2296_v30  ;;  %v6454_v47 = vcombine.low %v2420_v31, %v2424_v32  ;;  %v6447_v49 = vcombine.high %v2412_v37, %v2416_v40  ;;  %v2372_v31 = vld [vmem:[%s8835_s12 + $0x2c8] sm:$0xff] }
 0x3c9   : > { %v6415_v29 = vcombine.high %v2380_v14, %v2384_v22  ;;  %v2376_v32 = vld [vmem:[%s8835_s12 + $0x2e8] sm:$0xff] }
 0x3ca   : > { %5564 = vmatpush1.bf16.msra.mxu0 %v6366_v56  ;;  %v2532_v56 = vld [vmem:[%s8835_s12 + $0x7c8] sm:$0xff] }
 0x3cb   : > { %5605 = vmatpush1.bf16.msra.mxu1 %v6494_v57  ;;  %5565 = vmatprep.subr.bf16.mxu0 %v6359_v59  ;;  %v2536_v57 = vld [vmem:[%s8835_s12 + $0x7e8] sm:$0xff]  ;;  %v6318_v59 = vcombine.low %v2284_v35, %v2288_v36  ;;  %v6407_v35 = vcombine.high %v2372_v31, %v2376_v32 }
 0x3cc   : > { %5606 = vmatprep.subr.bf16.mxu1 %v6487_v60  ;;  %v6446_v60 = vcombine.low %v2412_v37, %v2416_v40  ;;  %v6567_v62 = vcombine.high %v2532_v56, %v2536_v57  ;;  %v2364_v37 = vld [vmem:[%s8835_s12 + $0x288] sm:$0xff] }
 0x3cd   : > { %v2368_v40 = vld [vmem:[%s8835_s12 + $0x2a8] sm:$0xff] }
 0x3ce   : > { %5566 = vmatpush1.bf16.msra.mxu0 %v6358_v3  ;;  %v2524_v3 = vld [vmem:[%s8835_s12 + $0x788] sm:$0xff] }
 0x3cf   : > { %5607 = vmatpush1.bf16.msra.mxu1 %v6486_v4  ;;  %5567 = vmatprep.subr.bf16.mxu0 %v6351_v5  ;;  %v2528_v4 = vld [vmem:[%s8835_s12 + $0x7a8] sm:$0xff]  ;;  %v6438_v5 = vcombine.low %v2404_v53, %v2408_v54  ;;  %v6399_v53 = vcombine.high %v2364_v37, %v2368_v40 }
 0x3d0   : > { %5608 = vmatprep.subr.bf16.mxu1 %v6479_v6  ;;  %v6566_v6 = vcombine.low %v2532_v56, %v2536_v57  ;;  %v6559_v8 = vcombine.high %v2524_v3, %v2528_v4  ;;  %v2356_v56 = vld [vmem:[%s8835_s12 + $0x248] sm:$0xff] }
 0x3d1   : > { %v2360_v57 = vld [vmem:[%s8835_s12 + $0x268] sm:$0xff] }
 0x3d2   : > { %5568 = vmatpush1.bf16.msra.mxu0 %v6350_v11  ;;  %v2516_v11 = vld [vmem:[%s8835_s12 + $0x748] sm:$0xff] }
 0x3d3   : > { %5609 = vmatpush1.bf16.msra.mxu1 %v6478_v17  ;;  %5569 = vmatprep.subr.bf16.mxu0 %v6343_v18  ;;  %v2520_v17 = vld [vmem:[%s8835_s12 + $0x768] sm:$0xff]  ;;  %v6430_v18 = vcombine.low %v2396_v63, %v2400_v2  ;;  %v6391_v63 = vcombine.high %v2356_v56, %v2360_v57 }
 0x3d4   : > { %5610 = vmatprep.subr.bf16.mxu1 %v6471_v19  ;;  %v6558_v19 = vcombine.low %v2524_v3, %v2528_v4  ;;  %v6551_v21 = vcombine.high %v2516_v11, %v2520_v17  ;;  %v2348_v3 = vld [vmem:[%s8835_s12 + $0x208] sm:$0xff] }
 0x3d5   : > { %v2352_v4 = vld [vmem:[%s8835_s12 + $0x228] sm:$0xff] }
 0x3d6   : > { %5570 = vmatpush1.bf16.msra.mxu0 %v6342_v25  ;;  %v2508_v25 = vld [vmem:[%s8835_s12 + $0x708] sm:$0xff] }
 0x3d7   : > { %5611 = vmatpush1.bf16.msra.mxu1 %v6470_v26  ;;  %5571 = vmatprep.subr.bf16.mxu0 %v6335_v27  ;;  %v2512_v26 = vld [vmem:[%s8835_s12 + $0x728] sm:$0xff]  ;;  %v6422_v27 = vcombine.low %v2388_v9, %v2392_v10  ;;  %v6383_v9 = vcombine.high %v2348_v3, %v2352_v4 }
 0x3d8   : > { %5612 = vmatprep.subr.bf16.mxu1 %v6463_v28  ;;  %v6550_v28 = vcombine.low %v2516_v11, %v2520_v17  ;;  %v6543_v30 = vcombine.high %v2508_v25, %v2512_v26  ;;  %v2596_v11 = vld [vmem:[%s8835_s12 + $0x9c8] sm:$0xff] }
 0x3d9   : > { %v2600_v17 = vld [vmem:[%s8835_s12 + $0x9e8] sm:$0xff] }
 0x3da   : > { %5572 = vmatpush1.bf16.msra.mxu0 %v6334_v41  ;;  %v2500_v41 = vld [vmem:[%s8835_s12 + $0x6c8] sm:$0xff] }
 0x3db   : > { %5613 = vmatpush1.bf16.msra.mxu1 %v6462_v43  ;;  %5573 = vmatprep.subr.bf16.mxu0 %v6327_v33  ;;  %v2504_v43 = vld [vmem:[%s8835_s12 + $0x6e8] sm:$0xff]  ;;  %v6414_v33 = vcombine.low %v2380_v14, %v2384_v22  ;;  %v6631_v14 = vcombine.high %v2596_v11, %v2600_v17 }
 0x3dc   : > { %5614 = vmatprep.subr.bf16.mxu1 %v6455_v34  ;;  %v6542_v34 = vcombine.low %v2508_v25, %v2512_v26  ;;  %v6535_v36 = vcombine.high %v2500_v41, %v2504_v43  ;;  %v2588_v25 = vld [vmem:[%s8835_s12 + $0x988] sm:$0xff] }
 0x3dd   : > { %v2592_v26 = vld [vmem:[%s8835_s12 + $0x9a8] sm:$0xff] }
 0x3de   : > { %5574 = vmatpush1.bf16.msra.mxu0 %v6326_v46  ;;  %v2492_v46 = vld [vmem:[%s8835_s12 + $0x688] sm:$0xff] }
 0x3df   : > { %5615 = vmatpush1.bf16.msra.mxu1 %v6454_v47  ;;  %5575 = vmatprep.subr.bf16.mxu0 %v6319_v48  ;;  %v2496_v47 = vld [vmem:[%s8835_s12 + $0x6a8] sm:$0xff]  ;;  %v6406_v48 = vcombine.low %v2372_v31, %v2376_v32  ;;  %v6623_v31 = vcombine.high %v2588_v25, %v2592_v26 }
 0x3e0   : > { %5616 = vmatprep.subr.bf16.mxu1 %v6447_v49  ;;  %v6534_v49 = vcombine.low %v2500_v41, %v2504_v43  ;;  %v6527_v54 = vcombine.high %v2492_v46, %v2496_v47  ;;  %v2580_v32 = vld [vmem:[%s8835_s12 + $0x948] sm:$0xff] }
 0x3e1   : > { %v2584_v41 = vld [vmem:[%s8835_s12 + $0x968] sm:$0xff] }
 0x3e2   : > { %5576 = vmatpush1.bf16.msra.mxu0 %v6318_v59  ;;  %v2484_v59 = vld [vmem:[%s8835_s12 + $0x648] sm:$0xff] }
 0x3e3   : > { %5617 = vmatpush1.bf16.msra.mxu1 %v6446_v60  ;;  %5577 = vmatprep.subr.bf16.mxu0 %v6439_v61  ;;  %v2488_v60 = vld [vmem:[%s8835_s12 + $0x668] sm:$0xff]  ;;  %v6398_v61 = vcombine.low %v2364_v37, %v2368_v40  ;;  %v6615_v37 = vcombine.high %v2580_v32, %v2584_v41 }
 0x3e4   : > { %5618 = vmatprep.subr.bf16.mxu1 %v6567_v62  ;;  %v6526_v62 = vcombine.low %v2492_v46, %v2496_v47  ;;  %v6519_v2 = vcombine.high %v2484_v59, %v2488_v60  ;;  %v2572_v46 = vld [vmem:[%s8835_s12 + $0x908] sm:$0xff] }
 0x3e5   : > { %v2576_v47 = vld [vmem:[%s8835_s12 + $0x928] sm:$0xff] }
 0x3e6   : > { %5578 = vmatpush2.bf16.msra.mxu0 %v6438_v5  ;;  %v2476_v5 = vld [vmem:[%s8835_s12 + $0x608] sm:$0xff] }
 0x3e7   : > { %5619 = vmatpush2.bf16.msra.mxu1 %v6566_v6  ;;  %5579 = vmatprep.subr.bf16.mxu0 %v6431_v7  ;;  %v2480_v6 = vld [vmem:[%s8835_s12 + $0x628] sm:$0xff]  ;;  %v6390_v7 = vcombine.low %v2356_v56, %v2360_v57  ;;  %v6607_v56 = vcombine.high %v2572_v46, %v2576_v47 }
 0x3e8   : > { %5620 = vmatprep.subr.bf16.mxu1 %v6559_v8  ;;  %v6518_v8 = vcombine.low %v2484_v59, %v2488_v60  ;;  %v6511_v10 = vcombine.high %v2476_v5, %v2480_v6  ;;  %v2564_v59 = vld [vmem:[%s8835_s12 + $0x8c8] sm:$0xff] }
 0x3e9   : > { %v2568_v60 = vld [vmem:[%s8835_s12 + $0x8e8] sm:$0xff] }
 0x3ea   : > { %5580 = vmatpush2.bf16.msra.mxu0 %v6430_v18  ;;  %v2724_v18 = vld [vmem:[%s8835_s12 + $0xdc8] sm:$0xff] }
 0x3eb   : > { %5621 = vmatpush2.bf16.msra.mxu1 %v6558_v19  ;;  %5581 = vmatprep.subr.bf16.mxu0 %v6423_v20  ;;  %v2728_v19 = vld [vmem:[%s8835_s12 + $0xde8] sm:$0xff]  ;;  %v6382_v20 = vcombine.low %v2348_v3, %v2352_v4  ;;  %v6599_v3 = vcombine.high %v2564_v59, %v2568_v60 }
 0x3ec   : > { %5622 = vmatprep.subr.bf16.mxu1 %v6551_v21  ;;  %v6510_v21 = vcombine.low %v2476_v5, %v2480_v6  ;;  %v6759_v22 = vcombine.high %v2724_v18, %v2728_v19  ;;  %v2556_v5 = vld [vmem:[%s8835_s12 + $0x888] sm:$0xff] }
 0x3ed   : > { %v2560_v6 = vld [vmem:[%s8835_s12 + $0x8a8] sm:$0xff] }
 0x3ee   : > { %5582 = vmatpush2.bf16.msra.mxu0 %v6422_v27  ;;  %v6630_v27 = vcombine.low %v2596_v11, %v2600_v17  ;;  %v6591_v11 = vcombine.high %v2556_v5, %v2560_v6 }
 0x3ef   : > { %5623 = vmatpush2.bf16.msra.mxu1 %v6550_v28  ;;  %5583 = vmatprep.subr.bf16.mxu0 %v6415_v29  ;;  %v2716_v28 = vld [vmem:[%s8835_s12 + $0xd88] sm:$0xff] }
 0x3f0   : > { %5624 = vmatprep.subr.bf16.mxu1 %v6543_v30  ;;  %v2720_v29 = vld [vmem:[%s8835_s12 + $0xda8] sm:$0xff]  ;;  %v6758_v30 = vcombine.low %v2724_v18, %v2728_v19 }
 0x3f1   : > { %v6751_v43 = vcombine.high %v2716_v28, %v2720_v29  ;;  %v2548_v18 = vld [vmem:[%s8835_s12 + $0x848] sm:$0xff] }
 0x3f2   : > { %5584 = vmatpush2.bf16.msra.mxu0 %v6414_v33  ;;  %v2708_v33 = vld [vmem:[%s8835_s12 + $0xd48] sm:$0xff] }
 0x3f3   : > { %5625 = vmatpush2.bf16.msra.mxu1 %v6542_v34  ;;  %5585 = vmatprep.subr.bf16.mxu0 %v6407_v35  ;;  %v2712_v34 = vld [vmem:[%s8835_s12 + $0xd68] sm:$0xff]  ;;  %v6622_v35 = vcombine.low %v2588_v25, %v2592_v26 }
 0x3f4   : > { %5626 = vmatprep.subr.bf16.mxu1 %v6535_v36  ;;  %v6750_v36 = vcombine.low %v2716_v28, %v2720_v29  ;;  %v6743_v40 = vcombine.high %v2708_v33, %v2712_v34  ;;  %v2552_v19 = vld [vmem:[%s8835_s12 + $0x868] sm:$0xff] }
 0x3f5   : > { %v6583_v25 = vcombine.high %v2548_v18, %v2552_v19  ;;  %v2544_v28 = vld [vmem:[%s8835_s12 + $0x828] sm:$0xff] }
 0x3f6   : > { %5586 = vmatpush2.bf16.msra.mxu0 %v6406_v48  ;;  %v2700_v48 = vld [vmem:[%s8835_s12 + $0xd08] sm:$0xff] }
 0x3f7   : > { %5627 = vmatpush2.bf16.msra.mxu1 %v6534_v49  ;;  %5587 = vmatprep.subr.bf16.mxu0 %v6399_v53  ;;  %v2704_v49 = vld [vmem:[%s8835_s12 + $0xd28] sm:$0xff]  ;;  %v6614_v53 = vcombine.low %v2580_v32, %v2584_v41 }
 0x3f8   : > { %5628 = vmatprep.subr.bf16.mxu1 %v6527_v54  ;;  %v6742_v54 = vcombine.low %v2708_v33, %v2712_v34  ;;  %v6735_v57 = vcombine.high %v2700_v48, %v2704_v49  ;;  %v2668_v29 = vld [vmem:[%s8835_s12 + $0xc08] sm:$0xff] }
 0x3f9   : > { %v2660_v33 = vld [vmem:[%s8835_s12 + $0xbc8] sm:$0xff] }
 0x3fa   : > { %5588 = vmatpush2.bf16.msra.mxu0 %v6398_v61  ;;  %v2692_v61 = vld [vmem:[%s8835_s12 + $0xcc8] sm:$0xff] }
 0x3fb   : > { %5629 = vmatpush2.bf16.msra.mxu1 %v6526_v62  ;;  %5589 = vmatprep.subr.bf16.mxu0 %v6391_v63  ;;  %v2696_v62 = vld [vmem:[%s8835_s12 + $0xce8] sm:$0xff]  ;;  %v6606_v63 = vcombine.low %v2572_v46, %v2576_v47 }
 0x3fc   : > { %5630 = vmatprep.subr.bf16.mxu1 %v6519_v2  ;;  %v6734_v2 = vcombine.low %v2700_v48, %v2704_v49  ;;  %v6727_v4 = vcombine.high %v2692_v61, %v2696_v62  ;;  %v2664_v34 = vld [vmem:[%s8835_s12 + $0xbe8] sm:$0xff] }
 0x3fd   : > { %v6695_v46 = vcombine.high %v2660_v33, %v2664_v34  ;;  %v2652_v48 = vld [vmem:[%s8835_s12 + $0xb88] sm:$0xff] }
 0x3fe   : > { %5590 = vmatpush2.bf16.msra.mxu0 %v6390_v7  ;;  %v2684_v7 = vld [vmem:[%s8835_s12 + $0xc88] sm:$0xff] }
 0x3ff   : > { %5631 = vmatpush2.bf16.msra.mxu1 %v6518_v8  ;;  %5591 = vmatprep.subr.bf16.mxu0 %v6383_v9  ;;  %v2688_v8 = vld [vmem:[%s8835_s12 + $0xca8] sm:$0xff]  ;;  %v6598_v9 = vcombine.low %v2564_v59, %v2568_v60 }
 0x400   : > { %5632 = vmatprep.subr.bf16.mxu1 %v6511_v10  ;;  %v6726_v10 = vcombine.low %v2692_v61, %v2696_v62  ;;  %v6719_v17 = vcombine.high %v2684_v7, %v2688_v8  ;;  %v2656_v49 = vld [vmem:[%s8835_s12 + $0xba8] sm:$0xff] }
 0x401   : > { %v6687_v59 = vcombine.high %v2652_v48, %v2656_v49  ;;  %v2644_v61 = vld [vmem:[%s8835_s12 + $0xb48] sm:$0xff] }
 0x402   : > { %5592 = vmatpush2.bf16.msra.mxu0 %v6382_v20  ;;  %v2676_v20 = vld [vmem:[%s8835_s12 + $0xc48] sm:$0xff] }
 0x403   : > { %5633 = vmatpush2.bf16.msra.mxu1 %v6510_v21  ;;  %5643 = vmatprep.subr.bf16.mxu0 %v6631_v14  ;;  %v2680_v21 = vld [vmem:[%s8835_s12 + $0xc68] sm:$0xff]  ;;  %v6590_v14 = vcombine.low %v2556_v5, %v2560_v6 }
 0x404   : > { %5684 = vmatprep.subr.bf16.mxu1 %v6759_v22  ;;  %v6718_v22 = vcombine.low %v2684_v7, %v2688_v8  ;;  %v6711_v26 = vcombine.high %v2676_v20, %v2680_v21  ;;  %v6710_v32 = vcombine.low %v2676_v20, %v2680_v21  ;;  %v2648_v62 = vld [vmem:[%s8835_s12 + $0xb68] sm:$0xff] }
 0x405   : > { %5594 = vmatmul.mubr.bf16.vlgmr.msra.gmra.mxu0 %v8958_v50  ;;  %v6679_v5 = vcombine.high %v2644_v61, %v2648_v62  ;;  %v2636_v7 = vld [vmem:[%s8835_s12 + $0xb08] sm:$0xff] }
 0x406   : > { %5635 = vmatmul.mubr.bf16.vlgmr.msra.gmra.mxu1 %v8960_v52  ;;  %5644 = vmatpush1.bf16.msra.mxu0 %v6630_v27  ;;  %v2540_v27 = vld [vmem:[%s8835_s12 + $0x808] sm:$0xff] }
 0x407   : > { %5675 = vmatprep.mubr.bf16.mxu0 %v8970_v0  ;;  %5685 = vmatpush1.bf16.msra.mxu1 %v6758_v30  ;;  %v2672_v30 = vld [vmem:[%s8835_s12 + $0xc28] sm:$0xff]  ;;  %v6575_v41 = vcombine.high %v2540_v27, %v2544_v28 }
 0x408   : > { %5716 = vmatprep.mubr.bf16.mxu1 %v8972_v1  ;;  %5645 = vmatprep.subr.bf16.mxu0 %v6623_v31  ;;  %v6582_v31 = vcombine.low %v2548_v18, %v2552_v19  ;;  %v2640_v8 = vld [vmem:[%s8835_s12 + $0xb28] sm:$0xff] }
 0x409   : > { %5686 = vmatprep.subr.bf16.mxu1 %v6751_v43  ;;  %v6703_v43 = vcombine.high %v2668_v29, %v2672_v30  ;;  %v6671_v18 = vcombine.high %v2636_v7, %v2640_v8  ;;  %v2628_v20 = vld [vmem:[%s8835_s12 + $0xac8] sm:$0xff] }
 0x40a   : > { %5646 = vmatpush1.bf16.msra.mxu0 %v6622_v35  ;;  %v2788_v35 = vld [vmem:[%s8835_s12 + $0xfc8] sm:$0xff] }
 0x40b   : > { %5687 = vmatpush1.bf16.msra.mxu1 %v6750_v36  ;;  %5647 = vmatprep.subr.bf16.mxu0 %v6615_v37  ;;  %v2792_v36 = vld [vmem:[%s8835_s12 + $0xfe8] sm:$0xff]  ;;  %v6574_v37 = vcombine.low %v2540_v27, %v2544_v28 }
 0x40c   : > { %5688 = vmatprep.subr.bf16.mxu1 %v6743_v40  ;;  %v6702_v40 = vcombine.low %v2668_v29, %v2672_v30  ;;  %v6823_v47 = vcombine.high %v2788_v35, %v2792_v36  ;;  %v2632_v21 = vld [vmem:[%s8835_s12 + $0xae8] sm:$0xff] }
 0x40d   : > { %v6663_v27 = vcombine.high %v2628_v20, %v2632_v21  ;;  %v2620_v29 = vld [vmem:[%s8835_s12 + $0xa88] sm:$0xff] }
 0x40e   : > { %5648 = vmatpush1.bf16.msra.mxu0 %v6614_v53  ;;  %v2780_v53 = vld [vmem:[%s8835_s12 + $0xf88] sm:$0xff] }
 0x40f   : > { %5689 = vmatpush1.bf16.msra.mxu1 %v6742_v54  ;;  %5649 = vmatprep.subr.bf16.mxu0 %v6607_v56  ;;  %v2784_v54 = vld [vmem:[%s8835_s12 + $0xfa8] sm:$0xff]  ;;  %v6694_v56 = vcombine.low %v2660_v33, %v2664_v34 }
 0x410   : > { %5690 = vmatprep.subr.bf16.mxu1 %v6735_v57  ;;  %v6822_v57 = vcombine.low %v2788_v35, %v2792_v36  ;;  %v6815_v60 = vcombine.high %v2780_v53, %v2784_v54  ;;  %v2624_v30 = vld [vmem:[%s8835_s12 + $0xaa8] sm:$0xff] }
 0x411   : > { %v6655_v33 = vcombine.high %v2620_v29, %v2624_v30  ;;  %v2612_v35 = vld [vmem:[%s8835_s12 + $0xa48] sm:$0xff] }
 0x412   : > { %5650 = vmatpush1.bf16.msra.mxu0 %v6606_v63  ;;  %v2772_v63 = vld [vmem:[%s8835_s12 + $0xf48] sm:$0xff] }
 0x413   : > { %5691 = vmatpush1.bf16.msra.mxu1 %v6734_v2  ;;  %5651 = vmatprep.subr.bf16.mxu0 %v6599_v3  ;;  %v2776_v2 = vld [vmem:[%s8835_s12 + $0xf68] sm:$0xff]  ;;  %v6686_v3 = vcombine.low %v2652_v48, %v2656_v49 }
 0x414   : > { %5692 = vmatprep.subr.bf16.mxu1 %v6727_v4  ;;  %v6814_v4 = vcombine.low %v2780_v53, %v2784_v54  ;;  %v6807_v6 = vcombine.high %v2772_v63, %v2776_v2  ;;  %v2616_v36 = vld [vmem:[%s8835_s12 + $0xa68] sm:$0xff] }
 0x415   : > { %v6647_v48 = vcombine.high %v2612_v35, %v2616_v36  ;;  %v2604_v53 = vld [vmem:[%s8835_s12 + $0xa08] sm:$0xff] }
 0x416   : > { %5652 = vmatpush1.bf16.msra.mxu0 %v6598_v9  ;;  %v2764_v9 = vld [vmem:[%s8835_s12 + $0xf08] sm:$0xff] }
 0x417   : > { %5693 = vmatpush1.bf16.msra.mxu1 %v6726_v10  ;;  %5653 = vmatprep.subr.bf16.mxu0 %v6591_v11  ;;  %v2768_v10 = vld [vmem:[%s8835_s12 + $0xf28] sm:$0xff]  ;;  %v6678_v11 = vcombine.low %v2644_v61, %v2648_v62 }
 0x418   : > { %5694 = vmatprep.subr.bf16.mxu1 %v6719_v17  ;;  %v6806_v17 = vcombine.low %v2772_v63, %v2776_v2  ;;  %v6799_v19 = vcombine.high %v2764_v9, %v2768_v10  ;;  %v2608_v54 = vld [vmem:[%s8835_s12 + $0xa28] sm:$0xff]  ;;  %v2341_v63 = vld [vmem:[%s8835_s12 + $0x1d0] sm:$0xff] }
 0x419   : > { %v6639_v61 = vcombine.high %v2604_v53, %v2608_v54  ;;  %v2345_v2 = vld [vmem:[%s8835_s12 + $0x1f0] sm:$0xff] }
 0x41a   : > { %5654 = vmatpush1.bf16.msra.mxu0 %v6590_v14  ;;  %v2756_v14 = vld [vmem:[%s8835_s12 + $0xec8] sm:$0xff] }
 0x41b   : > { %5695 = vmatpush1.bf16.msra.mxu1 %v6718_v22  ;;  %5655 = vmatprep.subr.bf16.mxu0 %v6583_v25  ;;  %v2760_v22 = vld [vmem:[%s8835_s12 + $0xee8] sm:$0xff]  ;;  %v6670_v25 = vcombine.low %v2636_v7, %v2640_v8  ;;  %v6377_v7 = vcombine.high %v2341_v63, %v2345_v2  ;;  %v2795_v8 = vld [vmem:[%s9184_s25] sm:$0xff] }
 0x41c   : > { %5696 = vmatprep.subr.bf16.mxu1 %v6711_v26  ;;  %v6798_v26 = vcombine.low %v2764_v9, %v2768_v10  ;;  %v6791_v28 = vcombine.high %v2756_v14, %v2760_v22  ;;  %v2333_v10 = vld [vmem:[%s8835_s12 + $0x190] sm:$0xff] }
 0x41e   : > { %5656 = vmatpush1.bf16.msra.mxu0 %v6582_v31  ;;  %v2748_v31 = vld [vmem:[%s8835_s12 + $0xe88] sm:$0xff] }
 0x41f   : > { %5697 = vmatpush1.bf16.msra.mxu1 %v6710_v32  ;;  %5657 = vmatprep.subr.bf16.mxu0 %v6575_v41  ;;  %v2752_v32 = vld [vmem:[%s8835_s12 + $0xea8] sm:$0xff]  ;;  %v6662_v41 = vcombine.low %v2628_v20, %v2632_v21  ;;  %v2465_v20 = vld [vmem:[%s8835_s12 + $0x5b0] sm:$0xff] }
 0x420   : > { %5698 = vmatprep.subr.bf16.mxu1 %v6703_v43  ;;  %v6790_v43 = vcombine.low %v2756_v14, %v2760_v22  ;;  %v6783_v34 = vcombine.high %v2748_v31, %v2752_v32  ;;  %v2804_v14 = vrot.slane %v2795_v8, %v1937_v15 }
 0x422   : > { %5658 = vmatpush1.bf16.msra.mxu0 %v6574_v37  ;;  %v2740_v37 = vld [vmem:[%s8835_s12 + $0xe48] sm:$0xff] }
 0x423   : > { %5699 = vmatpush1.bf16.msra.mxu1 %v6702_v40  ;;  %5659 = vmatprep.subr.bf16.mxu0 %v6695_v46  ;;  %v2744_v40 = vld [vmem:[%s8835_s12 + $0xe68] sm:$0xff]  ;;  %v6654_v46 = vcombine.low %v2620_v29, %v2624_v30  ;;  %v2453_v30 = vld [vmem:[%s8835_s12 + $0x550] sm:$0xff] }
 0x424   : > { %5700 = vmatprep.subr.bf16.mxu1 %v6823_v47  ;;  %v6782_v47 = vcombine.low %v2748_v31, %v2752_v32  ;;  %v6775_v49 = vcombine.high %v2740_v37, %v2744_v40 }
 0x426   : > { %5660 = vmatpush2.bf16.msra.mxu0 %v6694_v56  ;;  %v2732_v56 = vld [vmem:[%s8835_s12 + $0xe08] sm:$0xff] }
 0x427   : > { %5701 = vmatpush2.bf16.msra.mxu1 %v6822_v57  ;;  %5661 = vmatprep.subr.bf16.mxu0 %v6687_v59  ;;  %v2736_v57 = vld [vmem:[%s8835_s12 + $0xe28] sm:$0xff]  ;;  %v6646_v59 = vcombine.low %v2612_v35, %v2616_v36 }
 0x428   : > { %5702 = vmatprep.subr.bf16.mxu1 %v6815_v60  ;;  %v6774_v60 = vcombine.low %v2740_v37, %v2744_v40  ;;  %v6767_v62 = vcombine.high %v2732_v56, %v2736_v57  ;;  %v2317_v37 = vld [vmem:[%s8835_s12 + $0x110] sm:$0xff] }
 0x429   : > { %v2321_v40 = vld [vmem:[%s8835_s12 + $0x130] sm:$0xff] }
 0x42a   : > { %5662 = vmatpush2.bf16.msra.mxu0 %v6686_v3  ;;  %v2469_v3 = vld [vmem:[%s8835_s12 + $0x5d0] sm:$0xff] }
 0x42b   : > { %5703 = vmatpush2.bf16.msra.mxu1 %v6814_v4  ;;  %5663 = vmatprep.subr.bf16.mxu0 %v6679_v5  ;;  %v2473_v4 = vld [vmem:[%s8835_s12 + $0x5f0] sm:$0xff]  ;;  %v6638_v5 = vcombine.low %v2604_v53, %v2608_v54 }
 0x42c   : > { %5704 = vmatprep.subr.bf16.mxu1 %v6807_v6  ;;  %v6766_v6 = vcombine.low %v2732_v56, %v2736_v57  ;;  %v6505_v9 = vcombine.high %v2469_v3, %v2473_v4  ;;  %v6504_v21 = vcombine.low %v2469_v3, %v2473_v4  ;;  %v2441_v3 = vld [vmem:[%s8835_s12 + $0x4f0] sm:$0xff]  ;;  %v6352_v4 = vcombine.low %v2317_v37, %v2321_v40 }
 0x42e   : > { %5664 = vmatpush2.bf16.msra.mxu0 %v6678_v11  ;;  %v2337_v11 = vld [vmem:[%s8835_s12 + $0x1b0] sm:$0xff] }
 0x42f   : > { %5705 = vmatpush2.bf16.msra.mxu1 %v6806_v17  ;;  %5665 = vmatprep.subr.bf16.mxu0 %v6671_v18  ;;  %v6376_v17 = vcombine.low %v2341_v63, %v2345_v2  ;;  %v2800_v18 = vrot.slane %v2795_v8, %v1933_v12  ;;  %v6369_v22 = vcombine.high %v2333_v10, %v2337_v11  ;;  %v2457_v12 = vld [vmem:[%s8835_s12 + $0x570] sm:$0xff] }
 0x430   : > { %5706 = vmatprep.subr.bf16.mxu1 %v6799_v19  ;;  %v2461_v19 = vld [vmem:[%s8835_s12 + $0x590] sm:$0xff]  ;;  %v6368_v32 = vcombine.low %v2333_v10, %v2337_v11  ;;  %v6489_v36 = vcombine.high %v2453_v30, %v2457_v12 }
 0x431   : > { %v6497_v29 = vcombine.high %v2461_v19, %v2465_v20  ;;  %v2313_v63 = vld [vmem:[%s8835_s12 + $0xf0] sm:$0xff] }
 0x432   : > { %5666 = vmatpush2.bf16.msra.mxu0 %v6670_v25  ;;  %v2325_v25 = vld [vmem:[%s8835_s12 + $0x150] sm:$0xff] }
 0x433   : > { %5707 = vmatpush2.bf16.msra.mxu1 %v6798_v26  ;;  %5667 = vmatprep.subr.bf16.mxu0 %v6663_v27  ;;  %v2329_v26 = vld [vmem:[%s8835_s12 + $0x170] sm:$0xff] }
 0x434   : > { %5708 = vmatprep.subr.bf16.mxu1 %v6791_v28  ;;  %v6360_v54 = vcombine.low %v2325_v25, %v2329_v26  ;;  %v2437_v2 = vld [vmem:[%s8835_s12 + $0x4d0] sm:$0xff] }
 0x435   : > { %v2301_v8 = vld [vmem:[%s8835_s12 + $0x90] sm:$0xff] }
 0x436   : > { %5668 = vmatpush2.bf16.msra.mxu0 %v6662_v41  ;;  %v2429_v10 = vld [vmem:[%s8835_s12 + $0x490] sm:$0xff] }
 0x437   : > { %5709 = vmatpush2.bf16.msra.mxu1 %v6790_v43  ;;  %5669 = vmatprep.subr.bf16.mxu0 %v6655_v33  ;;  %v6496_v43 = vcombine.low %v2461_v19, %v2465_v20  ;;  %v6361_v33 = vcombine.high %v2325_v25, %v2329_v26  ;;  %v2433_v11 = vld [vmem:[%s8835_s12 + $0x4b0] sm:$0xff] }
 0x438   : > { %5710 = vmatprep.subr.bf16.mxu1 %v6783_v34  ;;  %v6465_v20 = vcombine.high %v2429_v10, %v2433_v11  ;;  %v2425_v25 = vld [vmem:[%s8835_s12 + $0x470] sm:$0xff] }
 0x43a   : > { %5670 = vmatpush2.bf16.msra.mxu0 %v6654_v46 }
 0x43b   : > { %5711 = vmatpush2.bf16.msra.mxu1 %v6782_v47  ;;  %5671 = vmatprep.subr.bf16.mxu0 %v6647_v48  ;;  %v2445_v48 = vld [vmem:[%s8835_s12 + $0x510] sm:$0xff] }
 0x43c   : > { %5712 = vmatprep.subr.bf16.mxu1 %v6775_v49  ;;  %v2449_v49 = vld [vmem:[%s8835_s12 + $0x530] sm:$0xff] }
 0x43e   : > { %5672 = vmatpush2.bf16.msra.mxu0 %v6646_v59  ;;  %v6488_v59 = vcombine.low %v2453_v30, %v2457_v12  ;;  %v2285_v30 = vld [vmem:[%s8835_s12 + $0x10] sm:$0xff] }
 0x43f   : > { %5713 = vmatpush2.bf16.msra.mxu1 %v6774_v60  ;;  %5673 = vmatprep.subr.bf16.mxu0 %v6639_v61  ;;  %v6353_v60 = vcombine.high %v2317_v37, %v2321_v40  ;;  %v6481_v61 = vcombine.high %v2445_v48, %v2449_v49  ;;  %v2289_v12 = vld [vmem:[%s8835_s12 + $0x30] sm:$0xff] }
 0x440   : > { %5714 = vmatprep.subr.bf16.mxu1 %v6767_v62  ;;  %v2309_v62 = vld [vmem:[%s8835_s12 + $0xd0] sm:$0xff] }
 0x441   : > { %v2533_v37 = vld [vmem:[%s8835_s12 + $0x7d0] sm:$0xff] }
 0x442   : > { %5674 = vmatpush2.bf16.msra.mxu0 %v6638_v5  ;;  %v6480_v5 = vcombine.low %v2445_v48, %v2449_v49  ;;  %v2537_v40 = vld [vmem:[%s8835_s12 + $0x7f0] sm:$0xff] }
 0x443   : > { %5715 = vmatpush2.bf16.msra.mxu1 %v6766_v6  ;;  %5725 = vmatprep.subr.bf16.mxu0 %v6377_v7  ;;  %v6345_v6 = vcombine.high %v2309_v62, %v2313_v63  ;;  %v6473_v7 = vcombine.high %v2437_v2, %v2441_v3  ;;  %v6569_v49 = vcombine.high %v2533_v37, %v2537_v40 }
 0x444   : > { %5766 = vmatprep.subr.bf16.mxu1 %v6505_v9  ;;  %v2305_v9 = vld [vmem:[%s8835_s12 + $0xb0] sm:$0xff] }
 0x445   : > { %5676 = vmatmul.mubr.bf16.vlgmr.msra.gmra.mxu0 %v9046_v38  ;;  %v5431_v27 = vpop.f32.mrf.mxu0  ;;  %v5472_v28 = vpop.f32.mrf.mxu1  ;;  %v6337_v19 = vcombine.high %v2301_v8, %v2305_v9  ;;  %v6336_v26 = vcombine.low %v2301_v8, %v2305_v9 }
 0x446   : > { %5717 = vmatmul.mubr.bf16.vlgmr.msra.gmra.mxu1 %v9048_v39  ;;  %v5432_v31 = vadd.f32 %v5431_v27, %v2800_v18  ;;  %5726 = vmatpush1.bf16.msra.mxu0 %v6376_v17  ;;  %v6344_v17 = vcombine.low %v2309_v62, %v2313_v63  ;;  %v6472_v18 = vcombine.low %v2437_v2, %v2441_v3  ;;  %v2389_v2 = vld [vmem:[%s8835_s12 + $0x350] sm:$0xff] }
 0x447   : > { %5757 = vmatprep.mubr.bf16.mxu0 %v8954_v44  ;;  %5767 = vmatpush1.bf16.msra.mxu1 %v6504_v21  ;;  %v5433_v15 = vpop.f32.mrf.mxu0  ;;  %v5474_v41 = vpop.f32.mrf.mxu1  ;;  %v2293_v21 = vld [vmem:[%s8835_s12 + $0x50] sm:$0xff]  ;;  %v6464_v27 = vcombine.low %v2429_v10, %v2433_v11 }
 0x448   : > { %v9204_v34 = vadd.f32 %v5472_v28, %v5432_v31  ;;  %5798 = vmatprep.mubr.bf16.mxu1 %v8956_v45  ;;  %v5434_v35 = vadd.f32 %v5433_v15, %v2804_v14  ;;  %5727 = vmatprep.subr.bf16.mxu0 %v6369_v22  ;;  %v2297_v14 = vld [vmem:[%s8835_s12 + $0x70] sm:$0xff] }
 0x449   : > { %5768 = vmatprep.subr.bf16.mxu1 %v6497_v29  ;;  %v5435_v46 = vpop.f32.mrf.mxu0  ;;  %v5476_v47 = vpop.f32.mrf.mxu1  ;;  %v2421_v22 = vld [vmem:[%s8835_s12 + $0x450] sm:$0xff]  ;;  %v6329_v28 = vcombine.high %v2293_v21, %v2297_v14  ;;  %v6328_v15 = vcombine.low %v2293_v21, %v2297_v14 }
 0x44a   : > { %v9211_v53 = vadd.f32 %v5474_v41, %v5434_v35  ;;  %5728 = vmatpush1.bf16.msra.mxu0 %v6368_v32  ;;  %v6457_v29 = vcombine.high %v2421_v22, %v2425_v25  ;;  %v2413_v31 = vld [vmem:[%s8835_s12 + $0x410] sm:$0xff]  ;;  %v6456_v41 = vcombine.low %v2421_v22, %v2425_v25  ;;  %v6320_v46 = vcombine.low %v2285_v30, %v2289_v12 }
 0x44b   : > { %5769 = vmatpush1.bf16.msra.mxu1 %v6496_v43  ;;  %v5436_v56 = vpop.f32.mrf.mxu0  ;;  %v5477_v57 = vpop.f32.mrf.mxu1  ;;  %5729 = vmatprep.subr.bf16.mxu0 %v6361_v33  ;;  %v2417_v32 = vld [vmem:[%s8835_s12 + $0x430] sm:$0xff]  ;;  %v6321_v43 = vcombine.high %v2285_v30, %v2289_v12 }
 0x44c   : > { %5770 = vmatprep.subr.bf16.mxu1 %v6489_v36  ;;  %v6449_v33 = vcombine.high %v2413_v31, %v2417_v32  ;;  %v2405_v35 = vld [vmem:[%s8835_s12 + $0x3d0] sm:$0xff]  ;;  %v6448_v47 = vcombine.low %v2413_v31, %v2417_v32 }
 0x44d   : > { %v2409_v36 = vld [vmem:[%s8835_s12 + $0x3f0] sm:$0xff] }
 0x44e   : > { %5730 = vmatpush1.bf16.msra.mxu0 %v6360_v54  ;;  %v6441_v48 = vcombine.high %v2405_v35, %v2409_v36  ;;  %v2397_v54 = vld [vmem:[%s8835_s12 + $0x390] sm:$0xff] }
 0x44f   : > { %5771 = vmatpush1.bf16.msra.mxu1 %v6488_v59  ;;  %5731 = vmatprep.subr.bf16.mxu0 %v6353_v60  ;;  %v2401_v56 = vld [vmem:[%s8835_s12 + $0x3b0] sm:$0xff]  ;;  %v6440_v60 = vcombine.low %v2405_v35, %v2409_v36 }
 0x450   : > { %5772 = vmatprep.subr.bf16.mxu1 %v6481_v61  ;;  %v2525_v57 = vld [vmem:[%s8835_s12 + $0x790] sm:$0xff]  ;;  %v6568_v61 = vcombine.low %v2533_v37, %v2537_v40  ;;  %v6433_v62 = vcombine.high %v2397_v54, %v2401_v56 }
 0x451   : > { %v2529_v59 = vld [vmem:[%s8835_s12 + $0x7b0] sm:$0xff] }
 0x452   : > { %5732 = vmatpush1.bf16.msra.mxu0 %v6352_v4  ;;  %v6561_v63 = vcombine.high %v2525_v57, %v2529_v59  ;;  %v2393_v3 = vld [vmem:[%s8835_s12 + $0x370] sm:$0xff] }
 0x453   : > { %5773 = vmatpush1.bf16.msra.mxu1 %v6480_v5  ;;  %5733 = vmatprep.subr.bf16.mxu0 %v6345_v6  ;;  %v2517_v4 = vld [vmem:[%s8835_s12 + $0x750] sm:$0xff]  ;;  %v6432_v6 = vcombine.low %v2397_v54, %v2401_v56  ;;  %v6425_v8 = vcombine.high %v2389_v2, %v2393_v3 }
 0x454   : > { %5774 = vmatprep.subr.bf16.mxu1 %v6473_v7  ;;  %v2521_v5 = vld [vmem:[%s8835_s12 + $0x770] sm:$0xff]  ;;  %v6560_v7 = vcombine.low %v2525_v57, %v2529_v59 }
 0x455   : > { %v6553_v9 = vcombine.high %v2517_v4, %v2521_v5  ;;  %v2381_v10 = vld [vmem:[%s8835_s12 + $0x310] sm:$0xff] }
 0x456   : > { %5734 = vmatpush1.bf16.msra.mxu0 %v6344_v17  ;;  %v2385_v11 = vld [vmem:[%s8835_s12 + $0x330] sm:$0xff] }
 0x457   : > { %5775 = vmatpush1.bf16.msra.mxu1 %v6472_v18  ;;  %5735 = vmatprep.subr.bf16.mxu0 %v6337_v19  ;;  %v2509_v17 = vld [vmem:[%s8835_s12 + $0x710] sm:$0xff]  ;;  %v6424_v19 = vcombine.low %v2389_v2, %v2393_v3  ;;  %v6417_v21 = vcombine.high %v2381_v10, %v2385_v11 }
 0x458   : > { %5776 = vmatprep.subr.bf16.mxu1 %v6465_v20  ;;  %v2513_v18 = vld [vmem:[%s8835_s12 + $0x730] sm:$0xff]  ;;  %v6552_v20 = vcombine.low %v2517_v4, %v2521_v5 }
 0x459   : > { %v6545_v14 = vcombine.high %v2509_v17, %v2513_v18  ;;  %v2373_v22 = vld [vmem:[%s8835_s12 + $0x2d0] sm:$0xff] }
 0x45a   : > { %5736 = vmatpush1.bf16.msra.mxu0 %v6336_v26  ;;  %v2377_v25 = vld [vmem:[%s8835_s12 + $0x2f0] sm:$0xff] }
 0x45b   : > { %5777 = vmatpush1.bf16.msra.mxu1 %v6464_v27  ;;  %5737 = vmatprep.subr.bf16.mxu0 %v6329_v28  ;;  %v2501_v26 = vld [vmem:[%s8835_s12 + $0x6d0] sm:$0xff]  ;;  %v6416_v28 = vcombine.low %v2381_v10, %v2385_v11  ;;  %v6409_v30 = vcombine.high %v2373_v22, %v2377_v25 }
 0x45c   : > { %5778 = vmatprep.subr.bf16.mxu1 %v6457_v29  ;;  %v2505_v27 = vld [vmem:[%s8835_s12 + $0x6f0] sm:$0xff]  ;;  %v6544_v29 = vcombine.low %v2509_v17, %v2513_v18 }
 0x45d   : > { %v6537_v12 = vcombine.high %v2501_v26, %v2505_v27  ;;  %v2365_v31 = vld [vmem:[%s8835_s12 + $0x290] sm:$0xff] }
 0x45e   : > { %5738 = vmatpush1.bf16.msra.mxu0 %v6328_v15  ;;  %v2369_v32 = vld [vmem:[%s8835_s12 + $0x2b0] sm:$0xff] }
 0x45f   : > { %5779 = vmatpush1.bf16.msra.mxu1 %v6456_v41  ;;  %5739 = vmatprep.subr.bf16.mxu0 %v6321_v43  ;;  %v2493_v15 = vld [vmem:[%s8835_s12 + $0x690] sm:$0xff]  ;;  %v6408_v43 = vcombine.low %v2373_v22, %v2377_v25  ;;  %v6401_v35 = vcombine.high %v2365_v31, %v2369_v32 }
 0x460   : > { %5780 = vmatprep.subr.bf16.mxu1 %v6449_v33  ;;  %v2497_v41 = vld [vmem:[%s8835_s12 + $0x6b0] sm:$0xff]  ;;  %v6536_v33 = vcombine.low %v2501_v26, %v2505_v27 }
 0x461   : > { %v6529_v36 = vcombine.high %v2493_v15, %v2497_v41  ;;  %v2357_v37 = vld [vmem:[%s8835_s12 + $0x250] sm:$0xff] }
 0x462   : > { %5740 = vmatpush1.bf16.msra.mxu0 %v6320_v46  ;;  %v2361_v40 = vld [vmem:[%s8835_s12 + $0x270] sm:$0xff] }
 0x463   : > { %5781 = vmatpush1.bf16.msra.mxu1 %v6448_v47  ;;  %5741 = vmatprep.subr.bf16.mxu0 %v6441_v48  ;;  %v2485_v46 = vld [vmem:[%s8835_s12 + $0x650] sm:$0xff]  ;;  %v6400_v48 = vcombine.low %v2365_v31, %v2369_v32  ;;  %v6393_v54 = vcombine.high %v2357_v37, %v2361_v40 }
 0x464   : > { %5782 = vmatprep.subr.bf16.mxu1 %v6569_v49  ;;  %v2489_v47 = vld [vmem:[%s8835_s12 + $0x670] sm:$0xff]  ;;  %v6528_v49 = vcombine.low %v2493_v15, %v2497_v41 }
 0x465   : > { %v6521_v56 = vcombine.high %v2485_v46, %v2489_v47  ;;  %v2349_v57 = vld [vmem:[%s8835_s12 + $0x210] sm:$0xff] }
 0x466   : > { %5742 = vmatpush2.bf16.msra.mxu0 %v6440_v60  ;;  %v2353_v59 = vld [vmem:[%s8835_s12 + $0x230] sm:$0xff] }
 0x467   : > { %5783 = vmatpush2.bf16.msra.mxu1 %v6568_v61  ;;  %5743 = vmatprep.subr.bf16.mxu0 %v6433_v62  ;;  %v2477_v60 = vld [vmem:[%s8835_s12 + $0x610] sm:$0xff]  ;;  %v6392_v62 = vcombine.low %v2357_v37, %v2361_v40  ;;  %v6385_v2 = vcombine.high %v2349_v57, %v2353_v59 }
 0x468   : > { %5784 = vmatprep.subr.bf16.mxu1 %v6561_v63  ;;  %v2481_v61 = vld [vmem:[%s8835_s12 + $0x630] sm:$0xff]  ;;  %v6520_v63 = vcombine.low %v2485_v46, %v2489_v47 }
 0x469   : > { %v6513_v3 = vcombine.high %v2477_v60, %v2481_v61  ;;  %v2597_v4 = vld [vmem:[%s8835_s12 + $0x9d0] sm:$0xff] }
 0x46a   : > { %5744 = vmatpush2.bf16.msra.mxu0 %v6432_v6  ;;  %v2601_v5 = vld [vmem:[%s8835_s12 + $0x9f0] sm:$0xff] }
 0x46b   : > { %5785 = vmatpush2.bf16.msra.mxu1 %v6560_v7  ;;  %5745 = vmatprep.subr.bf16.mxu0 %v6425_v8  ;;  %v2725_v6 = vld [vmem:[%s8835_s12 + $0xdd0] sm:$0xff]  ;;  %v6384_v8 = vcombine.low %v2349_v57, %v2353_v59  ;;  %v6633_v10 = vcombine.high %v2597_v4, %v2601_v5 }
 0x46c   : > { %5786 = vmatprep.subr.bf16.mxu1 %v6553_v9  ;;  %v2729_v7 = vld [vmem:[%s8835_s12 + $0xdf0] sm:$0xff]  ;;  %v6512_v9 = vcombine.low %v2477_v60, %v2481_v61 }
 0x46d   : > { %v6761_v11 = vcombine.high %v2725_v6, %v2729_v7  ;;  %v2589_v17 = vld [vmem:[%s8835_s12 + $0x990] sm:$0xff] }
 0x46e   : > { %5746 = vmatpush2.bf16.msra.mxu0 %v6424_v19  ;;  %v2593_v18 = vld [vmem:[%s8835_s12 + $0x9b0] sm:$0xff]  ;;  %v6632_v19 = vcombine.low %v2597_v4, %v2601_v5 }
 0x46f   : > { %5787 = vmatpush2.bf16.msra.mxu1 %v6552_v20  ;;  %5747 = vmatprep.subr.bf16.mxu0 %v6417_v21  ;;  %v2717_v20 = vld [vmem:[%s8835_s12 + $0xd90] sm:$0xff]  ;;  %v6625_v22 = vcombine.high %v2589_v17, %v2593_v18  ;;  %v6624_v32 = vcombine.low %v2589_v17, %v2593_v18 }
 0x470   : > { %5788 = vmatprep.subr.bf16.mxu1 %v6545_v14  ;;  %v2721_v21 = vld [vmem:[%s8835_s12 + $0xdb0] sm:$0xff]  ;;  %v6760_v14 = vcombine.low %v2725_v6, %v2729_v7 }
 0x471   : > { %v2581_v25 = vld [vmem:[%s8835_s12 + $0x950] sm:$0xff] }
 0x472   : > { %5748 = vmatpush2.bf16.msra.mxu0 %v6416_v28  ;;  %v2585_v26 = vld [vmem:[%s8835_s12 + $0x970] sm:$0xff] }
 0x473   : > { %5789 = vmatpush2.bf16.msra.mxu1 %v6544_v29  ;;  %5749 = vmatprep.subr.bf16.mxu0 %v6409_v30  ;;  %v6753_v29 = vcombine.high %v2717_v20, %v2721_v21  ;;  %v2709_v30 = vld [vmem:[%s8835_s12 + $0xd50] sm:$0xff]  ;;  %v6616_v57 = vcombine.low %v2581_v25, %v2585_v26 }
 0x474   : > { %5790 = vmatprep.subr.bf16.mxu1 %v6537_v12  ;;  %v2713_v12 = vld [vmem:[%s8835_s12 + $0xd70] sm:$0xff] }
 0x475   : > { %v2573_v37 = vld [vmem:[%s8835_s12 + $0x910] sm:$0xff]  ;;  %v6744_v60 = vcombine.low %v2709_v30, %v2713_v12 }
 0x476   : > { %5750 = vmatpush2.bf16.msra.mxu0 %v6408_v43  ;;  %v6752_v43 = vcombine.low %v2717_v20, %v2721_v21  ;;  %v2577_v40 = vld [vmem:[%s8835_s12 + $0x930] sm:$0xff] }
 0x477   : > { %5791 = vmatpush2.bf16.msra.mxu1 %v6536_v33  ;;  %5751 = vmatprep.subr.bf16.mxu0 %v6401_v35  ;;  %v6617_v33 = vcombine.high %v2581_v25, %v2585_v26  ;;  %v6609_v61 = vcombine.high %v2573_v37, %v2577_v40  ;;  %v2693_v4 = vld [vmem:[%s8835_s12 + $0xcd0] sm:$0xff]  ;;  %v6608_v6 = vcombine.low %v2573_v37, %v2577_v40 }
 0x478   : > { %5792 = vmatprep.subr.bf16.mxu1 %v6529_v36  ;;  %v2697_v5 = vld [vmem:[%s8835_s12 + $0xcf0] sm:$0xff] }
 0x479   : > { %v2685_v17 = vld [vmem:[%s8835_s12 + $0xc90] sm:$0xff]  ;;  %v6728_v20 = vcombine.low %v2693_v4, %v2697_v5 }
 0x47a   : > { %5752 = vmatpush2.bf16.msra.mxu0 %v6400_v48  ;;  %v2701_v48 = vld [vmem:[%s8835_s12 + $0xd10] sm:$0xff] }
 0x47b   : > { %5793 = vmatpush2.bf16.msra.mxu1 %v6528_v49  ;;  %5753 = vmatprep.subr.bf16.mxu0 %v6393_v54  ;;  %v2705_v49 = vld [vmem:[%s8835_s12 + $0xd30] sm:$0xff] }
 0x47c   : > { %5794 = vmatprep.subr.bf16.mxu1 %v6521_v56  ;;  %v6736_v7 = vcombine.low %v2701_v48, %v2705_v49  ;;  %v2689_v18 = vld [vmem:[%s8835_s12 + $0xcb0] sm:$0xff] }
 0x47d   : > { %v2553_v25 = vld [vmem:[%s8835_s12 + $0x870] sm:$0xff] }
 0x47e   : > { %5754 = vmatpush2.bf16.msra.mxu0 %v6392_v62  ;;  %v2677_v26 = vld [vmem:[%s8835_s12 + $0xc50] sm:$0xff] }
 0x47f   : > { %5795 = vmatpush2.bf16.msra.mxu1 %v6520_v63  ;;  %5755 = vmatprep.subr.bf16.mxu0 %v6385_v2  ;;  %v6737_v63 = vcombine.high %v2701_v48, %v2705_v49  ;;  %v2565_v2 = vld [vmem:[%s8835_s12 + $0x8d0] sm:$0xff] }
 0x480   : > { %5796 = vmatprep.subr.bf16.mxu1 %v6513_v3  ;;  %v2569_v3 = vld [vmem:[%s8835_s12 + $0x8f0] sm:$0xff] }
 0x481   : > { %v2665_v48 = vld [vmem:[%s8835_s12 + $0xbf0] sm:$0xff] }
 0x482   : > { %5756 = vmatpush2.bf16.msra.mxu0 %v6384_v8  ;;  %v6601_v8 = vcombine.high %v2565_v2, %v2569_v3  ;;  %v2789_v49 = vld [vmem:[%s8835_s12 + $0xfd0] sm:$0xff] }
 0x483   : > { %5797 = vmatpush2.bf16.msra.mxu1 %v6512_v9  ;;  %5807 = vmatprep.subr.bf16.mxu0 %v6633_v10  ;;  %v6729_v9 = vcombine.high %v2693_v4, %v2697_v5  ;;  %v2557_v10 = vld [vmem:[%s8835_s12 + $0x890] sm:$0xff] }
 0x484   : > { %5848 = vmatprep.subr.bf16.mxu1 %v6761_v11  ;;  %v2561_v11 = vld [vmem:[%s8835_s12 + $0x8b0] sm:$0xff] }
 0x485   : > { %v5513_v27 = vpop.f32.mrf.mxu0  ;;  %v5554_v28 = vpop.f32.mrf.mxu1  ;;  %5758 = vmatmul.mubr.bf16.vlgmr.msra.gmra.mxu0 %v8958_v50  ;;  %v6593_v21 = vcombine.high %v2557_v10, %v2561_v11 }
 0x486   : > { %v5514_v31 = vadd.f32 %v5513_v27, %v9204_v34  ;;  %5799 = vmatmul.mubr.bf16.vlgmr.msra.gmra.mxu1 %v8960_v52  ;;  %5808 = vmatpush1.bf16.msra.mxu0 %v6632_v19  ;;  %v6745_v34 = vcombine.high %v2709_v30, %v2713_v12  ;;  %v6600_v19 = vcombine.low %v2565_v2, %v2569_v3  ;;  %v2681_v27 = vld [vmem:[%s8835_s12 + $0xc70] sm:$0xff] }
 0x487   : > { %5839 = vmatprep.mubr.bf16.mxu0 %v8970_v0  ;;  %5849 = vmatpush1.bf16.msra.mxu1 %v6760_v14  ;;  %v5515_v15 = vpop.f32.mrf.mxu0  ;;  %v5556_v41 = vpop.f32.mrf.mxu1  ;;  %v6721_v14 = vcombine.high %v2685_v17, %v2689_v18  ;;  %v6713_v12 = vcombine.high %v2677_v26, %v2681_v27 }
 0x488   : > { %v5555_v35 = vadd.f32 %v5554_v28, %v5514_v31  ;;  %5880 = vmatprep.mubr.bf16.mxu1 %v8972_v1  ;;  %v5516_v36 = vadd.f32 %v5515_v15, %v9211_v53  ;;  %5809 = vmatprep.subr.bf16.mxu0 %v6625_v22  ;;  %v2549_v22 = vld [vmem:[%s8835_s12 + $0x850] sm:$0xff]  ;;  %v6592_v28 = vcombine.low %v2557_v10, %v2561_v11 }
 0x489   : > { %v5517_v46 = vpop.f32.mrf.mxu0  ;;  %v5558_v47 = vpop.f32.mrf.mxu1  ;;  %5850 = vmatprep.subr.bf16.mxu1 %v6753_v29  ;;  %v6720_v29 = vcombine.low %v2685_v17, %v2689_v18  ;;  %v6585_v30 = vcombine.high %v2549_v22, %v2553_v25  ;;  %v2541_v31 = vld [vmem:[%s8835_s12 + $0x810] sm:$0xff] }
 0x48a   : > { %v6828_v54 = vmul.f32 -1.442695, %v5555_v35  ;;  %v5557_v56 = vadd.f32 %v5556_v41, %v5516_v36  ;;  %5810 = vmatpush1.bf16.msra.mxu0 %v6624_v32  ;;  %v2545_v32 = vld [vmem:[%s8835_s12 + $0x830] sm:$0xff]  ;;  %v6584_v35 = vcombine.low %v2549_v22, %v2553_v25 }
 0x48b   : > { %5851 = vmatpush1.bf16.msra.mxu1 %v6752_v43  ;;  %v5518_v59 = vpop.f32.mrf.mxu0  ;;  %v5559_v53 = vpop.f32.mrf.mxu1  ;;  %5811 = vmatprep.subr.bf16.mxu0 %v6617_v33  ;;  %v2669_v41 = vld [vmem:[%s8835_s12 + $0xc10] sm:$0xff]  ;;  %v6577_v37 = vcombine.high %v2541_v31, %v2545_v32 }
 0x48c   : > { %7056 = vpow2.f32 %v6828_v54  ;;  %v6829_v62 = vmul.f32 -1.442695, %v5557_v56  ;;  %5852 = vmatprep.subr.bf16.mxu1 %v6745_v34  ;;  %v2673_v43 = vld [vmem:[%s8835_s12 + $0xc30] sm:$0xff]  ;;  %v6712_v34 = vcombine.low %v2677_v26, %v2681_v27  ;;  %v6576_v56 = vcombine.low %v2541_v31, %v2545_v32 }
 0x48d   : > { %v6705_v46 = vcombine.high %v2669_v41, %v2673_v43  ;;  %v2661_v47 = vld [vmem:[%s8835_s12 + $0xbd0] sm:$0xff] }
 0x48e   : > { %7058 = vpow2.f32 %v6829_v62  ;;  %5812 = vmatpush1.bf16.msra.mxu0 %v6616_v57  ;;  %v2793_v54 = vld [vmem:[%s8835_s12 + $0xff0] sm:$0xff]  ;;  %v6704_v57 = vcombine.low %v2669_v41, %v2673_v43  ;;  %v6697_v59 = vcombine.high %v2661_v47, %v2665_v48  ;;  %v6696_v2 = vcombine.low %v2661_v47, %v2665_v48 }
 0x48f   : > { %5853 = vmatpush1.bf16.msra.mxu1 %v6744_v60  ;;  %5813 = vmatprep.subr.bf16.mxu0 %v6609_v61  ;;  %v6825_v53 = vcombine.high %v2789_v49, %v2793_v54  ;;  %v2653_v60 = vld [vmem:[%s8835_s12 + $0xb90] sm:$0xff]  ;;  %v6824_v3 = vcombine.low %v2789_v49, %v2793_v54 }
 0x490   : > { %5854 = vmatprep.subr.bf16.mxu1 %v6737_v63  ;;  %v2657_v61 = vld [vmem:[%s8835_s12 + $0xbb0] sm:$0xff] }
 0x491   : > { %v2781_v62 = vld [vmem:[%s8835_s12 + $0xf90] sm:$0xff]  ;;  %v6689_v4 = vcombine.high %v2653_v60, %v2657_v61  ;;  %v6688_v10 = vcombine.low %v2653_v60, %v2657_v61 }
 0x492   : > { %5814 = vmatpush1.bf16.msra.mxu0 %v6608_v6  ;;  %v2785_v63 = vld [vmem:[%s8835_s12 + $0xfb0] sm:$0xff] }
 0x493   : > { %5855 = vmatpush1.bf16.msra.mxu1 %v6736_v7  ;;  %5815 = vmatprep.subr.bf16.mxu0 %v6601_v8  ;;  %v6817_v5 = vcombine.high %v2781_v62, %v2785_v63  ;;  %v2645_v6 = vld [vmem:[%s8835_s12 + $0xb50] sm:$0xff]  ;;  %v6816_v11 = vcombine.low %v2781_v62, %v2785_v63 }
 0x494   : > { %5856 = vmatprep.subr.bf16.mxu1 %v6729_v9  ;;  %v2649_v7 = vld [vmem:[%s8835_s12 + $0xb70] sm:$0xff] }
 0x495   : > { %v2773_v8 = vld [vmem:[%s8835_s12 + $0xf50] sm:$0xff]  ;;  %v6681_v17 = vcombine.high %v2645_v6, %v2649_v7  ;;  %v6680_v25 = vcombine.low %v2645_v6, %v2649_v7 }
 0x496   : > { %5816 = vmatpush1.bf16.msra.mxu0 %v6600_v19  ;;  %v2777_v9 = vld [vmem:[%s8835_s12 + $0xf70] sm:$0xff] }
 0x497   : > { %5857 = vmatpush1.bf16.msra.mxu1 %v6728_v20  ;;  %5817 = vmatprep.subr.bf16.mxu0 %v6593_v21  ;;  %v6809_v18 = vcombine.high %v2773_v8, %v2777_v9  ;;  %v2637_v19 = vld [vmem:[%s8835_s12 + $0xb10] sm:$0xff]  ;;  %v6808_v27 = vcombine.low %v2773_v8, %v2777_v9  ;;  %v2342_v9 = vld [vmem:[%s8835_s12 + $0x1d8] sm:$0xff] }
 0x498   : > { %5858 = vmatprep.subr.bf16.mxu1 %v6721_v14  ;;  %v2641_v20 = vld [vmem:[%s8835_s12 + $0xb30] sm:$0xff] }
 0x499   : > { %v7057_v15 = vpop.eup %7056  ;;  %v2765_v21 = vld [vmem:[%s8835_s12 + $0xf10] sm:$0xff]  ;;  %v6672_v41 = vcombine.low %v2637_v19, %v2641_v20 }
 0x49a   : > { %v6077_v33 = vadd.f32 1.0, %v7057_v15  ;;  %5818 = vmatpush1.bf16.msra.mxu0 %v6592_v28  ;;  %v2769_v14 = vld [vmem:[%s8835_s12 + $0xf30] sm:$0xff]  ;;  %v6673_v28 = vcombine.high %v2637_v19, %v2641_v20 }
 0x49b   : > { %v7059_v36 = vpop.eup %7058  ;;  %5859 = vmatpush1.bf16.msra.mxu1 %v6720_v29  ;;  %5819 = vmatprep.subr.bf16.mxu0 %v6585_v30  ;;  %v6801_v29 = vcombine.high %v2765_v21, %v2769_v14  ;;  %v2629_v30 = vld [vmem:[%s8835_s12 + $0xad0] sm:$0xff]  ;;  %v6800_v43 = vcombine.low %v2765_v21, %v2769_v14  ;;  %v2334_v14 = vld [vmem:[%s8835_s12 + $0x198] sm:$0xff] }
 0x49c   : > { %v6078_v40 = vadd.f32 1.0, %v7059_v36  ;;  %5860 = vmatprep.subr.bf16.mxu1 %v6713_v12  ;;  %7060 = vrcp.f32 %v6077_v33  ;;  %v2633_v12 = vld [vmem:[%s8835_s12 + $0xaf0] sm:$0xff] }
 0x49d   : > { %v2757_v32 = vld [vmem:[%s8835_s12 + $0xed0] sm:$0xff]  ;;  %v6665_v33 = vcombine.high %v2629_v30, %v2633_v12 }
 0x49e   : > { %7062 = vrcp.f32 %v6078_v40  ;;  %5820 = vmatpush1.bf16.msra.mxu0 %v6584_v35  ;;  %v2761_v15 = vld [vmem:[%s8835_s12 + $0xef0] sm:$0xff] }
 0x49f   : > { %5861 = vmatpush1.bf16.msra.mxu1 %v6712_v34  ;;  %5821 = vmatprep.subr.bf16.mxu0 %v6577_v37  ;;  %v6793_v35 = vcombine.high %v2757_v32, %v2761_v15  ;;  %v2621_v36 = vld [vmem:[%s8835_s12 + $0xa90] sm:$0xff]  ;;  %v6792_v47 = vcombine.low %v2757_v32, %v2761_v15  ;;  %v2326_v32 = vld [vmem:[%s8835_s12 + $0x158] sm:$0xff] }
 0x4a0   : > { %5862 = vmatprep.subr.bf16.mxu1 %v6705_v46  ;;  %v2625_v34 = vld [vmem:[%s8835_s12 + $0xab0] sm:$0xff]  ;;  %v6664_v46 = vcombine.low %v2629_v30, %v2633_v12  ;;  %v2330_v15 = vld [vmem:[%s8835_s12 + $0x178] sm:$0xff] }
 0x4a1   : > { %v2749_v37 = vld [vmem:[%s8835_s12 + $0xe90] sm:$0xff]  ;;  %v6657_v48 = vcombine.high %v2621_v36, %v2625_v34 }
 0x4a2   : > { %5822 = vmatpush1.bf16.msra.mxu0 %v6576_v56  ;;  %v2753_v40 = vld [vmem:[%s8835_s12 + $0xeb0] sm:$0xff] }
 0x4a3   : > { %5863 = vmatpush1.bf16.msra.mxu1 %v6704_v57  ;;  %5823 = vmatprep.subr.bf16.mxu0 %v6697_v59  ;;  %v6785_v49 = vcombine.high %v2749_v37, %v2753_v40  ;;  %v2613_v54 = vld [vmem:[%s8835_s12 + $0xa50] sm:$0xff]  ;;  %v6784_v60 = vcombine.low %v2749_v37, %v2753_v40 }
 0x4a4   : > { %5864 = vmatprep.subr.bf16.mxu1 %v6825_v53  ;;  %v2617_v56 = vld [vmem:[%s8835_s12 + $0xa70] sm:$0xff]  ;;  %v6656_v53 = vcombine.low %v2621_v36, %v2625_v34 }
 0x4a5   : > { %v2741_v57 = vld [vmem:[%s8835_s12 + $0xe50] sm:$0xff]  ;;  %v6649_v61 = vcombine.high %v2613_v54, %v2617_v56 }
 0x4a6   : > { %5824 = vmatpush2.bf16.msra.mxu0 %v6696_v2  ;;  %v2745_v59 = vld [vmem:[%s8835_s12 + $0xe70] sm:$0xff] }
 0x4a7   : > { %5865 = vmatpush2.bf16.msra.mxu1 %v6824_v3  ;;  %5825 = vmatprep.subr.bf16.mxu0 %v6689_v4  ;;  %v6777_v62 = vcombine.high %v2741_v57, %v2745_v59  ;;  %v2605_v63 = vld [vmem:[%s8835_s12 + $0xa10] sm:$0xff]  ;;  %v6776_v6 = vcombine.low %v2741_v57, %v2745_v59  ;;  %v2446_v57 = vld [vmem:[%s8835_s12 + $0x518] sm:$0xff] }
 0x4a8   : > { %5866 = vmatprep.subr.bf16.mxu1 %v6817_v5  ;;  %v2609_v2 = vld [vmem:[%s8835_s12 + $0xa30] sm:$0xff]  ;;  %v6648_v5 = vcombine.low %v2613_v54, %v2617_v56  ;;  %v2322_v54 = vld [vmem:[%s8835_s12 + $0x138] sm:$0xff] }
 0x4a9   : > { %v9315_v22 = vpop.eup %7060  ;;  %v2733_v3 = vld [vmem:[%s8835_s12 + $0xe10] sm:$0xff]  ;;  %v6641_v7 = vcombine.high %v2605_v63, %v2609_v2 }
 0x4aa   : > { %5826 = vmatpush2.bf16.msra.mxu0 %v6688_v10  ;;  %v2737_v4 = vld [vmem:[%s8835_s12 + $0xe30] sm:$0xff]  ;;  %v2346_v10 = vld [vmem:[%s8835_s12 + $0x1f8] sm:$0xff] }
 0x4ab   : > { %v9317_v26 = vpop.eup %7062  ;;  %5867 = vmatpush2.bf16.msra.mxu1 %v6816_v11  ;;  %5827 = vmatprep.subr.bf16.mxu0 %v6681_v17  ;;  %v6769_v8 = vcombine.high %v2733_v3, %v2737_v4  ;;  %v2470_v11 = vld [vmem:[%s8835_s12 + $0x5d8] sm:$0xff]  ;;  %v6768_v19 = vcombine.low %v2733_v3, %v2737_v4  ;;  %v6379_v20 = vcombine.high %v2342_v9, %v2346_v10 }
 0x4ac   : > { %5868 = vmatprep.subr.bf16.mxu1 %v6809_v18  ;;  %v6109_v31 = vcombine.low %v9315_v22, %v9317_v26  ;;  %v2474_v17 = vld [vmem:[%s8835_s12 + $0x5f8] sm:$0xff]  ;;  %v6640_v18 = vcombine.low %v2605_v63, %v2609_v2 }
 0x4ad   : > { %v6507_v21 = vcombine.high %v2470_v11, %v2474_v17  ;;  %v6506_v30 = vcombine.low %v2470_v11, %v2474_v17  ;;  %v2310_v2 = vld [vmem:[%s8835_s12 + $0xd8] sm:$0xff] }
 0x4ae   : > { %5828 = vmatpush2.bf16.msra.mxu0 %v6680_v25  ;;  %v2338_v25 = vld [vmem:[%s8835_s12 + $0x1b8] sm:$0xff] }
 0x4af   : > { %5869 = vmatpush2.bf16.msra.mxu1 %v6808_v27  ;;  %5829 = vmatprep.subr.bf16.mxu0 %v6673_v28  ;;  %v6378_v27 = vcombine.low %v2342_v9, %v2346_v10  ;;  %v2462_v28 = vld [vmem:[%s8835_s12 + $0x598] sm:$0xff]  ;;  %v6371_v12 = vcombine.high %v2334_v14, %v2338_v25  ;;  %v6370_v34 = vcombine.low %v2334_v14, %v2338_v25 }
 0x4b0   : > { %5870 = vmatprep.subr.bf16.mxu1 %v6801_v29  ;;  %v2466_v29 = vld [vmem:[%s8835_s12 + $0x5b8] sm:$0xff] }
 0x4b1   : > { %v6498_v40 = vcombine.low %v2462_v28, %v2466_v29  ;;  %v2314_v3 = vld [vmem:[%s8835_s12 + $0xf8] sm:$0xff] }
 0x4b2   : > { %5830 = vmatpush2.bf16.msra.mxu0 %v6672_v41  ;;  %v2438_v4 = vld [vmem:[%s8835_s12 + $0x4d8] sm:$0xff] }
 0x4b3   : > { %5871 = vmatpush2.bf16.msra.mxu1 %v6800_v43  ;;  %5831 = vmatprep.subr.bf16.mxu0 %v6665_v33  ;;  %v6499_v43 = vcombine.high %v2462_v28, %v2466_v29  ;;  %v2454_v33 = vld [vmem:[%s8835_s12 + $0x558] sm:$0xff] }
 0x4b4   : > { %5872 = vmatprep.subr.bf16.mxu1 %v6793_v35  ;;  %v2458_v35 = vld [vmem:[%s8835_s12 + $0x578] sm:$0xff] }
 0x4b5   : > { %v2302_v10 = vld [vmem:[%s8835_s12 + $0x98] sm:$0xff] }
 0x4b6   : > { %5832 = vmatpush2.bf16.msra.mxu0 %v6664_v46  ;;  %v6363_v46 = vcombine.high %v2326_v32, %v2330_v15  ;;  %v2306_v11 = vld [vmem:[%s8835_s12 + $0xb8] sm:$0xff] }
 0x4b7   : > { %5873 = vmatpush2.bf16.msra.mxu1 %v6792_v47  ;;  %5833 = vmatprep.subr.bf16.mxu0 %v6657_v48  ;;  %v6491_v48 = vcombine.high %v2454_v33, %v2458_v35  ;;  %v2430_v17 = vld [vmem:[%s8835_s12 + $0x498] sm:$0xff] }
 0x4b8   : > { %5874 = vmatprep.subr.bf16.mxu1 %v6785_v49  ;;  %v2318_v49 = vld [vmem:[%s8835_s12 + $0x118] sm:$0xff] }
 0x4b9   : > { %v2294_v25 = vld [vmem:[%s8835_s12 + $0x58] sm:$0xff] }
 0x4ba   : > { %5834 = vmatpush2.bf16.msra.mxu0 %v6656_v53  ;;  %v6362_v53 = vcombine.low %v2326_v32, %v2330_v15  ;;  %v2422_v28 = vld [vmem:[%s8835_s12 + $0x458] sm:$0xff] }
 0x4bb   : > { %5875 = vmatpush2.bf16.msra.mxu1 %v6784_v60  ;;  %5835 = vmatprep.subr.bf16.mxu0 %v6649_v61  ;;  %v6355_v61 = vcombine.high %v2318_v49, %v2322_v54  ;;  %v2426_v29 = vld [vmem:[%s8835_s12 + $0x478] sm:$0xff] }
 0x4bc   : > { %5876 = vmatprep.subr.bf16.mxu1 %v6777_v62  ;;  %v6459_v15 = vcombine.high %v2422_v28, %v2426_v29 }
 0x4be   : > { %5836 = vmatpush2.bf16.msra.mxu0 %v6648_v5  ;;  %v2442_v5 = vld [vmem:[%s8835_s12 + $0x4f8] sm:$0xff] }
 0x4bf   : > { %5877 = vmatpush2.bf16.msra.mxu1 %v6776_v6  ;;  %5837 = vmatprep.subr.bf16.mxu0 %v6641_v7  ;;  %v6354_v6 = vcombine.low %v2318_v49, %v2322_v54  ;;  %v6475_v9 = vcombine.high %v2438_v4, %v2442_v5  ;;  %v2406_v54 = vld [vmem:[%s8835_s12 + $0x3d8] sm:$0xff] }
 0x4c0   : > { %5878 = vmatprep.subr.bf16.mxu1 %v6769_v8  ;;  %v6347_v8 = vcombine.high %v2310_v2, %v2314_v3 }
 0x4c2   : > { %5838 = vmatpush2.bf16.msra.mxu0 %v6640_v18  ;;  %v2434_v18 = vld [vmem:[%s8835_s12 + $0x4b8] sm:$0xff] }
 0x4c3   : > { %5879 = vmatpush2.bf16.msra.mxu1 %v6768_v19  ;;  %5889 = vmatprep.subr.bf16.mxu0 %v6379_v20  ;;  %v6346_v19 = vcombine.low %v2310_v2, %v2314_v3  ;;  %v6474_v20 = vcombine.low %v2438_v4, %v2442_v5  ;;  %v6467_v14 = vcombine.high %v2430_v17, %v2434_v18  ;;  %v2530_v2 = vld [vmem:[%s8835_s12 + $0x7b8] sm:$0xff] }
 0x4c4   : > { %5930 = vmatprep.subr.bf16.mxu1 %v6507_v21  ;;  %v6339_v21 = vcombine.high %v2302_v10, %v2306_v11 }
 0x4c5   : > { %v9347_v41 = vpop.f32.mrf.mxu0  ;;  %5840 = vmatmul.mubr.bf16.vlgmr.msra.gmra.mxu0 %v9046_v38 }
 0x4c6   : > { %v9352_v36 = vpop.f32.mrf.mxu1  ;;  %5881 = vmatmul.mubr.bf16.vlgmr.msra.gmra.mxu1 %v9048_v39  ;;  %5890 = vmatpush1.bf16.msra.mxu0 %v6378_v27  ;;  %v2298_v27 = vld [vmem:[%s8835_s12 + $0x78] sm:$0xff] }
 0x4c7   : > { %5921 = vmatprep.mubr.bf16.mxu0 %v8954_v44  ;;  %5931 = vmatpush1.bf16.msra.mxu1 %v6506_v30  ;;  %v9356_v37 = vpop.f32.mrf.mxu0  ;;  %v2450_v44 = vld [vmem:[%s8835_s12 + $0x538] sm:$0xff]  ;;  %v6338_v30 = vcombine.low %v2302_v10, %v2306_v11  ;;  %v6331_v32 = vcombine.high %v2294_v25, %v2298_v27 }
 0x4c8   : > { %5962 = vmatprep.mubr.bf16.mxu1 %v8956_v45  ;;  %v9359_v47 = vpop.f32.mrf.mxu1  ;;  %5891 = vmatprep.subr.bf16.mxu0 %v6371_v12  ;;  %v6490_v45 = vcombine.low %v2454_v33, %v2458_v35  ;;  %v6483_v63 = vcombine.high %v2446_v57, %v2450_v44  ;;  %v6482_v7 = vcombine.low %v2446_v57, %v2450_v44  ;;  %v2290_v33 = vld [vmem:[%s8835_s12 + $0x38] sm:$0xff] }
 0x4c9   : > { %v5599_v56 = vpop.f32.mrf.mxu0  ;;  %5932 = vmatprep.subr.bf16.mxu1 %v6499_v43  ;;  %v6466_v12 = vcombine.low %v2430_v17, %v2434_v18  ;;  %v2286_v43 = vld [vmem:[%s8835_s12 + $0x18] sm:$0xff] }
 0x4ca   : > { %v5640_v59 = vpop.f32.mrf.mxu1  ;;  %5892 = vmatpush1.bf16.msra.mxu0 %v6370_v34  ;;  %v2414_v35 = vld [vmem:[%s8835_s12 + $0x418] sm:$0xff] }
 0x4cb   : > { %5933 = vmatpush1.bf16.msra.mxu1 %v6498_v40  ;;  %v5600_v60 = vpop.f32.mrf.mxu0  ;;  %5893 = vmatprep.subr.bf16.mxu0 %v6363_v46  ;;  %v2418_v34 = vld [vmem:[%s8835_s12 + $0x438] sm:$0xff]  ;;  %v6330_v40 = vcombine.low %v2294_v25, %v2298_v27  ;;  %v6458_v46 = vcombine.low %v2422_v28, %v2426_v29  ;;  %v6322_v59 = vcombine.low %v2286_v43, %v2290_v33 }
 0x4cc   : > { %v5641_v62 = vpop.f32.mrf.mxu1  ;;  %5934 = vmatprep.subr.bf16.mxu1 %v6491_v48  ;;  %v6323_v48 = vcombine.high %v2286_v43, %v2290_v33  ;;  %v6451_v49 = vcombine.high %v2414_v35, %v2418_v34  ;;  %v2410_v56 = vld [vmem:[%s8835_s12 + $0x3f8] sm:$0xff] }
 0x4cd   : > { %v2534_v57 = vld [vmem:[%s8835_s12 + $0x7d8] sm:$0xff]  ;;  %v6443_v60 = vcombine.high %v2406_v54, %v2410_v56  ;;  %v6442_v3 = vcombine.low %v2406_v54, %v2410_v56 }
 0x4ce   : > { %5894 = vmatpush1.bf16.msra.mxu0 %v6362_v53  ;;  %v2538_v44 = vld [vmem:[%s8835_s12 + $0x7f8] sm:$0xff]  ;;  %v6450_v53 = vcombine.low %v2414_v35, %v2418_v34 }
 0x4cf   : > { %5935 = vmatpush1.bf16.msra.mxu1 %v6490_v45  ;;  %5895 = vmatprep.subr.bf16.mxu0 %v6355_v61  ;;  %v6571_v45 = vcombine.high %v2534_v57, %v2538_v44  ;;  %v2398_v61 = vld [vmem:[%s8835_s12 + $0x398] sm:$0xff]  ;;  %v6570_v4 = vcombine.low %v2534_v57, %v2538_v44 }
 0x4d0   : > { %5936 = vmatprep.subr.bf16.mxu1 %v6483_v63  ;;  %v2402_v62 = vld [vmem:[%s8835_s12 + $0x3b8] sm:$0xff] }
 0x4d1   : > { %v2526_v63 = vld [vmem:[%s8835_s12 + $0x798] sm:$0xff]  ;;  %v6435_v5 = vcombine.high %v2398_v61, %v2402_v62  ;;  %v6434_v11 = vcombine.low %v2398_v61, %v2402_v62 }
 0x4d2   : > { %5896 = vmatpush1.bf16.msra.mxu0 %v6354_v6  ;;  %v6563_v6 = vcombine.high %v2526_v63, %v2530_v2  ;;  %v2522_v10 = vld [vmem:[%s8835_s12 + $0x778] sm:$0xff]  ;;  %v6562_v17 = vcombine.low %v2526_v63, %v2530_v2 }
 0x4d3   : > { %5937 = vmatpush1.bf16.msra.mxu1 %v6482_v7  ;;  %5897 = vmatprep.subr.bf16.mxu0 %v6347_v8  ;;  %v2390_v7 = vld [vmem:[%s8835_s12 + $0x358] sm:$0xff] }
 0x4d4   : > { %5938 = vmatprep.subr.bf16.mxu1 %v6475_v9  ;;  %v2394_v8 = vld [vmem:[%s8835_s12 + $0x378] sm:$0xff] }
 0x4d5   : > { %v2518_v9 = vld [vmem:[%s8835_s12 + $0x758] sm:$0xff]  ;;  %v6427_v18 = vcombine.high %v2390_v7, %v2394_v8  ;;  %v6426_v27 = vcombine.low %v2390_v7, %v2394_v8 }
 0x4d6   : > { %5898 = vmatpush1.bf16.msra.mxu0 %v6346_v19  ;;  %v6555_v19 = vcombine.high %v2518_v9, %v2522_v10  ;;  %v2514_v25 = vld [vmem:[%s8835_s12 + $0x738] sm:$0xff]  ;;  %v6554_v28 = vcombine.low %v2518_v9, %v2522_v10 }
 0x4d7   : > { %5939 = vmatpush1.bf16.msra.mxu1 %v6474_v20  ;;  %5899 = vmatprep.subr.bf16.mxu0 %v6339_v21  ;;  %v2382_v20 = vld [vmem:[%s8835_s12 + $0x318] sm:$0xff] }
 0x4d8   : > { %5940 = vmatprep.subr.bf16.mxu1 %v6467_v14  ;;  %v2386_v21 = vld [vmem:[%s8835_s12 + $0x338] sm:$0xff] }
 0x4d9   : > { %v2510_v14 = vld [vmem:[%s8835_s12 + $0x718] sm:$0xff]  ;;  %v6419_v29 = vcombine.high %v2382_v20, %v2386_v21  ;;  %v6418_v33 = vcombine.low %v2382_v20, %v2386_v21 }
 0x4da   : > { %5900 = vmatpush1.bf16.msra.mxu0 %v6338_v30  ;;  %v6547_v30 = vcombine.high %v2510_v14, %v2514_v25  ;;  %v2506_v43 = vld [vmem:[%s8835_s12 + $0x6f8] sm:$0xff]  ;;  %v6546_v35 = vcombine.low %v2510_v14, %v2514_v25 }
 0x4db   : > { %5941 = vmatpush1.bf16.msra.mxu1 %v6466_v12  ;;  %5901 = vmatprep.subr.bf16.mxu0 %v6331_v32  ;;  %v2374_v12 = vld [vmem:[%s8835_s12 + $0x2d8] sm:$0xff] }
 0x4dc   : > { %5942 = vmatprep.subr.bf16.mxu1 %v6459_v15  ;;  %v2378_v32 = vld [vmem:[%s8835_s12 + $0x2f8] sm:$0xff] }
 0x4dd   : > { %v2502_v15 = vld [vmem:[%s8835_s12 + $0x6d8] sm:$0xff]  ;;  %v6411_v34 = vcombine.high %v2374_v12, %v2378_v32  ;;  %v6410_v56 = vcombine.low %v2374_v12, %v2378_v32 }
 0x4de   : > { %5902 = vmatpush1.bf16.msra.mxu0 %v6330_v40  ;;  %v6539_v40 = vcombine.high %v2502_v15, %v2506_v43  ;;  %v2498_v54 = vld [vmem:[%s8835_s12 + $0x6b8] sm:$0xff]  ;;  %v6538_v57 = vcombine.low %v2502_v15, %v2506_v43 }
 0x4df   : > { %5943 = vmatpush1.bf16.msra.mxu1 %v6458_v46  ;;  %5903 = vmatprep.subr.bf16.mxu0 %v6323_v48  ;;  %v2366_v46 = vld [vmem:[%s8835_s12 + $0x298] sm:$0xff] }
 0x4e0   : > { %5944 = vmatprep.subr.bf16.mxu1 %v6451_v49  ;;  %v2370_v48 = vld [vmem:[%s8835_s12 + $0x2b8] sm:$0xff] }
 0x4e1   : > { %v2494_v49 = vld [vmem:[%s8835_s12 + $0x698] sm:$0xff]  ;;  %v6403_v44 = vcombine.high %v2366_v46, %v2370_v48  ;;  %v6402_v62 = vcombine.low %v2366_v46, %v2370_v48 }
 0x4e2   : > { %5904 = vmatpush1.bf16.msra.mxu0 %v6322_v59  ;;  %v6531_v59 = vcombine.high %v2494_v49, %v2498_v54  ;;  %v2490_v61 = vld [vmem:[%s8835_s12 + $0x678] sm:$0xff]  ;;  %v6530_v63 = vcombine.low %v2494_v49, %v2498_v54 }
 0x4e3   : > { %5945 = vmatpush1.bf16.msra.mxu1 %v6450_v53  ;;  %5905 = vmatprep.subr.bf16.mxu0 %v6443_v60  ;;  %v2358_v53 = vld [vmem:[%s8835_s12 + $0x258] sm:$0xff] }
 0x4e4   : > { %5946 = vmatprep.subr.bf16.mxu1 %v6571_v45  ;;  %v2362_v60 = vld [vmem:[%s8835_s12 + $0x278] sm:$0xff] }
 0x4e5   : > { %v2486_v45 = vld [vmem:[%s8835_s12 + $0x658] sm:$0xff]  ;;  %v6395_v2 = vcombine.high %v2358_v53, %v2362_v60  ;;  %v6394_v8 = vcombine.low %v2358_v53, %v2362_v60 }
 0x4e6   : > { %5906 = vmatpush2.bf16.msra.mxu0 %v6442_v3  ;;  %v6523_v3 = vcombine.high %v2486_v45, %v2490_v61  ;;  %v2482_v7 = vld [vmem:[%s8835_s12 + $0x638] sm:$0xff]  ;;  %v6522_v9 = vcombine.low %v2486_v45, %v2490_v61 }
 0x4e7   : > { %5947 = vmatpush2.bf16.msra.mxu1 %v6570_v4  ;;  %5907 = vmatprep.subr.bf16.mxu0 %v6435_v5  ;;  %v2350_v4 = vld [vmem:[%s8835_s12 + $0x218] sm:$0xff] }
 0x4e8   : > { %5948 = vmatprep.subr.bf16.mxu1 %v6563_v6  ;;  %v2354_v5 = vld [vmem:[%s8835_s12 + $0x238] sm:$0xff] }
 0x4e9   : > { %v2478_v6 = vld [vmem:[%s8835_s12 + $0x618] sm:$0xff]  ;;  %v6387_v10 = vcombine.high %v2350_v4, %v2354_v5 }
 0x4ea   : > { %5908 = vmatpush2.bf16.msra.mxu0 %v6434_v11  ;;  %v9414_v11 = vld [vmem:[%s9184_s25] sm:$0xff]  ;;  %v2602_v20 = vld [vmem:[%s8835_s12 + $0x9f8] sm:$0xff] }
 0x4eb   : > { %5949 = vmatpush2.bf16.msra.mxu1 %v6562_v17  ;;  %5909 = vmatprep.subr.bf16.mxu0 %v6427_v18  ;;  %v2808_v17 = vrot.slane %v9414_v11, %v1941_v13  ;;  %v6515_v18 = vcombine.high %v2478_v6, %v2482_v7  ;;  %v2726_v21 = vld [vmem:[%s8835_s12 + $0xdd8] sm:$0xff]  ;;  %v2812_v25 = vrot.slane %v9414_v11, %v1945_v16 }
 0x4ec   : > { %5950 = vmatprep.subr.bf16.mxu1 %v6555_v19  ;;  %v2598_v19 = vld [vmem:[%s8835_s12 + $0x9d8] sm:$0xff] }
 0x4ed   : > { %v2730_v14 = vld [vmem:[%s8835_s12 + $0xdf8] sm:$0xff]  ;;  %v6635_v13 = vcombine.high %v2598_v19, %v2602_v20  ;;  %v5598_v15 = vadd.f32 %v9356_v37, %v2812_v25  ;;  %v6634_v16 = vcombine.low %v2598_v19, %v2602_v20 }
 0x4ee   : > { %5910 = vmatpush2.bf16.msra.mxu0 %v6426_v27  ;;  %v6386_v27 = vcombine.low %v2350_v4, %v2354_v5  ;;  %v2590_v12 = vld [vmem:[%s8835_s12 + $0x998] sm:$0xff] }
 0x4ef   : > { %5951 = vmatpush2.bf16.msra.mxu1 %v6554_v28  ;;  %5911 = vmatprep.subr.bf16.mxu0 %v6419_v29  ;;  %v6514_v28 = vcombine.low %v2478_v6, %v2482_v7  ;;  %v5596_v29 = vadd.f32 %v9347_v41, %v2808_v17  ;;  %v2594_v32 = vld [vmem:[%s8835_s12 + $0x9b8] sm:$0xff] }
 0x4f0   : > { %5952 = vmatprep.subr.bf16.mxu1 %v6547_v30  ;;  %v6763_v30 = vcombine.high %v2726_v21, %v2730_v14  ;;  %v2718_v43 = vld [vmem:[%s8835_s12 + $0xd98] sm:$0xff]  ;;  %v6627_v41 = vcombine.high %v2590_v12, %v2594_v32 }
 0x4f1   : > { %v2586_v46 = vld [vmem:[%s8835_s12 + $0x978] sm:$0xff] }
 0x4f2   : > { %5912 = vmatpush2.bf16.msra.mxu0 %v6418_v33  ;;  %v2722_v33 = vld [vmem:[%s8835_s12 + $0xdb8] sm:$0xff] }
 0x4f3   : > { %5953 = vmatpush2.bf16.msra.mxu1 %v6546_v35  ;;  %5913 = vmatprep.subr.bf16.mxu0 %v6411_v34  ;;  %v6762_v35 = vcombine.low %v2726_v21, %v2730_v14  ;;  %v5637_v34 = vadd.f32 %v9352_v36, %v5596_v29  ;;  %v6755_v49 = vcombine.high %v2718_v43, %v2722_v33  ;;  %v2710_v37 = vld [vmem:[%s8835_s12 + $0xd58] sm:$0xff] }
 0x4f4   : > { %5954 = vmatprep.subr.bf16.mxu1 %v6539_v40  ;;  %v2582_v40 = vld [vmem:[%s8835_s12 + $0x958] sm:$0xff]  ;;  %v6626_v36 = vcombine.low %v2590_v12, %v2594_v32 }
 0x4f5   : > { %v2714_v54 = vld [vmem:[%s8835_s12 + $0xd78] sm:$0xff]  ;;  %v6619_v53 = vcombine.high %v2582_v40, %v2586_v46  ;;  %v6618_v6 = vcombine.low %v2582_v40, %v2586_v46 }
 0x4f6   : > { %5914 = vmatpush2.bf16.msra.mxu0 %v6410_v56  ;;  %v5639_v56 = vadd.f32 %v9359_v47, %v5598_v15  ;;  %v6747_v61 = vcombine.high %v2710_v37, %v2714_v54  ;;  %v6746_v7 = vcombine.low %v2710_v37, %v2714_v54  ;;  %v2570_v19 = vld [vmem:[%s8835_s12 + $0x8f8] sm:$0xff] }
 0x4f7   : > { %5955 = vmatpush2.bf16.msra.mxu1 %v6538_v57  ;;  %5915 = vmatprep.subr.bf16.mxu0 %v6403_v44  ;;  %v2694_v20 = vld [vmem:[%s8835_s12 + $0xcd8] sm:$0xff] }
 0x4f8   : > { %5956 = vmatprep.subr.bf16.mxu1 %v6531_v59  ;;  %v2698_v21 = vld [vmem:[%s8835_s12 + $0xcf8] sm:$0xff] }
 0x4f9   : > { %v2562_v29 = vld [vmem:[%s8835_s12 + $0x8b8] sm:$0xff]  ;;  %v6730_v15 = vcombine.low %v2694_v20, %v2698_v21 }
 0x4fa   : > { %5916 = vmatpush2.bf16.msra.mxu0 %v6402_v62  ;;  %v2574_v62 = vld [vmem:[%s8835_s12 + $0x918] sm:$0xff] }
 0x4fb   : > { %5957 = vmatpush2.bf16.msra.mxu1 %v6530_v63  ;;  %5917 = vmatprep.subr.bf16.mxu0 %v6395_v2  ;;  %v2578_v63 = vld [vmem:[%s8835_s12 + $0x938] sm:$0xff] }
 0x4fc   : > { %5958 = vmatprep.subr.bf16.mxu1 %v6523_v3  ;;  %v2702_v2 = vld [vmem:[%s8835_s12 + $0xd18] sm:$0xff]  ;;  %v6610_v14 = vcombine.low %v2574_v62, %v2578_v63 }
 0x4fd   : > { %v2706_v3 = vld [vmem:[%s8835_s12 + $0xd38] sm:$0xff] }
 0x4fe   : > { %5918 = vmatpush2.bf16.msra.mxu0 %v6394_v8  ;;  %v6611_v8 = vcombine.high %v2574_v62, %v2578_v63  ;;  %v6739_v17 = vcombine.high %v2702_v2, %v2706_v3  ;;  %v6738_v25 = vcombine.low %v2702_v2, %v2706_v3  ;;  %v2690_v12 = vld [vmem:[%s8835_s12 + $0xcb8] sm:$0xff] }
 0x4ff   : > { %5959 = vmatpush2.bf16.msra.mxu1 %v6522_v9  ;;  %5919 = vmatprep.subr.bf16.mxu0 %v6387_v10  ;;  %v2542_v37 = vld [vmem:[%s8835_s12 + $0x818] sm:$0xff] }
 0x500   : > { %5960 = vmatprep.subr.bf16.mxu1 %v6515_v18  ;;  %v2566_v18 = vld [vmem:[%s8835_s12 + $0x8d8] sm:$0xff] }
 0x501   : > { %v6602_v32 = vcombine.low %v2566_v18, %v2570_v19  ;;  %v2546_v54 = vld [vmem:[%s8835_s12 + $0x838] sm:$0xff] }
 0x502   : > { %5920 = vmatpush2.bf16.msra.mxu0 %v6386_v27  ;;  %v6603_v27 = vcombine.high %v2566_v18, %v2570_v19  ;;  %v2666_v62 = vld [vmem:[%s8835_s12 + $0xbf8] sm:$0xff]  ;;  %v6578_v2 = vcombine.low %v2542_v37, %v2546_v54 }
 0x503   : > { %5961 = vmatpush2.bf16.msra.mxu1 %v6514_v28  ;;  %5971 = vmatprep.subr.bf16.mxu0 %v6635_v13  ;;  %v6731_v28 = vcombine.high %v2694_v20, %v2698_v21  ;;  %v2558_v13 = vld [vmem:[%s8835_s12 + $0x898] sm:$0xff] }
 0x504   : > { %6012 = vmatprep.subr.bf16.mxu1 %v6763_v30  ;;  %v2686_v30 = vld [vmem:[%s8835_s12 + $0xc98] sm:$0xff]  ;;  %v6594_v40 = vcombine.low %v2558_v13, %v2562_v29 }
 0x505   : > { %v5677_v48 = vpop.f32.mrf.mxu0  ;;  %5922 = vmatmul.mubr.bf16.vlgmr.msra.gmra.mxu0 %v8958_v50  ;;  %v6754_v50 = vcombine.low %v2718_v43, %v2722_v33  ;;  %v6723_v43 = vcombine.high %v2686_v30, %v2690_v12  ;;  %v2550_v33 = vld [vmem:[%s8835_s12 + $0x858] sm:$0xff]  ;;  %v6722_v46 = vcombine.low %v2686_v30, %v2690_v12 }
 0x506   : > { %v5678_v57 = vadd.f32 %v5677_v48, %v5637_v34  ;;  %v5718_v44 = vpop.f32.mrf.mxu1  ;;  %5963 = vmatmul.mubr.bf16.vlgmr.msra.gmra.mxu1 %v8960_v52  ;;  %5972 = vmatpush1.bf16.msra.mxu0 %v6634_v16  ;;  %v6595_v16 = vcombine.high %v2558_v13, %v2562_v29  ;;  %v2678_v34 = vld [vmem:[%s8835_s12 + $0xc58] sm:$0xff] }
 0x507   : > { %6003 = vmatprep.mubr.bf16.mxu0 %v8970_v0  ;;  %6013 = vmatpush1.bf16.msra.mxu1 %v6762_v35  ;;  %v5679_v59 = vpop.f32.mrf.mxu0  ;;  %v2554_v35 = vld [vmem:[%s8835_s12 + $0x878] sm:$0xff] }
 0x508   : > { %v5719_v60 = vadd.f32 %v5718_v44, %v5678_v57  ;;  %6044 = vmatprep.mubr.bf16.mxu1 %v8972_v1  ;;  %v5680_v47 = vadd.f32 %v5679_v59, %v5639_v56  ;;  %v5720_v45 = vpop.f32.mrf.mxu1  ;;  %5973 = vmatprep.subr.bf16.mxu0 %v6627_v41  ;;  %v2682_v41 = vld [vmem:[%s8835_s12 + $0xc78] sm:$0xff]  ;;  %v6587_v48 = vcombine.high %v2550_v33, %v2554_v35 }
 0x509   : > { %v5681_v52 = vpop.f32.mrf.mxu0  ;;  %6014 = vmatprep.subr.bf16.mxu1 %v6755_v49  ;;  %v6715_v49 = vcombine.high %v2678_v34, %v2682_v41  ;;  %v2670_v57 = vld [vmem:[%s8835_s12 + $0xc18] sm:$0xff]  ;;  %v6586_v59 = vcombine.low %v2550_v33, %v2554_v35 }
 0x50a   : > { %v6830_v0 = vmul.f32 -1.442695, %v5719_v60  ;;  %v5721_v4 = vadd.f32 %v5720_v45, %v5680_v47  ;;  %v5722_v5 = vpop.f32.mrf.mxu1  ;;  %5974 = vmatpush1.bf16.msra.mxu0 %v6626_v36  ;;  %v2674_v44 = vld [vmem:[%s8835_s12 + $0xc38] sm:$0xff]  ;;  %v6579_v60 = vcombine.high %v2542_v37, %v2546_v54  ;;  %v6117_v37 = vrot.slane %v6109_v31, %v8524_v51 }
 0x50b   : > { %6015 = vmatpush1.bf16.msra.mxu1 %v6754_v50  ;;  %v5682_v1 = vpop.f32.mrf.mxu0  ;;  %5975 = vmatprep.subr.bf16.mxu0 %v6619_v53  ;;  %v6714_v53 = vcombine.low %v2678_v34, %v2682_v41  ;;  %v6707_v45 = vcombine.high %v2670_v57, %v2674_v44  ;;  %v2790_v63 = vld [vmem:[%s8835_s12 + $0xfd8] sm:$0xff]  ;;  %v6706_v3 = vcombine.low %v2670_v57, %v2674_v44 }
 0x50c   : > { %7064 = vpow2.f32 %v6830_v0  ;;  %v6831_v9 = vmul.f32 -1.442695, %v5721_v4  ;;  %v5723_v10 = vpop.f32.mrf.mxu1  ;;  %6016 = vmatprep.subr.bf16.mxu1 %v6747_v61  ;;  %v2662_v61 = vld [vmem:[%s8835_s12 + $0xbd8] sm:$0xff] }
 0x50d   : > { %v2794_v52 = vld [vmem:[%s8835_s12 + $0xff8] sm:$0xff]  ;;  %v6699_v0 = vcombine.high %v2662_v61, %v2666_v62 }
 0x50e   : > { %7066 = vpow2.f32 %v6831_v9  ;;  %5976 = vmatpush1.bf16.msra.mxu0 %v6618_v6  ;;  %v6827_v4 = vcombine.high %v2790_v63, %v2794_v52  ;;  %v2654_v5 = vld [vmem:[%s8835_s12 + $0xb98] sm:$0xff]  ;;  %v6826_v9 = vcombine.low %v2790_v63, %v2794_v52 }
 0x50f   : > { %6017 = vmatpush1.bf16.msra.mxu1 %v6746_v7  ;;  %5977 = vmatprep.subr.bf16.mxu0 %v6611_v8  ;;  %v2658_v6 = vld [vmem:[%s8835_s12 + $0xbb8] sm:$0xff]  ;;  %v6698_v8 = vcombine.low %v2662_v61, %v2666_v62 }
 0x510   : > { %6018 = vmatprep.subr.bf16.mxu1 %v6739_v17  ;;  %v2782_v1 = vld [vmem:[%s8835_s12 + $0xf98] sm:$0xff]  ;;  %v6691_v10 = vcombine.high %v2654_v5, %v2658_v6 }
 0x511   : > { %v2786_v7 = vld [vmem:[%s8835_s12 + $0xfb8] sm:$0xff] }
 0x512   : > { %5978 = vmatpush1.bf16.msra.mxu0 %v6610_v14  ;;  %v6819_v17 = vcombine.high %v2782_v1, %v2786_v7  ;;  %v2646_v18 = vld [vmem:[%s8835_s12 + $0xb58] sm:$0xff]  ;;  %v6690_v14 = vcombine.low %v2654_v5, %v2658_v6 }
 0x513   : > { %6019 = vmatpush1.bf16.msra.mxu1 %v6738_v25  ;;  %5979 = vmatprep.subr.bf16.mxu0 %v6603_v27  ;;  %v2650_v19 = vld [vmem:[%s8835_s12 + $0xb78] sm:$0xff]  ;;  %v6818_v25 = vcombine.low %v2782_v1, %v2786_v7 }
 0x514   : > { %6020 = vmatprep.subr.bf16.mxu1 %v6731_v28  ;;  %v2774_v20 = vld [vmem:[%s8835_s12 + $0xf58] sm:$0xff]  ;;  %v6683_v27 = vcombine.high %v2646_v18, %v2650_v19 }
 0x515   : > { %v2778_v21 = vld [vmem:[%s8835_s12 + $0xf78] sm:$0xff] }
 0x516   : > { %5980 = vmatpush1.bf16.msra.mxu0 %v6602_v32  ;;  %v6811_v28 = vcombine.high %v2774_v20, %v2778_v21  ;;  %v2638_v13 = vld [vmem:[%s8835_s12 + $0xb18] sm:$0xff] }
 0x517   : > { %6021 = vmatpush1.bf16.msra.mxu1 %v6730_v15  ;;  %5981 = vmatprep.subr.bf16.mxu0 %v6595_v16  ;;  %v2642_v29 = vld [vmem:[%s8835_s12 + $0xb38] sm:$0xff]  ;;  %v6682_v15 = vcombine.low %v2646_v18, %v2650_v19  ;;  %v2816_v19 = vrot.slane %v9414_v11, %v1949_v55 }
 0x518   : > { %6022 = vmatprep.subr.bf16.mxu1 %v6723_v43  ;;  %v2766_v30 = vld [vmem:[%s8835_s12 + $0xf18] sm:$0xff]  ;;  %v6810_v43 = vcombine.low %v2774_v20, %v2778_v21  ;;  %v6675_v33 = vcombine.high %v2638_v13, %v2642_v29  ;;  %v2820_v20 = vrot.slane %v9414_v11, %v1953_v23 }
 0x519   : > { %v7065_v56 = vpop.eup %7064  ;;  %v2770_v12 = vld [vmem:[%s8835_s12 + $0xf38] sm:$0xff] }
 0x51a   : > { %v6079_v36 = vadd.f32 1.0, %v7065_v56  ;;  %5982 = vmatpush1.bf16.msra.mxu0 %v6594_v40  ;;  %v6803_v35 = vcombine.high %v2766_v30, %v2770_v12  ;;  %v2630_v34 = vld [vmem:[%s8835_s12 + $0xad8] sm:$0xff]  ;;  %v6802_v56 = vcombine.low %v2766_v30, %v2770_v12 }
 0x51b   : > { %v7067_v50 = vpop.eup %7066  ;;  %6023 = vmatpush1.bf16.msra.mxu1 %v6722_v46  ;;  %5983 = vmatprep.subr.bf16.mxu0 %v6587_v48  ;;  %v2634_v41 = vld [vmem:[%s8835_s12 + $0xaf8] sm:$0xff] }
 0x51c   : > { %v6080_v47 = vadd.f32 1.0, %v7067_v50  ;;  %6024 = vmatprep.subr.bf16.mxu1 %v6715_v49  ;;  %7068 = vrcp.f32 %v6079_v36  ;;  %v2758_v46 = vld [vmem:[%s8835_s12 + $0xed8] sm:$0xff]  ;;  %v6674_v49 = vcombine.low %v2638_v13, %v2642_v29  ;;  %v6667_v57 = vcombine.high %v2630_v34, %v2634_v41 }
 0x51d   : > { %v2762_v48 = vld [vmem:[%s8835_s12 + $0xef8] sm:$0xff]  ;;  %v6666_v22 = vcombine.low %v2630_v34, %v2634_v41 }
 0x51e   : > { %7070 = vrcp.f32 %v6080_v47  ;;  %5984 = vmatpush1.bf16.msra.mxu0 %v6586_v59  ;;  %v6795_v44 = vcombine.high %v2758_v46, %v2762_v48  ;;  %v2622_v36 = vld [vmem:[%s8835_s12 + $0xa98] sm:$0xff]  ;;  %v6794_v26 = vcombine.low %v2758_v46, %v2762_v48 }
 0x51f   : > { %6025 = vmatpush1.bf16.msra.mxu1 %v6714_v53  ;;  %5985 = vmatprep.subr.bf16.mxu0 %v6579_v60  ;;  %v2626_v59 = vld [vmem:[%s8835_s12 + $0xab8] sm:$0xff] }
 0x520   : > { %6026 = vmatprep.subr.bf16.mxu1 %v6707_v45  ;;  %v2750_v53 = vld [vmem:[%s8835_s12 + $0xe98] sm:$0xff]  ;;  %v6659_v31 = vcombine.high %v2622_v36, %v2626_v59  ;;  %v6658_v52 = vcombine.low %v2622_v36, %v2626_v59 }
 0x521   : > { %v2754_v60 = vld [vmem:[%s8835_s12 + $0xeb8] sm:$0xff] }
 0x522   : > { %5986 = vmatpush1.bf16.msra.mxu0 %v6578_v2  ;;  %v6787_v47 = vcombine.high %v2750_v53, %v2754_v60  ;;  %v2614_v45 = vld [vmem:[%s8835_s12 + $0xa58] sm:$0xff]  ;;  %v6786_v2 = vcombine.low %v2750_v53, %v2754_v60 }
 0x523   : > { %6027 = vmatpush1.bf16.msra.mxu1 %v6706_v3  ;;  %5987 = vmatprep.subr.bf16.mxu0 %v6699_v0  ;;  %v2618_v61 = vld [vmem:[%s8835_s12 + $0xa78] sm:$0xff] }
 0x524   : > { %6028 = vmatprep.subr.bf16.mxu1 %v6827_v4  ;;  %v2742_v62 = vld [vmem:[%s8835_s12 + $0xe58] sm:$0xff]  ;;  %v6651_v3 = vcombine.high %v2614_v45, %v2618_v61  ;;  %v6650_v7 = vcombine.low %v2614_v45, %v2618_v61 }
 0x525   : > { %v2746_v63 = vld [vmem:[%s8835_s12 + $0xe78] sm:$0xff] }
 0x526   : > { %5988 = vmatpush2.bf16.msra.mxu0 %v6698_v8  ;;  %v6779_v0 = vcombine.high %v2742_v62, %v2746_v63  ;;  %v2606_v4 = vld [vmem:[%s8835_s12 + $0xa18] sm:$0xff]  ;;  %v6778_v8 = vcombine.low %v2742_v62, %v2746_v63 }
 0x527   : > { %6029 = vmatpush2.bf16.msra.mxu1 %v6826_v9  ;;  %5989 = vmatprep.subr.bf16.mxu0 %v6691_v10  ;;  %v2610_v5 = vld [vmem:[%s8835_s12 + $0xa38] sm:$0xff] }
 0x528   : > { %6030 = vmatprep.subr.bf16.mxu1 %v6819_v17  ;;  %v2734_v6 = vld [vmem:[%s8835_s12 + $0xe18] sm:$0xff]  ;;  %v6643_v9 = vcombine.high %v2606_v4, %v2610_v5  ;;  %v6642_v17 = vcombine.low %v2606_v4, %v2610_v5 }
 0x529   : > { %v7069_v32 = vpop.eup %7068  ;;  %v2738_v1 = vld [vmem:[%s8835_s12 + $0xe38] sm:$0xff]  ;;  %s7234_s12 = smov [#allocation5]  }
 0x52a   : > { %5990 = vmatpush2.bf16.msra.mxu0 %v6690_v14  ;;  %v6771_v10 = vcombine.high %v2734_v6, %v2738_v1  ;;  %v6770_v18 = vcombine.low %v2734_v6, %v2738_v1  ;;  %s6173_s30 = sshll.u32 %s7234_s12, 4  ;;  %s6174_s30 = int_to_ptr.vmem [resolvable:$true] %s6173_s30 }
 0x52b   : > { %v7071_v16 = vpop.eup %7070  ;;  %6031 = vmatpush2.bf16.msra.mxu1 %v6818_v25  ;;  %5991 = vmatprep.subr.bf16.mxu0 %v6683_v27  ;;  %s7089_s13 = scalar_lea.vmem %s6174_s30, 32  ;;  %p7096_p4 = scmp.lt.s32.totalorder %s6174_s30, %s6174_s30 }
 0x52c   : > { %6032 = vmatprep.subr.bf16.mxu1 %v6811_v28  ;;  %v6110_v40 = vcombine.low %v7069_v32, %v7071_v16  ;;  %p7090_p0 = scmp.ne.s32.totalorder %s6174_s30, %s7089_s13  ;;  %p7097_p5 = scmp.lt.s32.totalorder %s7089_s13, %s7089_s13 }
 0x52e   : > { %5992 = vmatpush2.bf16.msra.mxu0 %v6682_v15  ;;  %v6124_v54 = vrot.slane %v6110_v40, %v8524_v51  ;;  %p7091_p1 = pnand %p7090_p0, %p223_p3  ;;  %p7098_p7 = por %p7097_p5, %p7096_p4 }
 0x52f   : > { %6033 = vmatpush2.bf16.msra.mxu1 %v6810_v43  ;;  %5993 = vmatprep.subr.bf16.mxu0 %v6675_v33 }
 0x530   : > { %6034 = vmatprep.subr.bf16.mxu1 %v6803_v35  ;;  %v6125_v50 = vcombine.low %v6117_v37, %v6124_v54  ;;  %p7092_p2 = pneg %p7091_p1 }
 0x532   : > { %5994 = vmatpush2.bf16.msra.mxu0 %v6674_v49  ;;  %6145 = vst [vmem:[%s9492_s1] sm:$0xff] %v6125_v50  ;;  %p7099_p9 = pnand %p7098_p7, %p7092_p2 }
 0x533   : > { %6035 = vmatpush2.bf16.msra.mxu1 %v6802_v56  ;;  %5995 = vmatprep.subr.bf16.mxu0 %v6667_v57 }
 0x534   : > { %6036 = vmatprep.subr.bf16.mxu1 %v6795_v44 }
 0x536   : > { %5996 = vmatpush2.bf16.msra.mxu0 %v6666_v22 }
 0x537   : > { %6037 = vmatpush2.bf16.msra.mxu1 %v6794_v26  ;;  %5997 = vmatprep.subr.bf16.mxu0 %v6659_v31 }
 0x538   : > { %6038 = vmatprep.subr.bf16.mxu1 %v6787_v47 }
 0x53a   : > { %5998 = vmatpush2.bf16.msra.mxu0 %v6658_v52 }
 0x53b   : > { %6039 = vmatpush2.bf16.msra.mxu1 %v6786_v2  ;;  %5999 = vmatprep.subr.bf16.mxu0 %v6651_v3 }
 0x53c   : > { %6040 = vmatprep.subr.bf16.mxu1 %v6779_v0 }
 0x53e   : > { %6000 = vmatpush2.bf16.msra.mxu0 %v6650_v7 }
 0x53f   : > { %6041 = vmatpush2.bf16.msra.mxu1 %v6778_v8  ;;  %6001 = vmatprep.subr.bf16.mxu0 %v6643_v9 }
 0x540   : > { %6042 = vmatprep.subr.bf16.mxu1 %v6771_v10 }
 0x542   : > { %6002 = vmatpush2.bf16.msra.mxu0 %v6642_v17 }
 0x543   : > { %6043 = vmatpush2.bf16.msra.mxu1 %v6770_v18 }
 0x545   : > { %v5759_v21 = vpop.f32.mrf.mxu0  ;;  %6004 = vmatmul.mubr.bf16.vlgmr.msra.gmra.mxu0 %v9046_v38 }
 0x546   : > { %v5760_v14 = vadd.f32 %v5759_v21, %v2816_v19  ;;  %v5800_v25 = vpop.f32.mrf.mxu1  ;;  %6045 = vmatmul.mubr.bf16.vlgmr.msra.gmra.mxu1 %v9048_v39 }
 0x547   : > { %v5761_v27 = vpop.f32.mrf.mxu0 }
 0x548   : > { %v5801_v28 = vadd.f32 %v5800_v25, %v5760_v14  ;;  %v5762_v13 = vadd.f32 %v5761_v27, %v2820_v20  ;;  %v5802_v29 = vpop.f32.mrf.mxu1 }
 0x549   : > { %v5763_v30 = vpop.f32.mrf.mxu0 }
 0x54a   : > { %v5803_v12 = vadd.f32 %v5802_v29, %v5762_v13  ;;  %v5804_v32 = vpop.f32.mrf.mxu1 }
 0x54b   : > { %v5764_v55 = vpop.f32.mrf.mxu0 }
 0x54c   : > { %v5805_v15 = vpop.f32.mrf.mxu1 }
 0x585   : > { %v5841_v16 = vpop.f32.mrf.mxu0 }
 0x586   : > { %v5842_v43 = vadd.f32 %v5841_v16, %v5801_v28  ;;  %v5882_v33 = vpop.f32.mrf.mxu1 }
 0x587   : > { %v5843_v23 = vpop.f32.mrf.mxu0 }
 0x588   : > { %v5883_v35 = vadd.f32 %v5882_v33, %v5842_v43  ;;  %v5844_v34 = vadd.f32 %v5843_v23, %v5803_v12  ;;  %v5884_v38 = vpop.f32.mrf.mxu1 }
 0x589   : > { %v5845_v41 = vpop.f32.mrf.mxu0 }
 0x58a   : > { %v6832_v40 = vmul.f32 -1.442695, %v5883_v35  ;;  %v5885_v46 = vadd.f32 %v5884_v38, %v5844_v34  ;;  %v5886_v39 = vpop.f32.mrf.mxu1 }
 0x58b   : > { %v5846_v48 = vpop.f32.mrf.mxu0 }
 0x58c   : > { %7072 = vpow2.f32 %v6832_v40  ;;  %v6833_v49 = vmul.f32 -1.442695, %v5885_v46  ;;  %v5887_v37 = vpop.f32.mrf.mxu1 }
 0x58e   : > { %7074 = vpow2.f32 %v6833_v49 }
 0x599   : > { %v7073_v54 = vpop.eup %7072 }
 0x59a   : > { %v6081_v56 = vadd.f32 1.0, %v7073_v54 }
 0x59b   : > { %v7075_v57 = vpop.eup %7074 }
 0x59c   : > { %v6082_v44 = vadd.f32 1.0, %v7075_v57  ;;  %7076 = vrcp.f32 %v6081_v56 }
 0x59e   : > { %7078 = vrcp.f32 %v6082_v44 }
 0x59f   : > { %7102 = shalt.err (!%p7099_p9)
}
 0x5a0   : > { %6991 = dma.vmem_to_hbm [thread:$0]  (%p223_p3), %s6174_s30, 32, %s9602_s9, [#allocation6]  }
 0x5a1   : > { %s7235_s16 = smov [#allocation7]   ;;  %s7236_s24 = smov [#allocation8]  }
 0x5a2   : > { %s6184_s22 = sshll.u32 %s7235_s16, 4  ;;  %s6195_s25 = sshll.u32 %s7236_s24, 4  ;;  %s6185_s22 = int_to_ptr.vmem [resolvable:$true] %s6184_s22  ;;  %s6196_s25 = int_to_ptr.vmem [resolvable:$true] %s6195_s25 }
 0x5a3   : > { %s7113_s0 = scalar_lea.vmem %s6185_s22, 32  ;;  %p7120_p13 = scmp.lt.s32.totalorder %s6185_s22, %s6185_s22 }
 0x5a4   : > { %p7114_p10 = scmp.ne.s32.totalorder %s6185_s22, %s7113_s0  ;;  %p7121_p0 = scmp.lt.s32.totalorder %s7113_s0, %s7113_s0 }
 0x5a6   : > { %p7115_p11 = pnand %p7114_p10, %p223_p3  ;;  %p7122_p1 = por %p7121_p0, %p7120_p13 }
 0x5a8   : > { %p7116_p12 = pneg %p7115_p11 }
 0x5a9   : > { %v9518_v36 = vpop.eup %7076 }
 0x5aa   : > { %p7123_p2 = pnand %p7122_p1, %p7116_p12 }
 0x5ab   : > { %v9520_v59 = vpop.eup %7078 }
 0x5ac   : > { %v6126_v50 = vcombine.low %v9518_v36, %v9520_v59 }
 0x5ad   : > { %7126 = shalt.err (!%p7123_p2)
}
 0x5ae   : > { %6993 = dma.vmem_to_hbm [thread:$0]  (%p223_p3), %s6185_s22, 32, %s9603_s10, [#allocation6]  }
 0x5af   : > { %s7137_s13 = scalar_lea.vmem %s6196_s25, 32  ;;  %p7144_p9 = scmp.lt.s32.totalorder %s6196_s25, %s6196_s25 }
 0x5b0   : > { %p7138_p4 = scmp.ne.s32.totalorder %s6196_s25, %s7137_s13  ;;  %p7145_p10 = scmp.lt.s32.totalorder %s7137_s13, %s7137_s13 }
 0x5b2   : > { %p7139_p5 = pnand %p7138_p4, %p223_p3  ;;  %p7146_p11 = por %p7145_p10, %p7144_p9 }
 0x5b4   : > { %p7140_p7 = pneg %p7139_p5 }
 0x5b6   : > { %p7147_p8 = pnand %p7146_p11, %p7140_p7 }
 0x5b8   : > { %7150 = shalt.err (!%p7147_p8)
}
 0x5b9   : > { %6995 = dma.vmem_to_hbm [thread:$0]  (%p223_p3), %s6196_s25, 32, %s9604_s11, [#allocation9]   ;;  %v2824_v62 = vrot.slane %v9414_v11, %v1957_v58  ;;  %v2828_v63 = vrot.slane %v9414_v11, %v1961_v24  ;;  %v6134_v13 = vrot.slane %v6126_v50, %v8524_v51 }
 0x5ba   : > { %s6848_s16 = sshll.u32 %s7319_s21, 8  ;;  %s6162_s22 = sshll.u32 %s9492_s1, 4  ;;  %s6163_s22 = int_to_ptr.vmem [resolvable:$true] %s6162_s22 }
 0x5bb   : > { %s6160_s0 = scalar_lea.hbm %s9601_s8, %s6848_s16  ;;  %s6148_s12 = scalar_lea.sflag [#allocation4], %s8817_s29 }
 0x5bc   : > { %s7161_s30 = scalar_lea.vmem %s6163_s22, 256  ;;  %s7237_s13 = smov [#allocation3]  }
 0x5bd   : > { %p7162_p8 = scmp.ne.s32.totalorder %s6163_s22, %s7161_s30  ;;  %s7165_s14 = sshll.u32 %s7237_s13, 4  ;;  %s7166_s14 = int_to_ptr.vmem [resolvable:$false] %s7165_s14 }
 0x5be   : > { %s7167_s15 = scalar_lea.vmem %s7166_s14, 512  ;;  %p7168_p0 = scmp.lt.s32.totalorder %s6163_s22, %s7166_s14 }
 0x5bf   : > { %p7163_p12 = pnand %p7162_p8, %p7339_p6  ;;  %p7169_p1 = scmp.lt.s32.totalorder %s7167_s15, %s7161_s30 }
 0x5c1   : > { %p7164_p13 = pneg %p7163_p12  ;;  %p7170_p2 = por %p7169_p1, %p7168_p0 }
 0x5c3   : > { %p7171_p4 = pnand %p7170_p2, %p7164_p13 }
 0x5c5   : > { %v5923_v53 = vpop.f32.mrf.mxu0 }
 0x5c6   : > { %v5964_v60 = vpop.f32.mrf.mxu1  ;;  %v5924_v52 = vadd.f32 %v5923_v53, %v2824_v62 }
 0x5c7   : > { %v5925_v22 = vpop.f32.mrf.mxu0 }
 0x5c8   : > { %v5966_v26 = vpop.f32.mrf.mxu1  ;;  %v5926_v2 = vadd.f32 %v5925_v22, %v2828_v63  ;;  %v5965_v3 = vadd.f32 %v5964_v60, %v5924_v52 }
 0x5c9   : > { %v5927_v31 = vpop.f32.mrf.mxu0 }
 0x5ca   : > { %v5968_v47 = vpop.f32.mrf.mxu1  ;;  %v5967_v4 = vadd.f32 %v5966_v26, %v5926_v2 }
 0x5cb   : > { %v5928_v45 = vpop.f32.mrf.mxu0 }
 0x5cc   : > { %v5969_v61 = vpop.f32.mrf.mxu1 }
 0x605   : > { %v6005_v0 = vpop.f32.mrf.mxu0 }
 0x606   : > { %v6006_v5 = vadd.f32 %v6005_v0, %v5965_v3  ;;  %v6046_v6 = vpop.f32.mrf.mxu1 }
 0x607   : > { %v6007_v1 = vpop.f32.mrf.mxu0 }
 0x608   : > { %v6047_v7 = vadd.f32 %v6046_v6, %v6006_v5  ;;  %v6008_v8 = vadd.f32 %v6007_v1, %v5967_v4  ;;  %v6048_v9 = vpop.f32.mrf.mxu1 }
 0x609   : > { %v6009_v10 = vpop.f32.mrf.mxu0 }
 0x60a   : > { %v6834_v17 = vmul.f32 -1.442695, %v6047_v7  ;;  %v6049_v18 = vadd.f32 %v6048_v9, %v6008_v8  ;;  %v6050_v58 = vpop.f32.mrf.mxu1 }
 0x60b   : > { %v6010_v42 = vpop.f32.mrf.mxu0 }
 0x60c   : > { %7080 = vpow2.f32 %v6834_v17  ;;  %v6835_v24 = vmul.f32 -1.442695, %v6049_v18  ;;  %v6051_v11 = vpop.f32.mrf.mxu1 }
 0x60e   : > { %7082 = vpow2.f32 %v6835_v24 }
 0x619   : > { %v7081_v19 = vpop.eup %7080 }
 0x61a   : > { %v6083_v20 = vadd.f32 1.0, %v7081_v19 }
 0x61b   : > { %v7083_v21 = vpop.eup %7082 }
 0x61c   : > { %v6084_v14 = vadd.f32 1.0, %v7083_v21  ;;  %7084 = vrcp.f32 %v6083_v20 }
 0x61e   : > { %7086 = vrcp.f32 %v6084_v14 }
 0x629   : > { %v7085_v25 = vpop.eup %7084 }
 0x62b   : > { %v7087_v27 = vpop.eup %7086 }
 0x62c   : > { %v6127_v28 = vcombine.low %v7085_v25, %v7087_v27 }
 0x62e   : > { %v6141_v29 = vrot.slane %v6127_v28, %v8524_v51 }
 0x630   : > { %v6142_v30 = vcombine.low %v6134_v13, %v6141_v29 }
 0x632   : > { %6146 = vst [vmem:[%s9492_s1 + $0x8] sm:$0xff] %v6142_v30 }
 0x633   : > { %7174 = shalt.err (!%p7171_p4)
}
 0x634   : > { %s7175_s2 = scalar_lea.hbm %s6160_s0, 256  ;;  %s7179_s16 = scalar_lea.hbm %s9601_s8, 1024 }
 0x635   : > { %p7176_p5 = scmp.ne.s32.totalorder %s6160_s0, %s7175_s2  ;;  %p7180_p10 = scmp.lt.s32.totalorder %s6160_s0, %s9601_s8 }
 0x636   : > { %p7181_p11 = scmp.lt.s32.totalorder %s7179_s16, %s7175_s2 }
 0x637   : > { %p7177_p7 = pnand %p7176_p5, %p7339_p6 }
 0x638   : > { %p7182_p8 = por %p7181_p11, %p7180_p10 }
 0x639   : > { %p7178_p9 = pneg %p7177_p7 }
 0x63b   : > { %p7183_p12 = pnand %p7182_p8, %p7178_p9 }
 0x63d   : > { %7186 = shalt.err (!%p7183_p12)
}
 0x63e   : > { %6989 = dma.vmem_to_hbm [thread:$0]  (%p7339_p6), %s6163_s22, 256, %s6160_s0, %s6148_s12  }
 0x63f   : > { %7204 = dma.done.wait (%p223_p3), [#allocation6], 64  }
 0x640   : > { %7206 = vsyncadd (%p223_p3), [#allocation6], 4294967232 }
 0x641   : > { %7208 = dma.done.wait (%p223_p3), [#allocation9], 32  }
 0x642   : > { %7210 = vsyncadd (%p223_p3), [#allocation9], 4294967264 }
 0x643 PF: > { %p7013_p13 = scmp.ge.s32.totalorder %s7229_s20, 2  ;;  %s6219_s2 = sand.u32 1, %s7217_s17  }
 0x644   : > { %p9613_p0 = scmp.ne.s32.totalorder %s9609_s28, 0  ;;  %s6220_s27 = scalar_lea.sflag [#allocation4], %s6219_s2 }
 0x646   : > { %p7004_p1 = pnand %p7013_p13, %p9613_p0 }
 0x648   : > { %p7005_p6 = pneg %p7004_p1 }
 0x64a   : > { %7212 = dma.done.wait (%p7005_p6), %s6220_s27, 256  }
 0x64b   : > { %7214 = vsyncadd (%p7005_p6), %s6220_s27, 4294967040  ;;  %p24_p2 = scmp.ge.s32.totalorder %s7323_s23, 6   ;;  %s9614_s17 = smov %s7221_s18 }
 0x64c   : > { %s9615_s18 = smov %s7225_s19  ;;  %s9616_s19 = smov %s7335_s26 }
 0x64d   : > { %s9617_s20 = smov %s7323_s23  ;;  %26 = sbr.rel (!%p24_p2) target bundleno = 9 (0x9), region = 142 }
 0x652   :  { %6225 = vsyncpa [#allocation4], 1 }
 0x653   :  { %6227 = vsyncpa [#allocation4 + $0x1], 1 }
 0x654   :  { %6228 = vsyncpa [#allocation6], 1 }
 0x655   :  { %6229 = vsyncpa [#allocation9], 1 }

// kernel: vae_forward.2
= control target key start
LH: loop header
LB: loop body
LE: loop exit
PB: predicated region body
PF: predicated region fallthrough
CT: control target
= control target key end

     0   :  { %8 = vsyncpa [#allocation3], 0  ;;  %s6579_s0 = inlined_call_operand.vmem [shape: f32[2,4096], index: 0, kind: input, shape index: {}]   ;;  %s6580_s1 = inlined_call_operand.hbm [shape: bf16[4096,1024], index: 1, kind: input, shape index: {}]   ;;  %s6581_s2 = inlined_call_operand.hbm [shape: f32[1,1024], index: 2, kind: input, shape index: {}]   ;;  %s6582_s3 = inlined_call_operand.vmem [shape: f32[2,1024], index: 3, kind: output, shape index: {}]  }
   0x1   :  { %10 = vsyncpa [#allocation3 + $0x1], 0 }
   0x2   :  { %11 = vsyncpa [#allocation5], 0 }
   0x3   :  { %13 = vsyncpa [#allocation5 + $0x1], 0  ;;  %s5770_s12 = smov 0   ;;  %s5772_s13 = smov 0  }
   0x4   :  { %s5774_s14 = smov 0   ;;  %s5776_s15 = smov 0  }
   0x5 LB: > { %s4292_s16 = sadd.s32 4294967295, %s5742_s15   ;;  %s5790_s17 = sadd.s32 1, %s5742_s15   ;;  %s5742_s15 = sphi %s5776_s15, %s6592_s15   ;;  %s5738_s14 = sphi %s5774_s14, %s6591_s14   ;;  %s5734_s13 = sphi %s5772_s13, %s6590_s13   ;;  %s5730_s12 = sphi %s5770_s12, %s6589_s12  }
   0x6   : > { %s44_s18 = ssub.s32 %s5742_s15, %s5790_s17  ;;  %s47_s19 = sadd.s32 1, %s5738_s14 }
   0x7   : > { %p45_p0 = scmp.eq.s32.totalorder %s44_s18, 0  ;;  %p54_p1 = scmp.ne.s32.totalorder %s5738_s14, %s5734_s13 }
   0x8   : > { %p55_p2 = scmp.eq.s32.totalorder %s5742_s15, 0  ;;  %p60_p3 = scmp.ne.s32.totalorder %s5734_s13, %s5730_s12 }
   0x9   : > { %s5800_s20 = scalar_select %p45_p0, %s5738_s14, %s47_s19  }
   0xa   : > { %p56_p4 = por %p55_p2, %p54_p1  ;;  %p61_p5 = scmp.eq.s32.totalorder %s4292_s16, 0 }
   0xb   : > { %p4835_p6 = scmp.lt.s32.totalorder %s5742_s15, 4  ;;  %s5810_s22 = sand.u32 1, %s5738_s14  }
   0xc   : > { %p5805_p7 = por %p61_p5, %p60_p3  ;;  %s4296_s23 = sshll.u32 %s5810_s22, 12 }
   0xd   : > { %s4822_s24 = sshll.u32 %s5742_s15, 7  ;;  %s143_s28 = scalar_lea.vmem [#allocation2], %s4296_s23 }
   0xe   : > { %s6584_s21 = scalar_select %p5805_p7, 1, 0 }
   0xf   : > { %s5817_s27 = scalar_lea.hbm %s6580_s1, %s4822_s24  ;;  %s150_s29 = sshll.u32 %s143_s28, 4  ;;  %s5819_s29 = int_to_ptr.vmem [resolvable:$true] %s150_s29 }
  0x10   : > { %p5821_p8 = pnand %p4835_p6, %p56_p4  ;;  %s140_s4 = scalar_lea.sflag [#allocation3], %s5810_s22 }
  0x11   : > { %s5648_s5 = scalar_lea.hbm %s5817_s27, 65536  ;;  %s5653_s8 = scalar_lea.hbm %s6580_s1, 262144 }
  0x12   : > { %p5649_p9 = scmp.ne.s32.totalorder %s5817_s27, %s5648_s5  ;;  %p5650_p10 = pneg %p5821_p8 }
  0x13   : > { %p5654_p13 = scmp.lt.s32.totalorder %s5817_s27, %s6580_s1  ;;  %p5655_p0 = scmp.lt.s32.totalorder %s5653_s8, %s5648_s5 }
  0x14   : > { %p5651_p11 = pnand %p5650_p10, %p5649_p9 }
  0x15   : > { %p5656_p1 = por %p5655_p0, %p5654_p13 }
  0x16   : > { %p5652_p12 = pneg %p5651_p11 }
  0x18   : > { %p5657_p2 = pnand %p5656_p1, %p5652_p12 }
  0x1a   : > { %5660 = shalt.err (!%p5657_p2)
}
  0x1b   : > { %s5661_s11 = scalar_lea.vmem %s5819_s29, 65536  ;;  %s5744_s12 = smov [#allocation2]  }
  0x1c   : > { %p5662_p3 = scmp.ne.s32.totalorder %s5819_s29, %s5661_s11  ;;  %s5666_s18 = sshll.u32 %s5744_s12, 4  ;;  %s5667_s18 = int_to_ptr.vmem [resolvable:$false] %s5666_s18 }
  0x1d   : > { %s5668_s19 = scalar_lea.vmem %s5667_s18, 131072  ;;  %p5669_p6 = scmp.lt.s32.totalorder %s5819_s29, %s5667_s18 }
  0x1e   : > { %p5664_p4 = pnand %p5662_p3, %p5650_p10  ;;  %p5670_p9 = scmp.lt.s32.totalorder %s5668_s19, %s5661_s11 }
  0x20   : > { %p5665_p5 = pneg %p5664_p4  ;;  %p5671_p11 = por %p5670_p9, %p5669_p6 }
  0x22   : > { %p5672_p13 = pnand %p5671_p11, %p5665_p5 }
  0x24   : > { %5675 = shalt.err (!%p5672_p13)
}
  0x25   : > { %s5745_s23 = smov 512   ;;  %s5746_s24 = smov 128  }
  0x26   : > { %s5747_s25 = smov 8   ;;  %p4302_p12 = scmp.ge.s32.totalorder %s5742_s15, 1 }
  0x27   : > { %4831 = dma.hbm_to_vmem [thread:$0]  (!%p5821_p8), %s5817_s27, 65536, %s5819_s29, %s140_s4, %s5745_s23, %s5746_s24, %s5747_s25  }
  0x28   : > { %p177_p0 = scmp.lt.s32.totalorder %s5742_s15, 5  ;;  %s4299_s26 = sshll.u32 %s5810_s22, 1 }
  0x29   : > { %s4823_s5 = sshll.u32 %s5742_s15, 5  ;;  %s164_s6 = scalar_lea.vmem [#allocation4], %s4299_s26 }
  0x2a   : > { %p5855_p1 = pnand %p4302_p12, %p177_p0  ;;  %s172_s7 = sshll.u32 %s164_s6, 4  ;;  %s173_s7 = int_to_ptr.vmem [resolvable:$true] %s172_s7 }
  0x2b   : > { %s170_s10 = scalar_lea.hbm %s6581_s2, %s4823_s5  ;;  %s161_s11 = scalar_lea.sflag [#allocation5], %s5810_s22 }
  0x2c   : > { %s6586_s28 = scalar_select %p5855_p1, 1, 0 }
  0x2d   : > { %s5676_s12 = scalar_lea.hbm %s170_s10, 32  ;;  %s5681_s4 = scalar_lea.hbm %s6581_s2, 128 }
  0x2e   : > { %p5677_p2 = scmp.ne.s32.totalorder %s170_s10, %s5676_s12  ;;  %p5682_p5 = scmp.lt.s32.totalorder %s170_s10, %s6581_s2 }
  0x2f   : > { %p5683_p6 = scmp.lt.s32.totalorder %s5681_s4, %s5676_s12 }
  0x30   : > { %p5679_p3 = pnand %p5677_p2, %p5650_p10 }
  0x31   : > { %p5684_p9 = por %p5683_p6, %p5682_p5 }
  0x32   : > { %p5680_p4 = pneg %p5679_p3 }
  0x34   : > { %p5685_p11 = pnand %p5684_p9, %p5680_p4 }
  0x36   : > { %5688 = shalt.err (!%p5685_p11)
}
  0x37   : > { %s5689_s23 = scalar_lea.vmem %s173_s7, 32  ;;  %s5748_s22 = smov [#allocation4]  }
  0x38   : > { %p5690_p13 = scmp.ne.s32.totalorder %s173_s7, %s5689_s23  ;;  %s5694_s24 = sshll.u32 %s5748_s22, 4  ;;  %s5695_s24 = int_to_ptr.vmem [resolvable:$false] %s5694_s24 }
  0x39   : > { %s5696_s25 = scalar_lea.vmem %s5695_s24, 64  ;;  %p5697_p2 = scmp.lt.s32.totalorder %s173_s7, %s5695_s24 }
  0x3a   : > { %p5692_p12 = pnand %p5690_p13, %p5650_p10  ;;  %p5698_p3 = scmp.lt.s32.totalorder %s5696_s25, %s5689_s23 }
  0x3c   : > { %p5693_p0 = pneg %p5692_p12  ;;  %p5699_p7 = por %p5698_p3, %p5697_p2 }
  0x3e   : > { %p5700_p1 = pnand %p5699_p7, %p5693_p0 }
  0x40   : > { %5703 = shalt.err (!%p5700_p1)
}
  0x41   : > { %4834 = dma.hbm_to_vmem [thread:$0]  (!%p5821_p8), %s170_s10, 32, %s173_s7, %s161_s11  }
  0x42   : > { %p6587_p4 = scmp.ne.s32.totalorder %s6586_s28, 0 }
  0x43   : > { %s183_s26 = sand.u32 (!%p6587_p4), 1, %s5734_s13   ;;  %p6588_p10 = scmp.ne.s32.totalorder (!%p6587_p4), %s6584_s21, 0 }
  0x44   : > { %181 = sbr.rel (%p6587_p4) target bundleno = 794 (0x31a), region = 32  ;;  %s4303_s5 = sshll.u32 (!%p6587_p4), %s183_s26, 12 }
  0x45   : > { %s184_s6 = scalar_lea.sflag (!%p6587_p4), [#allocation3], %s183_s26  ;;  %s5881_s8 = scalar_lea.vmem (!%p6587_p4), [#allocation2], %s4303_s5 }
  0x49   : > { %5721 = dma.done.wait (%p6588_p10), %s184_s6, 65536  }
  0x4a   : > { %5723 = vsyncadd (%p6588_p10), %s184_s6, 4294901760  ;;  %s4304_s9 = sshll.u32 %s183_s26, 1  ;;  %s193_s12 = scalar_lea.sflag [#allocation5], %s183_s26 }
  0x4b   : > { %s5887_s30 = scalar_lea.vmem [#allocation4], %s4304_s9 }
  0x4c   : > { %5725 = dma.done.wait (%p6588_p10), %s193_s12, 32  }
  0x4d   : > { %5727 = vsyncadd (%p6588_p10), %s193_s12, 4294967264  ;;  %v4872_v0 = vld [vmem:[%s5881_s8 + $0x74] ss:$8 sps:$4 sm:$0xff]   ;;  %v4876_v2 = vld [vmem:[%s5881_s8 + $0x70] ss:$8 sps:$4 sm:$0xff]   ;;  %v252_v38 = vlaneseq  ;;  %s4305_s6 = sshll.u32 %s4292_s16, 1 }
  0x4e   : > { %v4874_v1 = vld [vmem:[%s5881_s8 + $0x174] ss:$8 sps:$4 sm:$0xff]   ;;  %3532 = vmatprep.subr.bf16.mxu0 %v4872_v0  ;;  %v4877_v3 = vld [vmem:[%s5881_s8 + $0x170] ss:$8 sps:$4 sm:$0xff]   ;;  %v4878_v4 = vld [vmem:[%s5881_s8 + $0x64] ss:$8 sps:$4 sm:$0xff]  }
  0x4f   : > { %3573 = vmatprep.subr.bf16.mxu1 %v4874_v1  ;;  %3533 = vmatpush1.bf16.msra.mxu0 %v4876_v2  ;;  %v4880_v5 = vld [vmem:[%s5881_s8 + $0x164] ss:$8 sps:$4 sm:$0xff]   ;;  %v4882_v6 = vld [vmem:[%s5881_s8 + $0x60] ss:$8 sps:$4 sm:$0xff]   ;;  %v4884_v8 = vld [vmem:[%s5881_s8 + $0x54] ss:$8 sps:$4 sm:$0xff]  }
  0x50   : > { %3574 = vmatpush1.bf16.msra.mxu1 %v4877_v3  ;;  %3534 = vmatprep.subr.bf16.mxu0 %v4878_v4  ;;  %v4883_v7 = vld [vmem:[%s5881_s8 + $0x160] ss:$8 sps:$4 sm:$0xff]   ;;  %v4886_v9 = vld [vmem:[%s5881_s8 + $0x154] ss:$8 sps:$4 sm:$0xff]   ;;  %v4888_v10 = vld [vmem:[%s5881_s8 + $0x50] ss:$8 sps:$4 sm:$0xff]  }
  0x51   : > { %3575 = vmatprep.subr.bf16.mxu1 %v4880_v5  ;;  %v4889_v11 = vld [vmem:[%s5881_s8 + $0x150] ss:$8 sps:$4 sm:$0xff]   ;;  %v4890_v12 = vld [vmem:[%s5881_s8 + $0x44] ss:$8 sps:$4 sm:$0xff]   ;;  %v4894_v14 = vld [vmem:[%s5881_s8 + $0x40] ss:$8 sps:$4 sm:$0xff]  }
  0x52   : > { %v4892_v13 = vld [vmem:[%s5881_s8 + $0x144] ss:$8 sps:$4 sm:$0xff]   ;;  %v4895_v15 = vld [vmem:[%s5881_s8 + $0x140] ss:$8 sps:$4 sm:$0xff]   ;;  %v4896_v16 = vld [vmem:[%s5881_s8 + $0x34] ss:$8 sps:$4 sm:$0xff]  }
  0x53   : > { %3535 = vmatpush1.bf16.msra.mxu0 %v4882_v6  ;;  %v4898_v17 = vld [vmem:[%s5881_s8 + $0x134] ss:$8 sps:$4 sm:$0xff]   ;;  %v4900_v18 = vld [vmem:[%s5881_s8 + $0x30] ss:$8 sps:$4 sm:$0xff]   ;;  %v4902_v20 = vld [vmem:[%s5881_s8 + $0x24] ss:$8 sps:$4 sm:$0xff]  }
  0x54   : > { %3576 = vmatpush1.bf16.msra.mxu1 %v4883_v7  ;;  %3536 = vmatprep.subr.bf16.mxu0 %v4884_v8  ;;  %v4901_v19 = vld [vmem:[%s5881_s8 + $0x130] ss:$8 sps:$4 sm:$0xff]   ;;  %v4904_v21 = vld [vmem:[%s5881_s8 + $0x124] ss:$8 sps:$4 sm:$0xff]   ;;  %v4906_v22 = vld [vmem:[%s5881_s8 + $0x20] ss:$8 sps:$4 sm:$0xff]  }
  0x55   : > { %3577 = vmatprep.subr.bf16.mxu1 %v4886_v9  ;;  %v4907_v23 = vld [vmem:[%s5881_s8 + $0x120] ss:$8 sps:$4 sm:$0xff]   ;;  %v4908_v24 = vld [vmem:[%s5881_s8 + $0x14] ss:$8 sps:$4 sm:$0xff]   ;;  %v4912_v26 = vld [vmem:[%s5881_s8 + $0x10] ss:$8 sps:$4 sm:$0xff]  }
  0x56   : > { %v4910_v25 = vld [vmem:[%s5881_s8 + $0x114] ss:$8 sps:$4 sm:$0xff]   ;;  %v4913_v27 = vld [vmem:[%s5881_s8 + $0x110] ss:$8 sps:$4 sm:$0xff]   ;;  %v4914_v28 = vld [vmem:[%s5881_s8 + $0x4] ss:$8 sps:$4 sm:$0xff]  }
  0x57   : > { %3537 = vmatpush1.bf16.msra.mxu0 %v4888_v10  ;;  %v4916_v29 = vld [vmem:[%s5881_s8 + $0x104] ss:$8 sps:$4 sm:$0xff]   ;;  %v4918_v30 = vld [vmem:[%s5881_s8] ss:$8 sps:$4 sm:$0xff]   ;;  %v4920_v32 = vld [vmem:[%s5881_s8 + $0xf4] ss:$8 sps:$4 sm:$0xff]  }
  0x58   : > { %3578 = vmatpush1.bf16.msra.mxu1 %v4889_v11  ;;  %3538 = vmatprep.subr.bf16.mxu0 %v4890_v12  ;;  %v4919_v31 = vld [vmem:[%s5881_s8 + $0x100] ss:$8 sps:$4 sm:$0xff]   ;;  %v4922_v33 = vld [vmem:[%s5881_s8 + $0x1f4] ss:$8 sps:$4 sm:$0xff]   ;;  %v4924_v34 = vld [vmem:[%s5881_s8 + $0xf0] ss:$8 sps:$4 sm:$0xff]  }
  0x59   : > { %3579 = vmatprep.subr.bf16.mxu1 %v4892_v13  ;;  %v4925_v35 = vld [vmem:[%s5881_s8 + $0x1f0] ss:$8 sps:$4 sm:$0xff]   ;;  %v5749_v36 = vmov 1983009808   ;;  %v4926_v39 = vld [vmem:[%s5881_s8 + $0xe4] ss:$8 sps:$4 sm:$0xff]  }
  0x5a   : > { %v250_v37 = vunpack.c.l.s4 %v5749_v36  ;;  %v4928_v40 = vld [vmem:[%s5881_s8 + $0x1e4] ss:$8 sps:$4 sm:$0xff]   ;;  %v4930_v41 = vld [vmem:[%s5881_s8 + $0xe0] ss:$8 sps:$4 sm:$0xff]   ;;  %v5932_v43 = vshrl.u32 %v252_v38, 7  ;;  %p227_p7 = scmp.lt.s32.totalorder %s4305_s6, 7 }
  0x5b   : > { %3539 = vmatpush1.bf16.msra.mxu0 %v4894_v14  ;;  %v4931_v44 = vld [vmem:[%s5881_s8 + $0x1e0] ss:$8 sps:$4 sm:$0xff]   ;;  %v4932_v45 = vld [vmem:[%s5881_s8 + $0xd4] ss:$8 sps:$4 sm:$0xff]   ;;  %v4936_v47 = vld [vmem:[%s5881_s8 + $0xd0] ss:$8 sps:$4 sm:$0xff]  }
  0x5c   : > { %3580 = vmatpush1.bf16.msra.mxu1 %v4895_v15  ;;  %3540 = vmatprep.subr.bf16.mxu0 %v4896_v16  ;;  %v251_v42 = vunpack.c.0.s8 %v250_v37  ;;  %v4934_v46 = vld [vmem:[%s5881_s8 + $0x1d4] ss:$8 sps:$4 sm:$0xff]   ;;  %v4937_v48 = vld [vmem:[%s5881_s8 + $0x1d0] ss:$8 sps:$4 sm:$0xff]   ;;  %v4938_v50 = vld [vmem:[%s5881_s8 + $0xc4] ss:$8 sps:$4 sm:$0xff]  }
  0x5d   : > { %3581 = vmatprep.subr.bf16.mxu1 %v4898_v17  ;;  %v4940_v51 = vld [vmem:[%s5881_s8 + $0x1c4] ss:$8 sps:$4 sm:$0xff]   ;;  %v4942_v53 = vld [vmem:[%s5881_s8 + $0xc0] ss:$8 sps:$4 sm:$0xff]   ;;  %v4944_v57 = vld [vmem:[%s5881_s8 + $0xb4] ss:$8 sps:$4 sm:$0xff]  }
  0x5e   : > { %v5940_v49 = vsub.s32 %v251_v42, %v5932_v43  ;;  %v232_v52 = vld [vmem:[%s6579_s0] sm:$0xff]  ;;  %v4946_v58 = vld [vmem:[%s5881_s8 + $0x1b4] ss:$8 sps:$4 sm:$0xff]   ;;  %v4948_v61 = vld [vmem:[%s5881_s8 + $0xb0] ss:$8 sps:$4 sm:$0xff]   ;;  %s6594_s6 = smov (!%p227_p7, %s4305_s6), 7 }
  0x5f   : > { %3541 = vmatpush1.bf16.msra.mxu0 %v4900_v18  ;;  %v248_v55 = vcombine.high %v232_v52, %v232_v52  ;;  %v4943_v56 = vld [vmem:[%s5881_s8 + $0x1c0] ss:$8 sps:$4 sm:$0xff]   ;;  %v4949_v0 = vld [vmem:[%s5881_s8 + $0x1b0] ss:$8 sps:$4 sm:$0xff]   ;;  %v4950_v1 = vld [vmem:[%s5881_s8 + $0xa4] ss:$8 sps:$4 sm:$0xff]  }
  0x60   : > { %3582 = vmatpush1.bf16.msra.mxu1 %v4901_v19  ;;  %3542 = vmatprep.subr.bf16.mxu0 %v4902_v20  ;;  %v255_v54 = vrot.slane %v232_v52, %v5940_v49  ;;  %v4952_v2 = vld [vmem:[%s5881_s8 + $0x1a4] ss:$8 sps:$4 sm:$0xff]   ;;  %v4954_v4 = vld [vmem:[%s5881_s8 + $0xa0] ss:$8 sps:$4 sm:$0xff]   ;;  %v4956_v6 = vld [vmem:[%s5881_s8 + $0x94] ss:$8 sps:$4 sm:$0xff]  }
  0x61   : > { %3583 = vmatprep.subr.bf16.mxu1 %v4904_v21  ;;  %v262_v60 = vrot.slane %v248_v55, %v5940_v49  ;;  %v4955_v5 = vld [vmem:[%s5881_s8 + $0x1a0] ss:$8 sps:$4 sm:$0xff]   ;;  %v4958_v7 = vld [vmem:[%s5881_s8 + $0x194] ss:$8 sps:$4 sm:$0xff]   ;;  %v4960_v8 = vld [vmem:[%s5881_s8 + $0x90] ss:$8 sps:$4 sm:$0xff]  }
  0x62   : > { %v263_v59 = vcombine.high %v255_v54, %v255_v54  ;;  %v4961_v9 = vld [vmem:[%s5881_s8 + $0x190] ss:$8 sps:$4 sm:$0xff]   ;;  %v4962_v10 = vld [vmem:[%s5881_s8 + $0x84] ss:$8 sps:$4 sm:$0xff]   ;;  %v4966_v12 = vld [vmem:[%s5881_s8 + $0x80] ss:$8 sps:$4 sm:$0xff]   ;;  %v416_v16 = vpack.c.bf16 %v255_v54, %v255_v54 }
  0x63   : > { %3543 = vmatpush1.bf16.msra.mxu0 %v4906_v22  ;;  %v264_v63 = vcombine.high %v262_v60, %v262_v60  ;;  %v4964_v11 = vld [vmem:[%s5881_s8 + $0x184] ss:$8 sps:$4 sm:$0xff]   ;;  %v4967_v13 = vld [vmem:[%s5881_s8 + $0x180] ss:$8 sps:$4 sm:$0xff]   ;;  %v4971_v14 = vld [vmem:[%s5881_s8 + $0x274] ss:$8 sps:$4 sm:$0xff]   ;;  %v418_v17 = vpack.c.bf16 %v262_v60, %v262_v60 }
  0x64   : > { %3584 = vmatpush1.bf16.msra.mxu1 %v4907_v23  ;;  %3544 = vmatprep.subr.bf16.mxu0 %v4908_v24  ;;  %v417_v62 = vpack.c.bf16 %v263_v59, %v263_v59  ;;  %v4974_v15 = vld [vmem:[%s5881_s8 + $0x374] ss:$8 sps:$4 sm:$0xff]   ;;  %v4969_v18 = vld [vmem:[%s5881_s8 + $0x270] ss:$8 sps:$4 sm:$0xff]   ;;  %v4977_v20 = vld [vmem:[%s5881_s8 + $0x264] ss:$8 sps:$4 sm:$0xff]  }
  0x65   : > { %3585 = vmatprep.subr.bf16.mxu1 %v4910_v25  ;;  %v419_v3 = vpack.c.bf16 %v264_v63, %v264_v63  ;;  %v4972_v19 = vld [vmem:[%s5881_s8 + $0x370] ss:$8 sps:$4 sm:$0xff]   ;;  %v4980_v21 = vld [vmem:[%s5881_s8 + $0x364] ss:$8 sps:$4 sm:$0xff]   ;;  %v4975_v22 = vld [vmem:[%s5881_s8 + $0x260] ss:$8 sps:$4 sm:$0xff]  }
  0x66   : > { %3564 = vmatprep.mubr.bf16.mxu0 %v417_v62  ;;  %v4978_v23 = vld [vmem:[%s5881_s8 + $0x360] ss:$8 sps:$4 sm:$0xff]   ;;  %v4983_v24 = vld [vmem:[%s5881_s8 + $0x254] ss:$8 sps:$4 sm:$0xff]   ;;  %v5001_v36 = vld [vmem:[%s5881_s8 + $0x224] ss:$8 sps:$4 sm:$0xff]  }
  0x67   : > { %3545 = vmatpush1.bf16.msra.mxu0 %v4912_v26  ;;  %3605 = vmatprep.mubr.bf16.mxu1 %v419_v3  ;;  %v4986_v25 = vld [vmem:[%s5881_s8 + $0x354] ss:$8 sps:$4 sm:$0xff]   ;;  %v4981_v26 = vld [vmem:[%s5881_s8 + $0x250] ss:$8 sps:$4 sm:$0xff]   ;;  %v5004_v37 = vld [vmem:[%s5881_s8 + $0x324] ss:$8 sps:$4 sm:$0xff]  }
  0x68   : > { %3586 = vmatpush1.bf16.msra.mxu1 %v4913_v27  ;;  %3546 = vmatprep.subr.bf16.mxu0 %v4914_v28  ;;  %v4984_v27 = vld [vmem:[%s5881_s8 + $0x350] ss:$8 sps:$4 sm:$0xff]   ;;  %v4989_v28 = vld [vmem:[%s5881_s8 + $0x244] ss:$8 sps:$4 sm:$0xff]   ;;  %v4999_v38 = vld [vmem:[%s5881_s8 + $0x220] ss:$8 sps:$4 sm:$0xff]  }
  0x69   : > { %3587 = vmatprep.subr.bf16.mxu1 %v4916_v29  ;;  %v4992_v29 = vld [vmem:[%s5881_s8 + $0x344] ss:$8 sps:$4 sm:$0xff]   ;;  %v5011_v55 = vld [vmem:[%s5881_s8 + $0x200] ss:$8 sps:$4 sm:$0xff]   ;;  %v5022_v59 = vld [vmem:[%s5881_s8 + $0x3f4] ss:$8 sps:$4 sm:$0xff]  }
  0x6a   : > { %v233_v42 = vld [vmem:[%s6579_s0 + $0x8] sm:$0xff]  ;;  %v5017_v60 = vld [vmem:[%s5881_s8 + $0x2f0] ss:$8 sps:$4 sm:$0xff]   ;;  %v5034_v3 = vld [vmem:[%s5881_s8 + $0x3d4] ss:$8 sps:$4 sm:$0xff]  }
  0x6b   : > { %3547 = vmatpush1.bf16.msra.mxu0 %v4918_v30  ;;  %v4987_v30 = vld [vmem:[%s5881_s8 + $0x240] ss:$8 sps:$4 sm:$0xff]   ;;  %v5016_v52 = vld [vmem:[%s5881_s8 + $0x304] ss:$8 sps:$4 sm:$0xff]  }
  0x6c   : > { %3588 = vmatpush1.bf16.msra.mxu1 %v4919_v31  ;;  %3548 = vmatprep.subr.bf16.mxu0 %v4920_v32  ;;  %v4990_v31 = vld [vmem:[%s5881_s8 + $0x340] ss:$8 sps:$4 sm:$0xff]   ;;  %v4995_v32 = vld [vmem:[%s5881_s8 + $0x234] ss:$8 sps:$4 sm:$0xff]   ;;  %v5025_v62 = vld [vmem:[%s5881_s8 + $0x2e4] ss:$8 sps:$4 sm:$0xff]  }
  0x6d   : > { %3589 = vmatprep.subr.bf16.mxu1 %v4922_v33  ;;  %v4998_v33 = vld [vmem:[%s5881_s8 + $0x334] ss:$8 sps:$4 sm:$0xff]   ;;  %v5028_v63 = vld [vmem:[%s5881_s8 + $0x3e4] ss:$8 sps:$4 sm:$0xff]  }
  0x6f   : > { %3549 = vmatpush2.bf16.msra.mxu0 %v4924_v34  ;;  %v4993_v34 = vld [vmem:[%s5881_s8 + $0x230] ss:$8 sps:$4 sm:$0xff]  }
  0x70   : > { %3590 = vmatpush2.bf16.msra.mxu1 %v4925_v35  ;;  %3550 = vmatprep.subr.bf16.mxu0 %v4926_v39  ;;  %v4996_v35 = vld [vmem:[%s5881_s8 + $0x330] ss:$8 sps:$4 sm:$0xff]   ;;  %v5002_v39 = vld [vmem:[%s5881_s8 + $0x320] ss:$8 sps:$4 sm:$0xff]  }
  0x71   : > { %3591 = vmatprep.subr.bf16.mxu1 %v4928_v40  ;;  %v5007_v40 = vld [vmem:[%s5881_s8 + $0x214] ss:$8 sps:$4 sm:$0xff]  }
  0x73   : > { %3551 = vmatpush2.bf16.msra.mxu0 %v4930_v41  ;;  %v5010_v41 = vld [vmem:[%s5881_s8 + $0x314] ss:$8 sps:$4 sm:$0xff]  }
  0x74   : > { %3592 = vmatpush2.bf16.msra.mxu1 %v4931_v44  ;;  %3552 = vmatprep.subr.bf16.mxu0 %v4932_v45  ;;  %v5997_v44 = vrot.slane %v233_v42, %v5940_v49  ;;  %v265_v45 = vcombine.high %v233_v42, %v233_v42  ;;  %v5083_v42 = vld [vmem:[%s5881_s8 + $0x554] ss:$8 sps:$4 sm:$0xff]  }
  0x75   : > { %3593 = vmatprep.subr.bf16.mxu1 %v4934_v46  ;;  %v5005_v46 = vld [vmem:[%s5881_s8 + $0x210] ss:$8 sps:$4 sm:$0xff]  }
  0x77   : > { %3553 = vmatpush2.bf16.msra.mxu0 %v4936_v47  ;;  %v5008_v47 = vld [vmem:[%s5881_s8 + $0x310] ss:$8 sps:$4 sm:$0xff]  }
  0x78   : > { %3594 = vmatpush2.bf16.msra.mxu1 %v4937_v48  ;;  %3554 = vmatprep.subr.bf16.mxu0 %v4938_v50  ;;  %v280_v48 = vcombine.high %v5997_v44, %v5997_v44  ;;  %v6004_v50 = vrot.slane %v265_v45, %v5940_v49 }
  0x79   : > { %3595 = vmatprep.subr.bf16.mxu1 %v4940_v51  ;;  %v5013_v51 = vld [vmem:[%s5881_s8 + $0x204] ss:$8 sps:$4 sm:$0xff]  }
  0x7a   : > { %v281_v54 = vcombine.high %v6004_v50, %v6004_v50 }
  0x7b   : > { %3555 = vmatpush2.bf16.msra.mxu0 %v4942_v53  ;;  %v421_v53 = vpack.c.bf16 %v280_v48, %v280_v48  ;;  %v5081_v48 = vld [vmem:[%s5881_s8 + $0x550] ss:$8 sps:$4 sm:$0xff]  }
  0x7c   : > { %3596 = vmatpush2.bf16.msra.mxu1 %v4943_v56  ;;  %3556 = vmatprep.subr.bf16.mxu0 %v4944_v57  ;;  %v5014_v56 = vld [vmem:[%s5881_s8 + $0x300] ss:$8 sps:$4 sm:$0xff]   ;;  %v423_v57 = vpack.c.bf16 %v281_v54, %v281_v54  ;;  %v5092_v54 = vld [vmem:[%s5881_s8 + $0x434] ss:$8 sps:$4 sm:$0xff]  }
  0x7d   : > { %3597 = vmatprep.subr.bf16.mxu1 %v4946_v58  ;;  %v5019_v58 = vld [vmem:[%s5881_s8 + $0x2f4] ss:$8 sps:$4 sm:$0xff]  }
  0x7f   : > { %3557 = vmatpush2.bf16.msra.mxu0 %v4948_v61  ;;  %v5020_v61 = vld [vmem:[%s5881_s8 + $0x3f0] ss:$8 sps:$4 sm:$0xff]  }
  0x80   : > { %3598 = vmatpush2.bf16.msra.mxu1 %v4949_v0  ;;  %3558 = vmatprep.subr.bf16.mxu0 %v4950_v1  ;;  %v5023_v0 = vld [vmem:[%s5881_s8 + $0x2e0] ss:$8 sps:$4 sm:$0xff]  }
  0x81   : > { %3599 = vmatprep.subr.bf16.mxu1 %v4952_v2  ;;  %v5026_v1 = vld [vmem:[%s5881_s8 + $0x3e0] ss:$8 sps:$4 sm:$0xff]   ;;  %v5031_v2 = vld [vmem:[%s5881_s8 + $0x2d4] ss:$8 sps:$4 sm:$0xff]  }
  0x83   : > { %3559 = vmatpush2.bf16.msra.mxu0 %v4954_v4  ;;  %v5029_v4 = vld [vmem:[%s5881_s8 + $0x2d0] ss:$8 sps:$4 sm:$0xff]  }
  0x84   : > { %3600 = vmatpush2.bf16.msra.mxu1 %v4955_v5  ;;  %3560 = vmatprep.subr.bf16.mxu0 %v4956_v6  ;;  %v5032_v5 = vld [vmem:[%s5881_s8 + $0x3d0] ss:$8 sps:$4 sm:$0xff]   ;;  %v5037_v6 = vld [vmem:[%s5881_s8 + $0x2c4] ss:$8 sps:$4 sm:$0xff]  }
  0x85   : > { %3601 = vmatprep.subr.bf16.mxu1 %v4958_v7  ;;  %v5040_v7 = vld [vmem:[%s5881_s8 + $0x3c4] ss:$8 sps:$4 sm:$0xff]  }
  0x87   : > { %3561 = vmatpush2.bf16.msra.mxu0 %v4960_v8  ;;  %v5035_v8 = vld [vmem:[%s5881_s8 + $0x2c0] ss:$8 sps:$4 sm:$0xff]  }
  0x88   : > { %3602 = vmatpush2.bf16.msra.mxu1 %v4961_v9  ;;  %3562 = vmatprep.subr.bf16.mxu0 %v4962_v10  ;;  %v5038_v9 = vld [vmem:[%s5881_s8 + $0x3c0] ss:$8 sps:$4 sm:$0xff]   ;;  %v5043_v10 = vld [vmem:[%s5881_s8 + $0x2b4] ss:$8 sps:$4 sm:$0xff]  }
  0x89   : > { %3603 = vmatprep.subr.bf16.mxu1 %v4964_v11  ;;  %v5046_v11 = vld [vmem:[%s5881_s8 + $0x3b4] ss:$8 sps:$4 sm:$0xff]  }
  0x8b   : > { %3563 = vmatpush2.bf16.msra.mxu0 %v4966_v12  ;;  %v5041_v12 = vld [vmem:[%s5881_s8 + $0x2b0] ss:$8 sps:$4 sm:$0xff]  }
  0x8c   : > { %3604 = vmatpush2.bf16.msra.mxu1 %v4967_v13  ;;  %3614 = vmatprep.subr.bf16.mxu0 %v4971_v14  ;;  %v5044_v13 = vld [vmem:[%s5881_s8 + $0x3b0] ss:$8 sps:$4 sm:$0xff]   ;;  %v5049_v14 = vld [vmem:[%s5881_s8 + $0x2a4] ss:$8 sps:$4 sm:$0xff]  }
  0x8d   : > { %3655 = vmatprep.subr.bf16.mxu1 %v4974_v15  ;;  %v5052_v15 = vld [vmem:[%s5881_s8 + $0x3a4] ss:$8 sps:$4 sm:$0xff]  }
  0x8e   : > { %3565 = vmatmul.mubr.bf16.vlgmr.msra.gmra.mxu0 %v416_v16  ;;  %v5047_v16 = vld [vmem:[%s5881_s8 + $0x2a0] ss:$8 sps:$4 sm:$0xff]  }
  0x8f   : > { %3606 = vmatmul.mubr.bf16.vlgmr.msra.gmra.mxu1 %v418_v17  ;;  %3615 = vmatpush1.bf16.msra.mxu0 %v4969_v18  ;;  %v5050_v17 = vld [vmem:[%s5881_s8 + $0x3a0] ss:$8 sps:$4 sm:$0xff]   ;;  %v5055_v18 = vld [vmem:[%s5881_s8 + $0x294] ss:$8 sps:$4 sm:$0xff]  }
  0x90   : > { %3656 = vmatpush1.bf16.msra.mxu1 %v4972_v19  ;;  %3616 = vmatprep.subr.bf16.mxu0 %v4977_v20  ;;  %v5058_v19 = vld [vmem:[%s5881_s8 + $0x394] ss:$8 sps:$4 sm:$0xff]   ;;  %v5053_v20 = vld [vmem:[%s5881_s8 + $0x290] ss:$8 sps:$4 sm:$0xff]  }
  0x91   : > { %3657 = vmatprep.subr.bf16.mxu1 %v4980_v21  ;;  %3646 = vmatprep.mubr.bf16.mxu0 %v421_v53  ;;  %v5056_v21 = vld [vmem:[%s5881_s8 + $0x390] ss:$8 sps:$4 sm:$0xff]   ;;  %v5087_v53 = vld [vmem:[%s5881_s8 + $0x540] ss:$8 sps:$4 sm:$0xff]  }
  0x92   : > { %3687 = vmatprep.mubr.bf16.mxu1 %v423_v57  ;;  %v5093_v57 = vld [vmem:[%s5881_s8 + $0x530] ss:$8 sps:$4 sm:$0xff]  }
  0x93   : > { %3617 = vmatpush1.bf16.msra.mxu0 %v4975_v22  ;;  %v5061_v22 = vld [vmem:[%s5881_s8 + $0x284] ss:$8 sps:$4 sm:$0xff]  }
  0x94   : > { %3658 = vmatpush1.bf16.msra.mxu1 %v4978_v23  ;;  %3618 = vmatprep.subr.bf16.mxu0 %v4983_v24  ;;  %v5064_v23 = vld [vmem:[%s5881_s8 + $0x384] ss:$8 sps:$4 sm:$0xff]   ;;  %v5059_v24 = vld [vmem:[%s5881_s8 + $0x280] ss:$8 sps:$4 sm:$0xff]  }
  0x95   : > { %3659 = vmatprep.subr.bf16.mxu1 %v4986_v25  ;;  %v5062_v25 = vld [vmem:[%s5881_s8 + $0x380] ss:$8 sps:$4 sm:$0xff]  }
  0x97   : > { %3619 = vmatpush1.bf16.msra.mxu0 %v4981_v26  ;;  %v5068_v26 = vld [vmem:[%s5881_s8 + $0x474] ss:$8 sps:$4 sm:$0xff]  }
  0x98   : > { %3660 = vmatpush1.bf16.msra.mxu1 %v4984_v27  ;;  %3620 = vmatprep.subr.bf16.mxu0 %v4989_v28  ;;  %v5071_v27 = vld [vmem:[%s5881_s8 + $0x574] ss:$8 sps:$4 sm:$0xff]   ;;  %v420_v28 = vpack.c.bf16 %v5997_v44, %v5997_v44 }
  0x99   : > { %3661 = vmatprep.subr.bf16.mxu1 %v4992_v29  ;;  %v422_v29 = vpack.c.bf16 %v6004_v50, %v6004_v50  ;;  %v5086_v50 = vld [vmem:[%s5881_s8 + $0x444] ss:$8 sps:$4 sm:$0xff]  }
  0x9b   : > { %3621 = vmatpush1.bf16.msra.mxu0 %v4987_v30  ;;  %v5066_v30 = vld [vmem:[%s5881_s8 + $0x470] ss:$8 sps:$4 sm:$0xff]  }
  0x9c   : > { %3662 = vmatpush1.bf16.msra.mxu1 %v4990_v31  ;;  %3622 = vmatprep.subr.bf16.mxu0 %v4995_v32  ;;  %v5069_v31 = vld [vmem:[%s5881_s8 + $0x570] ss:$8 sps:$4 sm:$0xff]   ;;  %v5074_v32 = vld [vmem:[%s5881_s8 + $0x464] ss:$8 sps:$4 sm:$0xff]  }
  0x9d   : > { %3663 = vmatprep.subr.bf16.mxu1 %v4998_v33  ;;  %v234_v33 = vld [vmem:[%s6579_s0 + $0x10] sm:$0xff] }
  0x9f   : > { %3623 = vmatpush1.bf16.msra.mxu0 %v4993_v34  ;;  %v5077_v34 = vld [vmem:[%s5881_s8 + $0x564] ss:$8 sps:$4 sm:$0xff]  }
  0xa0   : > { %3664 = vmatpush1.bf16.msra.mxu1 %v4996_v35  ;;  %3624 = vmatprep.subr.bf16.mxu0 %v5001_v36  ;;  %v6058_v35 = vrot.slane %v234_v33, %v5940_v49  ;;  %v282_v36 = vcombine.high %v234_v33, %v234_v33 }
  0xa1   : > { %3665 = vmatprep.subr.bf16.mxu1 %v5004_v37  ;;  %v5072_v37 = vld [vmem:[%s5881_s8 + $0x460] ss:$8 sps:$4 sm:$0xff]  }
  0xa3   : > { %3625 = vmatpush1.bf16.msra.mxu0 %v4999_v38  ;;  %v297_v38 = vcombine.high %v6058_v35, %v6058_v35 }
  0xa4   : > { %3666 = vmatpush1.bf16.msra.mxu1 %v5002_v39  ;;  %3626 = vmatprep.subr.bf16.mxu0 %v5007_v40  ;;  %v6064_v39 = vrot.slane %v282_v36, %v5940_v49  ;;  %v5075_v40 = vld [vmem:[%s5881_s8 + $0x560] ss:$8 sps:$4 sm:$0xff]   ;;  %v5153_v36 = vld [vmem:[%s5881_s8 + $0x590] ss:$8 sps:$4 sm:$0xff]  }
  0xa5   : > { %3667 = vmatprep.subr.bf16.mxu1 %v5010_v41  ;;  %v5080_v41 = vld [vmem:[%s5881_s8 + $0x454] ss:$8 sps:$4 sm:$0xff]   ;;  %v425_v44 = vpack.c.bf16 %v297_v38, %v297_v38  ;;  %v5161_v38 = vld [vmem:[%s5881_s8 + $0x584] ss:$8 sps:$4 sm:$0xff]  }
  0xa6   : > { %v298_v45 = vcombine.high %v6064_v39, %v6064_v39 }
  0xa7   : > { %3627 = vmatpush1.bf16.msra.mxu0 %v5005_v46  ;;  %v5078_v46 = vld [vmem:[%s5881_s8 + $0x450] ss:$8 sps:$4 sm:$0xff]  }
  0xa8   : > { %3668 = vmatpush1.bf16.msra.mxu1 %v5008_v47  ;;  %3628 = vmatprep.subr.bf16.mxu0 %v5013_v51  ;;  %v427_v47 = vpack.c.bf16 %v298_v45, %v298_v45  ;;  %v5089_v51 = vld [vmem:[%s5881_s8 + $0x544] ss:$8 sps:$4 sm:$0xff]   ;;  %v5165_v45 = vld [vmem:[%s5881_s8 + $0x674] ss:$8 sps:$4 sm:$0xff]  }
  0xa9   : > { %3669 = vmatprep.subr.bf16.mxu1 %v5016_v52  ;;  %v5084_v52 = vld [vmem:[%s5881_s8 + $0x440] ss:$8 sps:$4 sm:$0xff]  }
  0xab   : > { %3629 = vmatpush1.bf16.msra.mxu0 %v5011_v55  ;;  %v5095_v55 = vld [vmem:[%s5881_s8 + $0x534] ss:$8 sps:$4 sm:$0xff]  }
  0xac   : > { %3670 = vmatpush1.bf16.msra.mxu1 %v5014_v56  ;;  %3630 = vmatprep.subr.bf16.mxu0 %v5019_v58  ;;  %v5090_v56 = vld [vmem:[%s5881_s8 + $0x430] ss:$8 sps:$4 sm:$0xff]   ;;  %v5098_v58 = vld [vmem:[%s5881_s8 + $0x424] ss:$8 sps:$4 sm:$0xff]  }
  0xad   : > { %3671 = vmatprep.subr.bf16.mxu1 %v5022_v59  ;;  %v5101_v59 = vld [vmem:[%s5881_s8 + $0x524] ss:$8 sps:$4 sm:$0xff]  }
  0xaf   : > { %3631 = vmatpush2.bf16.msra.mxu0 %v5017_v60  ;;  %v5096_v60 = vld [vmem:[%s5881_s8 + $0x420] ss:$8 sps:$4 sm:$0xff]  }
  0xb0   : > { %3672 = vmatpush2.bf16.msra.mxu1 %v5020_v61  ;;  %3632 = vmatprep.subr.bf16.mxu0 %v5025_v62  ;;  %v5099_v61 = vld [vmem:[%s5881_s8 + $0x520] ss:$8 sps:$4 sm:$0xff]   ;;  %v5104_v62 = vld [vmem:[%s5881_s8 + $0x414] ss:$8 sps:$4 sm:$0xff]  }
  0xb1   : > { %3673 = vmatprep.subr.bf16.mxu1 %v5028_v63  ;;  %v5107_v63 = vld [vmem:[%s5881_s8 + $0x514] ss:$8 sps:$4 sm:$0xff]  }
  0xb3   : > { %3633 = vmatpush2.bf16.msra.mxu0 %v5023_v0  ;;  %v5102_v0 = vld [vmem:[%s5881_s8 + $0x410] ss:$8 sps:$4 sm:$0xff]  }
  0xb4   : > { %3674 = vmatpush2.bf16.msra.mxu1 %v5026_v1  ;;  %3634 = vmatprep.subr.bf16.mxu0 %v5031_v2  ;;  %v5105_v1 = vld [vmem:[%s5881_s8 + $0x510] ss:$8 sps:$4 sm:$0xff]   ;;  %v5110_v2 = vld [vmem:[%s5881_s8 + $0x404] ss:$8 sps:$4 sm:$0xff]  }
  0xb5   : > { %3675 = vmatprep.subr.bf16.mxu1 %v5034_v3  ;;  %v5113_v3 = vld [vmem:[%s5881_s8 + $0x504] ss:$8 sps:$4 sm:$0xff]  }
  0xb7   : > { %3635 = vmatpush2.bf16.msra.mxu0 %v5029_v4  ;;  %v5108_v4 = vld [vmem:[%s5881_s8 + $0x400] ss:$8 sps:$4 sm:$0xff]  }
  0xb8   : > { %3676 = vmatpush2.bf16.msra.mxu1 %v5032_v5  ;;  %3636 = vmatprep.subr.bf16.mxu0 %v5037_v6  ;;  %v5111_v5 = vld [vmem:[%s5881_s8 + $0x500] ss:$8 sps:$4 sm:$0xff]   ;;  %v5116_v6 = vld [vmem:[%s5881_s8 + $0x4f4] ss:$8 sps:$4 sm:$0xff]  }
  0xb9   : > { %3677 = vmatprep.subr.bf16.mxu1 %v5040_v7  ;;  %v5119_v7 = vld [vmem:[%s5881_s8 + $0x5f4] ss:$8 sps:$4 sm:$0xff]  }
  0xbb   : > { %3637 = vmatpush2.bf16.msra.mxu0 %v5035_v8  ;;  %v5114_v8 = vld [vmem:[%s5881_s8 + $0x4f0] ss:$8 sps:$4 sm:$0xff]  }
  0xbc   : > { %3678 = vmatpush2.bf16.msra.mxu1 %v5038_v9  ;;  %3638 = vmatprep.subr.bf16.mxu0 %v5043_v10  ;;  %v5117_v9 = vld [vmem:[%s5881_s8 + $0x5f0] ss:$8 sps:$4 sm:$0xff]   ;;  %v5122_v10 = vld [vmem:[%s5881_s8 + $0x4e4] ss:$8 sps:$4 sm:$0xff]  }
  0xbd   : > { %3679 = vmatprep.subr.bf16.mxu1 %v5046_v11  ;;  %v5125_v11 = vld [vmem:[%s5881_s8 + $0x5e4] ss:$8 sps:$4 sm:$0xff]  }
  0xbf   : > { %3639 = vmatpush2.bf16.msra.mxu0 %v5041_v12  ;;  %v5120_v12 = vld [vmem:[%s5881_s8 + $0x4e0] ss:$8 sps:$4 sm:$0xff]  }
  0xc0   : > { %3680 = vmatpush2.bf16.msra.mxu1 %v5044_v13  ;;  %3640 = vmatprep.subr.bf16.mxu0 %v5049_v14  ;;  %v5123_v13 = vld [vmem:[%s5881_s8 + $0x5e0] ss:$8 sps:$4 sm:$0xff]   ;;  %v5128_v14 = vld [vmem:[%s5881_s8 + $0x4d4] ss:$8 sps:$4 sm:$0xff]  }
  0xc1   : > { %3681 = vmatprep.subr.bf16.mxu1 %v5052_v15  ;;  %v5131_v15 = vld [vmem:[%s5881_s8 + $0x5d4] ss:$8 sps:$4 sm:$0xff]  }
  0xc3   : > { %3641 = vmatpush2.bf16.msra.mxu0 %v5047_v16  ;;  %v5126_v16 = vld [vmem:[%s5881_s8 + $0x4d0] ss:$8 sps:$4 sm:$0xff]  }
  0xc4   : > { %3682 = vmatpush2.bf16.msra.mxu1 %v5050_v17  ;;  %3642 = vmatprep.subr.bf16.mxu0 %v5055_v18  ;;  %v5129_v17 = vld [vmem:[%s5881_s8 + $0x5d0] ss:$8 sps:$4 sm:$0xff]   ;;  %v5134_v18 = vld [vmem:[%s5881_s8 + $0x4c4] ss:$8 sps:$4 sm:$0xff]  }
  0xc5   : > { %3683 = vmatprep.subr.bf16.mxu1 %v5058_v19  ;;  %v5137_v19 = vld [vmem:[%s5881_s8 + $0x5c4] ss:$8 sps:$4 sm:$0xff]  }
  0xc7   : > { %3643 = vmatpush2.bf16.msra.mxu0 %v5053_v20  ;;  %v5132_v20 = vld [vmem:[%s5881_s8 + $0x4c0] ss:$8 sps:$4 sm:$0xff]  }
  0xc8   : > { %3684 = vmatpush2.bf16.msra.mxu1 %v5056_v21  ;;  %3644 = vmatprep.subr.bf16.mxu0 %v5061_v22  ;;  %v5135_v21 = vld [vmem:[%s5881_s8 + $0x5c0] ss:$8 sps:$4 sm:$0xff]   ;;  %v5140_v22 = vld [vmem:[%s5881_s8 + $0x4b4] ss:$8 sps:$4 sm:$0xff]  }
  0xc9   : > { %3685 = vmatprep.subr.bf16.mxu1 %v5064_v23  ;;  %v5143_v23 = vld [vmem:[%s5881_s8 + $0x5b4] ss:$8 sps:$4 sm:$0xff]  }
  0xcb   : > { %3645 = vmatpush2.bf16.msra.mxu0 %v5059_v24  ;;  %v5138_v24 = vld [vmem:[%s5881_s8 + $0x4b0] ss:$8 sps:$4 sm:$0xff]  }
  0xcc   : > { %3686 = vmatpush2.bf16.msra.mxu1 %v5062_v25  ;;  %3696 = vmatprep.subr.bf16.mxu0 %v5068_v26  ;;  %v5141_v25 = vld [vmem:[%s5881_s8 + $0x5b0] ss:$8 sps:$4 sm:$0xff]   ;;  %v5146_v26 = vld [vmem:[%s5881_s8 + $0x4a4] ss:$8 sps:$4 sm:$0xff]  }
  0xcd   : > { %3737 = vmatprep.subr.bf16.mxu1 %v5071_v27  ;;  %v5149_v27 = vld [vmem:[%s5881_s8 + $0x5a4] ss:$8 sps:$4 sm:$0xff]  }
  0xce   : > { %3647 = vmatmul.mubr.bf16.vlgmr.msra.gmra.mxu0 %v420_v28  ;;  %v5144_v28 = vld [vmem:[%s5881_s8 + $0x4a0] ss:$8 sps:$4 sm:$0xff]  }
  0xcf   : > { %3688 = vmatmul.mubr.bf16.vlgmr.msra.gmra.mxu1 %v422_v29  ;;  %3697 = vmatpush1.bf16.msra.mxu0 %v5066_v30  ;;  %v235_v29 = vld [vmem:[%s6579_s0 + $0x18] sm:$0xff]  ;;  %v5147_v30 = vld [vmem:[%s5881_s8 + $0x5a0] ss:$8 sps:$4 sm:$0xff]  }
  0xd0   : > { %3738 = vmatpush1.bf16.msra.mxu1 %v5069_v31  ;;  %3698 = vmatprep.subr.bf16.mxu0 %v5074_v32  ;;  %v5152_v31 = vld [vmem:[%s5881_s8 + $0x494] ss:$8 sps:$4 sm:$0xff]   ;;  %v299_v33 = vcombine.high %v235_v29, %v235_v29 }
  0xd1   : > { %3739 = vmatprep.subr.bf16.mxu1 %v5077_v34  ;;  %3728 = vmatprep.mubr.bf16.mxu0 %v425_v44  ;;  %v5155_v32 = vld [vmem:[%s5881_s8 + $0x594] ss:$8 sps:$4 sm:$0xff]   ;;  %v5150_v34 = vld [vmem:[%s5881_s8 + $0x490] ss:$8 sps:$4 sm:$0xff]   ;;  %v5159_v44 = vld [vmem:[%s5881_s8 + $0x580] ss:$8 sps:$4 sm:$0xff]  }
  0xd2   : > { %3769 = vmatprep.mubr.bf16.mxu1 %v427_v47 }
  0xd3   : > { %3699 = vmatpush1.bf16.msra.mxu0 %v5072_v37  ;;  %v5158_v37 = vld [vmem:[%s5881_s8 + $0x484] ss:$8 sps:$4 sm:$0xff]  }
  0xd4   : > { %3740 = vmatpush1.bf16.msra.mxu1 %v5075_v40  ;;  %3700 = vmatprep.subr.bf16.mxu0 %v5080_v41  ;;  %v6127_v40 = vrot.slane %v235_v29, %v5940_v49  ;;  %v6130_v41 = vrot.slane %v299_v33, %v5940_v49  ;;  %v5226_v29 = vld [vmem:[%s5881_s8 + $0x7d0] ss:$8 sps:$4 sm:$0xff]   ;;  %v5232_v33 = vld [vmem:[%s5881_s8 + $0x7c0] ss:$8 sps:$4 sm:$0xff]  }
  0xd5   : > { %3741 = vmatprep.subr.bf16.mxu1 %v5083_v42  ;;  %v5156_v42 = vld [vmem:[%s5881_s8 + $0x480] ss:$8 sps:$4 sm:$0xff]  }
  0xd6   : > { %v314_v47 = vcombine.high %v6127_v40, %v6127_v40 }
  0xd7   : > { %3701 = vmatpush1.bf16.msra.mxu0 %v5078_v46  ;;  %v5168_v46 = vld [vmem:[%s5881_s8 + $0x774] ss:$8 sps:$4 sm:$0xff]  }
  0xd8   : > { %3742 = vmatpush1.bf16.msra.mxu1 %v5081_v48  ;;  %3702 = vmatprep.subr.bf16.mxu0 %v5086_v50  ;;  %v315_v48 = vcombine.high %v6130_v41, %v6130_v41  ;;  %v424_v50 = vpack.c.bf16 %v6058_v35, %v6058_v35  ;;  %v5169_v35 = vld [vmem:[%s5881_s8 + $0x660] ss:$8 sps:$4 sm:$0xff]  }
  0xd9   : > { %3743 = vmatprep.subr.bf16.mxu1 %v5089_v51  ;;  %v426_v51 = vpack.c.bf16 %v6064_v39, %v6064_v39  ;;  %v5172_v39 = vld [vmem:[%s5881_s8 + $0x760] ss:$8 sps:$4 sm:$0xff]  }
  0xdb   : > { %3703 = vmatpush1.bf16.msra.mxu0 %v5084_v52  ;;  %v5163_v52 = vld [vmem:[%s5881_s8 + $0x670] ss:$8 sps:$4 sm:$0xff]  }
  0xdc   : > { %3744 = vmatpush1.bf16.msra.mxu1 %v5087_v53  ;;  %3704 = vmatprep.subr.bf16.mxu0 %v5092_v54  ;;  %v5166_v53 = vld [vmem:[%s5881_s8 + $0x770] ss:$8 sps:$4 sm:$0xff]   ;;  %v5171_v54 = vld [vmem:[%s5881_s8 + $0x664] ss:$8 sps:$4 sm:$0xff]  }
  0xdd   : > { %3745 = vmatprep.subr.bf16.mxu1 %v5095_v55  ;;  %v5174_v55 = vld [vmem:[%s5881_s8 + $0x764] ss:$8 sps:$4 sm:$0xff]  }
  0xdf   : > { %3705 = vmatpush1.bf16.msra.mxu0 %v5090_v56  ;;  %v429_v56 = vpack.c.bf16 %v314_v47, %v314_v47  ;;  %v5244_v47 = vld [vmem:[%s5881_s8 + $0x7a0] ss:$8 sps:$4 sm:$0xff]  }
  0xe0   : > { %3746 = vmatpush1.bf16.msra.mxu1 %v5093_v57  ;;  %3706 = vmatprep.subr.bf16.mxu0 %v5098_v58  ;;  %v431_v57 = vpack.c.bf16 %v315_v48, %v315_v48  ;;  %v5177_v58 = vld [vmem:[%s5881_s8 + $0x654] ss:$8 sps:$4 sm:$0xff]  }
  0xe1   : > { %3747 = vmatprep.subr.bf16.mxu1 %v5101_v59  ;;  %v5180_v59 = vld [vmem:[%s5881_s8 + $0x754] ss:$8 sps:$4 sm:$0xff]  }
  0xe2   : > { %v5249_v48 = vld [vmem:[%s5881_s8 + $0x694] ss:$8 sps:$4 sm:$0xff]  }
  0xe3   : > { %3707 = vmatpush1.bf16.msra.mxu0 %v5096_v60  ;;  %v5175_v60 = vld [vmem:[%s5881_s8 + $0x650] ss:$8 sps:$4 sm:$0xff]  }
  0xe4   : > { %3748 = vmatpush1.bf16.msra.mxu1 %v5099_v61  ;;  %3708 = vmatprep.subr.bf16.mxu0 %v5104_v62  ;;  %v5178_v61 = vld [vmem:[%s5881_s8 + $0x750] ss:$8 sps:$4 sm:$0xff]   ;;  %v5183_v62 = vld [vmem:[%s5881_s8 + $0x644] ss:$8 sps:$4 sm:$0xff]  }
  0xe5   : > { %3749 = vmatprep.subr.bf16.mxu1 %v5107_v63  ;;  %v5186_v63 = vld [vmem:[%s5881_s8 + $0x744] ss:$8 sps:$4 sm:$0xff]  }
  0xe7   : > { %3709 = vmatpush1.bf16.msra.mxu0 %v5102_v0  ;;  %v5181_v0 = vld [vmem:[%s5881_s8 + $0x640] ss:$8 sps:$4 sm:$0xff]  }
  0xe8   : > { %3750 = vmatpush1.bf16.msra.mxu1 %v5105_v1  ;;  %3710 = vmatprep.subr.bf16.mxu0 %v5110_v2  ;;  %v5184_v1 = vld [vmem:[%s5881_s8 + $0x740] ss:$8 sps:$4 sm:$0xff]   ;;  %v5189_v2 = vld [vmem:[%s5881_s8 + $0x634] ss:$8 sps:$4 sm:$0xff]  }
  0xe9   : > { %3751 = vmatprep.subr.bf16.mxu1 %v5113_v3  ;;  %v5192_v3 = vld [vmem:[%s5881_s8 + $0x734] ss:$8 sps:$4 sm:$0xff]  }
  0xeb   : > { %3711 = vmatpush1.bf16.msra.mxu0 %v5108_v4  ;;  %v5187_v4 = vld [vmem:[%s5881_s8 + $0x630] ss:$8 sps:$4 sm:$0xff]  }
  0xec   : > { %3752 = vmatpush1.bf16.msra.mxu1 %v5111_v5  ;;  %3712 = vmatprep.subr.bf16.mxu0 %v5116_v6  ;;  %v5190_v5 = vld [vmem:[%s5881_s8 + $0x730] ss:$8 sps:$4 sm:$0xff]   ;;  %v5195_v6 = vld [vmem:[%s5881_s8 + $0x624] ss:$8 sps:$4 sm:$0xff]  }
  0xed   : > { %3753 = vmatprep.subr.bf16.mxu1 %v5119_v7  ;;  %v5198_v7 = vld [vmem:[%s5881_s8 + $0x724] ss:$8 sps:$4 sm:$0xff]  }
  0xef   : > { %3713 = vmatpush2.bf16.msra.mxu0 %v5114_v8  ;;  %v5193_v8 = vld [vmem:[%s5881_s8 + $0x620] ss:$8 sps:$4 sm:$0xff]  }
  0xf0   : > { %3754 = vmatpush2.bf16.msra.mxu1 %v5117_v9  ;;  %3714 = vmatprep.subr.bf16.mxu0 %v5122_v10  ;;  %v5196_v9 = vld [vmem:[%s5881_s8 + $0x720] ss:$8 sps:$4 sm:$0xff]   ;;  %v5201_v10 = vld [vmem:[%s5881_s8 + $0x614] ss:$8 sps:$4 sm:$0xff]  }
  0xf1   : > { %3755 = vmatprep.subr.bf16.mxu1 %v5125_v11  ;;  %v5204_v11 = vld [vmem:[%s5881_s8 + $0x714] ss:$8 sps:$4 sm:$0xff]  }
  0xf3   : > { %3715 = vmatpush2.bf16.msra.mxu0 %v5120_v12  ;;  %v5199_v12 = vld [vmem:[%s5881_s8 + $0x610] ss:$8 sps:$4 sm:$0xff]  }
  0xf4   : > { %3756 = vmatpush2.bf16.msra.mxu1 %v5123_v13  ;;  %3716 = vmatprep.subr.bf16.mxu0 %v5128_v14  ;;  %v5202_v13 = vld [vmem:[%s5881_s8 + $0x710] ss:$8 sps:$4 sm:$0xff]   ;;  %v5207_v14 = vld [vmem:[%s5881_s8 + $0x604] ss:$8 sps:$4 sm:$0xff]  }
  0xf5   : > { %3757 = vmatprep.subr.bf16.mxu1 %v5131_v15  ;;  %v5210_v15 = vld [vmem:[%s5881_s8 + $0x704] ss:$8 sps:$4 sm:$0xff]  }
  0xf7   : > { %3717 = vmatpush2.bf16.msra.mxu0 %v5126_v16  ;;  %v5205_v16 = vld [vmem:[%s5881_s8 + $0x600] ss:$8 sps:$4 sm:$0xff]  }
  0xf8   : > { %3758 = vmatpush2.bf16.msra.mxu1 %v5129_v17  ;;  %3718 = vmatprep.subr.bf16.mxu0 %v5134_v18  ;;  %v5208_v17 = vld [vmem:[%s5881_s8 + $0x700] ss:$8 sps:$4 sm:$0xff]   ;;  %v5213_v18 = vld [vmem:[%s5881_s8 + $0x6f4] ss:$8 sps:$4 sm:$0xff]  }
  0xf9   : > { %3759 = vmatprep.subr.bf16.mxu1 %v5137_v19  ;;  %v5216_v19 = vld [vmem:[%s5881_s8 + $0x7f4] ss:$8 sps:$4 sm:$0xff]  }
  0xfb   : > { %3719 = vmatpush2.bf16.msra.mxu0 %v5132_v20  ;;  %v5211_v20 = vld [vmem:[%s5881_s8 + $0x6f0] ss:$8 sps:$4 sm:$0xff]  }
  0xfc   : > { %3760 = vmatpush2.bf16.msra.mxu1 %v5135_v21  ;;  %3720 = vmatprep.subr.bf16.mxu0 %v5140_v22  ;;  %v5214_v21 = vld [vmem:[%s5881_s8 + $0x7f0] ss:$8 sps:$4 sm:$0xff]   ;;  %v5219_v22 = vld [vmem:[%s5881_s8 + $0x6e4] ss:$8 sps:$4 sm:$0xff]  }
  0xfd   : > { %3761 = vmatprep.subr.bf16.mxu1 %v5143_v23  ;;  %v5222_v23 = vld [vmem:[%s5881_s8 + $0x7e4] ss:$8 sps:$4 sm:$0xff]  }
  0xff   : > { %3721 = vmatpush2.bf16.msra.mxu0 %v5138_v24  ;;  %v5217_v24 = vld [vmem:[%s5881_s8 + $0x6e0] ss:$8 sps:$4 sm:$0xff]  }
 0x100   : > { %3762 = vmatpush2.bf16.msra.mxu1 %v5141_v25  ;;  %3722 = vmatprep.subr.bf16.mxu0 %v5146_v26  ;;  %v5220_v25 = vld [vmem:[%s5881_s8 + $0x7e0] ss:$8 sps:$4 sm:$0xff]   ;;  %v5225_v26 = vld [vmem:[%s5881_s8 + $0x6d4] ss:$8 sps:$4 sm:$0xff]  }
 0x101   : > { %3763 = vmatprep.subr.bf16.mxu1 %v5149_v27  ;;  %v5228_v27 = vld [vmem:[%s5881_s8 + $0x7d4] ss:$8 sps:$4 sm:$0xff]  }
 0x103   : > { %3723 = vmatpush2.bf16.msra.mxu0 %v5144_v28  ;;  %v5223_v28 = vld [vmem:[%s5881_s8 + $0x6d0] ss:$8 sps:$4 sm:$0xff]  }
 0x104   : > { %3764 = vmatpush2.bf16.msra.mxu1 %v5147_v30  ;;  %3724 = vmatprep.subr.bf16.mxu0 %v5152_v31  ;;  %v5231_v30 = vld [vmem:[%s5881_s8 + $0x6c4] ss:$8 sps:$4 sm:$0xff]  }
 0x105   : > { %3765 = vmatprep.subr.bf16.mxu1 %v5155_v32  ;;  %v5234_v31 = vld [vmem:[%s5881_s8 + $0x7c4] ss:$8 sps:$4 sm:$0xff]   ;;  %v5229_v32 = vld [vmem:[%s5881_s8 + $0x6c0] ss:$8 sps:$4 sm:$0xff]  }
 0x107   : > { %3725 = vmatpush2.bf16.msra.mxu0 %v5150_v34  ;;  %v5237_v34 = vld [vmem:[%s5881_s8 + $0x6b4] ss:$8 sps:$4 sm:$0xff]  }
 0x108   : > { %3766 = vmatpush2.bf16.msra.mxu1 %v5153_v36  ;;  %3726 = vmatprep.subr.bf16.mxu0 %v5158_v37  ;;  %v5240_v36 = vld [vmem:[%s5881_s8 + $0x7b4] ss:$8 sps:$4 sm:$0xff]   ;;  %v5235_v37 = vld [vmem:[%s5881_s8 + $0x6b0] ss:$8 sps:$4 sm:$0xff]  }
 0x109   : > { %3767 = vmatprep.subr.bf16.mxu1 %v5161_v38  ;;  %v5238_v38 = vld [vmem:[%s5881_s8 + $0x7b0] ss:$8 sps:$4 sm:$0xff]  }
 0x10b   : > { %3727 = vmatpush2.bf16.msra.mxu0 %v5156_v42  ;;  %v5243_v42 = vld [vmem:[%s5881_s8 + $0x6a4] ss:$8 sps:$4 sm:$0xff]  }
 0x10c   : > { %3768 = vmatpush2.bf16.msra.mxu1 %v5159_v44  ;;  %3778 = vmatprep.subr.bf16.mxu0 %v5165_v45  ;;  %v5246_v44 = vld [vmem:[%s5881_s8 + $0x7a4] ss:$8 sps:$4 sm:$0xff]  }
 0x10d   : > { %3819 = vmatprep.subr.bf16.mxu1 %v5168_v46  ;;  %v236_v45 = vld [vmem:[%s6579_s0 + $0x20] sm:$0xff] }
 0x10e   : > { %3729 = vmatmul.mubr.bf16.vlgmr.msra.gmra.mxu0 %v424_v50  ;;  %v5241_v46 = vld [vmem:[%s5881_s8 + $0x6a0] ss:$8 sps:$4 sm:$0xff]   ;;  %v5252_v50 = vld [vmem:[%s5881_s8 + $0x794] ss:$8 sps:$4 sm:$0xff]  }
 0x10f   : > { %3770 = vmatmul.mubr.bf16.vlgmr.msra.gmra.mxu1 %v426_v51  ;;  %3779 = vmatpush1.bf16.msra.mxu0 %v5163_v52  ;;  %v316_v51 = vcombine.high %v236_v45, %v236_v45  ;;  %v5247_v52 = vld [vmem:[%s5881_s8 + $0x690] ss:$8 sps:$4 sm:$0xff]  }
 0x110   : > { %3820 = vmatpush1.bf16.msra.mxu1 %v5166_v53  ;;  %3780 = vmatprep.subr.bf16.mxu0 %v5171_v54  ;;  %v5250_v53 = vld [vmem:[%s5881_s8 + $0x790] ss:$8 sps:$4 sm:$0xff]   ;;  %v5255_v54 = vld [vmem:[%s5881_s8 + $0x684] ss:$8 sps:$4 sm:$0xff]  }
 0x111   : > { %3821 = vmatprep.subr.bf16.mxu1 %v5174_v55  ;;  %3810 = vmatprep.mubr.bf16.mxu0 %v429_v56  ;;  %v5258_v55 = vld [vmem:[%s5881_s8 + $0x784] ss:$8 sps:$4 sm:$0xff]   ;;  %v6208_v56 = vrot.slane %v236_v45, %v5940_v49  ;;  %v5296_v45 = vld [vmem:[%s5881_s8 + $0x810] ss:$8 sps:$4 sm:$0xff]  }
 0x112   : > { %3851 = vmatprep.mubr.bf16.mxu1 %v431_v57  ;;  %v6211_v57 = vrot.slane %v316_v51, %v5940_v49  ;;  %v5305_v51 = vld [vmem:[%s5881_s8 + $0x900] ss:$8 sps:$4 sm:$0xff]  }
 0x113   : > { %3781 = vmatpush1.bf16.msra.mxu0 %v5169_v35  ;;  %v5253_v35 = vld [vmem:[%s5881_s8 + $0x680] ss:$8 sps:$4 sm:$0xff]  }
 0x114   : > { %3822 = vmatpush1.bf16.msra.mxu1 %v5172_v39  ;;  %3782 = vmatprep.subr.bf16.mxu0 %v5177_v58  ;;  %v5256_v39 = vld [vmem:[%s5881_s8 + $0x780] ss:$8 sps:$4 sm:$0xff]  }
 0x115   : > { %3823 = vmatprep.subr.bf16.mxu1 %v5180_v59  ;;  %v960_v58 = vld [vmem:[%s5887_s30] sm:$0x3]  ;;  %v964_v59 = vsub.s32 0, %v5932_v43 }
 0x117   : > { %3783 = vmatpush1.bf16.msra.mxu0 %v5175_v60  ;;  %v5262_v60 = vld [vmem:[%s5881_s8 + $0x874] ss:$8 sps:$4 sm:$0xff]  }
 0x118   : > { %3824 = vmatpush1.bf16.msra.mxu1 %v5178_v61  ;;  %3784 = vmatprep.subr.bf16.mxu0 %v5183_v62  ;;  %v5265_v61 = vld [vmem:[%s5881_s8 + $0x974] ss:$8 sps:$4 sm:$0xff]   ;;  %v968_v62 = vsub.s32 1, %v5932_v43  ;;  %v5268_v43 = vld [vmem:[%s5881_s8 + $0x864] ss:$8 sps:$4 sm:$0xff]  }
 0x119   : > { %3825 = vmatprep.subr.bf16.mxu1 %v5186_v63  ;;  %v331_v63 = vcombine.high %v6208_v56, %v6208_v56 }
 0x11b   : > { %3785 = vmatpush1.bf16.msra.mxu0 %v5181_v0  ;;  %v332_v0 = vcombine.high %v6211_v57, %v6211_v57 }
 0x11c   : > { %3826 = vmatpush1.bf16.msra.mxu1 %v5184_v1  ;;  %3786 = vmatprep.subr.bf16.mxu0 %v5189_v2  ;;  %v428_v1 = vpack.c.bf16 %v6127_v40, %v6127_v40  ;;  %v430_v2 = vpack.c.bf16 %v6130_v41, %v6130_v41  ;;  %v5266_v41 = vld [vmem:[%s5881_s8 + $0x860] ss:$8 sps:$4 sm:$0xff]  }
 0x11d   : > { %3827 = vmatprep.subr.bf16.mxu1 %v5192_v3  ;;  %v965_v3 = vrot.slane %v960_v58, %v964_v59  ;;  %v5317_v59 = vld [vmem:[%s5881_s8 + $0x9e0] ss:$8 sps:$4 sm:$0xff]  }
 0x11f   : > { %3787 = vmatpush1.bf16.msra.mxu0 %v5187_v4  ;;  %v5260_v4 = vld [vmem:[%s5881_s8 + $0x870] ss:$8 sps:$4 sm:$0xff]  }
 0x120   : > { %3828 = vmatpush1.bf16.msra.mxu1 %v5190_v5  ;;  %3788 = vmatprep.subr.bf16.mxu0 %v5195_v6  ;;  %v5263_v5 = vld [vmem:[%s5881_s8 + $0x970] ss:$8 sps:$4 sm:$0xff]   ;;  %v5271_v6 = vld [vmem:[%s5881_s8 + $0x964] ss:$8 sps:$4 sm:$0xff]  }
 0x121   : > { %3829 = vmatprep.subr.bf16.mxu1 %v5198_v7  ;;  %v969_v7 = vrot.slane %v960_v58, %v968_v62  ;;  %v5314_v58 = vld [vmem:[%s5881_s8 + $0x8e0] ss:$8 sps:$4 sm:$0xff]   ;;  %v5320_v62 = vld [vmem:[%s5881_s8 + $0x8d0] ss:$8 sps:$4 sm:$0xff]  }
 0x123   : > { %3789 = vmatpush1.bf16.msra.mxu0 %v5193_v8  ;;  %v433_v8 = vpack.c.bf16 %v331_v63, %v331_v63  ;;  %v5323_v63 = vld [vmem:[%s5881_s8 + $0x9d0] ss:$8 sps:$4 sm:$0xff]  }
 0x124   : > { %3830 = vmatpush1.bf16.msra.mxu1 %v5196_v9  ;;  %3790 = vmatprep.subr.bf16.mxu0 %v5201_v10  ;;  %v435_v9 = vpack.c.bf16 %v332_v0, %v332_v0  ;;  %v5328_v0 = vld [vmem:[%s5881_s8 + $0x8c4] ss:$8 sps:$4 sm:$0xff]  }
 0x125   : > { %3831 = vmatprep.subr.bf16.mxu1 %v5204_v11 }
 0x127   : > { %3791 = vmatpush1.bf16.msra.mxu0 %v5199_v12  ;;  %v5269_v12 = vld [vmem:[%s5881_s8 + $0x960] ss:$8 sps:$4 sm:$0xff]  }
 0x128   : > { %3832 = vmatpush1.bf16.msra.mxu1 %v5202_v13  ;;  %3792 = vmatprep.subr.bf16.mxu0 %v5207_v14  ;;  %v5274_v13 = vld [vmem:[%s5881_s8 + $0x854] ss:$8 sps:$4 sm:$0xff]  }
 0x129   : > { %3833 = vmatprep.subr.bf16.mxu1 %v5210_v15 }
 0x12b   : > { %3793 = vmatpush1.bf16.msra.mxu0 %v5205_v16  ;;  %v5277_v16 = vld [vmem:[%s5881_s8 + $0x954] ss:$8 sps:$4 sm:$0xff]  }
 0x12c   : > { %3834 = vmatpush1.bf16.msra.mxu1 %v5208_v17  ;;  %3794 = vmatprep.subr.bf16.mxu0 %v5213_v18 }
 0x12d   : > { %3835 = vmatprep.subr.bf16.mxu1 %v5216_v19 }
 0x12f   : > { %3795 = vmatpush2.bf16.msra.mxu0 %v5211_v20 }
 0x130   : > { %3836 = vmatpush2.bf16.msra.mxu1 %v5214_v21  ;;  %3796 = vmatprep.subr.bf16.mxu0 %v5219_v22  ;;  %v5272_v21 = vld [vmem:[%s5881_s8 + $0x850] ss:$8 sps:$4 sm:$0xff]  }
 0x131   : > { %3837 = vmatprep.subr.bf16.mxu1 %v5222_v23  ;;  %v5275_v22 = vld [vmem:[%s5881_s8 + $0x950] ss:$8 sps:$4 sm:$0xff]  }
 0x133   : > { %3797 = vmatpush2.bf16.msra.mxu0 %v5217_v24 }
 0x134   : > { %3838 = vmatpush2.bf16.msra.mxu1 %v5220_v25  ;;  %3798 = vmatprep.subr.bf16.mxu0 %v5225_v26  ;;  %v5280_v26 = vld [vmem:[%s5881_s8 + $0x844] ss:$8 sps:$4 sm:$0xff]  }
 0x135   : > { %3839 = vmatprep.subr.bf16.mxu1 %v5228_v27  ;;  %v5283_v27 = vld [vmem:[%s5881_s8 + $0x944] ss:$8 sps:$4 sm:$0xff]  }
 0x137   : > { %3799 = vmatpush2.bf16.msra.mxu0 %v5223_v28  ;;  %v5278_v28 = vld [vmem:[%s5881_s8 + $0x840] ss:$8 sps:$4 sm:$0xff]  }
 0x138   : > { %3840 = vmatpush2.bf16.msra.mxu1 %v5226_v29  ;;  %3800 = vmatprep.subr.bf16.mxu0 %v5231_v30  ;;  %v5281_v29 = vld [vmem:[%s5881_s8 + $0x940] ss:$8 sps:$4 sm:$0xff]   ;;  %v5286_v30 = vld [vmem:[%s5881_s8 + $0x834] ss:$8 sps:$4 sm:$0xff]  }
 0x139   : > { %3841 = vmatprep.subr.bf16.mxu1 %v5234_v31  ;;  %v5289_v31 = vld [vmem:[%s5881_s8 + $0x934] ss:$8 sps:$4 sm:$0xff]  }
 0x13b   : > { %3801 = vmatpush2.bf16.msra.mxu0 %v5229_v32  ;;  %v5284_v32 = vld [vmem:[%s5881_s8 + $0x830] ss:$8 sps:$4 sm:$0xff]  }
 0x13c   : > { %3842 = vmatpush2.bf16.msra.mxu1 %v5232_v33  ;;  %3802 = vmatprep.subr.bf16.mxu0 %v5237_v34  ;;  %v5287_v33 = vld [vmem:[%s5881_s8 + $0x930] ss:$8 sps:$4 sm:$0xff]   ;;  %v5292_v34 = vld [vmem:[%s5881_s8 + $0x824] ss:$8 sps:$4 sm:$0xff]  }
 0x13d   : > { %3843 = vmatprep.subr.bf16.mxu1 %v5240_v36  ;;  %v5295_v36 = vld [vmem:[%s5881_s8 + $0x924] ss:$8 sps:$4 sm:$0xff]  }
 0x13f   : > { %3803 = vmatpush2.bf16.msra.mxu0 %v5235_v37  ;;  %v5290_v37 = vld [vmem:[%s5881_s8 + $0x820] ss:$8 sps:$4 sm:$0xff]  }
 0x140   : > { %3844 = vmatpush2.bf16.msra.mxu1 %v5238_v38  ;;  %3804 = vmatprep.subr.bf16.mxu0 %v5243_v42  ;;  %v5293_v38 = vld [vmem:[%s5881_s8 + $0x920] ss:$8 sps:$4 sm:$0xff]   ;;  %v5298_v42 = vld [vmem:[%s5881_s8 + $0x814] ss:$8 sps:$4 sm:$0xff]  }
 0x141   : > { %3845 = vmatprep.subr.bf16.mxu1 %v5246_v44  ;;  %v5301_v44 = vld [vmem:[%s5881_s8 + $0x914] ss:$8 sps:$4 sm:$0xff]  }
 0x143   : > { %3805 = vmatpush2.bf16.msra.mxu0 %v5241_v46  ;;  %v5299_v46 = vld [vmem:[%s5881_s8 + $0x910] ss:$8 sps:$4 sm:$0xff]  }
 0x144   : > { %3846 = vmatpush2.bf16.msra.mxu1 %v5244_v47  ;;  %3806 = vmatprep.subr.bf16.mxu0 %v5249_v48  ;;  %v5304_v47 = vld [vmem:[%s5881_s8 + $0x804] ss:$8 sps:$4 sm:$0xff]  }
 0x145   : > { %3847 = vmatprep.subr.bf16.mxu1 %v5252_v50  ;;  %v5307_v48 = vld [vmem:[%s5881_s8 + $0x904] ss:$8 sps:$4 sm:$0xff]   ;;  %v5302_v50 = vld [vmem:[%s5881_s8 + $0x800] ss:$8 sps:$4 sm:$0xff]  }
 0x147   : > { %3807 = vmatpush2.bf16.msra.mxu0 %v5247_v52  ;;  %v5310_v52 = vld [vmem:[%s5881_s8 + $0x8f4] ss:$8 sps:$4 sm:$0xff]  }
 0x148   : > { %3848 = vmatpush2.bf16.msra.mxu1 %v5250_v53  ;;  %3808 = vmatprep.subr.bf16.mxu0 %v5255_v54  ;;  %v5313_v53 = vld [vmem:[%s5881_s8 + $0x9f4] ss:$8 sps:$4 sm:$0xff]   ;;  %v5308_v54 = vld [vmem:[%s5881_s8 + $0x8f0] ss:$8 sps:$4 sm:$0xff]  }
 0x149   : > { %3849 = vmatprep.subr.bf16.mxu1 %v5258_v55  ;;  %v5311_v55 = vld [vmem:[%s5881_s8 + $0x9f0] ss:$8 sps:$4 sm:$0xff]  }
 0x14b   : > { %3809 = vmatpush2.bf16.msra.mxu0 %v5253_v35  ;;  %v5316_v35 = vld [vmem:[%s5881_s8 + $0x8e4] ss:$8 sps:$4 sm:$0xff]  }
 0x14c   : > { %3850 = vmatpush2.bf16.msra.mxu1 %v5256_v39  ;;  %3860 = vmatprep.subr.bf16.mxu0 %v5262_v60  ;;  %v5319_v39 = vld [vmem:[%s5881_s8 + $0x9e4] ss:$8 sps:$4 sm:$0xff]   ;;  %v5322_v60 = vld [vmem:[%s5881_s8 + $0x8d4] ss:$8 sps:$4 sm:$0xff]  }
 0x14d   : > { %3901 = vmatprep.subr.bf16.mxu1 %v5265_v61  ;;  %v5325_v61 = vld [vmem:[%s5881_s8 + $0x9d4] ss:$8 sps:$4 sm:$0xff]  }
 0x14e   : > { %v3566_v40 = vpop.f32.mrf.mxu0  ;;  %3811 = vmatmul.mubr.bf16.vlgmr.msra.gmra.mxu0 %v428_v1  ;;  %v5331_v1 = vld [vmem:[%s5881_s8 + $0x9c4] ss:$8 sps:$4 sm:$0xff]  }
 0x14f   : > { %v3607_v10 = vpop.f32.mrf.mxu1  ;;  %3852 = vmatmul.mubr.bf16.vlgmr.msra.gmra.mxu1 %v430_v2  ;;  %v3567_v11 = vadd.f32 %v3566_v40, %v965_v3  ;;  %3861 = vmatpush1.bf16.msra.mxu0 %v5260_v4  ;;  %v5326_v2 = vld [vmem:[%s5881_s8 + $0x8c0] ss:$8 sps:$4 sm:$0xff]   ;;  %v5334_v4 = vld [vmem:[%s5881_s8 + $0x8b4] ss:$8 sps:$4 sm:$0xff]  }
 0x150   : > { %3902 = vmatpush1.bf16.msra.mxu1 %v5263_v5  ;;  %v3568_v14 = vpop.f32.mrf.mxu0  ;;  %3862 = vmatprep.subr.bf16.mxu0 %v5268_v43  ;;  %v5329_v3 = vld [vmem:[%s5881_s8 + $0x9c0] ss:$8 sps:$4 sm:$0xff]   ;;  %v5337_v5 = vld [vmem:[%s5881_s8 + $0x9b4] ss:$8 sps:$4 sm:$0xff]   ;;  %v5332_v43 = vld [vmem:[%s5881_s8 + $0x8b0] ss:$8 sps:$4 sm:$0xff]  }
 0x151   : > { %v3609_v15 = vpop.f32.mrf.mxu1  ;;  %3903 = vmatprep.subr.bf16.mxu1 %v5271_v6  ;;  %v6236_v17 = vadd.f32 %v3607_v10, %v3567_v11  ;;  %v3569_v18 = vadd.f32 %v3568_v14, %v969_v7  ;;  %3892 = vmatprep.mubr.bf16.mxu0 %v433_v8  ;;  %v5335_v6 = vld [vmem:[%s5881_s8 + $0x9b0] ss:$8 sps:$4 sm:$0xff]   ;;  %v5340_v7 = vld [vmem:[%s5881_s8 + $0x8a4] ss:$8 sps:$4 sm:$0xff]   ;;  %v5338_v40 = vld [vmem:[%s5881_s8 + $0x8a0] ss:$8 sps:$4 sm:$0xff]  }
 0x152   : > { %3933 = vmatprep.mubr.bf16.mxu1 %v435_v9  ;;  %v3570_v19 = vpop.f32.mrf.mxu0  ;;  %v5343_v8 = vld [vmem:[%s5881_s8 + $0x9a4] ss:$8 sps:$4 sm:$0xff]   ;;  %v5341_v10 = vld [vmem:[%s5881_s8 + $0x9a0] ss:$8 sps:$4 sm:$0xff]   ;;  %v5349_v11 = vld [vmem:[%s5881_s8 + $0x994] ss:$8 sps:$4 sm:$0xff]  }
 0x153   : > { %v3611_v20 = vpop.f32.mrf.mxu1  ;;  %v6240_v23 = vadd.f32 %v3609_v15, %v3569_v18  ;;  %3863 = vmatpush1.bf16.msra.mxu0 %v5266_v41  ;;  %v237_v9 = vld [vmem:[%s6579_s0 + $0x28] sm:$0xff]  ;;  %v5346_v41 = vld [vmem:[%s5881_s8 + $0x894] ss:$8 sps:$4 sm:$0xff]   ;;  %v5347_v14 = vld [vmem:[%s5881_s8 + $0x990] ss:$8 sps:$4 sm:$0xff]  }
 0x154   : > { %3904 = vmatpush1.bf16.msra.mxu1 %v5269_v12  ;;  %v3571_v24 = vpop.f32.mrf.mxu0  ;;  %3864 = vmatprep.subr.bf16.mxu0 %v5274_v13  ;;  %v333_v12 = vcombine.high %v237_v9, %v237_v9  ;;  %v5344_v13 = vld [vmem:[%s5881_s8 + $0x890] ss:$8 sps:$4 sm:$0xff]   ;;  %v5352_v15 = vld [vmem:[%s5881_s8 + $0x884] ss:$8 sps:$4 sm:$0xff]   ;;  %v6296_v18 = vrot.slane %v237_v9, %v5940_v49  ;;  %v5350_v20 = vld [vmem:[%s5881_s8 + $0x880] ss:$8 sps:$4 sm:$0xff]  }
 0x155   : > { %v3612_v25 = vpop.f32.mrf.mxu1  ;;  %3905 = vmatprep.subr.bf16.mxu1 %v5277_v16  ;;  %v5355_v16 = vld [vmem:[%s5881_s8 + $0x984] ss:$8 sps:$4 sm:$0xff]   ;;  %v5362_v24 = vld [vmem:[%s5881_s8 + $0xb74] ss:$8 sps:$4 sm:$0xff]   ;;  %v5402_v9 = vld [vmem:[%s5881_s8 + $0xb00] ss:$8 sps:$4 sm:$0xff]  }
 0x156   : > { %v6299_v19 = vrot.slane %v333_v12, %v5940_v49  ;;  %v5357_v25 = vld [vmem:[%s5881_s8 + $0xa70] ss:$8 sps:$4 sm:$0xff]   ;;  %v5413_v12 = vld [vmem:[%s5881_s8 + $0xae4] ss:$8 sps:$4 sm:$0xff]  }
 0x157   : > { %3865 = vmatpush1.bf16.msra.mxu0 %v5272_v21  ;;  %v5353_v21 = vld [vmem:[%s5881_s8 + $0x980] ss:$8 sps:$4 sm:$0xff]  }
 0x158   : > { %3906 = vmatpush1.bf16.msra.mxu1 %v5275_v22  ;;  %3866 = vmatprep.subr.bf16.mxu0 %v5280_v26  ;;  %v5359_v22 = vld [vmem:[%s5881_s8 + $0xa74] ss:$8 sps:$4 sm:$0xff]   ;;  %v5360_v26 = vld [vmem:[%s5881_s8 + $0xb70] ss:$8 sps:$4 sm:$0xff]  }
 0x159   : > { %3907 = vmatprep.subr.bf16.mxu1 %v5283_v27  ;;  %v348_v27 = vcombine.high %v6296_v18, %v6296_v18 }
 0x15b   : > { %3867 = vmatpush1.bf16.msra.mxu0 %v5278_v28  ;;  %v349_v28 = vcombine.high %v6299_v19, %v6299_v19 }
 0x15c   : > { %3908 = vmatpush1.bf16.msra.mxu1 %v5281_v29  ;;  %3868 = vmatprep.subr.bf16.mxu0 %v5286_v30  ;;  %v432_v29 = vpack.c.bf16 %v6208_v56, %v6208_v56  ;;  %v434_v30 = vpack.c.bf16 %v6211_v57, %v6211_v57  ;;  %v5363_v57 = vld [vmem:[%s5881_s8 + $0xa60] ss:$8 sps:$4 sm:$0xff]  }
 0x15d   : > { %3909 = vmatprep.subr.bf16.mxu1 %v5289_v31  ;;  %v5365_v31 = vld [vmem:[%s5881_s8 + $0xa64] ss:$8 sps:$4 sm:$0xff]  }
 0x15f   : > { %3869 = vmatpush1.bf16.msra.mxu0 %v5284_v32  ;;  %v5368_v32 = vld [vmem:[%s5881_s8 + $0xb64] ss:$8 sps:$4 sm:$0xff]  }
 0x160   : > { %3910 = vmatpush1.bf16.msra.mxu1 %v5287_v33  ;;  %3870 = vmatprep.subr.bf16.mxu0 %v5292_v34  ;;  %v437_v33 = vpack.c.bf16 %v348_v27, %v348_v27  ;;  %v439_v34 = vpack.c.bf16 %v349_v28, %v349_v28  ;;  %v5426_v27 = vld [vmem:[%s5881_s8 + $0xbc0] ss:$8 sps:$4 sm:$0xff]   ;;  %v5431_v28 = vld [vmem:[%s5881_s8 + $0xab4] ss:$8 sps:$4 sm:$0xff]  }
 0x161   : > { %3911 = vmatprep.subr.bf16.mxu1 %v5295_v36 }
 0x163   : > { %3871 = vmatpush1.bf16.msra.mxu0 %v5290_v37 }
 0x164   : > { %3912 = vmatpush1.bf16.msra.mxu1 %v5293_v38  ;;  %3872 = vmatprep.subr.bf16.mxu0 %v5298_v42  ;;  %v5366_v38 = vld [vmem:[%s5881_s8 + $0xb60] ss:$8 sps:$4 sm:$0xff]  }
 0x165   : > { %3913 = vmatprep.subr.bf16.mxu1 %v5301_v44 }
 0x167   : > { %3873 = vmatpush1.bf16.msra.mxu0 %v5296_v45  ;;  %v5371_v45 = vld [vmem:[%s5881_s8 + $0xa54] ss:$8 sps:$4 sm:$0xff]  }
 0x168   : > { %3914 = vmatpush1.bf16.msra.mxu1 %v5299_v46  ;;  %3874 = vmatprep.subr.bf16.mxu0 %v5304_v47  ;;  %v5374_v46 = vld [vmem:[%s5881_s8 + $0xb54] ss:$8 sps:$4 sm:$0xff]  }
 0x169   : > { %3915 = vmatprep.subr.bf16.mxu1 %v5307_v48 }
 0x16b   : > { %3875 = vmatpush1.bf16.msra.mxu0 %v5302_v50 }
 0x16c   : > { %3916 = vmatpush1.bf16.msra.mxu1 %v5305_v51  ;;  %3876 = vmatprep.subr.bf16.mxu0 %v5310_v52  ;;  %v5369_v52 = vld [vmem:[%s5881_s8 + $0xa50] ss:$8 sps:$4 sm:$0xff]  }
 0x16d   : > { %3917 = vmatprep.subr.bf16.mxu1 %v5313_v53  ;;  %v5372_v53 = vld [vmem:[%s5881_s8 + $0xb50] ss:$8 sps:$4 sm:$0xff]  }
 0x16f   : > { %3877 = vmatpush2.bf16.msra.mxu0 %v5308_v54 }
 0x170   : > { %3918 = vmatpush2.bf16.msra.mxu1 %v5311_v55  ;;  %3878 = vmatprep.subr.bf16.mxu0 %v5316_v35  ;;  %v5380_v35 = vld [vmem:[%s5881_s8 + $0xb44] ss:$8 sps:$4 sm:$0xff]  }
 0x171   : > { %3919 = vmatprep.subr.bf16.mxu1 %v5319_v39  ;;  %v5375_v39 = vld [vmem:[%s5881_s8 + $0xa40] ss:$8 sps:$4 sm:$0xff]  }
 0x173   : > { %3879 = vmatpush2.bf16.msra.mxu0 %v5314_v58  ;;  %v5378_v58 = vld [vmem:[%s5881_s8 + $0xb40] ss:$8 sps:$4 sm:$0xff]  }
 0x174   : > { %3920 = vmatpush2.bf16.msra.mxu1 %v5317_v59  ;;  %3880 = vmatprep.subr.bf16.mxu0 %v5322_v60  ;;  %v5383_v59 = vld [vmem:[%s5881_s8 + $0xa34] ss:$8 sps:$4 sm:$0xff]  }
 0x175   : > { %3921 = vmatprep.subr.bf16.mxu1 %v5325_v61  ;;  %v5386_v60 = vld [vmem:[%s5881_s8 + $0xb34] ss:$8 sps:$4 sm:$0xff]   ;;  %v5381_v61 = vld [vmem:[%s5881_s8 + $0xa30] ss:$8 sps:$4 sm:$0xff]  }
 0x177   : > { %3881 = vmatpush2.bf16.msra.mxu0 %v5320_v62  ;;  %v5384_v62 = vld [vmem:[%s5881_s8 + $0xb30] ss:$8 sps:$4 sm:$0xff]  }
 0x178   : > { %3922 = vmatpush2.bf16.msra.mxu1 %v5323_v63  ;;  %3882 = vmatprep.subr.bf16.mxu0 %v5328_v0  ;;  %v5389_v63 = vld [vmem:[%s5881_s8 + $0xa24] ss:$8 sps:$4 sm:$0xff]  }
 0x179   : > { %3923 = vmatprep.subr.bf16.mxu1 %v5331_v1  ;;  %v5392_v0 = vld [vmem:[%s5881_s8 + $0xb24] ss:$8 sps:$4 sm:$0xff]   ;;  %v5387_v1 = vld [vmem:[%s5881_s8 + $0xa20] ss:$8 sps:$4 sm:$0xff]  }
 0x17b   : > { %3883 = vmatpush2.bf16.msra.mxu0 %v5326_v2  ;;  %v5390_v2 = vld [vmem:[%s5881_s8 + $0xb20] ss:$8 sps:$4 sm:$0xff]  }
 0x17c   : > { %3924 = vmatpush2.bf16.msra.mxu1 %v5329_v3  ;;  %3884 = vmatprep.subr.bf16.mxu0 %v5334_v4  ;;  %v5395_v3 = vld [vmem:[%s5881_s8 + $0xa14] ss:$8 sps:$4 sm:$0xff]  }
 0x17d   : > { %3925 = vmatprep.subr.bf16.mxu1 %v5337_v5  ;;  %v5398_v4 = vld [vmem:[%s5881_s8 + $0xb14] ss:$8 sps:$4 sm:$0xff]   ;;  %v5393_v5 = vld [vmem:[%s5881_s8 + $0xa10] ss:$8 sps:$4 sm:$0xff]  }
 0x17f   : > { %3885 = vmatpush2.bf16.msra.mxu0 %v5332_v43  ;;  %v5396_v43 = vld [vmem:[%s5881_s8 + $0xb10] ss:$8 sps:$4 sm:$0xff]  }
 0x180   : > { %3926 = vmatpush2.bf16.msra.mxu1 %v5335_v6  ;;  %3886 = vmatprep.subr.bf16.mxu0 %v5340_v7  ;;  %v5401_v6 = vld [vmem:[%s5881_s8 + $0xa04] ss:$8 sps:$4 sm:$0xff]  }
 0x181   : > { %3927 = vmatprep.subr.bf16.mxu1 %v5343_v8  ;;  %v5404_v7 = vld [vmem:[%s5881_s8 + $0xb04] ss:$8 sps:$4 sm:$0xff]   ;;  %v5399_v8 = vld [vmem:[%s5881_s8 + $0xa00] ss:$8 sps:$4 sm:$0xff]  }
 0x183   : > { %3887 = vmatpush2.bf16.msra.mxu0 %v5338_v40  ;;  %v5407_v40 = vld [vmem:[%s5881_s8 + $0xaf4] ss:$8 sps:$4 sm:$0xff]  }
 0x184   : > { %3928 = vmatpush2.bf16.msra.mxu1 %v5341_v10  ;;  %3888 = vmatprep.subr.bf16.mxu0 %v5346_v41  ;;  %v5410_v10 = vld [vmem:[%s5881_s8 + $0xbf4] ss:$8 sps:$4 sm:$0xff]   ;;  %v5405_v41 = vld [vmem:[%s5881_s8 + $0xaf0] ss:$8 sps:$4 sm:$0xff]  }
 0x185   : > { %3929 = vmatprep.subr.bf16.mxu1 %v5349_v11  ;;  %v5408_v11 = vld [vmem:[%s5881_s8 + $0xbf0] ss:$8 sps:$4 sm:$0xff]  }
 0x187   : > { %3889 = vmatpush2.bf16.msra.mxu0 %v5344_v13  ;;  %v5416_v13 = vld [vmem:[%s5881_s8 + $0xbe4] ss:$8 sps:$4 sm:$0xff]  }
 0x188   : > { %3930 = vmatpush2.bf16.msra.mxu1 %v5347_v14  ;;  %3890 = vmatprep.subr.bf16.mxu0 %v5352_v15  ;;  %v5411_v14 = vld [vmem:[%s5881_s8 + $0xae0] ss:$8 sps:$4 sm:$0xff]  }
 0x189   : > { %3931 = vmatprep.subr.bf16.mxu1 %v5355_v16  ;;  %v5414_v15 = vld [vmem:[%s5881_s8 + $0xbe0] ss:$8 sps:$4 sm:$0xff]   ;;  %v5419_v16 = vld [vmem:[%s5881_s8 + $0xad4] ss:$8 sps:$4 sm:$0xff]  }
 0x18b   : > { %3891 = vmatpush2.bf16.msra.mxu0 %v5350_v20  ;;  %v5422_v20 = vld [vmem:[%s5881_s8 + $0xbd4] ss:$8 sps:$4 sm:$0xff]  }
 0x18c   : > { %3932 = vmatpush2.bf16.msra.mxu1 %v5353_v21  ;;  %3942 = vmatprep.subr.bf16.mxu0 %v5359_v22  ;;  %v5417_v21 = vld [vmem:[%s5881_s8 + $0xad0] ss:$8 sps:$4 sm:$0xff]  }
 0x18d   : > { %3983 = vmatprep.subr.bf16.mxu1 %v5362_v24  ;;  %v5420_v22 = vld [vmem:[%s5881_s8 + $0xbd0] ss:$8 sps:$4 sm:$0xff]   ;;  %v5425_v24 = vld [vmem:[%s5881_s8 + $0xac4] ss:$8 sps:$4 sm:$0xff]  }
 0x18e   : > { %v3648_v36 = vpop.f32.mrf.mxu0  ;;  %3893 = vmatmul.mubr.bf16.vlgmr.msra.gmra.mxu0 %v432_v29  ;;  %v5434_v29 = vld [vmem:[%s5881_s8 + $0xbb4] ss:$8 sps:$4 sm:$0xff]  }
 0x18f   : > { %v3689_v37 = vpop.f32.mrf.mxu1  ;;  %3934 = vmatmul.mubr.bf16.vlgmr.msra.gmra.mxu1 %v434_v30  ;;  %v3649_v56 = vadd.f32 %v3648_v36, %v6236_v17  ;;  %3943 = vmatpush1.bf16.msra.mxu0 %v5357_v25  ;;  %v5428_v25 = vld [vmem:[%s5881_s8 + $0xbc4] ss:$8 sps:$4 sm:$0xff]   ;;  %v5429_v30 = vld [vmem:[%s5881_s8 + $0xab0] ss:$8 sps:$4 sm:$0xff]   ;;  %v5435_v36 = vld [vmem:[%s5881_s8 + $0xaa0] ss:$8 sps:$4 sm:$0xff]  }
 0x190   : > { %3984 = vmatpush1.bf16.msra.mxu1 %v5360_v26  ;;  %v3650_v42 = vpop.f32.mrf.mxu0  ;;  %3944 = vmatprep.subr.bf16.mxu0 %v5365_v31  ;;  %v5423_v26 = vld [vmem:[%s5881_s8 + $0xac0] ss:$8 sps:$4 sm:$0xff]   ;;  %v5432_v31 = vld [vmem:[%s5881_s8 + $0xbb0] ss:$8 sps:$4 sm:$0xff]  }
 0x191   : > { %v3691_v44 = vpop.f32.mrf.mxu1  ;;  %3985 = vmatprep.subr.bf16.mxu1 %v5368_v32  ;;  %v6322_v47 = vadd.f32 %v3689_v37, %v3649_v56  ;;  %v3651_v48 = vadd.f32 %v3650_v42, %v6240_v23  ;;  %3974 = vmatprep.mubr.bf16.mxu0 %v437_v33  ;;  %v5377_v23 = vld [vmem:[%s5881_s8 + $0xa44] ss:$8 sps:$4 sm:$0xff]   ;;  %v5438_v37 = vld [vmem:[%s5881_s8 + $0xba0] ss:$8 sps:$4 sm:$0xff]   ;;  %v5443_v56 = vld [vmem:[%s5881_s8 + $0xa94] ss:$8 sps:$4 sm:$0xff]  }
 0x192   : > { %4015 = vmatprep.mubr.bf16.mxu1 %v439_v34  ;;  %v3652_v17 = vpop.f32.mrf.mxu0  ;;  %v5437_v32 = vld [vmem:[%s5881_s8 + $0xaa4] ss:$8 sps:$4 sm:$0xff]   ;;  %v238_v34 = vld [vmem:[%s6579_s0 + $0x30] sm:$0xff] }
 0x193   : > { %v3693_v50 = vpop.f32.mrf.mxu1  ;;  %v6325_v51 = vadd.f32 %v3691_v44, %v3651_v48  ;;  %3945 = vmatpush1.bf16.msra.mxu0 %v5363_v57  ;;  %v5440_v33 = vld [vmem:[%s5881_s8 + $0xba4] ss:$8 sps:$4 sm:$0xff]   ;;  %v5446_v57 = vld [vmem:[%s5881_s8 + $0xb94] ss:$8 sps:$4 sm:$0xff]   ;;  %v5441_v42 = vld [vmem:[%s5881_s8 + $0xa90] ss:$8 sps:$4 sm:$0xff]   ;;  %v6383_v48 = vrot.slane %v238_v34, %v5940_v49 }
 0x194   : > { %3986 = vmatpush1.bf16.msra.mxu1 %v5366_v38  ;;  %v3653_v54 = vpop.f32.mrf.mxu0  ;;  %3946 = vmatprep.subr.bf16.mxu0 %v5371_v45  ;;  %v350_v38 = vcombine.high %v238_v34, %v238_v34  ;;  %v5444_v44 = vld [vmem:[%s5881_s8 + $0xb90] ss:$8 sps:$4 sm:$0xff]   ;;  %v5449_v45 = vld [vmem:[%s5881_s8 + $0xa84] ss:$8 sps:$4 sm:$0xff]   ;;  %v5447_v50 = vld [vmem:[%s5881_s8 + $0xa80] ss:$8 sps:$4 sm:$0xff]  }
 0x195   : > { %v3694_v55 = vpop.f32.mrf.mxu1  ;;  %3987 = vmatprep.subr.bf16.mxu1 %v5374_v46  ;;  %v5452_v46 = vld [vmem:[%s5881_s8 + $0xb84] ss:$8 sps:$4 sm:$0xff]   ;;  %v5459_v54 = vld [vmem:[%s5881_s8 + $0xd74] ss:$8 sps:$4 sm:$0xff]   ;;  %v5499_v34 = vld [vmem:[%s5881_s8 + $0xd00] ss:$8 sps:$4 sm:$0xff]  }
 0x196   : > { %v6386_v17 = vrot.slane %v350_v38, %v5940_v49  ;;  %v365_v55 = vcombine.high %v6383_v48, %v6383_v48  ;;  %v5510_v38 = vld [vmem:[%s5881_s8 + $0xce4] ss:$8 sps:$4 sm:$0xff]  }
 0x197   : > { %3947 = vmatpush1.bf16.msra.mxu0 %v5369_v52  ;;  %v5450_v52 = vld [vmem:[%s5881_s8 + $0xb80] ss:$8 sps:$4 sm:$0xff]  }
 0x198   : > { %3988 = vmatpush1.bf16.msra.mxu1 %v5372_v53  ;;  %3948 = vmatprep.subr.bf16.mxu0 %v5377_v23  ;;  %v5456_v53 = vld [vmem:[%s5881_s8 + $0xc74] ss:$8 sps:$4 sm:$0xff]   ;;  %v366_v23 = vcombine.high %v6386_v17, %v6386_v17 }
 0x199   : > { %3989 = vmatprep.subr.bf16.mxu1 %v5380_v35  ;;  %v436_v35 = vpack.c.bf16 %v6296_v18, %v6296_v18 }
 0x19b   : > { %3949 = vmatpush1.bf16.msra.mxu0 %v5375_v39  ;;  %v438_v39 = vpack.c.bf16 %v6299_v19, %v6299_v19  ;;  %v5460_v19 = vld [vmem:[%s5881_s8 + $0xc60] ss:$8 sps:$4 sm:$0xff]  }
 0x19c   : > { %3990 = vmatpush1.bf16.msra.mxu1 %v5378_v58  ;;  %3950 = vmatprep.subr.bf16.mxu0 %v5383_v59  ;;  %v5454_v58 = vld [vmem:[%s5881_s8 + $0xc70] ss:$8 sps:$4 sm:$0xff]  }
 0x19d   : > { %3991 = vmatprep.subr.bf16.mxu1 %v5386_v60  ;;  %v5457_v59 = vld [vmem:[%s5881_s8 + $0xd70] ss:$8 sps:$4 sm:$0xff]   ;;  %v5462_v60 = vld [vmem:[%s5881_s8 + $0xc64] ss:$8 sps:$4 sm:$0xff]  }
 0x19f   : > { %3951 = vmatpush1.bf16.msra.mxu0 %v5381_v61  ;;  %v5465_v61 = vld [vmem:[%s5881_s8 + $0xd64] ss:$8 sps:$4 sm:$0xff]  }
 0x1a0   : > { %3992 = vmatpush1.bf16.msra.mxu1 %v5384_v62  ;;  %3952 = vmatprep.subr.bf16.mxu0 %v5389_v63  ;;  %v441_v62 = vpack.c.bf16 %v365_v55, %v365_v55  ;;  %v443_v63 = vpack.c.bf16 %v366_v23, %v366_v23  ;;  %v5525_v55 = vld [vmem:[%s5881_s8 + $0xdc4] ss:$8 sps:$4 sm:$0xff]   ;;  %v5520_v23 = vld [vmem:[%s5881_s8 + $0xcc0] ss:$8 sps:$4 sm:$0xff]  }
 0x1a1   : > { %3993 = vmatprep.subr.bf16.mxu1 %v5392_v0 }
 0x1a3   : > { %3953 = vmatpush1.bf16.msra.mxu0 %v5387_v1 }
 0x1a4   : > { %3994 = vmatpush1.bf16.msra.mxu1 %v5390_v2  ;;  %3954 = vmatprep.subr.bf16.mxu0 %v5395_v3  ;;  %v5463_v2 = vld [vmem:[%s5881_s8 + $0xd60] ss:$8 sps:$4 sm:$0xff]  }
 0x1a5   : > { %3995 = vmatprep.subr.bf16.mxu1 %v5398_v4 }
 0x1a7   : > { %3955 = vmatpush1.bf16.msra.mxu0 %v5393_v5  ;;  %v5468_v5 = vld [vmem:[%s5881_s8 + $0xc54] ss:$8 sps:$4 sm:$0xff]  }
 0x1a8   : > { %3996 = vmatpush1.bf16.msra.mxu1 %v5396_v43  ;;  %3956 = vmatprep.subr.bf16.mxu0 %v5401_v6  ;;  %v5471_v43 = vld [vmem:[%s5881_s8 + $0xd54] ss:$8 sps:$4 sm:$0xff]  }
 0x1a9   : > { %3997 = vmatprep.subr.bf16.mxu1 %v5404_v7 }
 0x1ab   : > { %3957 = vmatpush1.bf16.msra.mxu0 %v5399_v8 }
 0x1ac   : > { %3998 = vmatpush1.bf16.msra.mxu1 %v5402_v9  ;;  %3958 = vmatprep.subr.bf16.mxu0 %v5407_v40  ;;  %v5466_v40 = vld [vmem:[%s5881_s8 + $0xc50] ss:$8 sps:$4 sm:$0xff]  }
 0x1ad   : > { %3999 = vmatprep.subr.bf16.mxu1 %v5410_v10  ;;  %v5469_v10 = vld [vmem:[%s5881_s8 + $0xd50] ss:$8 sps:$4 sm:$0xff]  }
 0x1af   : > { %3959 = vmatpush2.bf16.msra.mxu0 %v5405_v41 }
 0x1b0   : > { %4000 = vmatpush2.bf16.msra.mxu1 %v5408_v11  ;;  %3960 = vmatprep.subr.bf16.mxu0 %v5413_v12  ;;  %v5477_v12 = vld [vmem:[%s5881_s8 + $0xd44] ss:$8 sps:$4 sm:$0xff]  }
 0x1b1   : > { %4001 = vmatprep.subr.bf16.mxu1 %v5416_v13  ;;  %v5472_v13 = vld [vmem:[%s5881_s8 + $0xc40] ss:$8 sps:$4 sm:$0xff]  }
 0x1b3   : > { %3961 = vmatpush2.bf16.msra.mxu0 %v5411_v14  ;;  %v5475_v14 = vld [vmem:[%s5881_s8 + $0xd40] ss:$8 sps:$4 sm:$0xff]  }
 0x1b4   : > { %4002 = vmatpush2.bf16.msra.mxu1 %v5414_v15  ;;  %3962 = vmatprep.subr.bf16.mxu0 %v5419_v16  ;;  %v5480_v15 = vld [vmem:[%s5881_s8 + $0xc34] ss:$8 sps:$4 sm:$0xff]  }
 0x1b5   : > { %4003 = vmatprep.subr.bf16.mxu1 %v5422_v20  ;;  %v5483_v16 = vld [vmem:[%s5881_s8 + $0xd34] ss:$8 sps:$4 sm:$0xff]   ;;  %v5478_v20 = vld [vmem:[%s5881_s8 + $0xc30] ss:$8 sps:$4 sm:$0xff]  }
 0x1b7   : > { %3963 = vmatpush2.bf16.msra.mxu0 %v5417_v21  ;;  %v5481_v21 = vld [vmem:[%s5881_s8 + $0xd30] ss:$8 sps:$4 sm:$0xff]  }
 0x1b8   : > { %4004 = vmatpush2.bf16.msra.mxu1 %v5420_v22  ;;  %3964 = vmatprep.subr.bf16.mxu0 %v5425_v24  ;;  %v5486_v22 = vld [vmem:[%s5881_s8 + $0xc24] ss:$8 sps:$4 sm:$0xff]  }
 0x1b9   : > { %4005 = vmatprep.subr.bf16.mxu1 %v5428_v25  ;;  %v5489_v24 = vld [vmem:[%s5881_s8 + $0xd24] ss:$8 sps:$4 sm:$0xff]   ;;  %v5484_v25 = vld [vmem:[%s5881_s8 + $0xc20] ss:$8 sps:$4 sm:$0xff]  }
 0x1bb   : > { %3965 = vmatpush2.bf16.msra.mxu0 %v5423_v26  ;;  %v5487_v26 = vld [vmem:[%s5881_s8 + $0xd20] ss:$8 sps:$4 sm:$0xff]  }
 0x1bc   : > { %4006 = vmatpush2.bf16.msra.mxu1 %v5426_v27  ;;  %3966 = vmatprep.subr.bf16.mxu0 %v5431_v28  ;;  %v5492_v27 = vld [vmem:[%s5881_s8 + $0xc14] ss:$8 sps:$4 sm:$0xff]  }
 0x1bd   : > { %4007 = vmatprep.subr.bf16.mxu1 %v5434_v29  ;;  %v5495_v28 = vld [vmem:[%s5881_s8 + $0xd14] ss:$8 sps:$4 sm:$0xff]   ;;  %v5490_v29 = vld [vmem:[%s5881_s8 + $0xc10] ss:$8 sps:$4 sm:$0xff]  }
 0x1bf   : > { %3967 = vmatpush2.bf16.msra.mxu0 %v5429_v30  ;;  %v5493_v30 = vld [vmem:[%s5881_s8 + $0xd10] ss:$8 sps:$4 sm:$0xff]  }
 0x1c0   : > { %4008 = vmatpush2.bf16.msra.mxu1 %v5432_v31  ;;  %3968 = vmatprep.subr.bf16.mxu0 %v5437_v32  ;;  %v5498_v31 = vld [vmem:[%s5881_s8 + $0xc04] ss:$8 sps:$4 sm:$0xff]  }
 0x1c1   : > { %4009 = vmatprep.subr.bf16.mxu1 %v5440_v33  ;;  %v5501_v32 = vld [vmem:[%s5881_s8 + $0xd04] ss:$8 sps:$4 sm:$0xff]   ;;  %v5496_v33 = vld [vmem:[%s5881_s8 + $0xc00] ss:$8 sps:$4 sm:$0xff]  }
 0x1c3   : > { %3969 = vmatpush2.bf16.msra.mxu0 %v5435_v36  ;;  %v5504_v36 = vld [vmem:[%s5881_s8 + $0xcf4] ss:$8 sps:$4 sm:$0xff]  }
 0x1c4   : > { %4010 = vmatpush2.bf16.msra.mxu1 %v5438_v37  ;;  %3970 = vmatprep.subr.bf16.mxu0 %v5443_v56  ;;  %v5507_v37 = vld [vmem:[%s5881_s8 + $0xdf4] ss:$8 sps:$4 sm:$0xff]   ;;  %v5502_v56 = vld [vmem:[%s5881_s8 + $0xcf0] ss:$8 sps:$4 sm:$0xff]  }
 0x1c5   : > { %4011 = vmatprep.subr.bf16.mxu1 %v5446_v57  ;;  %v5505_v57 = vld [vmem:[%s5881_s8 + $0xdf0] ss:$8 sps:$4 sm:$0xff]  }
 0x1c7   : > { %3971 = vmatpush2.bf16.msra.mxu0 %v5441_v42  ;;  %v5513_v42 = vld [vmem:[%s5881_s8 + $0xde4] ss:$8 sps:$4 sm:$0xff]  }
 0x1c8   : > { %4012 = vmatpush2.bf16.msra.mxu1 %v5444_v44  ;;  %3972 = vmatprep.subr.bf16.mxu0 %v5449_v45  ;;  %v5508_v44 = vld [vmem:[%s5881_s8 + $0xce0] ss:$8 sps:$4 sm:$0xff]  }
 0x1c9   : > { %4013 = vmatprep.subr.bf16.mxu1 %v5452_v46  ;;  %v5511_v45 = vld [vmem:[%s5881_s8 + $0xde0] ss:$8 sps:$4 sm:$0xff]   ;;  %v5516_v46 = vld [vmem:[%s5881_s8 + $0xcd4] ss:$8 sps:$4 sm:$0xff]  }
 0x1cb   : > { %3973 = vmatpush2.bf16.msra.mxu0 %v5447_v50  ;;  %v5519_v50 = vld [vmem:[%s5881_s8 + $0xdd4] ss:$8 sps:$4 sm:$0xff]  }
 0x1cc   : > { %4014 = vmatpush2.bf16.msra.mxu1 %v5450_v52  ;;  %4024 = vmatprep.subr.bf16.mxu0 %v5456_v53  ;;  %v5514_v52 = vld [vmem:[%s5881_s8 + $0xcd0] ss:$8 sps:$4 sm:$0xff]  }
 0x1cd   : > { %4065 = vmatprep.subr.bf16.mxu1 %v5459_v54  ;;  %v5517_v53 = vld [vmem:[%s5881_s8 + $0xdd0] ss:$8 sps:$4 sm:$0xff]   ;;  %v5522_v54 = vld [vmem:[%s5881_s8 + $0xcc4] ss:$8 sps:$4 sm:$0xff]  }
 0x1ce   : > { %v3730_v0 = vpop.f32.mrf.mxu0  ;;  %3975 = vmatmul.mubr.bf16.vlgmr.msra.gmra.mxu0 %v436_v35  ;;  %v5523_v35 = vld [vmem:[%s5881_s8 + $0xdc0] ss:$8 sps:$4 sm:$0xff]  }
 0x1cf   : > { %v3771_v1 = vpop.f32.mrf.mxu1  ;;  %4016 = vmatmul.mubr.bf16.vlgmr.msra.gmra.mxu1 %v438_v39  ;;  %v3731_v18 = vadd.f32 %v3730_v0, %v6322_v47  ;;  %4025 = vmatpush1.bf16.msra.mxu0 %v5454_v58  ;;  %v5528_v39 = vld [vmem:[%s5881_s8 + $0xcb4] ss:$8 sps:$4 sm:$0xff]   ;;  %v5532_v0 = vld [vmem:[%s5881_s8 + $0xca0] ss:$8 sps:$4 sm:$0xff]  }
 0x1d0   : > { %4066 = vmatpush1.bf16.msra.mxu1 %v5457_v59  ;;  %v3732_v3 = vpop.f32.mrf.mxu0  ;;  %4026 = vmatprep.subr.bf16.mxu0 %v5462_v60  ;;  %v5531_v58 = vld [vmem:[%s5881_s8 + $0xdb4] ss:$8 sps:$4 sm:$0xff]   ;;  %v5526_v59 = vld [vmem:[%s5881_s8 + $0xcb0] ss:$8 sps:$4 sm:$0xff]  }
 0x1d1   : > { %v3773_v4 = vpop.f32.mrf.mxu1  ;;  %4067 = vmatprep.subr.bf16.mxu1 %v5465_v61  ;;  %v6409_v6 = vadd.f32 %v3771_v1, %v3731_v18  ;;  %v3733_v7 = vadd.f32 %v3732_v3, %v6325_v51  ;;  %4056 = vmatprep.mubr.bf16.mxu0 %v441_v62  ;;  %v5474_v51 = vld [vmem:[%s5881_s8 + $0xc44] ss:$8 sps:$4 sm:$0xff]   ;;  %v5529_v60 = vld [vmem:[%s5881_s8 + $0xdb0] ss:$8 sps:$4 sm:$0xff]   ;;  %v5535_v1 = vld [vmem:[%s5881_s8 + $0xda0] ss:$8 sps:$4 sm:$0xff]  }
 0x1d2   : > { %4097 = vmatprep.mubr.bf16.mxu1 %v443_v63  ;;  %v3734_v47 = vpop.f32.mrf.mxu0  ;;  %v5534_v61 = vld [vmem:[%s5881_s8 + $0xca4] ss:$8 sps:$4 sm:$0xff]   ;;  %v239_v63 = vld [vmem:[%s6579_s0 + $0x38] sm:$0xff] }
 0x1d3   : > { %v3775_v8 = vpop.f32.mrf.mxu1  ;;  %v6412_v9 = vadd.f32 %v3773_v4, %v3733_v7  ;;  %4027 = vmatpush1.bf16.msra.mxu0 %v5460_v19  ;;  %v5537_v62 = vld [vmem:[%s5881_s8 + $0xda4] ss:$8 sps:$4 sm:$0xff]   ;;  %v5540_v18 = vld [vmem:[%s5881_s8 + $0xc94] ss:$8 sps:$4 sm:$0xff]   ;;  %v5538_v3 = vld [vmem:[%s5881_s8 + $0xc90] ss:$8 sps:$4 sm:$0xff]   ;;  %v6470_v7 = vrot.slane %v239_v63, %v5940_v49 }
 0x1d4   : > { %4068 = vmatpush1.bf16.msra.mxu1 %v5463_v2  ;;  %v3735_v41 = vpop.f32.mrf.mxu0  ;;  %4028 = vmatprep.subr.bf16.mxu0 %v5468_v5  ;;  %v5543_v19 = vld [vmem:[%s5881_s8 + $0xd94] ss:$8 sps:$4 sm:$0xff]   ;;  %v367_v2 = vcombine.high %v239_v63, %v239_v63  ;;  %v5541_v4 = vld [vmem:[%s5881_s8 + $0xd90] ss:$8 sps:$4 sm:$0xff]   ;;  %v5546_v5 = vld [vmem:[%s5881_s8 + $0xc84] ss:$8 sps:$4 sm:$0xff]  }
 0x1d5   : > { %v3776_v11 = vpop.f32.mrf.mxu1  ;;  %4069 = vmatprep.subr.bf16.mxu1 %v5471_v43  ;;  %v5549_v43 = vld [vmem:[%s5881_s8 + $0xd84] ss:$8 sps:$4 sm:$0xff]   ;;  %v5544_v8 = vld [vmem:[%s5881_s8 + $0xc80] ss:$8 sps:$4 sm:$0xff]   ;;  %v5556_v41 = vld [vmem:[%s5881_s8 + $0xf74] ss:$8 sps:$4 sm:$0xff]  }
 0x1d6   : > { %v6473_v47 = vrot.slane %v367_v2, %v5940_v49  ;;  %v382_v11 = vcombine.high %v6470_v7, %v6470_v7  ;;  %v440_v49 = vpack.c.bf16 %v6383_v48, %v6383_v48  ;;  %v5601_v63 = vld [vmem:[%s5881_s8 + $0xef4] ss:$8 sps:$4 sm:$0xff]   ;;  %v5610_v2 = vld [vmem:[%s5881_s8 + $0xfe4] ss:$8 sps:$4 sm:$0xff]  }
 0x1d7   : > { %4029 = vmatpush1.bf16.msra.mxu0 %v5466_v40  ;;  %v5547_v40 = vld [vmem:[%s5881_s8 + $0xd80] ss:$8 sps:$4 sm:$0xff]  }
 0x1d8   : > { %4070 = vmatpush1.bf16.msra.mxu1 %v5469_v10  ;;  %4030 = vmatprep.subr.bf16.mxu0 %v5474_v51  ;;  %v5553_v10 = vld [vmem:[%s5881_s8 + $0xe74] ss:$8 sps:$4 sm:$0xff]   ;;  %v383_v51 = vcombine.high %v6473_v47, %v6473_v47 }
 0x1d9   : > { %4071 = vmatprep.subr.bf16.mxu1 %v5477_v12  ;;  %v442_v12 = vpack.c.bf16 %v6386_v17, %v6386_v17  ;;  %v5557_v17 = vld [vmem:[%s5881_s8 + $0xe60] ss:$8 sps:$4 sm:$0xff]  }
 0x1db   : > { %4031 = vmatpush1.bf16.msra.mxu0 %v5472_v13  ;;  %v5551_v13 = vld [vmem:[%s5881_s8 + $0xe70] ss:$8 sps:$4 sm:$0xff]  }
 0x1dc   : > { %4072 = vmatpush1.bf16.msra.mxu1 %v5475_v14  ;;  %4032 = vmatprep.subr.bf16.mxu0 %v5480_v15  ;;  %v5554_v14 = vld [vmem:[%s5881_s8 + $0xf70] ss:$8 sps:$4 sm:$0xff]   ;;  %v5559_v15 = vld [vmem:[%s5881_s8 + $0xe64] ss:$8 sps:$4 sm:$0xff]  }
 0x1dd   : > { %4073 = vmatprep.subr.bf16.mxu1 %v5483_v16  ;;  %v5562_v16 = vld [vmem:[%s5881_s8 + $0xf64] ss:$8 sps:$4 sm:$0xff]  }
 0x1df   : > { %4033 = vmatpush1.bf16.msra.mxu0 %v5478_v20  ;;  %v445_v20 = vpack.c.bf16 %v382_v11, %v382_v11  ;;  %v5617_v11 = vld [vmem:[%s5881_s8 + $0xec0] ss:$8 sps:$4 sm:$0xff]  }
 0x1e0   : > { %4074 = vmatpush1.bf16.msra.mxu1 %v5481_v21  ;;  %4034 = vmatprep.subr.bf16.mxu0 %v5486_v22  ;;  %v447_v21 = vpack.c.bf16 %v383_v51, %v383_v51  ;;  %v5620_v51 = vld [vmem:[%s5881_s8 + $0xfc0] ss:$8 sps:$4 sm:$0xff]  }
 0x1e1   : > { %4075 = vmatprep.subr.bf16.mxu1 %v5489_v24 }
 0x1e3   : > { %4035 = vmatpush1.bf16.msra.mxu0 %v5484_v25  ;;  %v5560_v25 = vld [vmem:[%s5881_s8 + $0xf60] ss:$8 sps:$4 sm:$0xff]  }
 0x1e4   : > { %4076 = vmatpush1.bf16.msra.mxu1 %v5487_v26  ;;  %4036 = vmatprep.subr.bf16.mxu0 %v5492_v27 }
 0x1e5   : > { %4077 = vmatprep.subr.bf16.mxu1 %v5495_v28  ;;  %v5565_v28 = vld [vmem:[%s5881_s8 + $0xe54] ss:$8 sps:$4 sm:$0xff]  }
 0x1e7   : > { %4037 = vmatpush1.bf16.msra.mxu0 %v5490_v29  ;;  %v5568_v29 = vld [vmem:[%s5881_s8 + $0xf54] ss:$8 sps:$4 sm:$0xff]  }
 0x1e8   : > { %4078 = vmatpush1.bf16.msra.mxu1 %v5493_v30  ;;  %4038 = vmatprep.subr.bf16.mxu0 %v5498_v31 }
 0x1e9   : > { %4079 = vmatprep.subr.bf16.mxu1 %v5501_v32 }
 0x1eb   : > { %4039 = vmatpush1.bf16.msra.mxu0 %v5496_v33 }
 0x1ec   : > { %4080 = vmatpush1.bf16.msra.mxu1 %v5499_v34  ;;  %4040 = vmatprep.subr.bf16.mxu0 %v5504_v36  ;;  %v5563_v34 = vld [vmem:[%s5881_s8 + $0xe50] ss:$8 sps:$4 sm:$0xff]  }
 0x1ed   : > { %4081 = vmatprep.subr.bf16.mxu1 %v5507_v37  ;;  %v5566_v36 = vld [vmem:[%s5881_s8 + $0xf50] ss:$8 sps:$4 sm:$0xff]  }
 0x1ef   : > { %4041 = vmatpush2.bf16.msra.mxu0 %v5502_v56 }
 0x1f0   : > { %4082 = vmatpush2.bf16.msra.mxu1 %v5505_v57  ;;  %4042 = vmatprep.subr.bf16.mxu0 %v5510_v38  ;;  %v5574_v57 = vld [vmem:[%s5881_s8 + $0xf44] ss:$8 sps:$4 sm:$0xff]   ;;  %v5569_v38 = vld [vmem:[%s5881_s8 + $0xe40] ss:$8 sps:$4 sm:$0xff]  }
 0x1f1   : > { %4083 = vmatprep.subr.bf16.mxu1 %v5513_v42  ;;  %v5572_v42 = vld [vmem:[%s5881_s8 + $0xf40] ss:$8 sps:$4 sm:$0xff]  }
 0x1f3   : > { %4043 = vmatpush2.bf16.msra.mxu0 %v5508_v44  ;;  %v5577_v44 = vld [vmem:[%s5881_s8 + $0xe34] ss:$8 sps:$4 sm:$0xff]  }
 0x1f4   : > { %4084 = vmatpush2.bf16.msra.mxu1 %v5511_v45  ;;  %4044 = vmatprep.subr.bf16.mxu0 %v5516_v46  ;;  %v5580_v45 = vld [vmem:[%s5881_s8 + $0xf34] ss:$8 sps:$4 sm:$0xff]   ;;  %v5575_v46 = vld [vmem:[%s5881_s8 + $0xe30] ss:$8 sps:$4 sm:$0xff]  }
 0x1f5   : > { %4085 = vmatprep.subr.bf16.mxu1 %v5519_v50  ;;  %v5578_v50 = vld [vmem:[%s5881_s8 + $0xf30] ss:$8 sps:$4 sm:$0xff]  }
 0x1f7   : > { %4045 = vmatpush2.bf16.msra.mxu0 %v5514_v52  ;;  %v5583_v52 = vld [vmem:[%s5881_s8 + $0xe24] ss:$8 sps:$4 sm:$0xff]  }
 0x1f8   : > { %4086 = vmatpush2.bf16.msra.mxu1 %v5517_v53  ;;  %4046 = vmatprep.subr.bf16.mxu0 %v5522_v54  ;;  %v5586_v53 = vld [vmem:[%s5881_s8 + $0xf24] ss:$8 sps:$4 sm:$0xff]   ;;  %v5581_v54 = vld [vmem:[%s5881_s8 + $0xe20] ss:$8 sps:$4 sm:$0xff]  }
 0x1f9   : > { %4087 = vmatprep.subr.bf16.mxu1 %v5525_v55  ;;  %v5584_v55 = vld [vmem:[%s5881_s8 + $0xf20] ss:$8 sps:$4 sm:$0xff]  }
 0x1fb   : > { %4047 = vmatpush2.bf16.msra.mxu0 %v5520_v23  ;;  %v5589_v23 = vld [vmem:[%s5881_s8 + $0xe14] ss:$8 sps:$4 sm:$0xff]  }
 0x1fc   : > { %4088 = vmatpush2.bf16.msra.mxu1 %v5523_v35  ;;  %4048 = vmatprep.subr.bf16.mxu0 %v5528_v39  ;;  %v5592_v35 = vld [vmem:[%s5881_s8 + $0xf14] ss:$8 sps:$4 sm:$0xff]   ;;  %v5587_v39 = vld [vmem:[%s5881_s8 + $0xe10] ss:$8 sps:$4 sm:$0xff]  }
 0x1fd   : > { %4089 = vmatprep.subr.bf16.mxu1 %v5531_v58  ;;  %v5590_v58 = vld [vmem:[%s5881_s8 + $0xf10] ss:$8 sps:$4 sm:$0xff]  }
 0x1ff   : > { %4049 = vmatpush2.bf16.msra.mxu0 %v5526_v59  ;;  %v5595_v59 = vld [vmem:[%s5881_s8 + $0xe04] ss:$8 sps:$4 sm:$0xff]  }
 0x200   : > { %4090 = vmatpush2.bf16.msra.mxu1 %v5529_v60  ;;  %4050 = vmatprep.subr.bf16.mxu0 %v5534_v61  ;;  %v5598_v60 = vld [vmem:[%s5881_s8 + $0xf04] ss:$8 sps:$4 sm:$0xff]   ;;  %v5593_v61 = vld [vmem:[%s5881_s8 + $0xe00] ss:$8 sps:$4 sm:$0xff]  }
 0x201   : > { %4091 = vmatprep.subr.bf16.mxu1 %v5537_v62  ;;  %v5596_v62 = vld [vmem:[%s5881_s8 + $0xf00] ss:$8 sps:$4 sm:$0xff]  }
 0x203   : > { %4051 = vmatpush2.bf16.msra.mxu0 %v5532_v0  ;;  %v5604_v0 = vld [vmem:[%s5881_s8 + $0xff4] ss:$8 sps:$4 sm:$0xff]  }
 0x204   : > { %4092 = vmatpush2.bf16.msra.mxu1 %v5535_v1  ;;  %4052 = vmatprep.subr.bf16.mxu0 %v5540_v18  ;;  %v5599_v1 = vld [vmem:[%s5881_s8 + $0xef0] ss:$8 sps:$4 sm:$0xff]  }
 0x205   : > { %4093 = vmatprep.subr.bf16.mxu1 %v5543_v19  ;;  %v5602_v18 = vld [vmem:[%s5881_s8 + $0xff0] ss:$8 sps:$4 sm:$0xff]   ;;  %v5607_v19 = vld [vmem:[%s5881_s8 + $0xee4] ss:$8 sps:$4 sm:$0xff]  }
 0x207   : > { %4053 = vmatpush2.bf16.msra.mxu0 %v5538_v3  ;;  %v5605_v3 = vld [vmem:[%s5881_s8 + $0xee0] ss:$8 sps:$4 sm:$0xff]  }
 0x208   : > { %4094 = vmatpush2.bf16.msra.mxu1 %v5541_v4  ;;  %4054 = vmatprep.subr.bf16.mxu0 %v5546_v5  ;;  %v5608_v4 = vld [vmem:[%s5881_s8 + $0xfe0] ss:$8 sps:$4 sm:$0xff]   ;;  %v5613_v5 = vld [vmem:[%s5881_s8 + $0xed4] ss:$8 sps:$4 sm:$0xff]  }
 0x209   : > { %4095 = vmatprep.subr.bf16.mxu1 %v5549_v43  ;;  %v5616_v43 = vld [vmem:[%s5881_s8 + $0xfd4] ss:$8 sps:$4 sm:$0xff]  }
 0x20b   : > { %4055 = vmatpush2.bf16.msra.mxu0 %v5544_v8  ;;  %v5611_v8 = vld [vmem:[%s5881_s8 + $0xed0] ss:$8 sps:$4 sm:$0xff]  }
 0x20c   : > { %4096 = vmatpush2.bf16.msra.mxu1 %v5547_v40  ;;  %4106 = vmatprep.subr.bf16.mxu0 %v5553_v10  ;;  %v5614_v40 = vld [vmem:[%s5881_s8 + $0xfd0] ss:$8 sps:$4 sm:$0xff]   ;;  %v5619_v10 = vld [vmem:[%s5881_s8 + $0xec4] ss:$8 sps:$4 sm:$0xff]  }
 0x20d   : > { %4147 = vmatprep.subr.bf16.mxu1 %v5556_v41  ;;  %v5622_v41 = vld [vmem:[%s5881_s8 + $0xfc4] ss:$8 sps:$4 sm:$0xff]  }
 0x20e   : > { %v3812_v22 = vpop.f32.mrf.mxu0  ;;  %4057 = vmatmul.mubr.bf16.vlgmr.msra.gmra.mxu0 %v440_v49  ;;  %v5625_v49 = vld [vmem:[%s5881_s8 + $0xeb4] ss:$8 sps:$4 sm:$0xff]  }
 0x20f   : > { %v3853_v24 = vpop.f32.mrf.mxu1  ;;  %4098 = vmatmul.mubr.bf16.vlgmr.msra.gmra.mxu1 %v442_v12  ;;  %v3813_v48 = vadd.f32 %v3812_v22, %v6409_v6  ;;  %4107 = vmatpush1.bf16.msra.mxu0 %v5551_v13  ;;  %v5628_v12 = vld [vmem:[%s5881_s8 + $0xfb4] ss:$8 sps:$4 sm:$0xff]   ;;  %v5623_v13 = vld [vmem:[%s5881_s8 + $0xeb0] ss:$8 sps:$4 sm:$0xff]  }
 0x210   : > { %4148 = vmatpush1.bf16.msra.mxu1 %v5554_v14  ;;  %v3814_v26 = vpop.f32.mrf.mxu0  ;;  %4108 = vmatprep.subr.bf16.mxu0 %v5559_v15  ;;  %v5626_v14 = vld [vmem:[%s5881_s8 + $0xfb0] ss:$8 sps:$4 sm:$0xff]   ;;  %v5631_v15 = vld [vmem:[%s5881_s8 + $0xea4] ss:$8 sps:$4 sm:$0xff]   ;;  %v5637_v22 = vld [vmem:[%s5881_s8 + $0xe94] ss:$8 sps:$4 sm:$0xff]  }
 0x211   : > { %v3855_v27 = vpop.f32.mrf.mxu1  ;;  %4149 = vmatprep.subr.bf16.mxu1 %v5562_v16  ;;  %v6496_v30 = vadd.f32 %v3853_v24, %v3813_v48  ;;  %v3815_v31 = vadd.f32 %v3814_v26, %v6412_v9  ;;  %4138 = vmatprep.mubr.bf16.mxu0 %v445_v20  ;;  %v5571_v9 = vld [vmem:[%s5881_s8 + $0xe44] ss:$8 sps:$4 sm:$0xff]   ;;  %v5629_v20 = vld [vmem:[%s5881_s8 + $0xea0] ss:$8 sps:$4 sm:$0xff]   ;;  %v5640_v24 = vld [vmem:[%s5881_s8 + $0xf94] ss:$8 sps:$4 sm:$0xff]  }
 0x212   : > { %4179 = vmatprep.mubr.bf16.mxu1 %v447_v21  ;;  %v3816_v6 = vpop.f32.mrf.mxu0  ;;  %v5634_v16 = vld [vmem:[%s5881_s8 + $0xfa4] ss:$8 sps:$4 sm:$0xff]   ;;  %v5632_v21 = vld [vmem:[%s5881_s8 + $0xfa0] ss:$8 sps:$4 sm:$0xff]   ;;  %v5635_v48 = vld [vmem:[%s5881_s8 + $0xe90] ss:$8 sps:$4 sm:$0xff]  }
 0x213   : > { %v3857_v32 = vpop.f32.mrf.mxu1  ;;  %v6499_v33 = vadd.f32 %v3855_v27, %v3815_v31  ;;  %4109 = vmatpush1.bf16.msra.mxu0 %v5557_v17  ;;  %v5638_v17 = vld [vmem:[%s5881_s8 + $0xf90] ss:$8 sps:$4 sm:$0xff]   ;;  %v5646_v26 = vld [vmem:[%s5881_s8 + $0xf84] ss:$8 sps:$4 sm:$0xff]   ;;  %v5641_v27 = vld [vmem:[%s5881_s8 + $0xe80] ss:$8 sps:$4 sm:$0xff]   ;;  %v446_v31 = vpack.c.bf16 %v6473_v47, %v6473_v47 }
 0x214   : > { %4150 = vmatpush1.bf16.msra.mxu1 %v5560_v25  ;;  %v3817_v37 = vpop.f32.mrf.mxu0  ;;  %4110 = vmatprep.subr.bf16.mxu0 %v5565_v28  ;;  %v5643_v25 = vld [vmem:[%s5881_s8 + $0xe84] ss:$8 sps:$4 sm:$0xff]   ;;  %v5644_v28 = vld [vmem:[%s5881_s8 + $0xf80] ss:$8 sps:$4 sm:$0xff]   ;;  %s4306_s8 = sshll.u32 %s6594_s6, 1 }
 0x215   : > { %v3858_v56 = vpop.f32.mrf.mxu1  ;;  %4151 = vmatprep.subr.bf16.mxu1 %v5568_v29  ;;  %v444_v29 = vpack.c.bf16 %v6470_v7, %v6470_v7  ;;  %s230_s9 = scalar_lea.vmem %s6582_s3, %s4306_s8 }
 0x217   : > { %4111 = vmatpush1.bf16.msra.mxu0 %v5563_v34 }
 0x218   : > { %4152 = vmatpush1.bf16.msra.mxu1 %v5566_v36  ;;  %4112 = vmatprep.subr.bf16.mxu0 %v5571_v9 }
 0x219   : > { %4153 = vmatprep.subr.bf16.mxu1 %v5574_v57 }
 0x21b   : > { %4113 = vmatpush1.bf16.msra.mxu0 %v5569_v38 }
 0x21c   : > { %4154 = vmatpush1.bf16.msra.mxu1 %v5572_v42  ;;  %4114 = vmatprep.subr.bf16.mxu0 %v5577_v44 }
 0x21d   : > { %4155 = vmatprep.subr.bf16.mxu1 %v5580_v45 }
 0x21f   : > { %4115 = vmatpush1.bf16.msra.mxu0 %v5575_v46 }
 0x220   : > { %4156 = vmatpush1.bf16.msra.mxu1 %v5578_v50  ;;  %4116 = vmatprep.subr.bf16.mxu0 %v5583_v52 }
 0x221   : > { %4157 = vmatprep.subr.bf16.mxu1 %v5586_v53 }
 0x223   : > { %4117 = vmatpush1.bf16.msra.mxu0 %v5581_v54 }
 0x224   : > { %4158 = vmatpush1.bf16.msra.mxu1 %v5584_v55  ;;  %4118 = vmatprep.subr.bf16.mxu0 %v5589_v23 }
 0x225   : > { %4159 = vmatprep.subr.bf16.mxu1 %v5592_v35 }
 0x227   : > { %4119 = vmatpush1.bf16.msra.mxu0 %v5587_v39 }
 0x228   : > { %4160 = vmatpush1.bf16.msra.mxu1 %v5590_v58  ;;  %4120 = vmatprep.subr.bf16.mxu0 %v5595_v59 }
 0x229   : > { %4161 = vmatprep.subr.bf16.mxu1 %v5598_v60 }
 0x22b   : > { %4121 = vmatpush1.bf16.msra.mxu0 %v5593_v61 }
 0x22c   : > { %4162 = vmatpush1.bf16.msra.mxu1 %v5596_v62  ;;  %4122 = vmatprep.subr.bf16.mxu0 %v5601_v63 }
 0x22d   : > { %4163 = vmatprep.subr.bf16.mxu1 %v5604_v0 }
 0x22f   : > { %4123 = vmatpush2.bf16.msra.mxu0 %v5599_v1 }
 0x230   : > { %4164 = vmatpush2.bf16.msra.mxu1 %v5602_v18  ;;  %4124 = vmatprep.subr.bf16.mxu0 %v5607_v19 }
 0x231   : > { %4165 = vmatprep.subr.bf16.mxu1 %v5610_v2 }
 0x233   : > { %4125 = vmatpush2.bf16.msra.mxu0 %v5605_v3 }
 0x234   : > { %4166 = vmatpush2.bf16.msra.mxu1 %v5608_v4  ;;  %4126 = vmatprep.subr.bf16.mxu0 %v5613_v5 }
 0x235   : > { %4167 = vmatprep.subr.bf16.mxu1 %v5616_v43 }
 0x237   : > { %4127 = vmatpush2.bf16.msra.mxu0 %v5611_v8 }
 0x238   : > { %4168 = vmatpush2.bf16.msra.mxu1 %v5614_v40  ;;  %4128 = vmatprep.subr.bf16.mxu0 %v5619_v10 }
 0x239   : > { %4169 = vmatprep.subr.bf16.mxu1 %v5622_v41 }
 0x23b   : > { %4129 = vmatpush2.bf16.msra.mxu0 %v5617_v11 }
 0x23c   : > { %4170 = vmatpush2.bf16.msra.mxu1 %v5620_v51  ;;  %4130 = vmatprep.subr.bf16.mxu0 %v5625_v49 }
 0x23d   : > { %4171 = vmatprep.subr.bf16.mxu1 %v5628_v12 }
 0x23f   : > { %4131 = vmatpush2.bf16.msra.mxu0 %v5623_v13 }
 0x240   : > { %4172 = vmatpush2.bf16.msra.mxu1 %v5626_v14  ;;  %4132 = vmatprep.subr.bf16.mxu0 %v5631_v15 }
 0x241   : > { %4173 = vmatprep.subr.bf16.mxu1 %v5634_v16 }
 0x243   : > { %4133 = vmatpush2.bf16.msra.mxu0 %v5629_v20 }
 0x244   : > { %4174 = vmatpush2.bf16.msra.mxu1 %v5632_v21  ;;  %4134 = vmatprep.subr.bf16.mxu0 %v5637_v22 }
 0x245   : > { %4175 = vmatprep.subr.bf16.mxu1 %v5640_v24 }
 0x247   : > { %4135 = vmatpush2.bf16.msra.mxu0 %v5635_v48 }
 0x248   : > { %4176 = vmatpush2.bf16.msra.mxu1 %v5638_v17  ;;  %4136 = vmatprep.subr.bf16.mxu0 %v5643_v25 }
 0x249   : > { %4177 = vmatprep.subr.bf16.mxu1 %v5646_v26 }
 0x24b   : > { %4137 = vmatpush2.bf16.msra.mxu0 %v5641_v27 }
 0x24c   : > { %4178 = vmatpush2.bf16.msra.mxu1 %v5644_v28 }
 0x24e   : > { %v3894_v6 = vpop.f32.mrf.mxu0  ;;  %4139 = vmatmul.mubr.bf16.vlgmr.msra.gmra.mxu0 %v444_v29 }
 0x24f   : > { %v3935_v32 = vpop.f32.mrf.mxu1  ;;  %4180 = vmatmul.mubr.bf16.vlgmr.msra.gmra.mxu1 %v446_v31  ;;  %v3895_v34 = vadd.f32 %v3894_v6, %v6496_v30 }
 0x250   : > { %v3896_v36 = vpop.f32.mrf.mxu0 }
 0x251   : > { %v3937_v37 = vpop.f32.mrf.mxu1  ;;  %v3936_v56 = vadd.f32 %v3935_v32, %v3895_v34  ;;  %v3897_v9 = vadd.f32 %v3896_v36, %v6499_v33 }
 0x252   : > { %v3898_v57 = vpop.f32.mrf.mxu0 }
 0x253   : > { %v3939_v38 = vpop.f32.mrf.mxu1  ;;  %v3938_v42 = vadd.f32 %v3937_v37, %v3897_v9 }
 0x254   : > { %v3899_v7 = vpop.f32.mrf.mxu0 }
 0x255   : > { %v3940_v44 = vpop.f32.mrf.mxu1 }
 0x28e   : > { %v3976_v45 = vpop.f32.mrf.mxu0 }
 0x28f   : > { %v4017_v47 = vpop.f32.mrf.mxu1  ;;  %v3977_v46 = vadd.f32 %v3976_v45, %v3936_v56 }
 0x290   : > { %v3978_v50 = vpop.f32.mrf.mxu0 }
 0x291   : > { %v4019_v52 = vpop.f32.mrf.mxu1  ;;  %v4018_v53 = vadd.f32 %v4017_v47, %v3977_v46  ;;  %v3979_v54 = vadd.f32 %v3978_v50, %v3938_v42 }
 0x292   : > { %v3980_v55 = vpop.f32.mrf.mxu0 }
 0x293   : > { %v4021_v30 = vpop.f32.mrf.mxu1  ;;  %v4020_v23 = vadd.f32 %v4019_v52, %v3979_v54 }
 0x294   : > { %v3981_v35 = vpop.f32.mrf.mxu0 }
 0x295   : > { %v4022_v39 = vpop.f32.mrf.mxu1 }
 0x2ce   : > { %v4058_v58 = vpop.f32.mrf.mxu0 }
 0x2cf   : > { %v4099_v33 = vpop.f32.mrf.mxu1  ;;  %v4059_v59 = vadd.f32 %v4058_v58, %v4018_v53 }
 0x2d0   : > { %v4060_v60 = vpop.f32.mrf.mxu0 }
 0x2d1   : > { %v4101_v61 = vpop.f32.mrf.mxu1  ;;  %v4100_v62 = vadd.f32 %v4099_v33, %v4059_v59  ;;  %v4061_v19 = vadd.f32 %v4060_v60, %v4020_v23 }
 0x2d2   : > { %v4062_v63 = vpop.f32.mrf.mxu0 }
 0x2d3   : > { %v4103_v0 = vpop.f32.mrf.mxu1  ;;  %v4102_v4 = vadd.f32 %v4101_v61, %v4061_v19 }
 0x2d4   : > { %v4063_v1 = vpop.f32.mrf.mxu0 }
 0x2d5   : > { %v4104_v18 = vpop.f32.mrf.mxu1 }
 0x30e   : > { %v4140_v2 = vpop.f32.mrf.mxu0 }
 0x30f   : > { %v4181_v3 = vpop.f32.mrf.mxu1  ;;  %v4141_v5 = vadd.f32 %v4140_v2, %v4100_v62 }
 0x310   : > { %v4142_v43 = vpop.f32.mrf.mxu0 }
 0x311   : > { %v4183_v8 = vpop.f32.mrf.mxu1  ;;  %v4182_v40 = vadd.f32 %v4181_v3, %v4141_v5  ;;  %v4143_v10 = vadd.f32 %v4142_v43, %v4102_v4 }
 0x312   : > { %v4144_v41 = vpop.f32.mrf.mxu0 }
 0x313   : > { %v4185_v11 = vpop.f32.mrf.mxu1  ;;  %v4184_v51 = vadd.f32 %v4183_v8, %v4143_v10  ;;  %v4188_v13 = vmax.f32 %v4182_v40, 0.0 }
 0x314   : > { %v4145_v49 = vpop.f32.mrf.mxu0 }
 0x315   : > { %v4186_v12 = vpop.f32.mrf.mxu1  ;;  %v4189_v14 = vmax.f32 %v4184_v51, 0.0 }
 0x317   : > { %v4192_v15 = vcombine.low %v4188_v13, %v4189_v14 }
 0x319   : > { %4819 = vst.sshfl [vmem:[%s230_s9] sm:$0x33 pattern:$0x76325410] %v4192_v15 }
 0x31a PF: > { %p16_p8 = scmp.ge.s32.totalorder %s5790_s17, 6   ;;  %s6589_s12 = smov %s5734_s13 }
 0x31b   : > { %s6590_s13 = smov %s5738_s14  ;;  %s6591_s14 = smov %s5800_s20 }
 0x31c   : > { %s6592_s15 = smov %s5790_s17  ;;  %18 = sbr.rel (!%p16_p8) target bundleno = 5 (0x5), region = 85 }
 0x321   :  { %4224 = vsyncpa [#allocation3], 1 }
 0x322   :  { %4226 = vsyncpa [#allocation3 + $0x1], 1 }
 0x323   :  { %4227 = vsyncpa [#allocation5], 1 }
 0x324   :  { %4229 = vsyncpa [#allocation5 + $0x1], 1 }

</bundles_post_ra>
